<compile_context>
chip_gen: v5e
topology: v5e:2x2
jax: 0.10.0
libtpu: 0.0.40
codegen_flags: <defaults>
</compile_context>

<pallas_src>
import functools

import jax
import jax.numpy as jnp
from jax import lax
from jax.experimental import pallas as pl
from jax.experimental.pallas import tpu as pltpu

_LANE = 128


def _bottleneck_kernel(x_ref, w1_ref, s1_ref, b1_ref,
                       w2_ref, s2_ref, b2_ref,
                       w3_ref, s3_ref, b3_ref,
                       out_ref, pad_ref, slab_ref, *, H, W):
    # x_ref block: (1, H*W, Cin) bf16, lane-dense (Cin % 128 == 0).
    HW = x_ref.shape[1]
    wp = w1_ref.shape[1]                       # lane-padded bottleneck width

    x2d = x_ref[0]                             # (HW, Cin) bf16
    x_f32 = x2d.astype(jnp.float32)            # residual path (f32 epilogue)

    # ---- conv1 (1x1) + bn1 + relu : bf16 MXU, f32 accumulate/epilogue ----
    h1 = jnp.dot(x2d, w1_ref[...], preferred_element_type=jnp.float32)
    h1 = jnp.maximum(h1 * s1_ref[...] + b1_ref[...], 0.0)          # (HW, wp) f32

    # ---- conv2 (3x3, stride=1, pad=1, groups=1) + bn2 + relu ----
    # Zero-padded bf16 halo scratch.  Left/right zero columns are folded into
    # the interior write; only top/bottom halo rows need separate zero stores.
    # Every byte of pad_ref is rewritten each grid step, so the persistent
    # scratch stays correct when the batch axis is split across megacore TCs.
    h1b = h1.astype(jnp.bfloat16).reshape(H, W, wp)   # free: W % 8 == 0
    zcol = jnp.zeros((H, 1, wp), jnp.bfloat16)
    pad_ref[1:H + 1, :, :] = jnp.concatenate([zcol, h1b, zcol], axis=1)
    zrow = jnp.zeros((1, W + 2, wp), jnp.bfloat16)
    pad_ref[0:1, :, :] = zrow
    pad_ref[H + 1:H + 2, :, :] = zrow

    # im2col slab built directly in a VMEM scratch (no concatenate / transient
    # slab value), then ONE large-K MXU matmul (K = 9*wp, keeps v5e's MXU fed).
    for j in range(9):
        dh, dw = j // 3, j % 3
        slab_ref[:, j * wp:(j + 1) * wp] = (
            pad_ref[dh:dh + H, dw:dw + W, :].reshape(HW, wp))
    h2 = jnp.dot(slab_ref[...], w2_ref[...], preferred_element_type=jnp.float32)
    h2 = jnp.maximum(h2 * s2_ref[...] + b2_ref[...], 0.0)          # (HW, wp) f32

    # ---- conv3 (1x1) + bn3 ----
    h3 = jnp.dot(h2.astype(jnp.bfloat16), w3_ref[...],
                 preferred_element_type=jnp.float32)
    h3 = h3 * s3_ref[...] + b3_ref[...]                            # (HW, Cout) f32

    # ---- residual add (downsample=None: Cin==Cout, stride==1) + relu ----
    out_ref[0] = jnp.maximum(h3 + x_f32, 0.0).astype(out_ref.dtype)


def _pad_lanes(a, axis, new_size):
    pad = new_size - a.shape[axis]
    if pad == 0:
        return a
    cfg = [(0, 0)] * a.ndim
    cfg[axis] = (0, pad)
    return jnp.pad(a, cfg)


def _vmem_limit_bytes():
    """Generation-aware scoped-VMEM limit (v7x: 64 MiB physical per TC)."""
    try:
        phys = pltpu.get_tpu_info().vmem_capacity_bytes
    except Exception:            # fall back to a limit that is safe everywhere
        phys = None
    if phys is not None and phys > 64 * 1024 * 1024:
        return 96 * 1024 * 1024  # v5e / v6e (128 MiB physical)
    return 44 * 1024 * 1024      # v7x (64 MiB physical) or unknown


def _const_spec(shape):
    """BlockSpec for a grid-invariant operand; single-buffered when supported."""
    try:
        return pl.BlockSpec(shape, lambda n: (0, 0),
                            pipeline_mode=pl.Buffered(1))
    except Exception:            # older jax without pipeline_mode / Buffered
        return pl.BlockSpec(shape, lambda n: (0, 0))


def bottleneck_forward(x_nchw, params):
    """Eval-mode Bottleneck. x_nchw: (N, Cin, H, W) f32 -> (N, Cout, H, W) f32."""
    (w1, s1, b1, w2, s2, b2, w3, s3, b3) = params
    N, Cin, H, W = x_nchw.shape
    width = w1.shape[1]
    Cout = w3.shape[1]

    # Implemented config: stride=1, dilation=1, groups=1, downsample=None.
    assert Cin == Cout, "downsample=None requires inplanes == planes * expansion"
    assert w2.shape == (3, 3, width, width), "conv2 must be 3x3, groups=1"
    # Layout contract (asserted instead of silently degrading): lane-dense
    # activation blocks and free (H*W, C) <-> (H, W, C) reshapes in the kernel.
    assert Cin % _LANE == 0 and Cout % _LANE == 0, "channels must be multiples of 128"
    assert W % 8 == 0, "W must be a multiple of 8 (sublane-aligned rows)"

    HW = H * W
    wp = pl.cdiv(width, _LANE) * _LANE          # lane-padded bottleneck width

    # Wrapper-side packing: bf16 weights, bottleneck width zero-padded to wp.
    # Padded channels stay exactly zero through conv1->bn1->relu->conv2->bn2->
    # relu->conv3 (scales/biases/weights padded with zeros), so results match.
    w1b = _pad_lanes(w1, 1, wp).astype(jnp.bfloat16)                  # (Cin, wp)
    s1p = _pad_lanes(s1, 1, wp)
    b1p = _pad_lanes(b1, 1, wp)
    w2p = _pad_lanes(_pad_lanes(w2, 2, wp), 3, wp)                    # (3,3,wp,wp)
    w2b = w2p.reshape(9 * wp, wp).astype(jnp.bfloat16)                # (9*wp, wp)
    s2p = _pad_lanes(s2, 1, wp)
    b2p = _pad_lanes(b2, 1, wp)
    w3b = _pad_lanes(w3, 0, wp).astype(jnp.bfloat16)                  # (wp, Cout)

    # Activations cross HBM as bf16 in (N, H*W, C) layout (lane-dense, no
    # in-kernel relayout).  TODO(synk): keep NHWC bf16 end-to-end in a real net
    # instead of adapting from the PyTorch NCHW f32 interface here.
    x = jnp.transpose(x_nchw, (0, 2, 3, 1)).reshape(N, HW, Cin).astype(jnp.bfloat16)

    kernel = functools.partial(_bottleneck_kernel, H=H, W=W)
    out = pl.pallas_call(
        kernel,
        out_shape=jax.ShapeDtypeStruct((N, HW, Cout), jnp.bfloat16),
        grid_spec=pltpu.PrefetchScalarGridSpec(
            num_scalar_prefetch=0,
            # TODO(synk): for real sizes (e.g. 56x56, width>=64) add a row-tile
            # grid axis with a 1-row halo so per-step VMEM fits v7x's 64 MiB
            # and both v7x TensorCores get balanced, pipelined work.
            grid=(N,),
            in_specs=[
                pl.BlockSpec((1, HW, Cin), lambda n: (n, 0, 0)),
                # Grid-invariant operands (single-buffered when supported):
                _const_spec((Cin, wp)),
                _const_spec((1, wp)),
                _const_spec((1, wp)),
                _const_spec((9 * wp, wp)),
                _const_spec((1, wp)),
                _const_spec((1, wp)),
                _const_spec((wp, Cout)),
                _const_spec((1, Cout)),
                _const_spec((1, Cout)),
            ],
            out_specs=pl.BlockSpec((1, HW, Cout), lambda n: (n, 0, 0)),
            scratch_shapes=[
                pltpu.VMEM((H + 2, W + 2, wp), jnp.bfloat16),   # conv2 halo pad
                pltpu.VMEM((HW, 9 * wp), jnp.bfloat16),         # im2col slab
            ],
        ),
        compiler_params=pltpu.CompilerParams(
            dimension_semantics=("parallel",),
            vmem_limit_bytes=_vmem_limit_bytes()),
    )(x, w1b, s1p, b1p, w2b, s2p, b2p, w3b, s3, b3)

    out = out.astype(jnp.float32).reshape(N, H, W, Cout)
    return jnp.transpose(out, (0, 3, 1, 2))                          # NCHW


def _fold_bn(gamma, beta, mean, var, eps=1e-5):
    scale = gamma / jnp.sqrt(var + eps)
    bias = beta - mean * scale
    return scale[None, :], bias[None, :]                             # (1, C) f32


def _init_params(key, inplanes, planes, base_width=64, groups=1):
    width = int(planes * (base_width / 64.0)) * groups
    cout = planes * 4                                                 # expansion = 4
    ks = jax.random.split(key, 12)

    def rnd_bf16(a):
        # Keep test weights exactly bf16-representable so the kernel/reference
        # difference is only intermediate-precision / accumulation error.
        return a.astype(jnp.bfloat16).astype(jnp.float32)

    w1 = rnd_bf16(jax.random.normal(ks[0], (inplanes, width), jnp.float32) * 0.1)
    w2 = rnd_bf16(jax.random.normal(ks[1], (3, 3, width, width), jnp.float32) * 0.1)
    w3 = rnd_bf16(jax.random.normal(ks[2], (width, cout), jnp.float32) * 0.1)

    def bn(kg, kb, km, kv, c):
        g = 1.0 + 0.1 * jax.random.normal(kg, (c,), jnp.float32)
        b = 0.1 * jax.random.normal(kb, (c,), jnp.float32)
        m = 0.1 * jax.random.normal(km, (c,), jnp.float32)
        v = 1.0 + 0.1 * jax.nn.softplus(jax.random.normal(kv, (c,), jnp.float32))
        return g, b, m, v

    bn1 = bn(ks[3], ks[4], ks[5], ks[6], width)
    bn2 = bn(ks[7], ks[8], ks[9], ks[10], width)
    bn3 = bn(*jax.random.split(ks[11], 4), cout)

    s1, b1 = _fold_bn(*bn1)
    s2, b2 = _fold_bn(*bn2)
    s3, b3 = _fold_bn(*bn3)
    raw = dict(w1=w1, w2=w2, w3=w3, bn1=bn1, bn2=bn2, bn3=bn3)
    return (w1, s1, b1, w2, s2, b2, w3, s3, b3), raw


def _ref_forward(x_nchw, raw, eps=1e-5):
    """Pure-JAX f32 (XLA conv) reference of the same eval-mode Bottleneck."""
    x = jnp.transpose(x_nchw, (0, 2, 3, 1))                          # NHWC
    dn = ('NHWC', 'HWIO', 'NHWC')
    prec = lax.Precision.HIGHEST

    def bn_apply(y, p):
        g, b, m, v = p
        return (y - m) / jnp.sqrt(v + eps) * g + b

    w1, w2, w3 = raw['w1'], raw['w2'], raw['w3']
    cin, width = w1.shape
    h = lax.conv_general_dilated(x, w1.reshape(1, 1, cin, width),
                                 (1, 1), 'VALID', dimension_numbers=dn,
                                 precision=prec)
    h = jax.nn.relu(bn_apply(h, raw['bn1']))
    h = lax.conv_general_dilated(h, w2, (1, 1), 'SAME', dimension_numbers=dn,
                                 precision=prec)
    h = jax.nn.relu(bn_apply(h, raw['bn2']))
    h = lax.conv_general_dilated(h, w3.reshape(1, 1, width, w3.shape[1]),
                                 (1, 1), 'VALID', dimension_numbers=dn,
                                 precision=prec)
    h = bn_apply(h, raw['bn3'])
    out = jax.nn.relu(h + x)                                          # identity add
    return jnp.transpose(out, (0, 3, 1, 2))


if __name__ == "__main__":
    # Bottleneck(inplanes=128, planes=32): width=32 (lane-padded to 128 inside),
    # out channels = 32*4 = 128 == inplanes, so downsample=None applies, and
    # C=128 keeps the (N, H*W, C) activation blocks lane-dense.
    N, inplanes, planes, H, W = 2, 128, 32, 16, 16
    key = jax.random.PRNGKey(0)
    kx, kp = jax.random.split(key)
    x = jax.random.normal(kx, (N, inplanes, H, W), jnp.float32)
    x = x.astype(jnp.bfloat16).astype(jnp.float32)   # match the bf16 HBM boundary
    params, raw = _init_params(kp, inplanes, planes)

    out = jax.block_until_ready(bottleneck_forward(x, params))
    ref = jax.block_until_ready(_ref_forward(x, raw))

    assert out.shape == (N, planes * 4, H, W)
    err = jnp.max(jnp.abs(out - ref))
    # bf16 intermediates / bf16 output at the HBM boundary -> relaxed tolerance.
    assert jnp.allclose(out, ref, rtol=2e-2, atol=2e-2), f"max abs err {err}"
    print("KERNEL_OK")
</pallas_src>

<mosaic_0001>
module attributes {stable_mosaic.version = 11 : i64} {
  func.func @_bottleneck_kernel(%arg0: i32, %arg1: memref<1x256x128xbf16, #tpu.memory_space<vmem>>, %arg2: memref<128x128xbf16, #tpu.memory_space<vmem>>, %arg3: memref<1x128xf32, #tpu.memory_space<vmem>>, %arg4: memref<1x128xf32, #tpu.memory_space<vmem>>, %arg5: memref<1152x128xbf16, #tpu.memory_space<vmem>>, %arg6: memref<1x128xf32, #tpu.memory_space<vmem>>, %arg7: memref<1x128xf32, #tpu.memory_space<vmem>>, %arg8: memref<128x128xbf16, #tpu.memory_space<vmem>>, %arg9: memref<1x128xf32, #tpu.memory_space<vmem>>, %arg10: memref<1x128xf32, #tpu.memory_space<vmem>>, %arg11: memref<1x256x128xbf16, #tpu.memory_space<vmem>>, %arg12: memref<18x18x128xbf16, #tpu.memory_space<vmem>>, %arg13: memref<256x1152xbf16, #tpu.memory_space<vmem>>) attributes {dimension_semantics = [#tpu.dimension_semantics<parallel>], iteration_bounds = array<i64: 2>, scalar_prefetch = 0 : i64, scratch_operands = 2 : i64, tpu.core_type = #tpu.core_type<tc>, window_params = [{transform_indices = @transform_0, window_bounds = array<i64: 1, 256, 128>}, {pipeline_mode = #tpu.pipeline_mode<synchronous>, transform_indices = @transform_1, window_bounds = array<i64: 128, 128>}, {pipeline_mode = #tpu.pipeline_mode<synchronous>, transform_indices = @transform_2, window_bounds = array<i64: 1, 128>}, {pipeline_mode = #tpu.pipeline_mode<synchronous>, transform_indices = @transform_3, window_bounds = array<i64: 1, 128>}, {pipeline_mode = #tpu.pipeline_mode<synchronous>, transform_indices = @transform_4, window_bounds = array<i64: 1152, 128>}, {pipeline_mode = #tpu.pipeline_mode<synchronous>, transform_indices = @transform_5, window_bounds = array<i64: 1, 128>}, {pipeline_mode = #tpu.pipeline_mode<synchronous>, transform_indices = @transform_6, window_bounds = array<i64: 1, 128>}, {pipeline_mode = #tpu.pipeline_mode<synchronous>, transform_indices = @transform_7, window_bounds = array<i64: 128, 128>}, {pipeline_mode = #tpu.pipeline_mode<synchronous>, transform_indices = @transform_8, window_bounds = array<i64: 1, 128>}, {pipeline_mode = #tpu.pipeline_mode<synchronous>, transform_indices = @transform_9, window_bounds = array<i64: 1, 128>}, {transform_indices = @transform_10, window_bounds = array<i64: 1, 256, 128>}]} {
    %c0 = arith.constant 0 : index
    %c0_0 = arith.constant 0 : index
    %c0_1 = arith.constant 0 : index
    %0 = vector.load %arg1[%c0, %c0_0, %c0_1] : memref<1x256x128xbf16, #tpu.memory_space<vmem>>, vector<1x256x128xbf16>
    %1 = vector.shape_cast %0 : vector<1x256x128xbf16> to vector<256x128xbf16>
    %2 = arith.extf %1 : vector<256x128xbf16> to vector<256x128xf32>
    %c0_2 = arith.constant 0 : index
    %c0_3 = arith.constant 0 : index
    %3 = vector.load %arg2[%c0_2, %c0_3] : memref<128x128xbf16, #tpu.memory_space<vmem>>, vector<128x128xbf16>
    %cst = arith.constant dense<0.000000e+00> : vector<256x128xf32>
    %4 = tpu.matmul %1, %3, %cst {dimension_numbers = #tpu.dot_dimension_numbers<[1], [0], [0], [1], [0, 0, 1, 1], [], []>} : vector<256x128xbf16>, vector<128x128xbf16>, vector<256x128xf32> -> vector<256x128xf32>
    %c0_4 = arith.constant 0 : index
    %c0_5 = arith.constant 0 : index
    %5 = vector.load %arg3[%c0_4, %c0_5] : memref<1x128xf32, #tpu.memory_space<vmem>>, vector<1x128xf32>
    %6 = vector.broadcast %5 : vector<1x128xf32> to vector<256x128xf32>
    %7 = arith.mulf %4, %6 : vector<256x128xf32>
    %c0_6 = arith.constant 0 : index
    %c0_7 = arith.constant 0 : index
    %8 = vector.load %arg4[%c0_6, %c0_7] : memref<1x128xf32, #tpu.memory_space<vmem>>, vector<1x128xf32>
    %9 = vector.broadcast %8 : vector<1x128xf32> to vector<256x128xf32>
    %10 = arith.addf %7, %9 : vector<256x128xf32>
    %cst_8 = arith.constant 0.000000e+00 : f32
    %11 = vector.broadcast %cst_8 : f32 to vector<256x128xf32>
    %12 = arith.maximumf %10, %11 : vector<256x128xf32>
    %13 = arith.truncf %12 : vector<256x128xf32> to vector<256x128xbf16>
    %14 = vector.shape_cast %13 : vector<256x128xbf16> to vector<16x16x128xbf16>
    %cst_9 = arith.constant 0.000000e+00 : bf16
    %15 = vector.broadcast %cst_9 : bf16 to vector<16x1x128xbf16>
    %16 = tpu.concatenate %15, %14, %15 in 1 : vector<16x1x128xbf16>, vector<16x16x128xbf16>, vector<16x1x128xbf16> -> vector<16x18x128xbf16>
    %c1 = arith.constant 1 : index
    %c0_10 = arith.constant 0 : index
    %c0_11 = arith.constant 0 : index
    %17 = vector.load %arg12[%c1, %c0_10, %c0_11] : memref<18x18x128xbf16, #tpu.memory_space<vmem>>, vector<16x18x128xbf16>
    tpu.vector_store %arg12[%c1, %c0_10, %c0_11], %16 {strides = array<i32>} : memref<18x18x128xbf16, #tpu.memory_space<vmem>>, vector<16x18x128xbf16>,
    %cst_12 = arith.constant 0.000000e+00 : bf16
    %18 = vector.broadcast %cst_12 : bf16 to vector<1x18x128xbf16>
    %c0_13 = arith.constant 0 : index
    %c0_14 = arith.constant 0 : index
    %c0_15 = arith.constant 0 : index
    %19 = vector.load %arg12[%c0_13, %c0_14, %c0_15] : memref<18x18x128xbf16, #tpu.memory_space<vmem>>, vector<1x18x128xbf16>
    tpu.vector_store %arg12[%c0_13, %c0_14, %c0_15], %18 {strides = array<i32>} : memref<18x18x128xbf16, #tpu.memory_space<vmem>>, vector<1x18x128xbf16>,
    %c17 = arith.constant 17 : index
    %c0_16 = arith.constant 0 : index
    %c0_17 = arith.constant 0 : index
    %20 = vector.load %arg12[%c17, %c0_16, %c0_17] : memref<18x18x128xbf16, #tpu.memory_space<vmem>>, vector<1x18x128xbf16>
    tpu.vector_store %arg12[%c17, %c0_16, %c0_17], %18 {strides = array<i32>} : memref<18x18x128xbf16, #tpu.memory_space<vmem>>, vector<1x18x128xbf16>,
    %c0_18 = arith.constant 0 : index
    %c0_19 = arith.constant 0 : index
    %c0_20 = arith.constant 0 : index
    %21 = vector.load %arg12[%c0_18, %c0_19, %c0_20] : memref<18x18x128xbf16, #tpu.memory_space<vmem>>, vector<16x16x128xbf16>
    %22 = vector.shape_cast %21 : vector<16x16x128xbf16> to vector<256x128xbf16>
    %c0_21 = arith.constant 0 : index
    %c0_22 = arith.constant 0 : index
    %23 = vector.load %arg13[%c0_21, %c0_22] : memref<256x1152xbf16, #tpu.memory_space<vmem>>, vector<256x128xbf16>
    tpu.vector_store %arg13[%c0_21, %c0_22], %22 {strides = array<i32>} : memref<256x1152xbf16, #tpu.memory_space<vmem>>, vector<256x128xbf16>,
    %c0_23 = arith.constant 0 : index
    %c1_24 = arith.constant 1 : index
    %c0_25 = arith.constant 0 : index
    %24 = vector.load %arg12[%c0_23, %c1_24, %c0_25] : memref<18x18x128xbf16, #tpu.memory_space<vmem>>, vector<16x16x128xbf16>
    %25 = vector.shape_cast %24 : vector<16x16x128xbf16> to vector<256x128xbf16>
    %c0_26 = arith.constant 0 : index
    %c128 = arith.constant 128 : index
    %26 = vector.load %arg13[%c0_26, %c128] : memref<256x1152xbf16, #tpu.memory_space<vmem>>, vector<256x128xbf16>
    tpu.vector_store %arg13[%c0_26, %c128], %25 {strides = array<i32>} : memref<256x1152xbf16, #tpu.memory_space<vmem>>, vector<256x128xbf16>,
    %c0_27 = arith.constant 0 : index
    %c2 = arith.constant 2 : index
    %c0_28 = arith.constant 0 : index
    %27 = vector.load %arg12[%c0_27, %c2, %c0_28] : memref<18x18x128xbf16, #tpu.memory_space<vmem>>, vector<16x16x128xbf16>
    %28 = vector.shape_cast %27 : vector<16x16x128xbf16> to vector<256x128xbf16>
    %c0_29 = arith.constant 0 : index
    %c256 = arith.constant 256 : index
    %29 = vector.load %arg13[%c0_29, %c256] : memref<256x1152xbf16, #tpu.memory_space<vmem>>, vector<256x128xbf16>
    tpu.vector_store %arg13[%c0_29, %c256], %28 {strides = array<i32>} : memref<256x1152xbf16, #tpu.memory_space<vmem>>, vector<256x128xbf16>,
    %c1_30 = arith.constant 1 : index
    %c0_31 = arith.constant 0 : index
    %c0_32 = arith.constant 0 : index
    %30 = vector.load %arg12[%c1_30, %c0_31, %c0_32] : memref<18x18x128xbf16, #tpu.memory_space<vmem>>, vector<16x16x128xbf16>
    %31 = vector.shape_cast %30 : vector<16x16x128xbf16> to vector<256x128xbf16>
    %c0_33 = arith.constant 0 : index
    %c384 = arith.constant 384 : index
    %32 = vector.load %arg13[%c0_33, %c384] : memref<256x1152xbf16, #tpu.memory_space<vmem>>, vector<256x128xbf16>
    tpu.vector_store %arg13[%c0_33, %c384], %31 {strides = array<i32>} : memref<256x1152xbf16, #tpu.memory_space<vmem>>, vector<256x128xbf16>,
    %c1_34 = arith.constant 1 : index
    %c1_35 = arith.constant 1 : index
    %c0_36 = arith.constant 0 : index
    %33 = vector.load %arg12[%c1_34, %c1_35, %c0_36] : memref<18x18x128xbf16, #tpu.memory_space<vmem>>, vector<16x16x128xbf16>
    %34 = vector.shape_cast %33 : vector<16x16x128xbf16> to vector<256x128xbf16>
    %c0_37 = arith.constant 0 : index
    %c512 = arith.constant 512 : index
    %35 = vector.load %arg13[%c0_37, %c512] : memref<256x1152xbf16, #tpu.memory_space<vmem>>, vector<256x128xbf16>
    tpu.vector_store %arg13[%c0_37, %c512], %34 {strides = array<i32>} : memref<256x1152xbf16, #tpu.memory_space<vmem>>, vector<256x128xbf16>,
    %c1_38 = arith.constant 1 : index
    %c2_39 = arith.constant 2 : index
    %c0_40 = arith.constant 0 : index
    %36 = vector.load %arg12[%c1_38, %c2_39, %c0_40] : memref<18x18x128xbf16, #tpu.memory_space<vmem>>, vector<16x16x128xbf16>
    %37 = vector.shape_cast %36 : vector<16x16x128xbf16> to vector<256x128xbf16>
    %c0_41 = arith.constant 0 : index
    %c640 = arith.constant 640 : index
    %38 = vector.load %arg13[%c0_41, %c640] : memref<256x1152xbf16, #tpu.memory_space<vmem>>, vector<256x128xbf16>
    tpu.vector_store %arg13[%c0_41, %c640], %37 {strides = array<i32>} : memref<256x1152xbf16, #tpu.memory_space<vmem>>, vector<256x128xbf16>,
    %c2_42 = arith.constant 2 : index
    %c0_43 = arith.constant 0 : index
    %c0_44 = arith.constant 0 : index
    %39 = vector.load %arg12[%c2_42, %c0_43, %c0_44] : memref<18x18x128xbf16, #tpu.memory_space<vmem>>, vector<16x16x128xbf16>
    %40 = vector.shape_cast %39 : vector<16x16x128xbf16> to vector<256x128xbf16>
    %c0_45 = arith.constant 0 : index
    %c768 = arith.constant 768 : index
    %41 = vector.load %arg13[%c0_45, %c768] : memref<256x1152xbf16, #tpu.memory_space<vmem>>, vector<256x128xbf16>
    tpu.vector_store %arg13[%c0_45, %c768], %40 {strides = array<i32>} : memref<256x1152xbf16, #tpu.memory_space<vmem>>, vector<256x128xbf16>,
    %c2_46 = arith.constant 2 : index
    %c1_47 = arith.constant 1 : index
    %c0_48 = arith.constant 0 : index
    %42 = vector.load %arg12[%c2_46, %c1_47, %c0_48] : memref<18x18x128xbf16, #tpu.memory_space<vmem>>, vector<16x16x128xbf16>
    %43 = vector.shape_cast %42 : vector<16x16x128xbf16> to vector<256x128xbf16>
    %c0_49 = arith.constant 0 : index
    %c896 = arith.constant 896 : index
    %44 = vector.load %arg13[%c0_49, %c896] : memref<256x1152xbf16, #tpu.memory_space<vmem>>, vector<256x128xbf16>
    tpu.vector_store %arg13[%c0_49, %c896], %43 {strides = array<i32>} : memref<256x1152xbf16, #tpu.memory_space<vmem>>, vector<256x128xbf16>,
    %c2_50 = arith.constant 2 : index
    %c2_51 = arith.constant 2 : index
    %c0_52 = arith.constant 0 : index
    %45 = vector.load %arg12[%c2_50, %c2_51, %c0_52] : memref<18x18x128xbf16, #tpu.memory_space<vmem>>, vector<16x16x128xbf16>
    %46 = vector.shape_cast %45 : vector<16x16x128xbf16> to vector<256x128xbf16>
    %c0_53 = arith.constant 0 : index
    %c1024 = arith.constant 1024 : index
    %47 = vector.load %arg13[%c0_53, %c1024] : memref<256x1152xbf16, #tpu.memory_space<vmem>>, vector<256x128xbf16>
    tpu.vector_store %arg13[%c0_53, %c1024], %46 {strides = array<i32>} : memref<256x1152xbf16, #tpu.memory_space<vmem>>, vector<256x128xbf16>,
    %c0_54 = arith.constant 0 : index
    %c0_55 = arith.constant 0 : index
    %48 = vector.load %arg13[%c0_54, %c0_55] : memref<256x1152xbf16, #tpu.memory_space<vmem>>, vector<256x1152xbf16>
    %c0_56 = arith.constant 0 : index
    %c0_57 = arith.constant 0 : index
    %49 = vector.load %arg5[%c0_56, %c0_57] : memref<1152x128xbf16, #tpu.memory_space<vmem>>, vector<1152x128xbf16>
    %cst_58 = arith.constant dense<0.000000e+00> : vector<256x128xf32>
    %50 = tpu.matmul %48, %49, %cst_58 {dimension_numbers = #tpu.dot_dimension_numbers<[1], [0], [0], [1], [0, 0, 1, 1], [], []>} : vector<256x1152xbf16>, vector<1152x128xbf16>, vector<256x128xf32> -> vector<256x128xf32>
    %c0_59 = arith.constant 0 : index
    %c0_60 = arith.constant 0 : index
    %51 = vector.load %arg6[%c0_59, %c0_60] : memref<1x128xf32, #tpu.memory_space<vmem>>, vector<1x128xf32>
    %52 = vector.broadcast %51 : vector<1x128xf32> to vector<256x128xf32>
    %53 = arith.mulf %50, %52 : vector<256x128xf32>
    %c0_61 = arith.constant 0 : index
    %c0_62 = arith.constant 0 : index
    %54 = vector.load %arg7[%c0_61, %c0_62] : memref<1x128xf32, #tpu.memory_space<vmem>>, vector<1x128xf32>
    %55 = vector.broadcast %54 : vector<1x128xf32> to vector<256x128xf32>
    %56 = arith.addf %53, %55 : vector<256x128xf32>
    %cst_63 = arith.constant 0.000000e+00 : f32
    %57 = vector.broadcast %cst_63 : f32 to vector<256x128xf32>
    %58 = arith.maximumf %56, %57 : vector<256x128xf32>
    %59 = arith.truncf %58 : vector<256x128xf32> to vector<256x128xbf16>
    %c0_64 = arith.constant 0 : index
    %c0_65 = arith.constant 0 : index
    %60 = vector.load %arg8[%c0_64, %c0_65] : memref<128x128xbf16, #tpu.memory_space<vmem>>, vector<128x128xbf16>
    %cst_66 = arith.constant dense<0.000000e+00> : vector<256x128xf32>
    %61 = tpu.matmul %59, %60, %cst_66 {dimension_numbers = #tpu.dot_dimension_numbers<[1], [0], [0], [1], [0, 0, 1, 1], [], []>} : vector<256x128xbf16>, vector<128x128xbf16>, vector<256x128xf32> -> vector<256x128xf32>
    %c0_67 = arith.constant 0 : index
    %c0_68 = arith.constant 0 : index
    %62 = vector.load %arg9[%c0_67, %c0_68] : memref<1x128xf32, #tpu.memory_space<vmem>>, vector<1x128xf32>
    %63 = vector.broadcast %62 : vector<1x128xf32> to vector<256x128xf32>
    %64 = arith.mulf %61, %63 : vector<256x128xf32>
    %c0_69 = arith.constant 0 : index
    %c0_70 = arith.constant 0 : index
    %65 = vector.load %arg10[%c0_69, %c0_70] : memref<1x128xf32, #tpu.memory_space<vmem>>, vector<1x128xf32>
    %66 = vector.broadcast %65 : vector<1x128xf32> to vector<256x128xf32>
    %67 = arith.addf %64, %66 : vector<256x128xf32>
    %68 = arith.addf %67, %2 : vector<256x128xf32>
    %cst_71 = arith.constant 0.000000e+00 : f32
    %69 = vector.broadcast %cst_71 : f32 to vector<256x128xf32>
    %70 = arith.maximumf %68, %69 : vector<256x128xf32>
    %71 = arith.truncf %70 : vector<256x128xf32> to vector<256x128xbf16>
    %c0_72 = arith.constant 0 : index
    %c0_73 = arith.constant 0 : index
    %c0_74 = arith.constant 0 : index
    %72 = vector.load %arg11[%c0_72, %c0_73, %c0_74] : memref<1x256x128xbf16, #tpu.memory_space<vmem>>, vector<1x256x128xbf16>
    %73 = vector.shape_cast %72 : vector<1x256x128xbf16> to vector<256x128xbf16>
    %74 = vector.shape_cast %71 : vector<256x128xbf16> to vector<1x256x128xbf16>
    tpu.vector_store %arg11[%c0_72, %c0_73, %c0_74], %74 {strides = array<i32>} : memref<1x256x128xbf16, #tpu.memory_space<vmem>>, vector<1x256x128xbf16>,
    return
  }
  func.func @transform_0(%arg0: i32) -> (i32, i32, i32) {
    %c0_i32 = arith.constant 0 : i32
    %c0_i32_0 = arith.constant 0 : i32
    %c0_i32_1 = arith.constant 0 : i32
    return %arg0, %c0_i32, %c0_i32_0 : i32, i32, i32
  }
  func.func @transform_1(%arg0: i32) -> (i32, i32) {
    %c0_i32 = arith.constant 0 : i32
    %c0_i32_0 = arith.constant 0 : i32
    %c0_i32_1 = arith.constant 0 : i32
    return %c0_i32, %c0_i32_0 : i32, i32
  }
  func.func @transform_2(%arg0: i32) -> (i32, i32) {
    %c0_i32 = arith.constant 0 : i32
    %c0_i32_0 = arith.constant 0 : i32
    %c0_i32_1 = arith.constant 0 : i32
    return %c0_i32, %c0_i32_0 : i32, i32
  }
  func.func @transform_3(%arg0: i32) -> (i32, i32) {
    %c0_i32 = arith.constant 0 : i32
    %c0_i32_0 = arith.constant 0 : i32
    %c0_i32_1 = arith.constant 0 : i32
    return %c0_i32, %c0_i32_0 : i32, i32
  }
  func.func @transform_4(%arg0: i32) -> (i32, i32) {
    %c0_i32 = arith.constant 0 : i32
    %c0_i32_0 = arith.constant 0 : i32
    %c0_i32_1 = arith.constant 0 : i32
    return %c0_i32, %c0_i32_0 : i32, i32
  }
  func.func @transform_5(%arg0: i32) -> (i32, i32) {
    %c0_i32 = arith.constant 0 : i32
    %c0_i32_0 = arith.constant 0 : i32
    %c0_i32_1 = arith.constant 0 : i32
    return %c0_i32, %c0_i32_0 : i32, i32
  }
  func.func @transform_6(%arg0: i32) -> (i32, i32) {
    %c0_i32 = arith.constant 0 : i32
    %c0_i32_0 = arith.constant 0 : i32
    %c0_i32_1 = arith.constant 0 : i32
    return %c0_i32, %c0_i32_0 : i32, i32
  }
  func.func @transform_7(%arg0: i32) -> (i32, i32) {
    %c0_i32 = arith.constant 0 : i32
    %c0_i32_0 = arith.constant 0 : i32
    %c0_i32_1 = arith.constant 0 : i32
    return %c0_i32, %c0_i32_0 : i32, i32
  }
  func.func @transform_8(%arg0: i32) -> (i32, i32) {
    %c0_i32 = arith.constant 0 : i32
    %c0_i32_0 = arith.constant 0 : i32
    %c0_i32_1 = arith.constant 0 : i32
    return %c0_i32, %c0_i32_0 : i32, i32
  }
  func.func @transform_9(%arg0: i32) -> (i32, i32) {
    %c0_i32 = arith.constant 0 : i32
    %c0_i32_0 = arith.constant 0 : i32
    %c0_i32_1 = arith.constant 0 : i32
    return %c0_i32, %c0_i32_0 : i32, i32
  }
  func.func @transform_10(%arg0: i32) -> (i32, i32, i32) {
    %c0_i32 = arith.constant 0 : i32
    %c0_i32_0 = arith.constant 0 : i32
    %c0_i32_1 = arith.constant 0 : i32
    return %arg0, %c0_i32, %c0_i32_0 : i32, i32, i32
  }
}

</mosaic_0001>

<bundles_post_ra>
// kernel: tpu_custom_call.1
= control target key start
LH: loop header
LB: loop body
LE: loop exit
PB: predicated region body
PF: predicated region fallthrough
CT: control target
= control target key end

     0   :  { %s10413_s0 = inlined_call_operand.hbm [shape: bf16[2,256,128], index: 0, kind: input, shape index: {}]   ;;  %s10414_s1 = inlined_call_operand.hbm [shape: bf16[128,128], index: 1, kind: input, shape index: {}]   ;;  %s10415_s2 = inlined_call_operand.vmem [shape: f32[1,128], index: 2, kind: input, shape index: {}]   ;;  %s10416_s3 = inlined_call_operand.vmem [shape: f32[1,128], index: 3, kind: input, shape index: {}]   ;;  %s10417_s4 = inlined_call_operand.hbm [shape: bf16[1152,128], index: 4, kind: input, shape index: {}]   ;;  %s10418_s5 = inlined_call_operand.vmem [shape: f32[1,128], index: 5, kind: input, shape index: {}]   ;;  %s10419_s6 = inlined_call_operand.vmem [shape: f32[1,128], index: 6, kind: input, shape index: {}]   ;;  %s10420_s7 = inlined_call_operand.hbm [shape: bf16[128,128], index: 7, kind: input, shape index: {}]   ;;  %s10421_s8 = inlined_call_operand.vmem [shape: f32[1,128], index: 8, kind: input, shape index: {}]   ;;  %s10422_s9 = inlined_call_operand.vmem [shape: f32[1,128], index: 9, kind: input, shape index: {}]   ;;  %s10423_s10 = inlined_call_operand.hbm [shape: bf16[2,256,128], index: 10, kind: output, shape index: {}]  }
   0x1   :  { %10426 = sst [smem:[#allocation99_spill]] %s10414_s1 }
   0x2   :  { %10427 = sst [smem:[#allocation100_spill]] %s10417_s4 }
   0x3   :  { %10428 = sst [smem:[#allocation101_spill]] %s10420_s7 }
   0x4   :  { %15 = vsyncpa [#allocation5], 0 }
   0x5   :  { %17 = vsyncpa [#allocation5 + $0x1], 0 }
   0x6   :  { %18 = vsyncpa [#allocation8], 0 }
   0x7   :  { %19 = vsyncpa [#allocation11], 0 }
   0x8   :  { %20 = vsyncpa [#allocation6], 0 }
   0x9   :  { %22 = vsyncpa [#allocation6 + $0x1], 0  ;;  %s8520_s13 = smov 0   ;;  %s8522_s14 = smov 0  }
   0xa   :  { %s8524_s15 = smov 0   ;;  %s8526_s16 = smov 0  }
   0xb LB: > { %s8541_s17 = sadd.s32 4294967295, %s8455_s16   ;;  %s6738_s18 = sadd.s32 4294967294, %s8455_s16   ;;  %s8455_s16 = sphi %s8526_s16, %s10624_s16   ;;  %s8451_s15 = sphi %s8524_s15, %s10623_s15   ;;  %s8447_s14 = sphi %s8522_s14, %s10622_s14   ;;  %s8443_s13 = sphi %s8520_s13, %s10621_s13  }
   0xc   : > { %p48_p0 = scmp.ne.s32.totalorder %s8447_s14, %s8443_s13  ;;  %p49_p1 = scmp.eq.s32.totalorder %s8541_s17, 0 }
   0xd   : > { %p261_p2 = scmp.eq.s32.totalorder %s8541_s17, 1  ;;  %p267_p3 = scmp.eq.s32.totalorder %s6738_s18, 1 }
   0xe   : > { %p8550_p4 = por %p49_p1, %p48_p0  ;;  %p6739_p5 = scmp.ge.s32.totalorder %s8455_s16, 1 }
   0xf   : > { %p8555_p6 = por %p267_p3, %p48_p0  ;;  %p274_p7 = scmp.lt.s32.totalorder %s8455_s16, 3 }
  0x10   : > { %s10431_s1 = sld [smem:[#allocation99_spill]]  ;;  %s8457_s25 = smov [#allocation7]  }
  0x11   : > { %p8563_p8 = pnand %p6739_p5, %p274_p7  ;;  %s287_s26 = sshll.u32 %s8457_s25, 4  ;;  %s288_s26 = int_to_ptr.vmem [resolvable:$true] %s287_s26 }
  0x12   : > { %s10434_s4 = sld [smem:[#allocation100_spill]]  ;;  %s10424_s11 = smov 64  }
  0x13   : > { %p8183_p9 = pneg %p8563_p8  ;;  %s10425_s12 = smov 4  }
  0x14   : > { %s8460_s18 = smov [#allocation9]   ;;  %s10435_s7 = sld [smem:[#allocation101_spill]] }
  0x15   : > { %p8571_p10 = pnand %p8183_p9, %p49_p1  ;;  %s307_s21 = sshll.u32 %s8460_s18, 4  ;;  %s308_s21 = int_to_ptr.vmem [resolvable:$true] %s307_s21 }
  0x16   : > { %s285_s23 = sshll.u32 %s10431_s1, 4  ;;  %s8593_s29 = sadd.s32 1, %s8455_s16   ;;  %s286_s23 = int_to_ptr.hbm [resolvable:$true] %s285_s23 }
  0x17   : > { %8186 = dma.hbm_to_vmem [thread:$0]  (!%p8571_p10), %s286_s23, 1024, %s288_s26, [#allocation8], %s10424_s11, %s10424_s11, %s10425_s12  }
  0x18   : > { %s305_s30 = sshll.u32 %s10434_s4, 4  ;;  %s8461_s23 = smov [#allocation10]   ;;  %s306_s30 = int_to_ptr.hbm [resolvable:$true] %s305_s30 }
  0x19   : > { %8189 = dma.hbm_to_vmem [thread:$0]  (!%p8571_p10), %s306_s30, 9216, %s308_s21, [#allocation8], %s10424_s11, %s10424_s11, %s10425_s12  }
  0x1a   : > { %s325_s28 = sshll.u32 %s10435_s7, 4  ;;  %s327_s26 = sshll.u32 %s8461_s23, 4  ;;  %s326_s28 = int_to_ptr.hbm [resolvable:$true] %s325_s28  ;;  %s328_s26 = int_to_ptr.vmem [resolvable:$true] %s327_s26 }
  0x1b   : > { %8192 = dma.hbm_to_vmem [thread:$0]  (!%p8571_p10), %s326_s28, 1024, %s328_s26, [#allocation11], %s10424_s11, %s10424_s11, %s10425_s12  }
  0x1c   : > { %s32_s18 = ssub.s32 %s8455_s16, %s8593_s29  ;;  %s35_s22 = sadd.s32 1, %s8451_s15 }
  0x1d   : > { %p33_p12 = scmp.eq.s32.totalorder %s32_s18, 0  ;;  %p42_p13 = scmp.ne.s32.totalorder %s8451_s15, %s8447_s14 }
  0x1e   : > { %p43_p0 = scmp.eq.s32.totalorder %s8455_s16, 0  ;;  %p8204_p5 = scmp.lt.s32.totalorder %s8455_s16, 2 }
  0x1f   : > { %s8607_s25 = scalar_select %p33_p12, %s8451_s15, %s35_s22  }
  0x20   : > { %p8611_p3 = por %p261_p2, %p42_p13  ;;  %s347_s21 = sand.u32 1, %s8451_s15  }
  0x21   : > { %10436 = sst [smem:[#allocation17_spill]] %s8607_s25  ;;  %s7798_s27 = sshll.u32 %s8455_s16, 7 }
  0x22   : > { %p44_p7 = por %p43_p0, %p42_p13  ;;  %s6744_s23 = sshll.u32 %s347_s21, 7 }
  0x23   : > { %s356_s28 = scalar_lea.hbm %s10413_s0, %s7798_s27  ;;  %s351_s18 = scalar_lea.vmem [#allocation4], %s6744_s23 }
  0x24   : > { %s357_s26 = sshll.u32 %s356_s28, 4  ;;  %s359_s11 = sshll.u32 %s351_s18, 4  ;;  %s358_s26 = int_to_ptr.hbm [resolvable:$true] %s357_s26  ;;  %s360_s11 = int_to_ptr.vmem [resolvable:$true] %s359_s11 }
  0x25   : > { %p8621_p9 = pnand %p8204_p5, %p44_p7  ;;  %s348_s12 = scalar_lea.sflag [#allocation5], %s347_s21 }
  0x26   : > { %s8351_s7 = sshra.s32 %s358_s26, 4  ;;  %s8358_s27 = scalar_lea.hbm %s10413_s0, 256  ;;  %s8352_s7 = int_to_ptr.hbm [resolvable:$true] %s8351_s7 }
  0x27   : > { %s8353_s25 = scalar_lea.hbm %s8352_s7, 128  ;;  %p8355_p10 = pneg %p8621_p9 }
  0x28   : > { %p8354_p2 = scmp.ne.s32.totalorder %s8352_s7, %s8353_s25  ;;  %p8359_p0 = scmp.lt.s32.totalorder %s8352_s7, %s10413_s0 }
  0x29   : > { %p8360_p5 = scmp.lt.s32.totalorder %s8358_s27, %s8353_s25 }
  0x2a   : > { %p8356_p12 = pnand %p8355_p10, %p8354_p2 }
  0x2b   : > { %p8361_p7 = por %p8360_p5, %p8359_p0 }
  0x2c   : > { %p8357_p13 = pneg %p8356_p12 }
  0x2e   : > { %p8362_p11 = pnand %p8361_p7, %p8357_p13 }
  0x30   : > { %8365 = shalt.err (!%p8362_p11)
}
  0x31   : > { %s10439_s21 = smov 4   ;;  %s10440_s18 = smov 64  }
  0x32   : > { %8196 = dma.hbm_to_vmem [thread:$0]  (!%p8621_p9), %s358_s26, 2048, %s360_s11, %s348_s12, %s10440_s18, %s10440_s18, %s10439_s21  }
  0x33   : > { %371 = sbr.rel (%p8563_p8) target bundleno = 1383 (0x567), region = 60 }
  0x38   : > { %s8641_s1 = sand.u32 1, %s8447_s14  }
  0x39   : > { %s6748_s7 = sshll.u32 %s8641_s1, 7  ;;  %s374_s25 = scalar_lea.sflag [#allocation5], %s8641_s1 }
  0x3a   : > { %s8647_s4 = scalar_lea.vmem [#allocation4], %s6748_s7 }
  0x3b   : > { %8426 = dma.done.wait (%p8550_p4), %s374_s25, 2048  }
  0x3c   : > { %8428 = vsyncadd (%p8550_p4), %s374_s25, 4294965248 }
  0x3d   : > { %8430 = dma.done.wait (%p49_p1), [#allocation8], 10240  }
  0x3e   : > { %8432 = vsyncadd (%p49_p1), [#allocation8], 4294957056 }
  0x3f   : > { %8434 = dma.done.wait (%p49_p1), [#allocation11], 1024  }
  0x40   : > { %8436 = vsyncadd (%p49_p1), [#allocation11], 4294966272  ;;  %v7822_v0 = vld [vmem:[#allocation7 + $0x38] sm:$0xff]  ;;  %v7821_v1 = vld [vmem:[#allocation7 + $0x30] sm:$0xff]  ;;  %v8462_v23 = vmov 0   ;;  %vm1104_vm3 = vcmask 1040384  }
  0x41   : > { %655 = vmatpush.bf16.msra.mxu0 %v7822_v0  ;;  %8143 = vmatpush.bf16.msra.mxu3 %v7822_v0  ;;  %v7820_v2 = vld [vmem:[#allocation7 + $0x28] sm:$0xff]  ;;  %v7819_v3 = vld [vmem:[#allocation7 + $0x20] sm:$0xff]  ;;  %v7818_v4 = vld [vmem:[#allocation7 + $0x18] sm:$0xff]  ;;  %1364 = vst [vmem:[#allocation2] sm:$0xf] %v8462_v23  ;;  %vm2030_vm6 = vcmask 1042432  }
  0x42   : > { %v7817_v5 = vld [vmem:[#allocation7 + $0x10] sm:$0xff]  ;;  %v7816_v6 = vld [vmem:[#allocation7 + $0x8] sm:$0xff]  ;;  %v7815_v7 = vld [vmem:[#allocation7] sm:$0xff]  ;;  %1365 = vst [vmem:[#allocation2 + $0x4] sm:$0xf] %v8462_v23  ;;  %vm2031_vm7 = vcmask 1046532  }
  0x43   : > { %v7799_v8 = vld [vmem:[%s8647_s4] sm:$0xff]  ;;  %v7800_v9 = vld [vmem:[%s8647_s4 + $0x8] sm:$0xff]  ;;  %v7801_v10 = vld [vmem:[%s8647_s4 + $0x10] sm:$0xff]  ;;  %1366 = vst [vmem:[#allocation2 + $0x8] sm:$0x1] %v8462_v23  ;;  %s10228_s28 = scalar_lea.vmem [#allocation12], %s6748_s7 }
  0x44   : > { %v7802_v11 = vld [vmem:[%s8647_s4 + $0x18] sm:$0xff]  ;;  %v7803_v12 = vld [vmem:[%s8647_s4 + $0x20] sm:$0xff]  ;;  %v7804_v13 = vld [vmem:[%s8647_s4 + $0x28] sm:$0xff]  ;;  %1368 = vst [vmem:[#allocation2 + $0xcc] sm:$0xf] %v8462_v23  ;;  %s8047_s19 = sshll.u32 %s8541_s17, 7 }
  0x45   : > { %656 = vmatpush.bf16.msra.mxu0 %v7821_v1  ;;  %8144 = vmatpush.bf16.msra.mxu3 %v7821_v1  ;;  %v7805_v14 = vld [vmem:[%s8647_s4 + $0x30] sm:$0xff]  ;;  %v7974_v15 = vld [vmem:[#allocation9 + $0x38] sm:$0xff]  ;;  %v7972_v17 = vld [vmem:[#allocation9 + $0x28] sm:$0xff]  ;;  %1369 = vst [vmem:[#allocation2 + $0xd0] sm:$0xf] %v8462_v23  ;;  %s6632_s12 = scalar_lea.hbm %s10423_s10, %s8047_s19  ;;  %s6621_s17 = scalar_lea.sflag [#allocation6], %s8641_s1 }
  0x46   : > { %5346 = vmatpush.bf16.msra.mxu1 %v7974_v15  ;;  %v7973_v16 = vld [vmem:[#allocation9 + $0x30] sm:$0xff]  ;;  %v8668_v18 = vld [vmem:[#allocation9 + $0x78] sm:$0xff]  ;;  %v7971_v19 = vld [vmem:[#allocation9 + $0x20] sm:$0xff]  ;;  %1370 = vst [vmem:[#allocation2 + $0xd4] sm:$0x1] %v8462_v23  ;;  %s6635_s26 = sshll.u32 %s6632_s12, 4  ;;  %s6636_s26 = int_to_ptr.hbm [resolvable:$true] %s6635_s26 }
  0x47   : > { %5435 = vmatpush.bf16.msra.mxu2 %v8668_v18  ;;  %v7806_v20 = vld [vmem:[%s8647_s4 + $0x38] sm:$0xff]  ;;  %v8672_v21 = vld [vmem:[#allocation9 + $0x70] sm:$0xff]  ;;  %v8675_v24 = vld [vmem:[#allocation9 + $0x68] sm:$0xff]  ;;  %vm1483_vm0 = vsmask.f32 3328  ;;  %s8395_s22 = sshra.s32 %s6636_s26, 4  ;;  %s8396_s22 = int_to_ptr.hbm [resolvable:$true] %s8395_s22 }
  0x48   : > { %v7970_v22 = vld [vmem:[#allocation9 + $0x18] sm:$0xff]  ;;  %v7969_v25 = vld [vmem:[#allocation9 + $0x10] sm:$0xff]  ;;  %v8678_v26 = vld [vmem:[#allocation9 + $0x60] sm:$0xff]  ;;  %vm1484_vm1 = vsmask.f32 7440  ;;  %s8397_s27 = scalar_lea.hbm %s8396_s22, 128  ;;  %p8402_p11 = scmp.lt.s32.totalorder %s8396_s22, %s10423_s10 }
  0x49   : > { %657 = vmatpush.bf16.msra.mxu0 %v7820_v2  ;;  %8145 = vmatpush.bf16.msra.mxu3 %v7820_v2  ;;  %v1371_v27 = vld [vmem:[#allocation2] sm:$0xf]  ;;  %v1372_v29 = vld [vmem:[#allocation2 + $0x4] sm:$0xf]  ;;  %v8686_v36 = vld [vmem:[#allocation9 + $0x58] sm:$0xff]  ;;  %p8398_p1 = scmp.ne.s32.totalorder %s8396_s22, %s8397_s27  ;;  %s8401_s21 = scalar_lea.hbm %s10423_s10, 256 }
  0x4a   : > { %5347 = vmatpush.bf16.msra.mxu1 %v7973_v16  ;;  %v1435_v28 = vld [vmem:[#allocation2] sm:$0xf]  ;;  %1403 = vst [vmem:[#allocation3] sm:$0xf] %v1371_v27  ;;  %v1436_v30 = vld [vmem:[#allocation2 + $0x4] sm:$0xf]  ;;  %vm8698_vm2 = vmor %vm1483_vm0, %vm1484_vm1  ;;  %p8403_p9 = scmp.lt.s32.totalorder %s8401_s21, %s8397_s27 }
  0x4b   : > { %5436 = vmatpush.bf16.msra.mxu2 %v8672_v21  ;;  %v7968_v31 = vld [vmem:[#allocation9 + $0x8] sm:$0xff]  ;;  %1404 = vst [vmem:[#allocation3 + $0x24] sm:$0xf] %v1372_v29  ;;  %v1487_v32 = vshrl.u32 %v1435_v28, 16  ;;  %v1490_v33 = vshll.u32 %v1435_v28, 16  ;;  %v1496_v34 = vshll.u32 %v1436_v30, 16  ;;  %vm8776_vm8 = vmor %vm2030_vm6, %vm2031_vm7  ;;  %p8399_p4 = pnand %p8398_p1, %p8611_p3 }
  0x4c   : > { %v8684_v35 = vld [vmem:[%s10415_s2] ss:$0 sm:$0xff]  ;;  %v1500_v37 = vshrl.u32 %v1436_v30, 16  ;;  %v1437_v38 = vld [vmem:[#allocation2 + $0x8] sm:$0x1]  ;;  %v7807_v44 = vld [vmem:[%s8647_s4 + $0x40] sm:$0xff]  ;;  %p8404_p2 = por %p8403_p9, %p8402_p11 }
  0x4d   : > { %658 = vmatpush.bf16.msra.mxu0 %v7819_v3  ;;  %8146 = vmatpush.bf16.msra.mxu3 %v7819_v3  ;;  %v1489_v39 = vrot.slane %v1487_v32, 4  ;;  %v1492_v40 = vrot.slane %v1490_v33, 5  ;;  %v1498_v41 = vrot.slane %v1496_v34, 5  ;;  %v1506_v43 = vshll.u32 %v1437_v38, 16  ;;  %v7967_v45 = vld [vmem:[#allocation9] sm:$0xff]  ;;  %v8690_v48 = vld [vmem:[#allocation9 + $0x50] sm:$0xff]  ;;  %p8400_p8 = pneg %p8399_p4 }
  0x4e   : > { %5348 = vmatpush.bf16.msra.mxu1 %v7972_v17  ;;  %v1502_v42 = vrot.slane %v1500_v37, 4  ;;  %v8696_v52 = vld [vmem:[%s10416_s3] ss:$0 sm:$0xff]  ;;  %v7998_v61 = vld [vmem:[#allocation9 + $0xf8] sm:$0xff]  ;;  %v8711_v1 = vld [vmem:[#allocation9 + $0x40] sm:$0xff] }
  0x4f   : > { %5437 = vmatpush.bf16.msra.mxu2 %v8675_v24  ;;  %v1493_v46 = vor.u32 %v1492_v40, %v1489_v39  ;;  %v1508_v50 = vrot.slane %v1506_v43, 5  ;;  %v8705_v60 = vld [vmem:[#allocation9 + $0x48] sm:$0xff]  ;;  %v7997_v2 = vld [vmem:[#allocation9 + $0xf0] sm:$0xff]  ;;  %vm1105_vm4 = vsmask.f32 256  ;;  %v7994_v28 = vld [vmem:[#allocation9 + $0xd8] sm:$0xff]  ;;  %p8405_p10 = pnand %p8404_p2, %p8400_p8 }
  0x50   : > { %v1503_v49 = vor.u32 %v1502_v42, %v1498_v41  ;;  %vm8721_vm5 = vmand %vm1104_vm3, %vm1105_vm4  ;;  %v7993_v38 = vld [vmem:[#allocation9 + $0xd0] sm:$0xff] }
  0x51   : > { %659 = vmatpush.bf16.msra.mxu0 %v7818_v4  ;;  %8147 = vmatpush.bf16.msra.mxu3 %v7818_v4  ;;  %v6899_v53 = vld [vmem:[#allocation3] sm:$0xf]  ;;  %v1494_v55 = vrot.slane %v1493_v46, 4 }
  0x52   : > { %5349 = vmatpush.bf16.msra.mxu1 %v7971_v19  ;;  %v7827_v56 = vld [vmem:[#allocation3 + $0x20] sm:$0xf0]  ;;  %v1504_v57 = vrot.slane %v1503_v49, 4  ;;  %v7809_v49 = vld [vmem:[%s8647_s4 + $0x50] sm:$0xff] }
  0x53   : > { %5438 = vmatpush.bf16.msra.mxu2 %v8678_v26  ;;  %v6900_v58 = vor.u32 %v7827_v56, %v6899_v53  ;;  %v1499_v59 = vsel %vm8698_vm2, %v1494_v55, %v1498_v41  ;;  %v7812_v56 = vld [vmem:[%s8647_s4 + $0x68] sm:$0xff] }
  0x54   : > { %v1509_v62 = vsel %vm8698_vm2, %v1504_v57, %v1508_v50  ;;  %1902 = vst [vmem:[#allocation3 + $0x4] sm:$0xf] %v1499_v59  ;;  %v7991_v59 = vld [vmem:[#allocation9 + $0xc0] sm:$0xff] }
  0x55   : > { %660 = vmatpush.bf16.msra.mxu0 %v7817_v5  ;;  %8148 = vmatpush.bf16.msra.mxu3 %v7817_v5  ;;  %1903 = vst [vmem:[#allocation3 + $0x28] sm:$0xf] %v1509_v62 }
  0x56   : > { %5350 = vmatpush.bf16.msra.mxu1 %v7970_v22 }
  0x57   : > { %5439 = vmatpush.bf16.msra.mxu2 %v8686_v36 }
  0x59   : > { %661 = vmatpush.bf16.msra.mxu0 %v7816_v6  ;;  %8149 = vmatpush.bf16.msra.mxu3 %v7816_v6 }
  0x5a   : > { %5351 = vmatpush.bf16.msra.mxu1 %v7969_v25 }
  0x5b   : > { %5440 = vmatpush.bf16.msra.mxu2 %v8690_v48  ;;  %v7823_v6 = vld [vmem:[#allocation3 + $0x4] sm:$0xf] }
  0x5d   : > { %662 = vmatpush.bf16.msra.mxu0 %v7815_v7  ;;  %8150 = vmatpush.bf16.msra.mxu3 %v7815_v7  ;;  %v6901_v7 = vld [vmem:[#allocation3 + $0x24] sm:$0xf0] }
  0x5e   : > { %5352 = vmatpush.bf16.msra.mxu1 %v7968_v31 }
  0x5f   : > { %5441 = vmatpush.bf16.msra.mxu2 %v8705_v60 }
  0x60   : > { %663 = vmatmul.bf16.vlgmr.msra.gmra.mxu0 %v7799_v8  ;;  %v7996_v8 = vld [vmem:[#allocation9 + $0xe8] sm:$0xff] }
  0x61   : > { %8151 = vmatpush.bf16.msrb.mxu3 %v7974_v15  ;;  %5613 = vmatpush.bf16.msrb.mxu0 %v7998_v61 }
  0x62   : > { %5353 = vmatpush.bf16.msra.mxu1 %v7967_v45 }
  0x63   : > { %5442 = vmatpush.bf16.msra.mxu2 %v8711_v1 }
  0x65   : > { %8152 = vmatpush.bf16.msrb.mxu3 %v7973_v16  ;;  %5354 = vmatmul.bf16.vlgmr.msra.gmra.mxu1 %v6900_v58 }
  0x66   : > { %5614 = vmatpush.bf16.msrb.mxu0 %v7997_v2 }
  0x69   : > { %8153 = vmatpush.bf16.msrb.mxu3 %v7972_v17 }
  0x6a   : > { %5615 = vmatpush.bf16.msrb.mxu0 %v7996_v8 }
  0x6d   : > { %8154 = vmatpush.bf16.msrb.mxu3 %v7971_v19 }
  0x70   : > { %668 = vmatmul.bf16.gmra.mxu0 %v7800_v9 }
  0x71   : > { %8155 = vmatpush.bf16.msrb.mxu3 %v7970_v22 }
  0x75   : > { %8156 = vmatpush.bf16.msrb.mxu3 %v7969_v25 }
  0x79   : > { %8157 = vmatpush.bf16.msrb.mxu3 %v7968_v31 }
  0x7d   : > { %8158 = vmatpush.bf16.msrb.mxu3 %v7967_v45 }
  0x80   : > { %673 = vmatmul.bf16.gmra.mxu0 %v7801_v10 }
  0x90   : > { %678 = vmatmul.bf16.gmra.mxu0 %v7802_v11  ;;  %v6904_v11 = vor.u32 %v7823_v6, %v6901_v7 }
  0x92   : > { %5443 = vmatmul.bf16.vlgmr.msra.gmra.mxu2 %v6904_v11 }
  0xa0   : > { %683 = vmatmul.bf16.gmra.mxu0 %v7803_v12 }
  0xb0   : > { %688 = vmatmul.bf16.gmra.mxu0 %v7804_v13  ;;  %v7808_v13 = vld [vmem:[%s8647_s4 + $0x48] sm:$0xff] }
  0xc0   : > { %693 = vmatmul.bf16.gmra.mxu0 %v7805_v14  ;;  %v7811_v14 = vld [vmem:[%s8647_s4 + $0x60] sm:$0xff] }
  0xc1   : > { %723 = vmatmul.bf16.vlgmr.msra.gmra.mxu3 %v7811_v14 }
  0xc2   : > { %8159 = vmatpush.bf16.msra.mxu3 %v8668_v18 }
  0xc6   : > { %8160 = vmatpush.bf16.msra.mxu3 %v8672_v21 }
  0xca   : > { %8161 = vmatpush.bf16.msra.mxu3 %v8675_v24  ;;  %v7992_v24 = vld [vmem:[#allocation9 + $0xc8] sm:$0xff] }
  0xce   : > { %8162 = vmatpush.bf16.msra.mxu3 %v8678_v26 }
  0xd0   : > { %698 = vmatmul.bf16.gmra.mxu0 %v7806_v20  ;;  %v7995_v20 = vld [vmem:[#allocation9 + $0xe0] sm:$0xff] }
  0xd1   : > { %5616 = vmatpush.bf16.msrb.mxu0 %v7995_v20  ;;  %728 = vmatmul.bf16.gmra.mxu3 %v7812_v56 }
  0xd2   : > { %8163 = vmatpush.bf16.msra.mxu3 %v8686_v36 }
  0xd5   : > { %5617 = vmatpush.bf16.msrb.mxu0 %v7994_v28 }
  0xd6   : > { %8164 = vmatpush.bf16.msra.mxu3 %v8690_v48 }
  0xd9   : > { %5618 = vmatpush.bf16.msrb.mxu0 %v7993_v38 }
  0xda   : > { %8165 = vmatpush.bf16.msra.mxu3 %v8705_v60 }
  0xdd   : > { %v664_v47 = vpop.f32.mrf.mxu0  ;;  %5619 = vmatpush.bf16.msrb.mxu0 %v7992_v24 }
  0xde   : > { %v748_v51 = vmul.f32 %v8684_v35, %v664_v47  ;;  %8166 = vmatpush.bf16.msra.mxu3 %v8711_v1 }
  0xe0   : > { %703 = vmatmul.bf16.gmra.mxu0 %v7807_v44  ;;  %v784_v63 = vadd.f32 %v8696_v52, %v748_v51 }
  0xe1   : > { %5620 = vmatpush.bf16.msrb.mxu0 %v7991_v59 }
  0xe2   : > { %v816_v3 = vmax.f32 %v784_v63, 0.0 }
  0xe4   : > { %v848_v9 = vpack.c.bf16 %v816_v3, %v816_v3 }
  0xe5   : > { %v666_v0 = vpop.f32.mrf.mxu0 }
  0xe6   : > { %v749_v4 = vmul.f32 %v8684_v35, %v666_v0  ;;  %v912_v16 = vunpack.c.l.b16 %v848_v9 }
  0xe8   : > { %v785_v5 = vadd.f32 %v8696_v52, %v749_v4 }
  0xea   : > { %v817_v10 = vmax.f32 %v785_v5, 0.0 }
  0xec   : > { %v849_v12 = vpack.c.bf16 %v817_v10, %v817_v10 }
  0xed   : > { %v669_v15 = vpop.f32.mrf.mxu0 }
  0xee   : > { %v913_v17 = vunpack.c.l.b16 %v849_v12  ;;  %v750_v19 = vmul.f32 %v8684_v35, %v669_v15 }
  0xf0   : > { %v944_v22 = vpack.c.b16 %v913_v17, %v912_v16  ;;  %708 = vmatmul.bf16.gmra.mxu0 %v7808_v13  ;;  %v786_v25 = vadd.f32 %v8696_v52, %v750_v19 }
  0xf2   : > { %v961_v23 = vshrl.u32 %v944_v22, 16  ;;  %v964_v30 = vshll.u32 %v944_v22, 16  ;;  %v818_v33 = vmax.f32 %v786_v25, 0.0 }
  0xf4   : > { %v963_v29 = vrot.slane %v961_v23, 7  ;;  %v850_v43 = vpack.c.bf16 %v818_v33, %v818_v33 }
  0xf5   : > { %v671_v31 = vpop.f32.mrf.mxu0 }
  0xf6   : > { %v966_v18 = vor.u32 %v964_v30, %v963_v29  ;;  %v1123_v32 = vsel %vm8721_vm5, %v963_v29, 0  ;;  %v751_v34 = vmul.f32 %v8684_v35, %v671_v31  ;;  %v914_v51 = vunpack.c.l.b16 %v850_v43 }
  0xf7   : > { %v1173_v37 = vunpack.c.l.b16 %v1123_v32 }
  0xf8   : > { %v1107_v39 = vsel %vm8721_vm5, 0, %v966_v18  ;;  %v787_v21 = vadd.f32 %v8696_v52, %v751_v34 }
  0xf9   : > { %v1171_v40 = vunpack.c.l.b16 %v1107_v39  ;;  %v1172_v41 = vunpack.c.h.b16 %v1107_v39  ;;  %v1221_v42 = vpack.c.b16 %v1173_v37, %v1173_v37  ;;  %v7810_v39 = vld [vmem:[%s8647_s4 + $0x58] sm:$0xff] }
  0xfa   : > { %v819_v44 = vmax.f32 %v787_v21, 0.0 }
  0xfb   : > { %v1219_v45 = vpack.c.b16 %v1171_v40, %v1171_v40  ;;  %v1220_v46 = vpack.c.b16 %v1172_v41, %v1172_v41  ;;  %1318 = vst [vmem:[#allocation2 + $0x14] sm:$0x1] %v1221_v42 }
  0xfc   : > { %v851_v47 = vpack.c.bf16 %v819_v44, %v819_v44 }
  0xfd   : > { %1316 = vst [vmem:[#allocation2 + $0xc] sm:$0xf] %v1219_v45  ;;  %v674_v50 = vpop.f32.mrf.mxu0 }
  0xfe   : > { %1317 = vst [vmem:[#allocation2 + $0x10] sm:$0xf] %v1220_v46  ;;  %v915_v53 = vunpack.c.l.b16 %v851_v47  ;;  %v752_v55 = vmul.f32 %v8684_v35, %v674_v50 }
 0x100   : > { %v945_v57 = vpack.c.b16 %v915_v53, %v914_v51  ;;  %v788_v58 = vadd.f32 %v8696_v52, %v752_v55  ;;  %713 = vmatmul.bf16.gmra.mxu0 %v7809_v49 }
 0x102   : > { %v968_v26 = vshrl.u32 %v945_v57, 16  ;;  %v820_v61 = vmax.f32 %v788_v58, 0.0  ;;  %v971_v63 = vshll.u32 %v945_v57, 16  ;;  %v1440_v2 = vld [vmem:[#allocation2 + $0x14] sm:$0x1] }
 0x103   : > { %v1530_v19 = vshll.u32 %v1440_v2, 16  ;;  %v2275_v1 = vld [vmem:[#allocation2 + $0x14] sm:$0x1] }
 0x104   : > { %v970_v62 = vrot.slane %v968_v26, 7  ;;  %v1373_v0 = vld [vmem:[#allocation2 + $0xc] sm:$0xf]  ;;  %v852_v8 = vpack.c.bf16 %v820_v61, %v820_v61 }
 0x105   : > { %v676_v3 = vpop.f32.mrf.mxu0  ;;  %v1374_v4 = vld [vmem:[#allocation2 + $0x10] sm:$0xf]  ;;  %1405 = vst [vmem:[#allocation3 + $0x48] sm:$0xf] %v1373_v0  ;;  %v1438_v5 = vld [vmem:[#allocation2 + $0xc] sm:$0xf] }
 0x106   : > { %v2273_v36 = vld [vmem:[#allocation2 + $0xc] sm:$0xf]  ;;  %v973_v6 = vor.u32 %v971_v63, %v970_v62  ;;  %v1124_v7 = vsel %vm8721_vm5, %v970_v62, 0  ;;  %v753_v9 = vmul.f32 %v8684_v35, %v676_v3  ;;  %1406 = vst [vmem:[#allocation3 + $0x6c] sm:$0xf] %v1374_v4  ;;  %v1511_v48 = vshrl.u32 %v1438_v5, 16 }
 0x107   : > { %v1439_v10 = vld [vmem:[#allocation2 + $0x10] sm:$0xf]  ;;  %v1176_v11 = vunpack.c.l.b16 %v1124_v7  ;;  %v1514_v12 = vshll.u32 %v1438_v5, 16  ;;  %v2209_v14 = vld [vmem:[#allocation2 + $0xc] sm:$0xf]  ;;  %v2322_v33 = vshrl.u32 %v2273_v36, 16  ;;  %v916_v42 = vunpack.c.l.b16 %v852_v8 }
 0x108   : > { %v1520_v13 = vshll.u32 %v1439_v10, 16  ;;  %v1108_v15 = vsel %vm8721_vm5, 0, %v973_v6  ;;  %v789_v16 = vadd.f32 %v8696_v52, %v753_v9  ;;  %v1524_v17 = vshrl.u32 %v1439_v10, 16  ;;  %v2210_v20 = vld [vmem:[#allocation2 + $0x10] sm:$0xf]  ;;  %v7813_v4 = vld [vmem:[%s8647_s4 + $0x70] sm:$0xff] }
 0x109   : > { %v1174_v22 = vunpack.c.l.b16 %v1108_v15  ;;  %v1175_v23 = vunpack.c.h.b16 %v1108_v15  ;;  %v1224_v25 = vpack.c.b16 %v1176_v11, %v1176_v11  ;;  %v1513_v28 = vrot.slane %v1511_v48, 4  ;;  %2241 = vst [vmem:[#allocation3 + $0xc] sm:$0xf] %v2209_v14  ;;  %v2274_v41 = vld [vmem:[#allocation2 + $0x10] sm:$0xf]  ;;  %733 = vmatmul.bf16.gmra.mxu3 %v7813_v4 }
 0x10a   : > { %v821_v29 = vmax.f32 %v789_v16, 0.0  ;;  %v1516_v30 = vrot.slane %v1514_v12, 5  ;;  %v1522_v31 = vrot.slane %v1520_v13, 5  ;;  %v1526_v18 = vrot.slane %v1524_v17, 4  ;;  %2242 = vst [vmem:[#allocation3 + $0x30] sm:$0xf] %v2210_v20 }
 0x10b   : > { %v1222_v60 = vpack.c.b16 %v1174_v22, %v1174_v22  ;;  %v1223_v32 = vpack.c.b16 %v1175_v23, %v1175_v23  ;;  %1321 = vst [vmem:[#allocation2 + $0x20] sm:$0x1] %v1224_v25  ;;  %v2325_v34 = vshll.u32 %v2273_v36, 16  ;;  %v2324_v45 = vrot.slane %v2322_v33, 4  ;;  %v2769_v17 = vld [vmem:[#allocation2 + $0xc] sm:$0xe] }
 0x10c   : > { %v853_v37 = vpack.c.bf16 %v821_v29, %v821_v29  ;;  %v6935_v38 = vld [vmem:[#allocation3 + $0x48] sm:$0xf]  ;;  %v1517_v21 = vor.u32 %v1516_v30, %v1513_v28  ;;  %v1527_v40 = vor.u32 %v1526_v18, %v1522_v31  ;;  %v1532_v51 = vrot.slane %v1530_v19, 5  ;;  %v2771_v4 = vld [vmem:[#allocation2 + $0x14] sm:$0x1] }
 0x10d   : > { %1319 = vst [vmem:[#allocation2 + $0x18] sm:$0xf] %v1222_v60  ;;  %v679_v43 = vpop.f32.mrf.mxu0  ;;  %v7836_v44 = vld [vmem:[#allocation3 + $0x68] sm:$0xf0]  ;;  %v2327_v24 = vrot.slane %v2325_v34, 5  ;;  %v2331_v53 = vshll.u32 %v2274_v41, 16 }
 0x10e   : > { %1320 = vst [vmem:[#allocation2 + $0x1c] sm:$0xf] %v1223_v32  ;;  %v917_v46 = vunpack.c.l.b16 %v853_v37  ;;  %v6936_v47 = vor.u32 %v7836_v44, %v6935_v38  ;;  %v1518_v49 = vrot.slane %v1517_v21, 4  ;;  %v1528_v50 = vrot.slane %v1527_v40, 4 }
 0x10f   : > { %v754_v56 = vmul.f32 %v8684_v35, %v679_v43  ;;  %v2335_v58 = vshrl.u32 %v2274_v41, 16  ;;  %v2328_v61 = vor.u32 %v2327_v24, %v2324_v45  ;;  %v8754_v62 = vrot.slane %v2331_v53, 5 }
 0x110   : > { %v946_v55 = vpack.c.b16 %v917_v46, %v916_v42  ;;  %5359 = vmatmul.bf16.gmra.mxu1 %v6936_v47  ;;  %718 = vmatmul.bf16.gmra.mxu0 %v7810_v39  ;;  %v1523_v57 = vsel %vm8698_vm2, %v1518_v49, %v1522_v31  ;;  %v1533_v59 = vsel %vm8698_vm2, %v1528_v50, %v1532_v51  ;;  %v2341_v63 = vshll.u32 %v2275_v1, 16  ;;  %v7824_v11 = vld [vmem:[#allocation3 + $0xc] sm:$0xf]  ;;  %v2770_v39 = vld [vmem:[#allocation2 + $0x10] sm:$0xf] }
 0x111   : > { %1904 = vst [vmem:[#allocation3 + $0x4c] sm:$0xf] %v1523_v57  ;;  %v790_v3 = vadd.f32 %v8696_v52, %v754_v56  ;;  %v2337_v5 = vrot.slane %v2335_v58, 4  ;;  %v8760_v8 = vrot.slane %v2328_v61, 4  ;;  %v6909_v48 = vld [vmem:[#allocation3 + $0x2c] sm:$0xf0] }
 0x112   : > { %v975_v26 = vshrl.u32 %v946_v55, 16  ;;  %1905 = vst [vmem:[#allocation3 + $0x70] sm:$0xf] %v1533_v59  ;;  %v978_v2 = vshll.u32 %v946_v55, 16  ;;  %v2343_v16 = vrot.slane %v2341_v63, 5  ;;  %v6912_v30 = vor.u32 %v7824_v11, %v6909_v48 }
 0x113   : > { %v822_v13 = vmax.f32 %v790_v3, 0.0  ;;  %v2338_v15 = vor.u32 %v2337_v5, %v8754_v62  ;;  %v2334_v18 = vsel %vm8698_vm2, %v8760_v8, %v8754_v62  ;;  %v1443_v37 = vld [vmem:[#allocation2 + $0x20] sm:$0x1]  ;;  %v6865_v49 = vrot.slane %v2769_v17, 9 }
 0x114   : > { %v977_v0 = vrot.slane %v975_v26, 7  ;;  %v1375_v10 = vld [vmem:[#allocation2 + $0x18] sm:$0xf]  ;;  %v1554_v56 = vshll.u32 %v1443_v37, 16  ;;  %v2867_v62 = vrot.slane %v2770_v39, 5 }
 0x115   : > { %v681_v36 = vpop.f32.mrf.mxu0  ;;  %v1376_v25 = vld [vmem:[#allocation2 + $0x1c] sm:$0xf]  ;;  %1407 = vst [vmem:[#allocation3 + $0x90] sm:$0xf] %v1375_v10  ;;  %v1441_v28 = vld [vmem:[#allocation2 + $0x18] sm:$0xf]  ;;  %v854_v44 = vpack.c.bf16 %v822_v13, %v822_v13 }
 0x116   : > { %v980_v6 = vor.u32 %v978_v2, %v977_v0  ;;  %v1125_v7 = vsel %vm8721_vm5, %v977_v0, 0  ;;  %v755_v23 = vmul.f32 %v8684_v35, %v681_v36  ;;  %1408 = vst [vmem:[#allocation3 + $0xb4] sm:$0xf] %v1376_v25  ;;  %v1442_v31 = vld [vmem:[#allocation2 + $0x1c] sm:$0xf]  ;;  %v1535_v21 = vshrl.u32 %v1441_v28, 16 }
 0x117   : > { %v1179_v9 = vunpack.c.l.b16 %v1125_v7  ;;  %v2211_v38 = vld [vmem:[#allocation2 + $0x18] sm:$0xf]  ;;  %v1538_v40 = vshll.u32 %v1441_v28, 16  ;;  %v1544_v41 = vshll.u32 %v1442_v31, 16  ;;  %v1548_v42 = vshrl.u32 %v1442_v31, 16 }
 0x118   : > { %v1109_v12 = vsel %vm8721_vm5, 0, %v980_v6  ;;  %v7832_v14 = vld [vmem:[#allocation3 + $0x4c] sm:$0xf]  ;;  %v791_v33 = vadd.f32 %v8696_v52, %v755_v23  ;;  %v2212_v43 = vld [vmem:[#allocation2 + $0x1c] sm:$0xf]  ;;  %v2339_v47 = vrot.slane %v2338_v15, 4  ;;  %v918_v63 = vunpack.c.l.b16 %v854_v44 }
 0x119   : > { %v1177_v19 = vunpack.c.l.b16 %v1109_v12  ;;  %v1178_v20 = vunpack.c.h.b16 %v1109_v12  ;;  %v1227_v22 = vpack.c.b16 %v1179_v9, %v1179_v9  ;;  %v6937_v29 = vld [vmem:[#allocation3 + $0x6c] sm:$0xf0]  ;;  %v1537_v50 = vrot.slane %v1535_v21, 4  ;;  %2243 = vst [vmem:[#allocation3 + $0x54] sm:$0xf] %v2211_v38 }
 0x11a   : > { %v6940_v34 = vor.u32 %v7832_v14, %v6937_v29  ;;  %v823_v45 = vmax.f32 %v791_v33, 0.0  ;;  %v1540_v51 = vrot.slane %v1538_v40, 5  ;;  %v1546_v53 = vrot.slane %v1544_v41, 5  ;;  %2244 = vst [vmem:[#allocation3 + $0x78] sm:$0xf] %v2212_v43 }
 0x11b   : > { %v1225_v60 = vpack.c.b16 %v1177_v19, %v1177_v19  ;;  %v1226_v32 = vpack.c.b16 %v1178_v20, %v1178_v20  ;;  %1324 = vst [vmem:[#allocation2 + $0x2c] sm:$0x1] %v1227_v22  ;;  %v1550_v55 = vrot.slane %v1548_v42, 4  ;;  %v2344_v57 = vsel %vm8698_vm2, %v2339_v47, %v2343_v16 }
 0x11c   : > { %5448 = vmatmul.bf16.gmra.mxu2 %v6940_v34  ;;  %v855_v1 = vpack.c.bf16 %v823_v45, %v823_v45  ;;  %v6971_v26 = vld [vmem:[#allocation3 + $0x90] sm:$0xf]  ;;  %v1541_v61 = vor.u32 %v1540_v51, %v1537_v50  ;;  %2737 = vst [vmem:[#allocation3 + $0x10] sm:$0xf] %v2334_v18  ;;  %v2868_v7 = vsel %vm8776_vm8, %v6865_v49, %v2867_v62  ;;  %v1556_v11 = vrot.slane %v1554_v56, 5 }
 0x11d   : > { %1322 = vst [vmem:[#allocation2 + $0x24] sm:$0xf] %v1225_v60  ;;  %v684_v46 = vpop.f32.mrf.mxu0  ;;  %v7845_v2 = vld [vmem:[#allocation3 + $0xb0] sm:$0xf0]  ;;  %v1551_v3 = vor.u32 %v1550_v55, %v1546_v53  ;;  %v2869_v14 = vrot.slane %v2867_v62, 4  ;;  %v2870_v15 = vrot.slane %v2771_v4, 5 }
 0x11e   : > { %1323 = vst [vmem:[#allocation2 + $0x28] sm:$0xf] %v1226_v32  ;;  %v756_v24 = vmul.f32 %v8684_v35, %v684_v46  ;;  %v919_v0 = vunpack.c.l.b16 %v855_v1  ;;  %v6972_v5 = vor.u32 %v7845_v2, %v6971_v26  ;;  %v1542_v36 = vrot.slane %v1541_v61, 4  ;;  %v2276_v56 = vld [vmem:[#allocation2 + $0x18] sm:$0xf] }
 0x11f   : > { %2738 = vst [vmem:[#allocation3 + $0x34] sm:$0xf] %v2344_v57  ;;  %v1552_v10 = vrot.slane %v1551_v3, 4  ;;  %v2871_v39 = vsel %vm8776_vm8, %v2869_v14, %v2870_v15 }
 0x120   : > { %v792_v59 = vadd.f32 %v8696_v52, %v756_v24  ;;  %5621 = vmatmul.bf16.vlgmr.msrb.gmra.mxu0 %v6912_v30  ;;  %v947_v8 = vpack.c.b16 %v919_v0, %v918_v63  ;;  %3009 = vst [vmem:[#allocation3 + $0x14] sm:$0xf] %v2868_v7  ;;  %5364 = vmatmul.bf16.gmra.mxu1 %v6972_v5  ;;  %v7833_v32 = vld [vmem:[#allocation3 + $0x54] sm:$0xf]  ;;  %v2277_v0 = vld [vmem:[#allocation2 + $0x1c] sm:$0xf] }
 0x121   : > { %v1547_v48 = vsel %vm8698_vm2, %v1542_v36, %v1546_v53  ;;  %v1557_v19 = vsel %vm8698_vm2, %v1552_v10, %v1556_v11  ;;  %v6945_v33 = vld [vmem:[#allocation3 + $0x74] sm:$0xf0]  ;;  %3010 = vst [vmem:[#allocation3 + $0x38] sm:$0xf] %v2871_v39  ;;  %v2346_v10 = vshrl.u32 %v2276_v56, 16  ;;  %v2355_v14 = vshll.u32 %v2277_v0, 16 }
 0x122   : > { %v1446_v6 = vld [vmem:[#allocation2 + $0x2c] sm:$0x1]  ;;  %v824_v9 = vmax.f32 %v792_v59, 0.0  ;;  %v982_v16 = vshrl.u32 %v947_v8, 16  ;;  %1906 = vst [vmem:[#allocation3 + $0x94] sm:$0xf] %v1547_v48  ;;  %v6948_v26 = vor.u32 %v7833_v32, %v6945_v33 }
 0x123   : > { %v1578_v22 = vshll.u32 %v1446_v6, 16  ;;  %1907 = vst [vmem:[#allocation3 + $0xb8] sm:$0xf] %v1557_v19  ;;  %v985_v30 = vshll.u32 %v947_v8, 16  ;;  %v2359_v19 = vshrl.u32 %v2277_v0, 16  ;;  %v8811_v33 = vrot.slane %v2355_v14, 5 }
 0x124   : > { %v1377_v12 = vld [vmem:[#allocation2 + $0x24] sm:$0xf]  ;;  %v984_v29 = vrot.slane %v982_v16, 7  ;;  %v856_v31 = vpack.c.bf16 %v824_v9, %v824_v9 }
 0x125   : > { %v1444_v13 = vld [vmem:[#allocation2 + $0x24] sm:$0xf]  ;;  %v686_v17 = vpop.f32.mrf.mxu0  ;;  %v1378_v20 = vld [vmem:[#allocation2 + $0x28] sm:$0xf]  ;;  %1409 = vst [vmem:[#allocation3 + $0xd8] sm:$0xf] %v1377_v12 }
 0x126   : > { %v757_v23 = vmul.f32 %v8684_v35, %v686_v17  ;;  %v1445_v25 = vld [vmem:[#allocation2 + $0x28] sm:$0xf]  ;;  %v2213_v28 = vld [vmem:[#allocation2 + $0x24] sm:$0xf]  ;;  %v1559_v18 = vshrl.u32 %v1444_v13, 16  ;;  %v1562_v34 = vshll.u32 %v1444_v13, 16  ;;  %v987_v21 = vor.u32 %v985_v30, %v984_v29 }
 0x127   : > { %1410 = vst [vmem:[#allocation3 + $0xfc] sm:$0xf] %v1378_v20  ;;  %v1568_v37 = vshll.u32 %v1445_v25, 16  ;;  %v2214_v38 = vld [vmem:[#allocation2 + $0x28] sm:$0xf]  ;;  %v1126_v40 = vsel %vm8721_vm5, %v984_v29, 0  ;;  %v920_v49 = vunpack.c.l.b16 %v856_v31 }
 0x128   : > { %v793_v60 = vadd.f32 %v8696_v52, %v757_v23  ;;  %v1561_v41 = vrot.slane %v1559_v18, 4  ;;  %v1572_v42 = vshrl.u32 %v1445_v25, 16  ;;  %2245 = vst [vmem:[#allocation3 + $0x9c] sm:$0xf] %v2213_v28  ;;  %v1182_v43 = vunpack.c.l.b16 %v1126_v40  ;;  %v8796_v12 = vld [vmem:[#allocation2 + $0x20] sm:$0x1] }
 0x129   : > { %v1564_v45 = vrot.slane %v1562_v34, 5  ;;  %v1570_v46 = vrot.slane %v1568_v37, 5  ;;  %2246 = vst [vmem:[#allocation3 + $0xc0] sm:$0xf] %v2214_v38  ;;  %v1110_v47 = vsel %vm8721_vm5, 0, %v987_v21  ;;  %v1580_v63 = vrot.slane %v1578_v22, 5 }
 0x12a   : > { %v825_v44 = vmax.f32 %v793_v60, 0.0  ;;  %v1574_v24 = vrot.slane %v1572_v42, 4  ;;  %v1180_v50 = vunpack.c.l.b16 %v1110_v47  ;;  %v1181_v51 = vunpack.c.h.b16 %v1110_v47  ;;  %v7841_v55 = vld [vmem:[#allocation3 + $0x94] sm:$0xf]  ;;  %v6973_v57 = vld [vmem:[#allocation3 + $0xb4] sm:$0xf0] }
 0x12b   : > { %v1230_v53 = vpack.c.b16 %v1182_v43, %v1182_v43  ;;  %v1565_v61 = vor.u32 %v1564_v45, %v1561_v41  ;;  %v6976_v5 = vor.u32 %v7841_v55, %v6973_v57  ;;  %v2349_v13 = vshll.u32 %v2276_v56, 16  ;;  %v8803_v20 = vld [vmem:[#allocation2 + $0x18] sm:$0xe]  ;;  %v8809_v60 = vld [vmem:[#allocation2 + $0x1c] sm:$0xf] }
 0x12c   : > { %v857_v1 = vpack.c.bf16 %v825_v44, %v825_v44  ;;  %v1575_v62 = vor.u32 %v1574_v24, %v1570_v46  ;;  %v1228_v2 = vpack.c.b16 %v1180_v50, %v1180_v50  ;;  %v1229_v3 = vpack.c.b16 %v1181_v51, %v1181_v51  ;;  %v7007_v36 = vld [vmem:[#allocation3 + $0xd8] sm:$0xf] }
 0x12d   : > { %v689_v59 = vpop.f32.mrf.mxu0  ;;  %1327 = vst [vmem:[#allocation2 + $0x38] sm:$0x1] %v1230_v53  ;;  %v1566_v8 = vrot.slane %v1565_v61, 4  ;;  %5453 = vmatmul.bf16.gmra.mxu2 %v6976_v5  ;;  %v2348_v28 = vrot.slane %v2346_v10, 4  ;;  %v2351_v29 = vrot.slane %v2349_v13, 5  ;;  %v2361_v34 = vrot.slane %v2359_v19, 4 }
 0x12e   : > { %v921_v4 = vunpack.c.l.b16 %v857_v1  ;;  %v758_v6 = vmul.f32 %v8684_v35, %v689_v59  ;;  %v7854_v7 = vld [vmem:[#allocation3 + $0xf8] sm:$0xf0]  ;;  %v1576_v9 = vrot.slane %v1575_v62, 4  ;;  %1325 = vst [vmem:[#allocation2 + $0x30] sm:$0xf] %v1228_v2  ;;  %v2365_v37 = vshll.u32 %v8796_v12, 16 }
 0x12f   : > { %v7008_v48 = vor.u32 %v7854_v7, %v7007_v36  ;;  %1326 = vst [vmem:[#allocation2 + $0x34] sm:$0xf] %v1229_v3  ;;  %v1571_v16 = vsel %vm8698_vm2, %v1566_v8, %v1570_v46  ;;  %v8805_v23 = vld [vmem:[#allocation3 + $0x9c] sm:$0xf]  ;;  %v6866_v38 = vrot.slane %v8803_v20, 9  ;;  %v2874_v42 = vrot.slane %v8809_v60, 5 }
 0x130   : > { %v948_v11 = vpack.c.b16 %v921_v4, %v920_v49  ;;  %5626 = vmatmul.bf16.gmra.mxu0 %v6948_v26  ;;  %v794_v15 = vadd.f32 %v8696_v52, %v758_v6  ;;  %v1581_v17 = vsel %vm8698_vm2, %v1576_v9, %v1580_v63  ;;  %1908 = vst [vmem:[#allocation3 + $0xdc] sm:$0xf] %v1571_v16  ;;  %v8807_v25 = vld [vmem:[#allocation3 + $0xbc] sm:$0xf0] }
 0x131   : > { %1909 = vst [vmem:[#allocation3 + $0x100] sm:$0xf] %v1581_v17  ;;  %5369 = vmatmul.bf16.gmra.mxu1 %v7008_v48  ;;  %v6984_v45 = vor.u32 %v8805_v23, %v8807_v25  ;;  %v2352_v49 = vor.u32 %v2351_v29, %v2348_v28  ;;  %v2362_v61 = vor.u32 %v2361_v34, %v8811_v33  ;;  %v8826_v23 = vld [vmem:[#allocation2 + $0x20] sm:$0x1] }
 0x132   : > { %v989_v22 = vshrl.u32 %v948_v11, 16  ;;  %v992_v31 = vshll.u32 %v948_v11, 16  ;;  %v826_v18 = vmax.f32 %v794_v15, 0.0  ;;  %v2367_v15 = vrot.slane %v2365_v37, 5 }
 0x133   : > { %v2353_v13 = vrot.slane %v2352_v49, 4  ;;  %v2363_v14 = vrot.slane %v2362_v61, 4 }
 0x134   : > { %v991_v30 = vrot.slane %v989_v22, 7  ;;  %v1449_v41 = vld [vmem:[#allocation2 + $0x38] sm:$0x1]  ;;  %v858_v50 = vpack.c.bf16 %v826_v18, %v826_v18 }
 0x135   : > { %v691_v32 = vpop.f32.mrf.mxu0  ;;  %v1379_v44 = vld [vmem:[#allocation2 + $0x30] sm:$0xf]  ;;  %v1602_v6 = vshll.u32 %v1449_v41, 16  ;;  %v2358_v29 = vsel %vm8698_vm2, %v2353_v13, %v8811_v33  ;;  %v8838_v33 = vrot.slane %v2874_v42, 4  ;;  %v2877_v41 = vrot.slane %v8826_v23, 5 }
 0x136   : > { %v994_v39 = vor.u32 %v992_v31, %v991_v30  ;;  %v1127_v21 = vsel %vm8721_vm5, %v991_v30, 0  ;;  %v759_v40 = vmul.f32 %v8684_v35, %v691_v32  ;;  %v1447_v46 = vld [vmem:[#allocation2 + $0x30] sm:$0xf]  ;;  %v1380_v53 = vld [vmem:[#allocation2 + $0x34] sm:$0xf]  ;;  %v922_v16 = vunpack.c.l.b16 %v858_v50 }
 0x137   : > { %v1185_v43 = vunpack.c.l.b16 %v1127_v21  ;;  %v2215_v47 = vld [vmem:[#allocation2 + $0x30] sm:$0xf]  ;;  %1411 = vst [vmem:[#allocation3 + $0x120] sm:$0xf] %v1379_v44  ;;  %v1583_v1 = vshrl.u32 %v1447_v46, 16  ;;  %v1586_v2 = vshll.u32 %v1447_v46, 16  ;;  %v2368_v30 = vsel %vm8698_vm2, %v2363_v14, %v2367_v15 }
 0x138   : > { %v1111_v24 = vsel %vm8721_vm5, 0, %v994_v39  ;;  %v795_v51 = vadd.f32 %v8696_v52, %v759_v40  ;;  %v7850_v59 = vld [vmem:[#allocation3 + $0xdc] sm:$0xf]  ;;  %1412 = vst [vmem:[#allocation3 + $0x144] sm:$0xf] %v1380_v53  ;;  %v1604_v39 = vrot.slane %v1602_v6, 5 }
 0x139   : > { %v1183_v55 = vunpack.c.l.b16 %v1111_v24  ;;  %v1184_v56 = vunpack.c.h.b16 %v1111_v24  ;;  %v1233_v57 = vpack.c.b16 %v1185_v43, %v1185_v43  ;;  %v1448_v26 = vld [vmem:[#allocation2 + $0x34] sm:$0xf]  ;;  %v7009_v63 = vld [vmem:[#allocation3 + $0xfc] sm:$0xf0]  ;;  %v1585_v0 = vrot.slane %v1583_v1, 4 }
 0x13a   : > { %v827_v62 = vmax.f32 %v795_v51, 0.0  ;;  %v1592_v3 = vshll.u32 %v1448_v26, 16  ;;  %v1596_v36 = vshrl.u32 %v1448_v26, 16  ;;  %v7012_v8 = vor.u32 %v7850_v59, %v7009_v63  ;;  %v2216_v11 = vld [vmem:[#allocation2 + $0x34] sm:$0xf] }
 0x13b   : > { %v1231_v4 = vpack.c.b16 %v1183_v55, %v1183_v55  ;;  %v1232_v5 = vpack.c.b16 %v1184_v56, %v1184_v56  ;;  %1330 = vst [vmem:[#allocation2 + $0x44] sm:$0x1] %v1233_v57  ;;  %v1588_v9 = vrot.slane %v1586_v2, 5  ;;  %v8833_v31 = vld [vmem:[#allocation2 + $0x2c] sm:$0x1]  ;;  %v7814_v55 = vld [vmem:[%s8647_s4 + $0x78] sm:$0xff]  ;;  %v2875_v26 = vsel %vm8776_vm8, %v6866_v38, %v2874_v42 }
 0x13c   : > { %v859_v7 = vpack.c.bf16 %v827_v62, %v827_v62  ;;  %v1594_v10 = vrot.slane %v1592_v3, 5  ;;  %2247 = vst [vmem:[#allocation3 + $0xe4] sm:$0xf] %v2215_v47  ;;  %v1598_v12 = vrot.slane %v1596_v36, 4  ;;  %v8843_v47 = vld [vmem:[#allocation2 + $0x24] sm:$0xf]  ;;  %738 = vmatmul.bf16.gmra.mxu3 %v7814_v55 }
 0x13d   : > { %1328 = vst [vmem:[#allocation2 + $0x3c] sm:$0xf] %v1231_v4  ;;  %v694_v48 = vpop.f32.mrf.mxu0  ;;  %v1589_v22 = vor.u32 %v1588_v9, %v1585_v0  ;;  %5458 = vmatmul.bf16.gmra.mxu2 %v7012_v8  ;;  %v2370_v0 = vshrl.u32 %v8843_v47, 16  ;;  %v2373_v23 = vshll.u32 %v8843_v47, 16 }
 0x13e   : > { %1329 = vst [vmem:[#allocation2 + $0x40] sm:$0xf] %v1232_v5  ;;  %v923_v17 = vunpack.c.l.b16 %v859_v7  ;;  %v760_v19 = vmul.f32 %v8684_v35, %v694_v48  ;;  %v7043_v25 = vld [vmem:[#allocation3 + $0x120] sm:$0xf]  ;;  %v1599_v28 = vor.u32 %v1598_v12, %v1594_v10 }
 0x13f   : > { %2248 = vst [vmem:[#allocation3 + $0x108] sm:$0xf] %v2216_v11  ;;  %v7863_v34 = vld [vmem:[#allocation3 + $0x140] sm:$0xf0]  ;;  %v1590_v37 = vrot.slane %v1589_v22, 4  ;;  %v2375_v47 = vrot.slane %v2373_v23, 5 }
 0x140   : > { %v949_v18 = vpack.c.b16 %v923_v17, %v922_v16  ;;  %v796_v32 = vadd.f32 %v8696_v52, %v760_v19  ;;  %5631 = vmatmul.bf16.gmra.mxu0 %v6984_v45  ;;  %2739 = vst [vmem:[#allocation3 + $0x58] sm:$0xf] %v2358_v29  ;;  %v7044_v21 = vor.u32 %v7863_v34, %v7043_v25  ;;  %v1600_v40 = vrot.slane %v1599_v28, 4 }
 0x141   : > { %2740 = vst [vmem:[#allocation3 + $0x7c] sm:$0xf] %v2368_v30  ;;  %v1595_v44 = vsel %vm8698_vm2, %v1590_v37, %v1594_v10  ;;  %v2389_v45 = vshll.u32 %v8833_v31, 16  ;;  %v8862_v25 = vrot.slane %v2370_v0, 4 }
 0x142   : > { %v996_v43 = vshrl.u32 %v949_v18, 16  ;;  %v1452_v46 = vld [vmem:[#allocation2 + $0x44] sm:$0x1]  ;;  %v999_v49 = vshll.u32 %v949_v18, 16  ;;  %v828_v24 = vmax.f32 %v796_v32, 0.0  ;;  %v1605_v50 = vsel %vm8698_vm2, %v1600_v40, %v1604_v39  ;;  %5374 = vmatmul.bf16.gmra.mxu1 %v7044_v21 }
 0x143   : > { %1910 = vst [vmem:[#allocation3 + $0x124] sm:$0xf] %v1595_v44  ;;  %v1626_v51 = vshll.u32 %v1452_v46, 16  ;;  %v7851_v42 = vld [vmem:[#allocation3 + $0xe4] sm:$0xf]  ;;  %v2878_v40 = vsel %vm8776_vm8, %v8838_v33, %v2877_v41 }
 0x144   : > { %v998_v53 = vrot.slane %v996_v43, 7  ;;  %1911 = vst [vmem:[#allocation3 + $0x148] sm:$0xf] %v1605_v50  ;;  %v1381_v1 = vld [vmem:[#allocation2 + $0x3c] sm:$0xf]  ;;  %v860_v3 = vpack.c.bf16 %v828_v24, %v828_v24 }
 0x145   : > { %v696_v56 = vpop.f32.mrf.mxu0  ;;  %v1382_v57 = vld [vmem:[#allocation2 + $0x40] sm:$0xf]  ;;  %1413 = vst [vmem:[#allocation3 + $0x168] sm:$0xf] %v1381_v1  ;;  %v1450_v59 = vld [vmem:[#allocation2 + $0x3c] sm:$0xf] }
 0x146   : > { %v1001_v61 = vor.u32 %v999_v49, %v998_v53  ;;  %v1128_v62 = vsel %vm8721_vm5, %v998_v53, 0  ;;  %v761_v63 = vmul.f32 %v8684_v35, %v696_v56  ;;  %1414 = vst [vmem:[#allocation3 + $0x18c] sm:$0xf] %v1382_v57  ;;  %v1451_v4 = vld [vmem:[#allocation2 + $0x40] sm:$0xf]  ;;  %v1607_v5 = vshrl.u32 %v1450_v59, 16 }
 0x147   : > { %v1188_v2 = vunpack.c.l.b16 %v1128_v62  ;;  %v1610_v60 = vshll.u32 %v1450_v59, 16  ;;  %v2217_v36 = vld [vmem:[#allocation2 + $0x3c] sm:$0xf]  ;;  %v7017_v6 = vld [vmem:[#allocation3 + $0x104] sm:$0xf0]  ;;  %v1616_v7 = vshll.u32 %v1451_v4, 16  ;;  %v924_v34 = vunpack.c.l.b16 %v860_v3 }
 0x148   : > { %v1112_v20 = vsel %vm8721_vm5, 0, %v1001_v61  ;;  %v797_v38 = vadd.f32 %v8696_v52, %v761_v63  ;;  %v1620_v8 = vshrl.u32 %v1451_v4, 16  ;;  %v1609_v11 = vrot.slane %v1607_v5, 4  ;;  %v2218_v48 = vld [vmem:[#allocation2 + $0x40] sm:$0xf] }
 0x149   : > { %v1186_v35 = vunpack.c.l.b16 %v1112_v20  ;;  %v1187_v9 = vunpack.c.h.b16 %v1112_v20  ;;  %v1236_v10 = vpack.c.b16 %v1188_v2, %v1188_v2  ;;  %2249 = vst [vmem:[#allocation3 + $0x12c] sm:$0xf] %v2217_v36  ;;  %v1612_v14 = vrot.slane %v1610_v60, 5  ;;  %v2280_v43 = vld [vmem:[#allocation2 + $0x28] sm:$0xf] }
 0x14a   : > { %v829_v12 = vmax.f32 %v797_v38, 0.0  ;;  %v7859_v13 = vld [vmem:[#allocation3 + $0x124] sm:$0xf]  ;;  %v1618_v15 = vrot.slane %v1616_v7, 5  ;;  %v1622_v16 = vrot.slane %v1620_v8, 4  ;;  %v1628_v52 = vrot.slane %v1626_v51, 5 }
 0x14b   : > { %v1234_v17 = vpack.c.b16 %v1186_v35, %v1186_v35  ;;  %v1235_v19 = vpack.c.b16 %v1187_v9, %v1187_v9  ;;  %1333 = vst [vmem:[#allocation2 + $0x50] sm:$0x1] %v1236_v10  ;;  %v7045_v22 = vld [vmem:[#allocation3 + $0x144] sm:$0xf0]  ;;  %v1613_v18 = vor.u32 %v1612_v14, %v1609_v11  ;;  %v7020_v21 = vor.u32 %v7851_v42, %v7017_v6 }
 0x14c   : > { %v861_v28 = vpack.c.bf16 %v829_v12, %v829_v12  ;;  %v7048_v29 = vor.u32 %v7859_v13, %v7045_v22  ;;  %v7079_v30 = vld [vmem:[#allocation3 + $0x168] sm:$0xf]  ;;  %v1623_v32 = vor.u32 %v1622_v16, %v1618_v15  ;;  %2250 = vst [vmem:[#allocation3 + $0x150] sm:$0xf] %v2218_v48  ;;  %v2379_v53 = vshll.u32 %v2280_v43, 16 }
 0x14d   : > { %1331 = vst [vmem:[#allocation2 + $0x48] sm:$0xf] %v1234_v17  ;;  %v699_v37 = vpop.f32.mrf.mxu0  ;;  %v7872_v39 = vld [vmem:[#allocation3 + $0x188] sm:$0xf0]  ;;  %v8872_v46 = vld [vmem:[%s10415_s2] ss:$0 sm:$0xff]  ;;  %v2376_v7 = vor.u32 %v2375_v47, %v8862_v25 }
 0x14e   : > { %1332 = vst [vmem:[#allocation2 + $0x4c] sm:$0xf] %v1235_v19  ;;  %v925_v44 = vunpack.c.l.b16 %v861_v28  ;;  %v762_v49 = vmul.f32 %v8872_v46, %v699_v37  ;;  %v7080_v24 = vor.u32 %v7872_v39, %v7079_v30  ;;  %v1614_v50 = vrot.slane %v1613_v18, 4  ;;  %5463 = vmatmul.bf16.gmra.mxu2 %v7048_v29  ;;  %v8879_v33 = vld [vmem:[%s10416_s3] ss:$0 sm:$0xff] }
 0x14f   : > { %v1624_v51 = vrot.slane %v1623_v32, 4  ;;  %3011 = vst [vmem:[#allocation3 + $0x5c] sm:$0xf] %v2875_v26  ;;  %v2383_v1 = vshrl.u32 %v2280_v43, 16  ;;  %v8886_v59 = vrot.slane %v2379_v53, 5  ;;  %v8896_v36 = vrot.slane %v2389_v45, 5 }
 0x150   : > { %v950_v55 = vpack.c.b16 %v925_v44, %v924_v34  ;;  %v798_v41 = vadd.f32 %v8879_v33, %v762_v49  ;;  %5636 = vmatmul.bf16.gmra.mxu0 %v7020_v21  ;;  %v1619_v56 = vsel %vm8698_vm2, %v1614_v50, %v1618_v15  ;;  %3012 = vst [vmem:[#allocation3 + $0x80] sm:$0xf] %v2878_v40  ;;  %v8888_v63 = vld [vmem:[#allocation3 + $0x12c] sm:$0xf]  ;;  %v2776_v25 = vld [vmem:[#allocation2 + $0x28] sm:$0xf] }
 0x151   : > { %v1629_v57 = vsel %vm8698_vm2, %v1624_v51, %v1628_v52  ;;  %1912 = vst [vmem:[#allocation3 + $0x16c] sm:$0xf] %v1619_v56  ;;  %v2385_v26 = vrot.slane %v2383_v1, 4  ;;  %v2775_v15 = vld [vmem:[#allocation2 + $0x24] sm:$0xe]  ;;  %v2377_v49 = vrot.slane %v2376_v7, 4 }
 0x152   : > { %v1003_v61 = vshrl.u32 %v950_v55, 16  ;;  %v830_v62 = vmax.f32 %v798_v41, 0.0  ;;  %1913 = vst [vmem:[#allocation3 + $0x190] sm:$0xf] %v1629_v57  ;;  %v1006_v0 = vshll.u32 %v950_v55, 16  ;;  %5379 = vmatmul.bf16.gmra.mxu1 %v7080_v24  ;;  %v6867_v53 = vrot.slane %v2775_v15, 9 }
 0x153   : > { %v8890_v2 = vld [vmem:[#allocation3 + $0x14c] sm:$0xf0]  ;;  %v8892_v3 = vld [vmem:[#allocation2 + $0x50] sm:$0x1]  ;;  %v2386_v8 = vor.u32 %v2385_v26, %v8886_v59  ;;  %v2382_v57 = vsel %vm8698_vm2, %v2377_v49, %v8886_v59  ;;  %v2881_v47 = vrot.slane %v2776_v25, 5 }
 0x154   : > { %v1005_v4 = vrot.slane %v1003_v61, 7  ;;  %v1383_v5 = vld [vmem:[#allocation2 + $0x48] sm:$0xf]  ;;  %v8898_v20 = vpack.c.bf16 %v830_v62, %v830_v62  ;;  %v7056_v31 = vor.u32 %v8888_v63, %v8890_v2  ;;  %v1650_v52 = vshll.u32 %v8892_v3, 16  ;;  %2741 = vst [vmem:[#allocation3 + $0xa0] sm:$0xf] %v2382_v57 }
 0x155   : > { %v1453_v60 = vld [vmem:[#allocation2 + $0x48] sm:$0xf]  ;;  %v701_v38 = vpop.f32.mrf.mxu0  ;;  %v1384_v42 = vld [vmem:[#allocation2 + $0x4c] sm:$0xf]  ;;  %1415 = vst [vmem:[#allocation3 + $0x1b0] sm:$0xf] %v1383_v5  ;;  %v2882_v5 = vsel %vm8776_vm8, %v6867_v53, %v2881_v47 }
 0x156   : > { %v1454_v6 = vld [vmem:[#allocation2 + $0x4c] sm:$0xf]  ;;  %v1008_v35 = vor.u32 %v1006_v0, %v1005_v4  ;;  %v1129_v9 = vsel %vm8721_vm5, %v1005_v4, 0  ;;  %v763_v10 = vmul.f32 %v8872_v46, %v701_v38  ;;  %1416 = vst [vmem:[#allocation3 + $0x1d4] sm:$0xf] %v1384_v42  ;;  %v1631_v48 = vshrl.u32 %v1453_v60, 16 }
 0x157   : > { %v2219_v45 = vld [vmem:[#allocation2 + $0x48] sm:$0xf]  ;;  %v1191_v11 = vunpack.c.l.b16 %v1129_v9  ;;  %v1634_v12 = vshll.u32 %v1453_v60, 16  ;;  %v1640_v13 = vshll.u32 %v1454_v6, 16  ;;  %v2220_v14 = vld [vmem:[#allocation2 + $0x4c] sm:$0xf]  ;;  %v926_v1 = vunpack.c.l.b16 %v8898_v20 }
 0x158   : > { %v1113_v16 = vsel %vm8721_vm5, 0, %v1008_v35  ;;  %v799_v17 = vadd.f32 %v8879_v33, %v763_v10  ;;  %v7868_v19 = vld [vmem:[#allocation3 + $0x16c] sm:$0xf]  ;;  %v1644_v22 = vshrl.u32 %v1454_v6, 16  ;;  %v1633_v32 = vrot.slane %v1631_v48, 4 }
 0x159   : > { %v1189_v28 = vunpack.c.l.b16 %v1113_v16  ;;  %v1190_v29 = vunpack.c.h.b16 %v1113_v16  ;;  %v1239_v30 = vpack.c.b16 %v1191_v11, %v1191_v11  ;;  %v7081_v18 = vld [vmem:[#allocation3 + $0x18c] sm:$0xf0]  ;;  %2251 = vst [vmem:[#allocation3 + $0x174] sm:$0xf] %v2219_v45  ;;  %v1636_v39 = vrot.slane %v1634_v12, 5 }
 0x15a   : > { %v831_v34 = vmax.f32 %v799_v17, 0.0  ;;  %v7084_v37 = vor.u32 %v7868_v19, %v7081_v18  ;;  %v1642_v21 = vrot.slane %v1640_v13, 5  ;;  %2252 = vst [vmem:[#allocation3 + $0x198] sm:$0xf] %v2220_v14  ;;  %v1646_v44 = vrot.slane %v1644_v22, 4 }
 0x15b   : > { %v1237_v40 = vpack.c.b16 %v1189_v28, %v1189_v28  ;;  %v1238_v43 = vpack.c.b16 %v1190_v29, %v1190_v29  ;;  %1336 = vst [vmem:[#allocation2 + $0x5c] sm:$0x1] %v1239_v30  ;;  %v1637_v51 = vor.u32 %v1636_v39, %v1633_v32  ;;  %v2387_v23 = vrot.slane %v2386_v8, 4  ;;  %v8916_v0 = vld [vmem:[#allocation2 + $0x30] sm:$0xf] }
 0x15c   : > { %v863_v24 = vpack.c.bf16 %v831_v34, %v831_v34  ;;  %v7115_v50 = vld [vmem:[#allocation3 + $0x1b0] sm:$0xf]  ;;  %v1647_v56 = vor.u32 %v1646_v44, %v1642_v21  ;;  %v1652_v63 = vrot.slane %v1650_v52, 5  ;;  %v2777_v38 = vld [vmem:[#allocation2 + $0x2c] sm:$0x1]  ;;  %v2883_v6 = vrot.slane %v2881_v47, 4 }
 0x15d   : > { %1334 = vst [vmem:[#allocation2 + $0x54] sm:$0xf] %v1237_v40  ;;  %v704_v55 = vpop.f32.mrf.mxu0  ;;  %v7881_v41 = vld [vmem:[#allocation3 + $0x1d0] sm:$0xf0]  ;;  %v1638_v62 = vrot.slane %v1637_v51, 4  ;;  %v2392_v4 = vsel %vm8698_vm2, %v2387_v23, %v8896_v36  ;;  %v2394_v36 = vshrl.u32 %v8916_v0, 16 }
 0x15e   : > { %1335 = vst [vmem:[#allocation2 + $0x58] sm:$0xf] %v1238_v43  ;;  %v927_v26 = vunpack.c.l.b16 %v863_v24  ;;  %v764_v61 = vmul.f32 %v8872_v46, %v704_v55  ;;  %v7116_v2 = vor.u32 %v7881_v41, %v7115_v50  ;;  %v1648_v3 = vrot.slane %v1647_v56, 4  ;;  %5468 = vmatmul.bf16.gmra.mxu2 %v7084_v37 }
 0x15f   : > { %v1643_v20 = vsel %vm8698_vm2, %v1638_v62, %v1642_v21  ;;  %2742 = vst [vmem:[#allocation3 + $0xc4] sm:$0xf] %v2392_v4  ;;  %v2884_v9 = vrot.slane %v2777_v38, 5  ;;  %v8929_v11 = vrot.slane %v2394_v36, 4  ;;  %v2397_v52 = vshll.u32 %v8916_v0, 16 }
 0x160   : > { %v951_v59 = vpack.c.b16 %v927_v26, %v926_v1  ;;  %v800_v60 = vadd.f32 %v8879_v33, %v764_v61  ;;  %5641 = vmatmul.bf16.gmra.mxu0 %v7056_v31  ;;  %v1653_v42 = vsel %vm8698_vm2, %v1648_v3, %v1652_v63  ;;  %1914 = vst [vmem:[#allocation3 + $0x1b4] sm:$0xf] %v1643_v20  ;;  %v7869_v21 = vld [vmem:[#allocation3 + $0x174] sm:$0xf]  ;;  %v2283_v0 = vld [vmem:[#allocation2 + $0x34] sm:$0xf] }
 0x161   : > { %1915 = vst [vmem:[#allocation3 + $0x1d8] sm:$0xf] %v1653_v42  ;;  %v2885_v15 = vsel %vm8776_vm8, %v2883_v6, %v2884_v9  ;;  %v7089_v40 = vld [vmem:[#allocation3 + $0x194] sm:$0xf0]  ;;  %v2399_v47 = vrot.slane %v2397_v52, 5  ;;  %v2407_v9 = vshrl.u32 %v2283_v0, 16 }
 0x162   : > { %v1010_v7 = vshrl.u32 %v951_v59, 16  ;;  %v1013_v8 = vshll.u32 %v951_v59, 16  ;;  %v832_v35 = vmax.f32 %v800_v60, 0.0  ;;  %3013 = vst [vmem:[#allocation3 + $0xa4] sm:$0xf] %v2882_v5  ;;  %5384 = vmatmul.bf16.gmra.mxu1 %v7116_v2  ;;  %v7092_v5 = vor.u32 %v7869_v21, %v7089_v40 }
 0x163   : > { %v1458_v14 = vld [vmem:[#allocation2 + $0x5c] sm:$0x1]  ;;  %3014 = vst [vmem:[#allocation3 + $0xc8] sm:$0xf] %v2885_v15  ;;  %v2400_v60 = vor.u32 %v2399_v47, %v8929_v11 }
 0x164   : > { %v1012_v10 = vrot.slane %v1010_v7, 7  ;;  %v1385_v31 = vld [vmem:[#allocation2 + $0x54] sm:$0xf]  ;;  %v864_v34 = vpack.c.bf16 %v832_v35, %v832_v35  ;;  %v1674_v55 = vshll.u32 %v1458_v14, 16  ;;  %v2403_v35 = vshll.u32 %v2283_v0, 16 }
 0x165   : > { %v1456_v45 = vld [vmem:[#allocation2 + $0x54] sm:$0xf]  ;;  %v706_v48 = vpop.f32.mrf.mxu0  ;;  %v1386_v12 = vld [vmem:[#allocation2 + $0x58] sm:$0xf]  ;;  %1417 = vst [vmem:[#allocation3 + $0x1f8] sm:$0xf] %v1385_v31 }
 0x166   : > { %v1457_v13 = vld [vmem:[#allocation2 + $0x58] sm:$0xf]  ;;  %v1015_v16 = vor.u32 %v1013_v8, %v1012_v10  ;;  %v1130_v17 = vsel %vm8721_vm5, %v1012_v10, 0  ;;  %v765_v19 = vmul.f32 %v8872_v46, %v706_v48  ;;  %1418 = vst [vmem:[#allocation3 + $0x21c] sm:$0xf] %v1386_v12  ;;  %v1655_v28 = vshrl.u32 %v1456_v45, 16 }
 0x167   : > { %v2221_v22 = vld [vmem:[#allocation2 + $0x54] sm:$0xf]  ;;  %v1194_v25 = vunpack.c.l.b16 %v1130_v17  ;;  %v1658_v29 = vshll.u32 %v1456_v45, 16  ;;  %v1664_v30 = vshll.u32 %v1457_v13, 16  ;;  %v2222_v18 = vld [vmem:[#allocation2 + $0x58] sm:$0xf]  ;;  %v928_v2 = vunpack.c.l.b16 %v864_v34 }
 0x168   : > { %v1114_v32 = vsel %vm8721_vm5, 0, %v1015_v16  ;;  %v801_v37 = vadd.f32 %v8879_v33, %v765_v19  ;;  %v7877_v39 = vld [vmem:[#allocation3 + $0x1b4] sm:$0xf]  ;;  %v1668_v43 = vshrl.u32 %v1457_v13, 16  ;;  %v7117_v50 = vld [vmem:[#allocation3 + $0x1d4] sm:$0xf0] }
 0x169   : > { %v1192_v44 = vunpack.c.l.b16 %v1114_v32  ;;  %v1193_v49 = vunpack.c.h.b16 %v1114_v32  ;;  %v1242_v24 = vpack.c.b16 %v1194_v25, %v1194_v25  ;;  %v1657_v51 = vrot.slane %v1655_v28, 4  ;;  %2253 = vst [vmem:[#allocation3 + $0x1bc] sm:$0xf] %v2221_v22  ;;  %v2284_v8 = vld [vmem:[#allocation2 + $0x38] sm:$0x1] }
 0x16a   : > { %v833_v23 = vmax.f32 %v801_v37, 0.0  ;;  %v1660_v53 = vrot.slane %v1658_v29, 5  ;;  %v1666_v1 = vrot.slane %v1664_v30, 5  ;;  %2254 = vst [vmem:[#allocation3 + $0x1e0] sm:$0xf] %v2222_v18  ;;  %v1670_v57 = vrot.slane %v1668_v43, 4 }
 0x16b   : > { %v1240_v41 = vpack.c.b16 %v1192_v44, %v1192_v44  ;;  %v1241_v56 = vpack.c.b16 %v1193_v49, %v1193_v49  ;;  %1339 = vst [vmem:[#allocation2 + $0x68] sm:$0x1] %v1242_v24  ;;  %v7120_v61 = vor.u32 %v7877_v39, %v7117_v50  ;;  %v1676_v6 = vrot.slane %v1674_v55, 5 }
 0x16c   : > { %v865_v26 = vpack.c.bf16 %v833_v23, %v833_v23  ;;  %v7151_v62 = vld [vmem:[#allocation3 + $0x1f8] sm:$0xf]  ;;  %v1661_v63 = vor.u32 %v1660_v53, %v1657_v51  ;;  %v1671_v59 = vor.u32 %v1670_v57, %v1666_v1  ;;  %v2401_v48 = vrot.slane %v2400_v60, 4  ;;  %v8955_v57 = vld [vmem:[#allocation2 + $0x34] sm:$0xf] }
 0x16d   : > { %1337 = vst [vmem:[#allocation2 + $0x60] sm:$0xf] %v1240_v41  ;;  %v709_v3 = vpop.f32.mrf.mxu0  ;;  %v7890_v4 = vld [vmem:[#allocation3 + $0x218] sm:$0xf0]  ;;  %v2405_v12 = vrot.slane %v2403_v35, 5  ;;  %v2409_v13 = vrot.slane %v2407_v9, 4 }
 0x16e   : > { %1338 = vst [vmem:[#allocation2 + $0x64] sm:$0xf] %v1241_v56  ;;  %v929_v20 = vunpack.c.l.b16 %v865_v26  ;;  %v766_v38 = vmul.f32 %v8872_v46, %v709_v3  ;;  %v1662_v42 = vrot.slane %v1661_v63, 4  ;;  %v7152_v36 = vor.u32 %v7890_v4, %v7151_v62  ;;  %5473 = vmatmul.bf16.gmra.mxu2 %v7120_v61  ;;  %v5355_v63 = vpop.f32.mrf.mxu1  ;;  %v2778_v9 = vld [vmem:[#allocation2 + $0x30] sm:$0xe] }
 0x16f   : > { %v1672_v7 = vrot.slane %v1671_v59, 4  ;;  %v2413_v15 = vshll.u32 %v2284_v8, 16  ;;  %v2406_v18 = vsel %vm8698_vm2, %v2401_v48, %v2405_v12  ;;  %v2410_v32 = vor.u32 %v2409_v13, %v2405_v12  ;;  %v724_v59 = vpop.f32.mrf.mxu3 }
 0x170   : > { %v952_v10 = vpack.c.b16 %v929_v20, %v928_v2  ;;  %v802_v31 = vadd.f32 %v8879_v33, %v766_v38  ;;  %5646 = vmatmul.bf16.gmra.mxu0 %v7092_v5  ;;  %v1667_v45 = vsel %vm8698_vm2, %v1662_v42, %v1666_v1  ;;  %v7878_v44 = vld [vmem:[#allocation3 + $0x1bc] sm:$0xf]  ;;  %2743 = vst [vmem:[#allocation3 + $0xe8] sm:$0xf] %v2406_v18  ;;  %v2888_v12 = vrot.slane %v8955_v57, 5 }
 0x171   : > { %v1677_v11 = vsel %vm8698_vm2, %v1672_v7, %v1676_v6  ;;  %1916 = vst [vmem:[#allocation3 + $0x1fc] sm:$0xf] %v1667_v45  ;;  %v2415_v40 = vrot.slane %v2413_v15, 5  ;;  %v7125_v41 = vld [vmem:[#allocation3 + $0x1dc] sm:$0xf0]  ;;  %v2411_v42 = vrot.slane %v2410_v32, 4 }
 0x172   : > { %v1017_v14 = vshrl.u32 %v952_v10, 16  ;;  %1917 = vst [vmem:[#allocation3 + $0x220] sm:$0xf] %v1677_v11  ;;  %v1020_v16 = vshll.u32 %v952_v10, 16  ;;  %v834_v19 = vmax.f32 %v802_v31, 0.0  ;;  %5389 = vmatmul.bf16.gmra.mxu1 %v7152_v36  ;;  %v7128_v8 = vor.u32 %v7878_v44, %v7125_v41 }
 0x173   : > { %v1461_v30 = vld [vmem:[#allocation2 + $0x68] sm:$0x1]  ;;  %v2416_v48 = vsel %vm8698_vm2, %v2411_v42, %v2415_v40  ;;  %v2890_v40 = vrot.slane %v2888_v12, 4 }
 0x174   : > { %v1019_v17 = vrot.slane %v1017_v14, 7  ;;  %v1387_v22 = vld [vmem:[#allocation2 + $0x60] sm:$0xf]  ;;  %v866_v53 = vpack.c.bf16 %v834_v19, %v834_v19  ;;  %v1698_v5 = vshll.u32 %v1461_v30, 16  ;;  %v5444_v19 = vpop.f32.mrf.mxu2  ;;  %2744 = vst [vmem:[#allocation3 + $0x10c] sm:$0xf] %v2416_v48 }
 0x175   : > { %v1459_v52 = vld [vmem:[#allocation2 + $0x60] sm:$0xf]  ;;  %v711_v25 = vpop.f32.mrf.mxu0  ;;  %v1388_v28 = vld [vmem:[#allocation2 + $0x64] sm:$0xf]  ;;  %1419 = vst [vmem:[#allocation3 + $0x240] sm:$0xf] %v1387_v22 }
 0x176   : > { %v1460_v29 = vld [vmem:[#allocation2 + $0x64] sm:$0xf]  ;;  %v1022_v34 = vor.u32 %v1020_v16, %v1019_v17  ;;  %v1131_v37 = vsel %vm8721_vm5, %v1019_v17, 0  ;;  %v767_v39 = vmul.f32 %v8872_v46, %v711_v25  ;;  %1420 = vst [vmem:[#allocation3 + $0x264] sm:$0xf] %v1388_v28  ;;  %v1679_v49 = vshrl.u32 %v1459_v52, 16 }
 0x177   : > { %v2223_v21 = vld [vmem:[#allocation2 + $0x60] sm:$0xf]  ;;  %v1197_v43 = vunpack.c.l.b16 %v1131_v37  ;;  %v1682_v24 = vshll.u32 %v1459_v52, 16  ;;  %v1688_v50 = vshll.u32 %v1460_v29, 16  ;;  %v2224_v51 = vld [vmem:[#allocation2 + $0x64] sm:$0xf]  ;;  %v930_v10 = vunpack.c.l.b16 %v866_v53 }
 0x178   : > { %v1115_v23 = vsel %vm8721_vm5, 0, %v1022_v34  ;;  %v803_v1 = vadd.f32 %v8879_v33, %v767_v39  ;;  %v7886_v55 = vld [vmem:[#allocation3 + $0x1fc] sm:$0xf]  ;;  %v1692_v56 = vshrl.u32 %v1460_v29, 16  ;;  %v1681_v0 = vrot.slane %v1679_v49, 4 }
 0x179   : > { %v1195_v47 = vunpack.c.l.b16 %v1115_v23  ;;  %v1196_v26 = vunpack.c.h.b16 %v1115_v23  ;;  %v1245_v61 = vpack.c.b16 %v1197_v43, %v1197_v43  ;;  %v7153_v62 = vld [vmem:[#allocation3 + $0x21c] sm:$0xf0]  ;;  %2255 = vst [vmem:[#allocation3 + $0x204] sm:$0xf] %v2223_v21  ;;  %v1684_v3 = vrot.slane %v1682_v24, 5  ;;  %v8006_v17 = vld [vmem:[#allocation9 + $0x138] sm:$0xff]  ;;  %v726_v24 = vpop.f32.mrf.mxu3 }
 0x17a   : > { %v835_v2 = vmax.f32 %v803_v1, 0.0  ;;  %v1690_v4 = vrot.slane %v1688_v50, 5  ;;  %2256 = vst [vmem:[#allocation3 + $0x228] sm:$0xf] %v2224_v51  ;;  %v1694_v38 = vrot.slane %v1692_v56, 4  ;;  %v7156_v36 = vor.u32 %v7886_v55, %v7153_v62  ;;  %5702 = vmatpush.bf16.msrb.mxu1 %v8006_v17  ;;  %v8974_v51 = vpop.f32.mrf.mxu1 }
 0x17b   : > { %v1243_v60 = vpack.c.b16 %v1195_v47, %v1195_v47  ;;  %v1244_v20 = vpack.c.b16 %v1196_v26, %v1196_v26  ;;  %1342 = vst [vmem:[#allocation2 + $0x74] sm:$0x1] %v1245_v61  ;;  %v1685_v35 = vor.u32 %v1684_v3, %v1681_v0  ;;  %v1700_v16 = vrot.slane %v1698_v5, 5  ;;  %v8961_v22 = vld [vmem:[#allocation2 + $0x18] sm:$0xf] }
 0x17c   : > { %v867_v6 = vpack.c.bf16 %v835_v2, %v835_v2  ;;  %v7187_v7 = vld [vmem:[#allocation3 + $0x240] sm:$0xf]  ;;  %v1695_v11 = vor.u32 %v1694_v38, %v1690_v4  ;;  %v8963_v28 = vadd.f32 %v5444_v19, %v5355_v63  ;;  %v772_v29 = vmul.f32 %v8872_v46, %v724_v59  ;;  %10447 = vst [vmem:[#allocation18_spill] sm:$0xff] %v8974_v51  ;;  %v8984_v3 = vld [vmem:[#allocation2 + $0x3c] sm:$0xf] }
 0x17d   : > { %1340 = vst [vmem:[#allocation2 + $0x6c] sm:$0xf] %v1243_v60  ;;  %v714_v31 = vpop.f32.mrf.mxu0  ;;  %v7899_v45 = vld [vmem:[#allocation3 + $0x260] sm:$0xf0]  ;;  %v1686_v15 = vrot.slane %v1685_v35, 4  ;;  %v6868_v21 = vrot.slane %v2778_v9, 9  ;;  %v773_v53 = vmul.f32 %v8872_v46, %v726_v24 }
 0x17e   : > { %1341 = vst [vmem:[#allocation2 + $0x70] sm:$0xf] %v1244_v20  ;;  %v931_v13 = vunpack.c.l.b16 %v867_v6  ;;  %v768_v14 = vmul.f32 %v8872_v46, %v714_v31  ;;  %v7188_v52 = vor.u32 %v7899_v45, %v7187_v7  ;;  %v1696_v25 = vrot.slane %v1695_v11, 4  ;;  %5478 = vmatmul.bf16.gmra.mxu2 %v7156_v36  ;;  %v2780_v34 = vld [vmem:[#allocation2 + $0x38] sm:$0x1] }
 0x17f   : > { %v1691_v32 = vsel %vm8698_vm2, %v1686_v15, %v1690_v4  ;;  %v808_v39 = vadd.f32 %v8879_v33, %v772_v29  ;;  %v3155_v43 = vshrl.u32 %v8961_v22, 16  ;;  %v3158_v50 = vshll.u32 %v8961_v22, 16 }
 0x180   : > { %v953_v30 = vpack.c.b16 %v931_v13, %v930_v10  ;;  %v804_v18 = vadd.f32 %v8879_v33, %v768_v14  ;;  %5651 = vmatmul.bf16.gmra.mxu0 %v7128_v8  ;;  %v1701_v37 = vsel %vm8698_vm2, %v1696_v25, %v1700_v16  ;;  %1918 = vst [vmem:[#allocation3 + $0x244] sm:$0xf] %v1691_v32  ;;  %v2891_v1 = vrot.slane %v2780_v34, 5  ;;  %v7887_v9 = vld [vmem:[#allocation3 + $0x204] sm:$0xf] }
 0x181   : > { %1919 = vst [vmem:[#allocation3 + $0x268] sm:$0xf] %v1701_v37  ;;  %v840_v23 = vmax.f32 %v808_v39, 0.0  ;;  %v809_v62 = vadd.f32 %v8879_v33, %v773_v53  ;;  %v2889_v0 = vsel %vm8776_vm8, %v6868_v21, %v2888_v12  ;;  %v7161_v10 = vld [vmem:[#allocation3 + $0x224] sm:$0xf0]  ;;  %v729_v25 = vpop.f32.mrf.mxu3  ;;  %v2418_v29 = vshrl.u32 %v8984_v3, 16 }
 0x182   : > { %v1024_v44 = vshrl.u32 %v953_v30, 16  ;;  %v836_v49 = vmax.f32 %v804_v18, 0.0  ;;  %v1027_v41 = vshll.u32 %v953_v30, 16  ;;  %5394 = vmatmul.bf16.gmra.mxu1 %v7188_v52  ;;  %v2892_v2 = vsel %vm8776_vm8, %v2890_v40, %v2891_v1  ;;  %v1464_v31 = vld [vmem:[#allocation2 + $0x74] sm:$0x1] }
 0x183   : > { %v872_v26 = vpack.c.bf16 %v840_v23, %v840_v23  ;;  %v841_v6 = vmax.f32 %v809_v62, 0.0  ;;  %3015 = vst [vmem:[#allocation3 + $0xec] sm:$0xf] %v2889_v0  ;;  %v8996_v30 = vld [vmem:[#allocation2 + $0x1c] sm:$0xf]  ;;  %v1722_v37 = vshll.u32 %v1464_v31, 16 }
 0x184   : > { %v1026_v55 = vrot.slane %v1024_v44, 7  ;;  %v1389_v56 = vld [vmem:[#allocation2 + $0x6c] sm:$0xf]  ;;  %v8988_v59 = vpack.c.bf16 %v836_v49, %v836_v49  ;;  %3016 = vst [vmem:[#allocation3 + $0x110] sm:$0xf] %v2892_v2  ;;  %v2421_v62 = vshll.u32 %v8984_v3, 16 }
 0x185   : > { %v1462_v57 = vld [vmem:[#allocation2 + $0x6c] sm:$0xf]  ;;  %v716_v47 = vpop.f32.mrf.mxu0  ;;  %v1390_v61 = vld [vmem:[#allocation2 + $0x70] sm:$0xf]  ;;  %1421 = vst [vmem:[#allocation3 + $0x288] sm:$0xf] %v1389_v56  ;;  %v936_v42 = vunpack.c.l.b16 %v872_v26  ;;  %v873_v16 = vpack.c.bf16 %v841_v6, %v841_v6 }
 0x186   : > { %v8978_v63 = vld [vmem:[#allocation2 + $0x70] sm:$0xf]  ;;  %v1029_v4 = vor.u32 %v1027_v41, %v1026_v55  ;;  %v1132_v5 = vsel %vm8721_vm5, %v1026_v55, 0  ;;  %v769_v60 = vmul.f32 %v8872_v46, %v716_v47  ;;  %1422 = vst [vmem:[#allocation3 + $0x2ac] sm:$0xf] %v1390_v61  ;;  %v1703_v36 = vshrl.u32 %v1462_v57, 16 }
 0x187   : > { %v2225_v20 = vld [vmem:[#allocation2 + $0x6c] sm:$0xf]  ;;  %v1200_v38 = vunpack.c.l.b16 %v1132_v5  ;;  %v2226_v7 = vld [vmem:[#allocation2 + $0x70] sm:$0xf]  ;;  %v1706_v45 = vshll.u32 %v1462_v57, 16  ;;  %v1712_v11 = vshll.u32 %v8978_v63, 16  ;;  %v937_v34 = vunpack.c.l.b16 %v873_v16 }
 0x188   : > { %2257 = vst [vmem:[#allocation3 + $0x24c] sm:$0xf] %v2225_v20  ;;  %v1116_v8 = vsel %vm8721_vm5, 0, %v1029_v4  ;;  %v805_v35 = vadd.f32 %v8879_v33, %v769_v60  ;;  %v7895_v14 = vld [vmem:[#allocation3 + $0x244] sm:$0xf]  ;;  %v1705_v19 = vrot.slane %v1703_v36, 4  ;;  %v932_v24 = vunpack.c.l.b16 %v8988_v59 }
 0x189   : > { %v1198_v48 = vunpack.c.l.b16 %v1116_v8  ;;  %v1199_v12 = vunpack.c.h.b16 %v1116_v8  ;;  %v1248_v13 = vpack.c.b16 %v1200_v38, %v1200_v38  ;;  %v7189_v15 = vld [vmem:[#allocation3 + $0x264] sm:$0xf0]  ;;  %2258 = vst [vmem:[#allocation3 + $0x270] sm:$0xf] %v2226_v7  ;;  %v1708_v52 = vrot.slane %v1706_v45, 5  ;;  %v8005_v57 = vld [vmem:[#allocation9 + $0x130] sm:$0xff] }
 0x18a   : > { %v837_v17 = vmax.f32 %v805_v35, 0.0  ;;  %v7192_v21 = vor.u32 %v7895_v14, %v7189_v15  ;;  %v1716_v49 = vshrl.u32 %v8978_v63, 16  ;;  %v7164_v55 = vor.u32 %v7887_v9, %v7161_v10  ;;  %5703 = vmatpush.bf16.msrb.mxu1 %v8005_v57  ;;  %v9005_v5 = vld [vmem:[#allocation2 + $0x40] sm:$0xf]  ;;  %v731_v10 = vpop.f32.mrf.mxu3  ;;  %v8014_v15 = vld [vmem:[#allocation9 + $0x178] sm:$0xff] }
 0x18b   : > { %v1246_v18 = vpack.c.b16 %v1198_v48, %v1198_v48  ;;  %v1247_v32 = vpack.c.b16 %v1199_v12, %v1199_v12  ;;  %1345 = vst [vmem:[#allocation2 + $0x80] sm:$0x1] %v1248_v13  ;;  %v1709_v44 = vor.u32 %v1708_v52, %v1705_v19  ;;  %v956_v41 = vpack.c.b16 %v937_v34, %v936_v42  ;;  %v8004_v31 = vld [vmem:[#allocation9 + $0x128] sm:$0xff] }
 0x18c   : > { %v869_v39 = vpack.c.bf16 %v837_v17, %v837_v17  ;;  %v7223_v40 = vld [vmem:[#allocation3 + $0x288] sm:$0xf]  ;;  %v1714_v56 = vrot.slane %v1712_v11, 5  ;;  %v3164_v63 = vshll.u32 %v8996_v30, 16  ;;  %v1718_v4 = vrot.slane %v1716_v49, 4  ;;  %5791 = vmatpush.bf16.msrb.mxu2 %v8014_v15 }
 0x18d   : > { %1343 = vst [vmem:[#allocation2 + $0x78] sm:$0xf] %v1246_v18  ;;  %v9000_v23 = vpop.f32.mrf.mxu1  ;;  %v719_v53 = vpop.f32.mrf.mxu0  ;;  %v7908_v1 = vld [vmem:[#allocation3 + $0x2a8] sm:$0xf0]  ;;  %v1710_v61 = vrot.slane %v1709_v44, 4  ;;  %v1045_v2 = vshrl.u32 %v956_v41, 16  ;;  %v774_v13 = vmul.f32 %v8872_v46, %v729_v25 }
 0x18e   : > { %1344 = vst [vmem:[#allocation2 + $0x7c] sm:$0xf] %v1247_v32  ;;  %v933_v47 = vunpack.c.l.b16 %v869_v39  ;;  %v770_v26 = vmul.f32 %v8872_v46, %v719_v53  ;;  %v7224_v0 = vor.u32 %v7908_v1, %v7223_v40  ;;  %5483 = vmatmul.bf16.gmra.mxu2 %v7192_v21  ;;  %v9014_v3 = vrot.slane %v2418_v29, 4  ;;  %5704 = vmatpush.bf16.msrb.mxu1 %v8004_v31  ;;  %v8003_v21 = vld [vmem:[#allocation9 + $0x120] sm:$0xff]  ;;  %v8013_v1 = vld [vmem:[#allocation9 + $0x170] sm:$0xff] }
 0x18f   : > { %v1715_v20 = vsel %vm8698_vm2, %v1710_v61, %v1714_v56  ;;  %v9010_v38 = vld [vmem:[#allocation3 + $0x24c] sm:$0xf]  ;;  %v1047_v6 = vrot.slane %v1045_v2, 7  ;;  %v1048_v36 = vshll.u32 %v956_v41, 16  ;;  %v1719_v7 = vor.u32 %v1718_v4, %v1714_v56 }
 0x190   : > { %v954_v59 = vpack.c.b16 %v933_v47, %v932_v24  ;;  %v806_v60 = vadd.f32 %v8879_v33, %v770_v26  ;;  %5656 = vmatmul.bf16.gmra.mxu0 %v7164_v55  ;;  %v9012_v42 = vld [vmem:[#allocation3 + $0x26c] sm:$0xf0]  ;;  %v1724_v8 = vrot.slane %v1722_v37, 5  ;;  %1920 = vst [vmem:[#allocation3 + $0x28c] sm:$0xf] %v1715_v20  ;;  %v9016_v45 = vrot.slane %v2421_v62, 5  ;;  %v9034_v24 = vpop.f32.mrf.mxu2  ;;  %5792 = vmatpush.bf16.msrb.mxu2 %v8013_v1 }
 0x191   : > { %v2427_v11 = vshll.u32 %v9005_v5, 16  ;;  %v1050_v48 = vor.u32 %v1048_v36, %v1047_v6  ;;  %v1720_v12 = vrot.slane %v1719_v7, 4  ;;  %v7200_v14 = vor.u32 %v9010_v38, %v9012_v42  ;;  %10448 = vst [vmem:[#allocation19_spill] sm:$0xff] %v9034_v24 }
 0x192   : > { %v1031_v35 = vshrl.u32 %v954_v59, 16  ;;  %v838_v9 = vmax.f32 %v806_v60, 0.0  ;;  %v1034_v17 = vshll.u32 %v954_v59, 16  ;;  %5399 = vmatmul.bf16.gmra.mxu1 %v7224_v0  ;;  %v1135_v19 = vsel %vm8721_vm5, %v1047_v6, 0 }
 0x193   : > { %v775_v29 = vmul.f32 %v8872_v46, %v731_v10  ;;  %v1119_v32 = vsel %vm8721_vm5, 0, %v1050_v48  ;;  %v1209_v34 = vunpack.c.l.b16 %v1135_v19  ;;  %v1725_v25 = vsel %vm8698_vm2, %v1720_v12, %v1724_v8  ;;  %5705 = vmatpush.bf16.msrb.mxu1 %v8003_v21  ;;  %v8002_v8 = vld [vmem:[#allocation9 + $0x118] sm:$0xff]  ;;  %v734_v12 = vpop.f32.mrf.mxu3 }
 0x194   : > { %v1033_v16 = vrot.slane %v1031_v35, 7  ;;  %v1391_v52 = vld [vmem:[#allocation2 + $0x78] sm:$0xf]  ;;  %v810_v37 = vadd.f32 %v8879_v33, %v774_v13  ;;  %v9032_v49 = vpack.c.bf16 %v838_v9, %v838_v9  ;;  %1921 = vst [vmem:[#allocation3 + $0x2b0] sm:$0xf] %v1725_v25  ;;  %v1207_v56 = vunpack.c.l.b16 %v1119_v32  ;;  %v8012_v35 = vld [vmem:[#allocation9 + $0x168] sm:$0xff] }
 0x195   : > { %v721_v18 = vpop.f32.mrf.mxu0  ;;  %v1392_v39 = vld [vmem:[#allocation2 + $0x7c] sm:$0xf]  ;;  %1423 = vst [vmem:[#allocation3 + $0x2d0] sm:$0xf] %v1391_v52  ;;  %v9037_v41 = vpop.f32.mrf.mxu1  ;;  %v1208_v57 = vunpack.c.h.b16 %v1119_v32  ;;  %v1257_v47 = vpack.c.b16 %v1209_v34, %v1209_v34  ;;  %v2227_v26 = vld [vmem:[#allocation2 + $0x78] sm:$0xf]  ;;  %v811_v4 = vadd.f32 %v8879_v33, %v775_v29  ;;  %5793 = vmatpush.bf16.msrb.mxu2 %v8012_v35  ;;  %v2424_v1 = vor.u32 %v9016_v45, %v9014_v3 }
 0x196   : > { %v1036_v40 = vor.u32 %v1034_v17, %v1033_v16  ;;  %v1133_v44 = vsel %vm8721_vm5, %v1033_v16, 0  ;;  %v771_v53 = vmul.f32 %v8872_v46, %v721_v18  ;;  %1424 = vst [vmem:[#allocation3 + $0x2f4] sm:$0xf] %v1392_v39  ;;  %v2228_v61 = vld [vmem:[#allocation2 + $0x7c] sm:$0xf]  ;;  %v842_v2 = vmax.f32 %v810_v37, 0.0 }
 0x197   : > { %v1203_v55 = vunpack.c.l.b16 %v1133_v44  ;;  %v1465_v59 = vld [vmem:[#allocation2 + $0x78] sm:$0xf]  ;;  %2259 = vst [vmem:[#allocation3 + $0x294] sm:$0xf] %v2227_v26  ;;  %v1255_v36 = vpack.c.b16 %v1207_v56, %v1207_v56  ;;  %v1466_v7 = vld [vmem:[#allocation2 + $0x7c] sm:$0xf]  ;;  %v1256_v10 = vpack.c.b16 %v1208_v57, %v1208_v57  ;;  %5706 = vmatpush.bf16.msrb.mxu1 %v8002_v8 }
 0x198   : > { %v1117_v62 = vsel %vm8721_vm5, 0, %v1036_v40  ;;  %v807_v0 = vadd.f32 %v8879_v33, %v771_v53  ;;  %1354 = vst [vmem:[#allocation2 + $0xa4] sm:$0x1] %v1257_v47  ;;  %v874_v31 = vpack.c.bf16 %v842_v2, %v842_v2  ;;  %v843_v48 = vmax.f32 %v811_v4, 0.0  ;;  %v7904_v16 = vld [vmem:[#allocation3 + $0x28c] sm:$0xf] }
 0x199   : > { %v1201_v60 = vunpack.c.l.b16 %v1117_v62  ;;  %v1202_v20 = vunpack.c.h.b16 %v1117_v62  ;;  %v1251_v6 = vpack.c.b16 %v1203_v55, %v1203_v55  ;;  %2260 = vst [vmem:[#allocation3 + $0x2b8] sm:$0xf] %v2228_v61  ;;  %v1727_v17 = vshrl.u32 %v1465_v59, 16  ;;  %v1467_v34 = vld [vmem:[#allocation2 + $0x80] sm:$0x1]  ;;  %v8001_v37 = vld [vmem:[#allocation9 + $0x110] sm:$0xff] }
 0x19a   : > { %v839_v9 = vmax.f32 %v807_v0, 0.0  ;;  %v1730_v19 = vshll.u32 %v1465_v59, 16  ;;  %1352 = vst [vmem:[#allocation2 + $0x9c] sm:$0xf] %v1255_v36  ;;  %v938_v29 = vunpack.c.l.b16 %v874_v31  ;;  %v875_v32 = vpack.c.bf16 %v843_v48, %v843_v48  ;;  %v8011_v61 = vld [vmem:[#allocation9 + $0x160] sm:$0xff]  ;;  %v8000_v31 = vld [vmem:[#allocation9 + $0x108] sm:$0xff] }
 0x19b   : > { %v1249_v13 = vpack.c.b16 %v1201_v60, %v1201_v60  ;;  %v1250_v15 = vpack.c.b16 %v1202_v20, %v1202_v20  ;;  %1348 = vst [vmem:[#allocation2 + $0x8c] sm:$0x1] %v1251_v6  ;;  %v1736_v25 = vshll.u32 %v1466_v7, 16  ;;  %v7225_v39 = vld [vmem:[#allocation3 + $0x2ac] sm:$0xf0]  ;;  %v1729_v40 = vrot.slane %v1727_v17, 4  ;;  %5707 = vmatpush.bf16.msrb.mxu1 %v8001_v37  ;;  %5794 = vmatpush.bf16.msrb.mxu2 %v8011_v61  ;;  %v736_v38 = vpop.f32.mrf.mxu3 }
 0x19c   : > { %v871_v52 = vpack.c.bf16 %v839_v9, %v839_v9  ;;  %v7259_v18 = vld [vmem:[#allocation3 + $0x2d0] sm:$0xf]  ;;  %v1732_v44 = vrot.slane %v1730_v19, 5  ;;  %v776_v53 = vmul.f32 %v8872_v46, %v734_v12  ;;  %v934_v55 = vunpack.c.l.b16 %v9032_v49  ;;  %1353 = vst [vmem:[#allocation2 + $0xa0] sm:$0xf] %v1256_v10  ;;  %v8010_v48 = vld [vmem:[#allocation9 + $0x158] sm:$0xff] }
 0x19d   : > { %1346 = vst [vmem:[#allocation2 + $0x84] sm:$0xf] %v1249_v13  ;;  %v9043_v21 = vpop.f32.mrf.mxu0  ;;  %v7228_v57 = vor.u32 %v7904_v16, %v7225_v39  ;;  %v7917_v47 = vld [vmem:[#allocation3 + $0x2f0] sm:$0xf0]  ;;  %v939_v26 = vunpack.c.l.b16 %v875_v32  ;;  %v1738_v2 = vrot.slane %v1736_v25, 5  ;;  %v1740_v4 = vshrl.u32 %v1466_v7, 16  ;;  %v9057_v20 = vpop.f32.mrf.mxu1 }
 0x19e   : > { %1347 = vst [vmem:[#allocation2 + $0x88] sm:$0xf] %v1250_v15  ;;  %v935_v56 = vunpack.c.l.b16 %v871_v52  ;;  %v7260_v62 = vor.u32 %v7917_v47, %v7259_v18  ;;  %v1733_v0 = vor.u32 %v1732_v44, %v1729_v40  ;;  %v812_v45 = vadd.f32 %v8879_v33, %v776_v53  ;;  %v9066_v16 = vld [vmem:[%s10415_s2] ss:$0 sm:$0xff] }
 0x19f   : > { %5488 = vmatmul.bf16.gmra.mxu2 %v7228_v57  ;;  %v5449_v46 = vpop.f32.mrf.mxu2  ;;  %v957_v3 = vpack.c.b16 %v939_v26, %v938_v29  ;;  %v2431_v49 = vshrl.u32 %v9005_v5, 16  ;;  %v1742_v36 = vrot.slane %v1740_v4, 4  ;;  %v1746_v7 = vshll.u32 %v1467_v34, 16  ;;  %5708 = vmatpush.bf16.msrb.mxu1 %v8000_v31  ;;  %v8009_v57 = vld [vmem:[#allocation9 + $0x150] sm:$0xff] }
 0x1a0   : > { %v955_v59 = vpack.c.b16 %v935_v56, %v934_v55  ;;  %5661 = vmatmul.bf16.gmra.mxu0 %v7200_v14  ;;  %v9055_v60 = vadd.f32 %v5449_v46, %v9000_v23  ;;  %v1734_v6 = vrot.slane %v1733_v0, 4  ;;  %v9059_v42 = vrot.slane %v2424_v1, 4  ;;  %5795 = vmatpush.bf16.msrb.mxu2 %v8010_v48  ;;  %v7999_v56 = vld [vmem:[#allocation9 + $0x100] sm:$0xff] }
 0x1a1   : > { %v1052_v35 = vshrl.u32 %v957_v3, 16  ;;  %v1055_v9 = vshll.u32 %v957_v3, 16  ;;  %v1743_v10 = vor.u32 %v1742_v36, %v1738_v2  ;;  %v844_v23 = vmax.f32 %v812_v45, 0.0  ;;  %v7233_v36 = vld [vmem:[#allocation3 + $0x2b4] sm:$0xf0] }
 0x1a2   : > { %v1038_v8 = vshrl.u32 %v955_v59, 16  ;;  %v1041_v14 = vshll.u32 %v955_v59, 16  ;;  %v1739_v33 = vsel %vm8698_vm2, %v1734_v6, %v1738_v2  ;;  %5404 = vmatmul.bf16.gmra.mxu1 %v7260_v62  ;;  %v777_v17 = vmul.f32 %v9066_v16, %v736_v38  ;;  %v9087_v62 = vld [vmem:[%s10416_s3] ss:$0 sm:$0xff]  ;;  %v7905_v6 = vld [vmem:[#allocation3 + $0x294] sm:$0xf] }
 0x1a3   : > { %v1054_v13 = vrot.slane %v1052_v35, 7  ;;  %1922 = vst [vmem:[#allocation3 + $0x2d4] sm:$0xf] %v1739_v33  ;;  %v1744_v52 = vrot.slane %v1743_v10, 4  ;;  %v1748_v29 = vrot.slane %v1746_v7, 5  ;;  %v9071_v18 = vpack.c.bf16 %v844_v23, %v844_v23  ;;  %5709 = vmatpush.bf16.msrb.mxu1 %v7999_v56  ;;  %v8008_v35 = vld [vmem:[#allocation9 + $0x148] sm:$0xff] }
 0x1a4   : > { %v1040_v12 = vrot.slane %v1038_v8, 7  ;;  %v1393_v15 = vld [vmem:[#allocation2 + $0x84] sm:$0xf]  ;;  %v813_v0 = vadd.f32 %v9087_v62, %v777_v17  ;;  %5796 = vmatpush.bf16.msrb.mxu2 %v8009_v57  ;;  %v1470_v10 = vld [vmem:[#allocation2 + $0x8c] sm:$0x1]  ;;  %v9115_v5 = vrot.slane %v3158_v50, 5 }
 0x1a5   : > { %v9069_v19 = vpop.f32.mrf.mxu0  ;;  %v1394_v32 = vld [vmem:[#allocation2 + $0x88] sm:$0xf]  ;;  %1425 = vst [vmem:[#allocation3 + $0x318] sm:$0xf] %v1393_v15  ;;  %v1057_v37 = vor.u32 %v1055_v9, %v1054_v13  ;;  %v1136_v39 = vsel %vm8721_vm5, %v1054_v13, 0  ;;  %v1749_v1 = vsel %vm8698_vm2, %v1744_v52, %v1748_v29  ;;  %v940_v55 = vunpack.c.l.b16 %v9071_v18  ;;  %v9093_v45 = vpop.f32.mrf.mxu1  ;;  %v8007_v18 = vld [vmem:[#allocation9 + $0x140] sm:$0xff] }
 0x1a6   : > { %10449 = vst [vmem:[#allocation20_spill] sm:$0xff] %v9069_v19  ;;  %v1043_v34 = vor.u32 %v1041_v14, %v1040_v12  ;;  %v1134_v25 = vsel %vm8721_vm5, %v1040_v12, 0  ;;  %v1468_v40 = vld [vmem:[#allocation2 + $0x84] sm:$0xf]  ;;  %v1212_v53 = vunpack.c.l.b16 %v1136_v39  ;;  %v1469_v7 = vld [vmem:[#allocation2 + $0x88] sm:$0xf]  ;;  %v7236_v39 = vor.u32 %v7905_v6, %v7233_v36 }
 0x1a7   : > { %1426 = vst [vmem:[#allocation3 + $0x33c] sm:$0xf] %v1394_v32  ;;  %v1206_v44 = vunpack.c.l.b16 %v1134_v25  ;;  %v5451_v26 = vpop.f32.mrf.mxu2  ;;  %v1120_v61 = vsel %vm8721_vm5, 0, %v1057_v37  ;;  %v1751_v2 = vshrl.u32 %v1468_v40, 16  ;;  %v2229_v8 = vld [vmem:[#allocation2 + $0x84] sm:$0xf] }
 0x1a8   : > { %v1118_v47 = vsel %vm8721_vm5, 0, %v1043_v34  ;;  %1923 = vst [vmem:[#allocation3 + $0x2f8] sm:$0xf] %v1749_v1  ;;  %v9091_v3 = vadd.f32 %v5451_v26, %v9037_v41  ;;  %v1210_v9 = vunpack.c.l.b16 %v1120_v61  ;;  %v1211_v38 = vunpack.c.h.b16 %v1120_v61  ;;  %5797 = vmatpush.bf16.msrb.mxu2 %v8008_v35 }
 0x1a9   : > { %v1204_v4 = vunpack.c.l.b16 %v1118_v47  ;;  %v1205_v59 = vunpack.c.h.b16 %v1118_v47  ;;  %v1254_v46 = vpack.c.b16 %v1206_v44, %v1206_v44  ;;  %v1260_v14 = vpack.c.b16 %v1212_v53, %v1212_v53  ;;  %2261 = vst [vmem:[#allocation3 + $0x2dc] sm:$0xf] %v2229_v8  ;;  %v9107_v8 = vld [vmem:[#allocation2 + $0x40] sm:$0xf] }
 0x1aa   : > { %v845_v33 = vmax.f32 %v813_v0, 0.0  ;;  %v7913_v41 = vld [vmem:[#allocation3 + $0x2d4] sm:$0xf]  ;;  %v1753_v48 = vrot.slane %v1751_v2, 4  ;;  %v1754_v12 = vshll.u32 %v1468_v40, 16  ;;  %v1258_v13 = vpack.c.b16 %v1210_v9, %v1210_v9 }
 0x1ab   : > { %v1252_v23 = vpack.c.b16 %v1204_v4, %v1204_v4  ;;  %v1253_v31 = vpack.c.b16 %v1205_v59, %v1205_v59  ;;  %1351 = vst [vmem:[#allocation2 + $0x98] sm:$0x1] %v1254_v46  ;;  %v1259_v15 = vpack.c.b16 %v1211_v38, %v1211_v38  ;;  %v1760_v29 = vshll.u32 %v1469_v7, 16  ;;  %v2230_v40 = vld [vmem:[#allocation2 + $0x88] sm:$0xf] }
 0x1ac   : > { %1357 = vst [vmem:[#allocation2 + $0xb0] sm:$0x1] %v1260_v14  ;;  %v7295_v17 = vld [vmem:[#allocation3 + $0x318] sm:$0xf]  ;;  %v877_v52 = vpack.c.bf16 %v845_v33, %v845_v33  ;;  %v1756_v25 = vrot.slane %v1754_v12, 5  ;;  %v1764_v37 = vshrl.u32 %v1469_v7, 16  ;;  %5798 = vmatpush.bf16.msrb.mxu2 %v8007_v18 }
 0x1ad   : > { %1349 = vst [vmem:[#allocation2 + $0x90] sm:$0xf] %v1252_v23  ;;  %v9095_v32 = vpop.f32.mrf.mxu0  ;;  %v1762_v53 = vrot.slane %v1760_v29, 5  ;;  %v1770_v1 = vshll.u32 %v1470_v10, 16  ;;  %v2429_v26 = vrot.slane %v2427_v11, 5  ;;  %v2433_v59 = vrot.slane %v2431_v49, 4 }
 0x1ae   : > { %10450 = vst [vmem:[#allocation21_spill] sm:$0xff] %v9095_v32  ;;  %v7926_v34 = vld [vmem:[#allocation3 + $0x338] sm:$0xf0]  ;;  %v941_v44 = vunpack.c.l.b16 %v877_v52  ;;  %v1757_v57 = vor.u32 %v1756_v25, %v1753_v48  ;;  %v1766_v47 = vrot.slane %v1764_v37, 4  ;;  %v2287_v4 = vld [vmem:[#allocation2 + $0x44] sm:$0x1]  ;;  %v9102_v6 = vpop.f32.mrf.mxu1 }
 0x1af   : > { %1350 = vst [vmem:[#allocation2 + $0x94] sm:$0xf] %v1253_v31  ;;  %v7261_v56 = vld [vmem:[#allocation3 + $0x2f4] sm:$0xf0]  ;;  %v7296_v0 = vor.u32 %v7926_v34, %v7295_v17  ;;  %v3168_v46 = vshrl.u32 %v8996_v30, 16  ;;  %v2430_v11 = vsel %vm8698_vm2, %v9059_v42, %v2429_v26  ;;  %v1772_v33 = vrot.slane %v1770_v1, 5 }
 0x1b0   : > { %1355 = vst [vmem:[#allocation2 + $0xa8] sm:$0xf] %v1258_v13  ;;  %v7264_v61 = vor.u32 %v7913_v41, %v7261_v56  ;;  %5666 = vmatmul.bf16.gmra.mxu0 %v7236_v39  ;;  %v958_v2 = vpack.c.b16 %v941_v44, %v940_v55  ;;  %v1758_v36 = vrot.slane %v1757_v57, 4  ;;  %v1767_v7 = vor.u32 %v1766_v47, %v1762_v53  ;;  %v9117_v9 = vld [vmem:[#allocation2 + $0x3c] sm:$0xe]  ;;  %v5454_v38 = vpop.f32.mrf.mxu2 }
 0x1b1   : > { %1356 = vst [vmem:[#allocation2 + $0xac] sm:$0xf] %v1259_v15  ;;  %v9111_v55 = vrot.slane %v3155_v43, 4  ;;  %v2437_v10 = vshll.u32 %v2287_v4, 16  ;;  %v9122_v43 = vadd.f32 %v5454_v38, %v9057_v20  ;;  %v2434_v50 = vor.u32 %v2433_v59, %v2429_v26  ;;  %v9124_v23 = vld [vmem:[#allocation2 + $0x44] sm:$0x1] }
 0x1b2   : > { %2262 = vst [vmem:[#allocation3 + $0x300] sm:$0xf] %v2230_v40  ;;  %5493 = vmatmul.bf16.gmra.mxu2 %v7264_v61  ;;  %v1059_v49 = vshrl.u32 %v958_v2, 16  ;;  %v1062_v35 = vshll.u32 %v958_v2, 16  ;;  %v1763_v14 = vsel %vm8698_vm2, %v1758_v36, %v1762_v53  ;;  %v1768_v42 = vrot.slane %v1767_v7, 4  ;;  %5409 = vmatmul.bf16.gmra.mxu1 %v7296_v0 }
 0x1b3   : > { %2745 = vst [vmem:[#allocation3 + $0x130] sm:$0xf] %v2430_v11  ;;  %v2895_v31 = vrot.slane %v9107_v8, 5  ;;  %v2288_v15 = vld [vmem:[#allocation2 + $0x48] sm:$0xf]  ;;  %v6869_v29 = vrot.slane %v9117_v9, 9 }
 0x1b4   : > { %v1061_v22 = vrot.slane %v1059_v49, 7  ;;  %1924 = vst [vmem:[#allocation3 + $0x31c] sm:$0xf] %v1763_v14  ;;  %v1773_v48 = vsel %vm8698_vm2, %v1768_v42, %v1772_v33  ;;  %v1395_v12 = vld [vmem:[#allocation2 + $0x90] sm:$0xf]  ;;  %v2439_v37 = vrot.slane %v2437_v10, 5 }
 0x1b5   : > { %v9127_v41 = vpop.f32.mrf.mxu0  ;;  %1925 = vst [vmem:[#allocation3 + $0x340] sm:$0xf] %v1773_v48  ;;  %v1397_v52 = vld [vmem:[#allocation2 + $0x9c] sm:$0xf]  ;;  %v2289_v18 = vld [vmem:[#allocation2 + $0x4c] sm:$0xf] }
 0x1b6   : > { %10451 = vst [vmem:[#allocation22_spill] sm:$0xff] %v9127_v41  ;;  %v1396_v13 = vld [vmem:[#allocation2 + $0x94] sm:$0xf]  ;;  %v1064_v17 = vor.u32 %v1062_v35, %v1061_v22  ;;  %v1137_v20 = vsel %vm8721_vm5, %v1061_v22, 0  ;;  %v1398_v25 = vld [vmem:[#allocation2 + $0xa0] sm:$0xf]  ;;  %v9137_v56 = vpop.f32.mrf.mxu1 }
 0x1b7   : > { %v1215_v34 = vunpack.c.l.b16 %v1137_v20  ;;  %1427 = vst [vmem:[#allocation3 + $0x360] sm:$0xf] %v1395_v12  ;;  %v2898_v39 = vrot.slane %v9124_v23, 5  ;;  %v2435_v53 = vrot.slane %v2434_v50, 4  ;;  %v2897_v1 = vrot.slane %v2895_v31, 4 }
 0x1b8   : > { %v1121_v44 = vsel %vm8721_vm5, 0, %v1064_v17  ;;  %1428 = vst [vmem:[#allocation3 + $0x384] sm:$0xf] %v1396_v13  ;;  %v2442_v40 = vshrl.u32 %v2288_v15, 16  ;;  %v7914_v61 = vld [vmem:[#allocation3 + $0x2dc] sm:$0xf]  ;;  %v5456_v11 = vpop.f32.mrf.mxu2 }
 0x1b9   : > { %v1213_v57 = vunpack.c.l.b16 %v1121_v44  ;;  %v1214_v47 = vunpack.c.h.b16 %v1121_v44  ;;  %v1263_v26 = vpack.c.b16 %v1215_v34, %v1215_v34  ;;  %1429 = vst [vmem:[#allocation3 + $0x3a8] sm:$0xf] %v1397_v52  ;;  %v2231_v0 = vld [vmem:[#allocation2 + $0x90] sm:$0xf]  ;;  %v7269_v4 = vld [vmem:[#allocation3 + $0x2fc] sm:$0xf0]  ;;  %v9140_v14 = vadd.f32 %v5456_v11, %v9093_v45 }
 0x1ba   : > { %v2290_v2 = vld [vmem:[#allocation2 + $0x50] sm:$0x1]  ;;  %1430 = vst [vmem:[#allocation3 + $0x3cc] sm:$0xf] %v1398_v25  ;;  %v2232_v59 = vld [vmem:[#allocation2 + $0x94] sm:$0xf]  ;;  %v2440_v48 = vsel %vm8698_vm2, %v2435_v53, %v2439_v37  ;;  %v7272_v20 = vor.u32 %v7914_v61, %v7269_v4  ;;  %v2896_v52 = vsel %vm8776_vm8, %v6869_v29, %v2895_v31  ;;  %v2899_v25 = vsel %vm8776_vm8, %v2897_v1, %v2898_v39 }
 0x1bb   : > { %v2444_v36 = vrot.slane %v2442_v40, 4  ;;  %v2445_v7 = vshll.u32 %v2288_v15, 16  ;;  %v1261_v8 = vpack.c.b16 %v1213_v57, %v1213_v57  ;;  %v1262_v49 = vpack.c.b16 %v1214_v47, %v1214_v47  ;;  %1360 = vst [vmem:[#allocation2 + $0xbc] sm:$0x1] %v1263_v26  ;;  %v7922_v35 = vld [vmem:[#allocation3 + $0x31c] sm:$0xf] }
 0x1bc   : > { %v2451_v9 = vshll.u32 %v2289_v18, 16  ;;  %v2455_v38 = vshrl.u32 %v2289_v18, 16  ;;  %2263 = vst [vmem:[#allocation3 + $0x324] sm:$0xf] %v2231_v0  ;;  %v2461_v33 = vshll.u32 %v2290_v2, 16  ;;  %v9154_v37 = vrot.slane %v3164_v63, 5 }
 0x1bd   : > { %v2447_v42 = vrot.slane %v2445_v7, 5  ;;  %v9142_v10 = vld [vmem:[#allocation2 + $0x4c] sm:$0xf]  ;;  %1358 = vst [vmem:[#allocation2 + $0xb4] sm:$0xf] %v1261_v8  ;;  %v9144_v50 = vpop.f32.mrf.mxu0  ;;  %v3170_v31 = vrot.slane %v3168_v46, 4 }
 0x1be   : > { %v7297_v22 = vld [vmem:[#allocation3 + $0x33c] sm:$0xf0]  ;;  %10452 = vst [vmem:[#allocation23_spill] sm:$0xff] %v9144_v50  ;;  %v6915_v23 = vld [vmem:[#allocation3 + $0x10] sm:$0xf]  ;;  %v2453_v12 = vrot.slane %v2451_v9, 5 }
 0x1bf   : > { %v2457_v13 = vrot.slane %v2455_v38, 4  ;;  %1359 = vst [vmem:[#allocation2 + $0xb8] sm:$0xf] %v1262_v49  ;;  %v7300_v15 = vor.u32 %v7922_v35, %v7297_v22  ;;  %v7331_v17 = vld [vmem:[#allocation3 + $0x360] sm:$0xf]  ;;  %v2448_v18 = vor.u32 %v2447_v42, %v2444_v36  ;;  %v2902_v26 = vrot.slane %v9142_v10, 5  ;;  %v9159_v29 = vpop.f32.mrf.mxu1 }
 0x1c0   : > { %v7829_v45 = vld [vmem:[#allocation3 + $0x30] sm:$0xf0]  ;;  %v7935_v34 = vld [vmem:[#allocation3 + $0x380] sm:$0xf0]  ;;  %2264 = vst [vmem:[#allocation3 + $0x348] sm:$0xf] %v2232_v59  ;;  %5671 = vmatmul.bf16.gmra.mxu0 %v7272_v20  ;;  %v5459_v59 = vpop.f32.mrf.mxu2 }
 0x1c1   : > { %v2458_v44 = vor.u32 %v2457_v13, %v2453_v12  ;;  %v2784_v40 = vld [vmem:[#allocation2 + $0x48] sm:$0xe]  ;;  %v3108_v57 = vld [vmem:[#allocation2 + $0x20] sm:$0x1]  ;;  %v7332_v53 = vor.u32 %v7935_v34, %v7331_v17  ;;  %2746 = vst [vmem:[#allocation3 + $0x154] sm:$0xf] %v2440_v48  ;;  %v6916_v61 = vor.u32 %v7829_v45, %v6915_v23  ;;  %v9164_v7 = vadd.f32 %v5459_v59, %v9102_v6 }
 0x1c2   : > { %v2449_v47 = vrot.slane %v2448_v18, 4  ;;  %3017 = vst [vmem:[#allocation3 + $0x134] sm:$0xf] %v2896_v52  ;;  %v2463_v39 = vrot.slane %v2461_v33, 5  ;;  %v2786_v1 = vld [vmem:[#allocation2 + $0x50] sm:$0x1]  ;;  %5498 = vmatmul.bf16.gmra.mxu2 %v7300_v15  ;;  %v3161_v6 = vor.u32 %v9115_v5, %v9111_v55  ;;  %v3171_v15 = vor.u32 %v3170_v31, %v9154_v37  ;;  %v739_v18 = vpop.f32.mrf.mxu3 }
 0x1c3   : > { %5414 = vmatmul.bf16.vlgmr.msrb.gmra.mxu3 %v7332_v53  ;;  %3018 = vst [vmem:[#allocation3 + $0x158] sm:$0xf] %v2899_v25  ;;  %v2459_v0 = vrot.slane %v2458_v44, 4  ;;  %v6870_v2 = vrot.slane %v2784_v40, 9  ;;  %v2291_v4 = vld [vmem:[#allocation2 + $0x54] sm:$0xf]  ;;  %5710 = vmatmul.bf16.vlgmr.msrb.gmra.mxu1 %v6916_v61  ;;  %v778_v40 = vmul.f32 %v9066_v16, %v739_v18 }
 0x1c4   : > { %v2454_v63 = vsel %vm8698_vm2, %v2449_v47, %v2453_v12  ;;  %v2904_v36 = vrot.slane %v2902_v26, 4  ;;  %v2292_v30 = vld [vmem:[#allocation2 + $0x58] sm:$0xf]  ;;  %v2466_v46 = vshrl.u32 %v2291_v4, 16  ;;  %v1399_v11 = vld [vmem:[#allocation2 + $0xa8] sm:$0xf] }
 0x1c5   : > { %2747 = vst [vmem:[#allocation3 + $0x178] sm:$0xf] %v2454_v63  ;;  %v1400_v8 = vld [vmem:[#allocation2 + $0xac] sm:$0xf]  ;;  %v2233_v49 = vld [vmem:[#allocation2 + $0x9c] sm:$0xf]  ;;  %v9166_v9 = vpop.f32.mrf.mxu0  ;;  %v2464_v33 = vsel %vm8698_vm2, %v2459_v0, %v2463_v39  ;;  %v2903_v48 = vsel %vm8776_vm8, %v6870_v2, %v2902_v26  ;;  %v814_v0 = vadd.f32 %v9087_v62, %v778_v40 }
 0x1c6   : > { %v3174_v35 = vshll.u32 %v3108_v57, 16  ;;  %10453 = vst [vmem:[#allocation24_spill] sm:$0xff] %v9166_v9  ;;  %v2234_v38 = vld [vmem:[#allocation2 + $0xa0] sm:$0xf]  ;;  %v2905_v42 = vrot.slane %v2786_v1, 5  ;;  %v2468_v22 = vrot.slane %v2466_v46, 4 }
 0x1c7   : > { %1431 = vst [vmem:[#allocation3 + $0x3f0] sm:$0xf] %v1399_v11  ;;  %v2293_v10 = vld [vmem:[#allocation2 + $0x5c] sm:$0x1]  ;;  %v2469_v23 = vshll.u32 %v2291_v4, 16  ;;  %v2475_v12 = vshll.u32 %v2292_v30, 16  ;;  %v9177_v52 = vpop.f32.mrf.mxu1 }
 0x1c8   : > { %1432 = vst [vmem:[#allocation3 + $0x414] sm:$0xf] %v1400_v8  ;;  %v2479_v13 = vshrl.u32 %v2292_v30, 16  ;;  %v2906_v17 = vsel %vm8776_vm8, %v2904_v36, %v2905_v42  ;;  %v3176_v20 = vrot.slane %v3174_v35, 5  ;;  %v2485_v5 = vshll.u32 %v2293_v10, 16  ;;  %v5461_v53 = vpop.f32.mrf.mxu2 }
 0x1c9   : > { %2265 = vst [vmem:[#allocation3 + $0x36c] sm:$0xf] %v2233_v49  ;;  %v2471_v45 = vrot.slane %v2469_v23, 5  ;;  %v2477_v34 = vrot.slane %v2475_v12, 5  ;;  %v7923_v25 = vld [vmem:[#allocation3 + $0x324] sm:$0xf]  ;;  %v9181_v61 = vadd.f32 %v5461_v53, %v9137_v56 }
 0x1ca   : > { %2266 = vst [vmem:[#allocation3 + $0x390] sm:$0xf] %v2234_v38  ;;  %v2481_v55 = vrot.slane %v2479_v13, 4  ;;  %v7305_v44 = vld [vmem:[#allocation3 + $0x344] sm:$0xf0]  ;;  %v3162_v31 = vrot.slane %v3161_v6, 4  ;;  %v741_v18 = vpop.f32.mrf.mxu3 }
 0x1cb   : > { %2748 = vst [vmem:[#allocation3 + $0x19c] sm:$0xf] %v2464_v33  ;;  %v2472_v57 = vor.u32 %v2471_v45, %v2468_v22  ;;  %v6917_v47 = vld [vmem:[#allocation3 + $0x34] sm:$0xf0]  ;;  %v3172_v39 = vrot.slane %v3171_v15, 4  ;;  %v2487_v49 = vrot.slane %v2485_v5, 5  ;;  %v7308_v42 = vor.u32 %v7923_v25, %v7305_v44 }
 0x1cc   : > { %3019 = vst [vmem:[#allocation3 + $0x17c] sm:$0xf] %v2903_v48  ;;  %v2482_v26 = vor.u32 %v2481_v55, %v2477_v34  ;;  %v3109_v1 = vld [vmem:[#allocation2 + $0x24] sm:$0xf]  ;;  %v7367_v63 = vld [vmem:[#allocation3 + $0x3a8] sm:$0xf]  ;;  %v3167_v35 = vsel %vm8698_vm2, %v3162_v31, %v9154_v37  ;;  %v779_v5 = vmul.f32 %v9066_v16, %v741_v18 }
 0x1cd   : > { %3020 = vst [vmem:[#allocation3 + $0x1a0] sm:$0xf] %v2906_v17  ;;  %v2473_v2 = vrot.slane %v2472_v57, 4  ;;  %v3110_v4 = vld [vmem:[#allocation2 + $0x28] sm:$0xf]  ;;  %v3179_v59 = vshrl.u32 %v3109_v1, 16  ;;  %v9184_v30 = vpop.f32.mrf.mxu0  ;;  %v3177_v10 = vsel %vm8698_vm2, %v3172_v39, %v3176_v20 }
 0x1ce   : > { %v7825_v36 = vld [vmem:[#allocation3 + $0x14] sm:$0xf]  ;;  %10454 = vst [vmem:[#allocation25_spill] sm:$0xff] %v9184_v30  ;;  %v7944_v46 = vld [vmem:[#allocation3 + $0x3c8] sm:$0xf0]  ;;  %v2483_v8 = vrot.slane %v2482_v26, 4 }
 0x1cf   : > { %v6951_v11 = vld [vmem:[#allocation3 + $0x58] sm:$0xf]  ;;  %v3182_v38 = vshll.u32 %v3109_v1, 16  ;;  %v7838_v56 = vld [vmem:[#allocation3 + $0x78] sm:$0xf0]  ;;  %v2478_v33 = vsel %vm8698_vm2, %v2473_v2, %v2477_v34  ;;  %v3181_v22 = vrot.slane %v3179_v59, 4  ;;  %v6920_v13 = vor.u32 %v7825_v36, %v6917_v47  ;;  %v9195_v45 = vpop.f32.mrf.mxu1 }
 0x1d0   : > { %3570 = vst [vmem:[#allocation3 + $0x1c] sm:$0xf] %v3167_v35  ;;  %v2488_v23 = vsel %vm8698_vm2, %v2483_v8, %v2487_v49  ;;  %v3111_v6 = vld [vmem:[#allocation2 + $0x2c] sm:$0x1]  ;;  %v3188_v12 = vshll.u32 %v3110_v4, 16  ;;  %v7368_v37 = vor.u32 %v7944_v46, %v7367_v63  ;;  %5676 = vmatmul.bf16.gmra.mxu0 %v7308_v42  ;;  %v846_v15 = vmax.f32 %v814_v0, 0.0 }
 0x1d1   : > { %2749 = vst [vmem:[#allocation3 + $0x1c0] sm:$0xf] %v2478_v33  ;;  %v3184_v48 = vrot.slane %v3182_v38, 5  ;;  %v3192_v17 = vshrl.u32 %v3110_v4, 16  ;;  %v6952_v55 = vor.u32 %v7838_v56, %v6951_v11  ;;  %v3198_v44 = vshll.u32 %v3111_v6, 16  ;;  %v5464_v57 = vpop.f32.mrf.mxu2 }
 0x1d2   : > { %2750 = vst [vmem:[#allocation3 + $0x1e4] sm:$0xf] %v2488_v23  ;;  %v3190_v34 = vrot.slane %v3188_v12, 5  ;;  %5799 = vmatmul.bf16.vlgmr.msrb.gmra.mxu2 %v6920_v13  ;;  %v3112_v40 = vld [vmem:[#allocation2 + $0x30] sm:$0xf]  ;;  %v9199_v31 = vadd.f32 %v5464_v57, %v9159_v29  ;;  %v878_v39 = vpack.c.bf16 %v846_v15, %v846_v15  ;;  %v815_v1 = vadd.f32 %v9087_v62, %v779_v5 }
 0x1d3   : > { %3571 = vst [vmem:[#allocation3 + $0x40] sm:$0xf] %v3177_v10  ;;  %v3185_v20 = vor.u32 %v3184_v48, %v3181_v22  ;;  %5419 = vmatmul.bf16.gmra.mxu3 %v7368_v37  ;;  %v3194_v25 = vrot.slane %v3192_v17, 4  ;;  %v3203_v47 = vshrl.u32 %v3112_v40, 16  ;;  %v1937_v26 = vld [vmem:[#allocation2 + $0xc] sm:$0xe]  ;;  %5715 = vmatmul.bf16.gmra.mxu1 %v6952_v55 }
 0x1d4   : > { %v1401_v63 = vld [vmem:[#allocation2 + $0xb4] sm:$0xf]  ;;  %v1402_v0 = vld [vmem:[#allocation2 + $0xb8] sm:$0xf]  ;;  %v2235_v2 = vld [vmem:[#allocation2 + $0xa8] sm:$0xf]  ;;  %v942_v42 = vunpack.c.l.b16 %v878_v39 }
 0x1d5   : > { %v3186_v53 = vrot.slane %v3185_v20, 4  ;;  %v3195_v4 = vor.u32 %v3194_v25, %v3190_v34  ;;  %v9202_v59 = vpop.f32.mrf.mxu0  ;;  %1433 = vst [vmem:[#allocation3 + $0x438] sm:$0xf] %v1401_v63  ;;  %v2236_v16 = vld [vmem:[#allocation2 + $0xac] sm:$0xf]  ;;  %v847_v11 = vmax.f32 %v815_v1, 0.0 }
 0x1d6   : > { %10455 = vst [vmem:[#allocation26_spill] sm:$0xff] %v9202_v59  ;;  %v3113_v36 = vld [vmem:[#allocation2 + $0x34] sm:$0xf]  ;;  %v1938_v46 = vld [vmem:[#allocation2 + $0x10] sm:$0xf]  ;;  %v3200_v49 = vrot.slane %v3198_v44, 5 }
 0x1d7   : > { %1434 = vst [vmem:[#allocation3 + $0x45c] sm:$0xf] %v1402_v0  ;;  %v3191_v29 = vsel %vm8698_vm2, %v3186_v53, %v3190_v34  ;;  %v3196_v8 = vrot.slane %v3195_v4, 4  ;;  %v1939_v35 = vld [vmem:[#allocation2 + $0x14] sm:$0x1]  ;;  %v3205_v62 = vrot.slane %v3203_v47, 4  ;;  %v879_v33 = vpack.c.bf16 %v847_v11, %v847_v11  ;;  %v9208_v6 = vpop.f32.mrf.mxu1 }
 0x1d8   : > { %2267 = vst [vmem:[#allocation3 + $0x3b4] sm:$0xf] %v2235_v2  ;;  %v3206_v38 = vshll.u32 %v3112_v40, 16  ;;  %v6850_v56 = vrot.slane %v1937_v26, 9  ;;  %v3114_v22 = vld [vmem:[#allocation2 + $0x38] sm:$0x1] }
 0x1d9   : > { %2268 = vst [vmem:[#allocation3 + $0x3d8] sm:$0xf] %v2236_v16  ;;  %v3201_v10 = vsel %vm8698_vm2, %v3196_v8, %v3200_v49  ;;  %v3212_v23 = vshll.u32 %v3113_v36, 16  ;;  %v7932_v48 = vld [vmem:[#allocation3 + $0x36c] sm:$0xf]  ;;  %v3216_v13 = vshrl.u32 %v3113_v36, 16  ;;  %v943_v15 = vunpack.c.l.b16 %v879_v33  ;;  %v5466_v20 = vpop.f32.mrf.mxu2 }
 0x1da   : > { %3572 = vst [vmem:[#allocation3 + $0x64] sm:$0xf] %v3191_v29  ;;  %v3208_v12 = vrot.slane %v3206_v38, 5  ;;  %v7341_v37 = vld [vmem:[#allocation3 + $0x38c] sm:$0xf0]  ;;  %v2042_v18 = vrot.slane %v1938_v46, 5  ;;  %v9211_v57 = vadd.f32 %v5466_v20, %v9177_v52 }
 0x1db   : > { %3573 = vst [vmem:[#allocation3 + $0x88] sm:$0xf] %v3201_v10  ;;  %v3214_v17 = vrot.slane %v3212_v23, 5  ;;  %v6953_v34 = vld [vmem:[#allocation3 + $0x7c] sm:$0xf0]  ;;  %v3218_v5 = vrot.slane %v3216_v13, 4  ;;  %v959_v47 = vpack.c.b16 %v943_v15, %v942_v42  ;;  %v7344_v29 = vor.u32 %v7932_v48, %v7341_v37 }
 0x1dc   : > { %v3209_v55 = vor.u32 %v3208_v12, %v3205_v62  ;;  %v3222_v25 = vshll.u32 %v3114_v22, 16  ;;  %v2045_v44 = vrot.slane %v1939_v35, 5  ;;  %v1940_v40 = vld [vmem:[#allocation2 + $0x18] sm:$0xe]  ;;  %v7403_v53 = vld [vmem:[#allocation3 + $0x3f0] sm:$0xf]  ;;  %v2043_v26 = vsel %vm8776_vm8, %v6850_v56, %v2042_v18 }
 0x1dd   : > { %v2044_v39 = vrot.slane %v2042_v18, 4  ;;  %v1941_v1 = vld [vmem:[#allocation2 + $0x1c] sm:$0xf]  ;;  %v7834_v0 = vld [vmem:[#allocation3 + $0x5c] sm:$0xf]  ;;  %v3219_v16 = vor.u32 %v3218_v5, %v3214_v17  ;;  %v6851_v36 = vrot.slane %v1940_v40, 9  ;;  %v9217_v46 = vpop.f32.mrf.mxu0 }
 0x1de   : > { %v9215_v63 = vld [vmem:[#allocation2 + $0x1c] sm:$0xf]  ;;  %v7953_v2 = vld [vmem:[#allocation3 + $0x410] sm:$0xf0]  ;;  %v3210_v4 = vrot.slane %v3209_v55, 4  ;;  %10456 = vst [vmem:[#allocation27_spill] sm:$0xff] %v9217_v46  ;;  %v6956_v33 = vor.u32 %v7834_v0, %v6953_v34 }
 0x1df   : > { %2179 = vst [vmem:[#allocation3 + $0x50] sm:$0xf] %v2043_v26  ;;  %v6987_v11 = vld [vmem:[#allocation3 + $0xa0] sm:$0xf]  ;;  %v7847_v52 = vld [vmem:[#allocation3 + $0xc0] sm:$0xf0]  ;;  %v2046_v35 = vsel %vm8776_vm8, %v2044_v39, %v2045_v44  ;;  %v7404_v10 = vor.u32 %v7953_v2, %v7403_v53  ;;  %v9223_v48 = vpop.f32.mrf.mxu1 }
 0x1e0   : > { %v1066_v8 = vshrl.u32 %v959_v47, 16  ;;  %v1069_v49 = vshll.u32 %v959_v47, 16  ;;  %v3215_v62 = vsel %vm8698_vm2, %v3210_v4, %v3214_v17  ;;  %v3220_v38 = vrot.slane %v3219_v16, 4  ;;  %2180 = vst [vmem:[#allocation3 + $0x74] sm:$0xf] %v2046_v35  ;;  %5681 = vmatmul.bf16.gmra.mxu0 %v7344_v29 }
 0x1e1   : > { %v3224_v56 = vrot.slane %v3222_v25, 5  ;;  %v2049_v42 = vrot.slane %v1941_v1, 5  ;;  %3574 = vst [vmem:[#allocation3 + $0xac] sm:$0xf] %v3215_v62  ;;  %v1943_v23 = vld [vmem:[#allocation2 + $0x24] sm:$0xe]  ;;  %v6988_v18 = vor.u32 %v7847_v52, %v6987_v11  ;;  %v5469_v25 = vpop.f32.mrf.mxu2 }
 0x1e2   : > { %v1068_v22 = vrot.slane %v1066_v8, 7  ;;  %v1471_v12 = vld [vmem:[#allocation2 + $0x90] sm:$0xf]  ;;  %v9229_v15 = vld [vmem:[#allocation2 + $0x28] sm:$0xf]  ;;  %v3700_v17 = vrot.slane %v9215_v63, 5  ;;  %5804 = vmatmul.bf16.gmra.mxu2 %v6956_v33  ;;  %v9240_v1 = vadd.f32 %v5469_v25, %v9195_v45 }
 0x1e3   : > { %v3225_v13 = vsel %vm8698_vm2, %v3220_v38, %v3224_v56  ;;  %v2050_v37 = vsel %vm8776_vm8, %v6851_v36, %v2049_v42  ;;  %5424 = vmatmul.bf16.gmra.mxu3 %v7404_v10  ;;  %v1942_v55 = vld [vmem:[#allocation2 + $0x20] sm:$0x1]  ;;  %v1473_v5 = vld [vmem:[#allocation2 + $0x98] sm:$0x1]  ;;  %v2051_v40 = vrot.slane %v2049_v42, 4  ;;  %v6852_v53 = vrot.slane %v1943_v23, 9  ;;  %5720 = vmatmul.bf16.gmra.mxu1 %v6988_v18 }
 0x1e4   : > { %v1071_v20 = vor.u32 %v1069_v49, %v1068_v22  ;;  %v1138_v34 = vsel %vm8721_vm5, %v1068_v22, 0  ;;  %3575 = vst [vmem:[#allocation3 + $0xd0] sm:$0xf] %v3225_v13  ;;  %v2056_v47 = vrot.slane %v9229_v15, 5  ;;  %v9235_v26 = vld [vmem:[#allocation2 + $0x18] sm:$0xe] }
 0x1e5   : > { %v1218_v44 = vunpack.c.l.b16 %v1138_v34  ;;  %2181 = vst [vmem:[#allocation3 + $0x98] sm:$0xf] %v2050_v37  ;;  %v9237_v39 = vld [vmem:[#allocation2 + $0x20] sm:$0x1]  ;;  %v1472_v2 = vld [vmem:[#allocation2 + $0x94] sm:$0xf]  ;;  %v9244_v22 = vpop.f32.mrf.mxu0 }
 0x1e6   : > { %v1122_v0 = vsel %vm8721_vm5, 0, %v1071_v20  ;;  %v1775_v4 = vshrl.u32 %v1471_v12, 16  ;;  %v1778_v16 = vshll.u32 %v1471_v12, 16  ;;  %v7990_v36 = vld [vmem:[#allocation9 + $0xb8] sm:$0xff]  ;;  %v1784_v8 = vshll.u32 %v1472_v2, 16  ;;  %10457 = vst [vmem:[#allocation28_spill] sm:$0xff] %v9244_v22 }
 0x1e7   : > { %v1216_v11 = vunpack.c.l.b16 %v1122_v0  ;;  %v1217_v52 = vunpack.c.h.b16 %v1122_v0  ;;  %v1266_v29 = vpack.c.b16 %v1218_v44, %v1218_v44  ;;  %v2237_v49 = vld [vmem:[#allocation2 + $0xb4] sm:$0xf]  ;;  %v2238_v35 = vld [vmem:[#allocation2 + $0xb8] sm:$0xf]  ;;  %v1788_v42 = vshrl.u32 %v1472_v2, 16  ;;  %5524 = vmatpush.bf16.msrb.mxu3 %v7990_v36  ;;  %v9250_v34 = vpop.f32.mrf.mxu1 }
 0x1e8   : > { %v8030_v62 = vld [vmem:[#allocation9 + $0x1f8] sm:$0xff]  ;;  %v1777_v38 = vrot.slane %v1775_v4, 4  ;;  %v1780_v56 = vrot.slane %v1778_v16, 5  ;;  %2269 = vst [vmem:[#allocation3 + $0x3fc] sm:$0xf] %v2237_v49  ;;  %v2052_v45 = vrot.slane %v1942_v55, 5  ;;  %v2057_v25 = vsel %vm8776_vm8, %v6852_v53, %v2056_v47 }
 0x1e9   : > { %v1264_v33 = vpack.c.b16 %v1216_v11, %v1216_v11  ;;  %v1265_v27 = vpack.c.b16 %v1217_v52, %v1217_v52  ;;  %1363 = vst [vmem:[#allocation2 + $0xc8] sm:$0x1] %v1266_v29  ;;  %v1786_v10 = vrot.slane %v1784_v8, 5  ;;  %5969 = vmatpush.bf16.msra.mxu0 %v8030_v62  ;;  %v1790_v12 = vrot.slane %v1788_v42, 4  ;;  %v1945_v15 = vld [vmem:[#allocation2 + $0x2c] sm:$0x1] }
 0x1ea   : > { %v1781_v23 = vor.u32 %v1780_v56, %v1777_v38  ;;  %v1794_v13 = vshll.u32 %v1473_v5, 16  ;;  %2270 = vst [vmem:[#allocation3 + $0x420] sm:$0xf] %v2238_v35  ;;  %v2053_v37 = vsel %vm8776_vm8, %v2051_v40, %v2052_v45  ;;  %v6881_v18 = vrot.slane %v9235_v26, 9  ;;  %v7941_v55 = vld [vmem:[#allocation3 + $0x3b4] sm:$0xf]  ;;  %v5471_v40 = vpop.f32.mrf.mxu2 }
 0x1eb   : > { %v3703_v20 = vrot.slane %v9237_v39, 5  ;;  %1361 = vst [vmem:[#allocation2 + $0xc0] sm:$0xf] %v1264_v33  ;;  %v7377_v44 = vld [vmem:[#allocation3 + $0x3d4] sm:$0xf0]  ;;  %v1791_v5 = vor.u32 %v1790_v12, %v1786_v10  ;;  %v3702_v2 = vrot.slane %v3700_v17, 4  ;;  %v9257_v36 = vadd.f32 %v5471_v40, %v9208_v6 }
 0x1ec   : > { %1362 = vst [vmem:[#allocation2 + $0xc4] sm:$0xf] %v1265_v27  ;;  %v1782_v0 = vrot.slane %v1781_v23, 4  ;;  %v6989_v4 = vld [vmem:[#allocation3 + $0xc4] sm:$0xf0]  ;;  %v2058_v26 = vrot.slane %v2056_v47, 4  ;;  %v7380_v38 = vor.u32 %v7941_v55, %v7377_v44  ;;  %v3701_v6 = vsel %vm8776_vm8, %v6881_v18, %v3700_v17 }
 0x1ed   : > { %v7439_v16 = vld [vmem:[#allocation3 + $0x438] sm:$0xf]  ;;  %2182 = vst [vmem:[#allocation3 + $0xbc] sm:$0xf] %v2053_v37  ;;  %v2059_v39 = vrot.slane %v1945_v15, 5  ;;  %v1792_v53 = vrot.slane %v1791_v5, 4  ;;  %v3704_v27 = vsel %vm8776_vm8, %v3702_v2, %v3703_v20  ;;  %v9275_v37 = vpop.f32.mrf.mxu0 }
 0x1ee   : > { %v1787_v11 = vsel %vm8698_vm2, %v1782_v0, %v1786_v10  ;;  %v1796_v52 = vrot.slane %v1794_v13, 5  ;;  %v8029_v29 = vld [vmem:[#allocation9 + $0x1f0] sm:$0xff]  ;;  %2183 = vst [vmem:[#allocation3 + $0xe0] sm:$0xf] %v2057_v25  ;;  %v7843_v49 = vld [vmem:[#allocation3 + $0xa4] sm:$0xf] }
 0x1ef   : > { %v7989_v8 = vld [vmem:[#allocation9 + $0xb0] sm:$0xff]  ;;  %v7962_v35 = vld [vmem:[#allocation3 + $0x458] sm:$0xf0]  ;;  %v7023_v62 = vld [vmem:[#allocation3 + $0xe8] sm:$0xf]  ;;  %v2060_v47 = vsel %vm8776_vm8, %v2058_v26, %v2059_v39  ;;  %5970 = vmatpush.bf16.msra.mxu0 %v8029_v29  ;;  %v6992_v12 = vor.u32 %v7843_v49, %v6989_v4  ;;  %v9271_v63 = vpop.f32.mrf.mxu1  ;;  %10458 = vst [vmem:[#allocation29_spill] sm:$0xff] %v9275_v37 }
 0x1f0   : > { %1926 = vst [vmem:[#allocation3 + $0x364] sm:$0xf] %v1787_v11  ;;  %v1946_v56 = vld [vmem:[#allocation2 + $0x30] sm:$0xe]  ;;  %v1797_v42 = vsel %vm8698_vm2, %v1792_v53, %v1796_v52  ;;  %5525 = vmatpush.bf16.msrb.mxu3 %v7989_v8  ;;  %v1947_v45 = vld [vmem:[#allocation2 + $0x34] sm:$0xf]  ;;  %v7440_v13 = vor.u32 %v7962_v35, %v7439_v16  ;;  %5686 = vmatmul.bf16.gmra.mxu0 %v7380_v38 }
 0x1f1   : > { %2184 = vst [vmem:[#allocation3 + $0x104] sm:$0xf] %v2060_v47  ;;  %v6853_v33 = vrot.slane %v1946_v56, 9  ;;  %v7856_v10 = vld [vmem:[#allocation3 + $0x108] sm:$0xf0]  ;;  %v2063_v23 = vrot.slane %v1947_v45, 5 }
 0x1f2   : > { %1927 = vst [vmem:[#allocation3 + $0x388] sm:$0xf] %v1797_v42  ;;  %5809 = vmatmul.bf16.gmra.mxu2 %v6992_v12  ;;  %v7024_v15 = vor.u32 %v7856_v10, %v7023_v62  ;;  %v8028_v18 = vld [vmem:[#allocation9 + $0x1e8] sm:$0xff]  ;;  %v5474_v20 = vpop.f32.mrf.mxu2  ;;  %v1948_v55 = vld [vmem:[#allocation2 + $0x38] sm:$0x1]  ;;  %v8026_v56 = vld [vmem:[#allocation9 + $0x1d8] sm:$0xff] }
 0x1f3   : > { %3842 = vst [vmem:[#allocation3 + $0x20] sm:$0xf] %v3701_v6  ;;  %v2064_v17 = vsel %vm8776_vm8, %v6853_v33, %v2063_v23  ;;  %5429 = vmatmul.bf16.gmra.mxu3 %v7440_v13  ;;  %v9278_v25 = vadd.f32 %v5474_v20, %v9223_v48  ;;  %5971 = vmatpush.bf16.msra.mxu0 %v8028_v18  ;;  %v8027_v44 = vld [vmem:[#allocation9 + $0x1e0] sm:$0xff]  ;;  %v2065_v5 = vrot.slane %v2063_v23, 4  ;;  %v1475_v2 = vld [vmem:[#allocation2 + $0xa0] sm:$0xf] }
 0x1f4   : > { %3843 = vst [vmem:[#allocation3 + $0x44] sm:$0xf] %v3704_v27  ;;  %5725 = vmatmul.bf16.gmra.mxu1 %v7024_v15  ;;  %v1474_v0 = vld [vmem:[#allocation2 + $0x9c] sm:$0xf]  ;;  %v1476_v40 = vld [vmem:[#allocation2 + $0xa4] sm:$0x1] }
 0x1f5   : > { %2185 = vst [vmem:[#allocation3 + $0x128] sm:$0xf] %v2064_v17  ;;  %v1799_v4 = vshrl.u32 %v1474_v0, 16  ;;  %v1802_v16 = vshll.u32 %v1474_v0, 16  ;;  %v1808_v26 = vshll.u32 %v1475_v2, 16  ;;  %v1812_v39 = vshrl.u32 %v1475_v2, 16 }
 0x1f6   : > { %v1818_v11 = vshll.u32 %v1476_v40, 16  ;;  %v7988_v53 = vld [vmem:[#allocation9 + $0xa8] sm:$0xff]  ;;  %v2066_v52 = vrot.slane %v1948_v55, 5  ;;  %v7950_v48 = vld [vmem:[#allocation3 + $0x3fc] sm:$0xf] }
 0x1f7   : > { %v1801_v29 = vrot.slane %v1799_v4, 4  ;;  %v1804_v8 = vrot.slane %v1802_v16, 5  ;;  %v2239_v49 = vld [vmem:[#allocation2 + $0xc0] sm:$0xf]  ;;  %v2240_v35 = vld [vmem:[#allocation2 + $0xc4] sm:$0xf]  ;;  %5972 = vmatpush.bf16.msra.mxu0 %v8027_v44  ;;  %5526 = vmatpush.bf16.msrb.mxu3 %v7988_v53  ;;  %v9282_v42 = vpop.f32.mrf.mxu1 }
 0x1f8   : > { %v7413_v62 = vld [vmem:[#allocation3 + $0x41c] sm:$0xf0]  ;;  %v1810_v38 = vrot.slane %v1808_v26, 5  ;;  %v1814_v47 = vrot.slane %v1812_v39, 4  ;;  %2271 = vst [vmem:[#allocation3 + $0x444] sm:$0xf] %v2239_v49  ;;  %v2067_v6 = vsel %vm8776_vm8, %v2065_v5, %v2066_v52  ;;  %v9287_v5 = vpop.f32.mrf.mxu0 }
 0x1f9   : > { %v1805_v45 = vor.u32 %v1804_v8, %v1801_v29  ;;  %2272 = vst [vmem:[#allocation3 + $0x468] sm:$0xf] %v2240_v35  ;;  %v2787_v33 = vld [vmem:[#allocation2 + $0x54] sm:$0xe]  ;;  %v2788_v27 = vld [vmem:[#allocation2 + $0x58] sm:$0xf] }
 0x1fa   : > { %v7025_v10 = vld [vmem:[#allocation3 + $0x10c] sm:$0xf0]  ;;  %v1815_v23 = vor.u32 %v1814_v47, %v1810_v38  ;;  %v1820_v12 = vrot.slane %v1818_v11, 5  ;;  %v2789_v13 = vld [vmem:[#allocation2 + $0x5c] sm:$0x1]  ;;  %v6871_v17 = vrot.slane %v2787_v33, 9  ;;  %v5476_v18 = vpop.f32.mrf.mxu2  ;;  %v7416_v11 = vor.u32 %v7950_v48, %v7413_v62 }
 0x1fb   : > { %v2909_v15 = vrot.slane %v2788_v27, 5  ;;  %v7931_v20 = vld [vmem:[#allocation3 + $0x364] sm:$0xf]  ;;  %v1806_v55 = vrot.slane %v1805_v45, 4  ;;  %v2912_v44 = vrot.slane %v2789_v13, 5  ;;  %v9285_v0 = vadd.f32 %v5476_v18, %v9250_v34  ;;  %10459 = vst [vmem:[#allocation30_spill] sm:$0xff] %v9287_v5  ;;  %5973 = vmatpush.bf16.msra.mxu0 %v8026_v56 }
 0x1fc   : > { %2186 = vst [vmem:[#allocation3 + $0x14c] sm:$0xf] %v2067_v6  ;;  %v7333_v2 = vld [vmem:[#allocation3 + $0x384] sm:$0xf0]  ;;  %v1816_v40 = vrot.slane %v1815_v23, 4  ;;  %v8025_v4 = vld [vmem:[#allocation9 + $0x1d0] sm:$0xff] }
 0x1fd   : > { %v7987_v16 = vld [vmem:[#allocation9 + $0xa0] sm:$0xff]  ;;  %v2910_v26 = vsel %vm8776_vm8, %v6871_v17, %v2909_v15  ;;  %v2911_v39 = vrot.slane %v2909_v15, 4  ;;  %v1811_v53 = vsel %vm8698_vm2, %v1806_v55, %v1810_v38  ;;  %v3116_v29 = vld [vmem:[#allocation2 + $0x40] sm:$0xf]  ;;  %v7852_v34 = vld [vmem:[#allocation3 + $0xec] sm:$0xf]  ;;  %v7336_v6 = vor.u32 %v7931_v20, %v7333_v2 }
 0x1fe   : > { %3021 = vst [vmem:[#allocation3 + $0x1c4] sm:$0xf] %v2910_v26  ;;  %v3115_v52 = vld [vmem:[#allocation2 + $0x3c] sm:$0xf]  ;;  %v1821_v8 = vsel %vm8698_vm2, %v1816_v40, %v1820_v12  ;;  %5527 = vmatpush.bf16.msrb.mxu3 %v7987_v16  ;;  %v7028_v56 = vor.u32 %v7852_v34, %v7025_v10  ;;  %v7059_v48 = vld [vmem:[#allocation3 + $0x130] sm:$0xf] }
 0x1ff   : > { %1928 = vst [vmem:[#allocation3 + $0x3ac] sm:$0xf] %v1811_v53  ;;  %v2913_v49 = vsel %vm8776_vm8, %v2911_v39, %v2912_v44  ;;  %v3227_v35 = vshrl.u32 %v3115_v52, 16  ;;  %v3230_v47 = vshll.u32 %v3115_v52, 16  ;;  %v7865_v62 = vld [vmem:[#allocation3 + $0x150] sm:$0xf0]  ;;  %v9297_v23 = vpop.f32.mrf.mxu1  ;;  %5974 = vmatpush.bf16.msra.mxu0 %v8025_v4 }
 0x200   : > { %1929 = vst [vmem:[#allocation3 + $0x3d0] sm:$0xf] %v1821_v8  ;;  %5691 = vmatmul.bf16.gmra.mxu0 %v7416_v11  ;;  %v3236_v33 = vshll.u32 %v3116_v29, 16  ;;  %v3240_v27 = vshrl.u32 %v3116_v29, 16  ;;  %v7060_v12 = vor.u32 %v7865_v62, %v7059_v48  ;;  %v8024_v13 = vld [vmem:[#allocation9 + $0x1c8] sm:$0xff]  ;;  %v8023_v16 = vld [vmem:[#allocation9 + $0x1c0] sm:$0xff]  ;;  %v9310_v52 = vpop.f32.mrf.mxu0 }
 0x201   : > { %3022 = vst [vmem:[#allocation3 + $0x1e8] sm:$0xf] %v2913_v49  ;;  %v3229_v38 = vrot.slane %v3227_v35, 4  ;;  %v3232_v45 = vrot.slane %v3230_v47, 5  ;;  %v9299_v10 = vld [vmem:[#allocation3 + $0x444] sm:$0xf] }
 0x202   : > { %5814 = vmatmul.bf16.gmra.mxu2 %v7028_v56  ;;  %v5479_v15 = vpop.f32.mrf.mxu2  ;;  %v9301_v18 = vld [vmem:[#allocation3 + $0x464] sm:$0xf0]  ;;  %v3117_v20 = vld [vmem:[#allocation2 + $0x44] sm:$0x1]  ;;  %v1477_v44 = vld [vmem:[#allocation2 + $0xa8] sm:$0xf] }
 0x203   : > { %5503 = vmatmul.bf16.vlgmr.msra.gmra.mxu3 %v7336_v6  ;;  %v3233_v17 = vor.u32 %v3232_v45, %v3229_v38  ;;  %v9304_v55 = vadd.f32 %v5479_v15, %v9271_v63  ;;  %v1478_v2 = vld [vmem:[#allocation2 + $0xac] sm:$0xf]  ;;  %v9306_v40 = vrot.slane %v3236_v33, 5  ;;  %v9308_v4 = vrot.slane %v3240_v27, 4  ;;  %5975 = vmatpush.bf16.msra.mxu0 %v8024_v13  ;;  %v1479_v26 = vld [vmem:[#allocation2 + $0xb0] sm:$0x1] }
 0x204   : > { %5730 = vmatmul.bf16.gmra.mxu1 %v7060_v12  ;;  %v1823_v39 = vshrl.u32 %v1477_v44, 16  ;;  %v1826_v11 = vshll.u32 %v1477_v44, 16  ;;  %10460 = vst [vmem:[#allocation31_spill] sm:$0xff] %v9310_v52  ;;  %v1832_v29 = vshll.u32 %v1478_v2, 16  ;;  %v1836_v34 = vshrl.u32 %v1478_v2, 16  ;;  %v7986_v63 = vld [vmem:[#allocation9 + $0x98] sm:$0xff] }
 0x205   : > { %v3234_v53 = vrot.slane %v3233_v17, 4  ;;  %v1842_v8 = vshll.u32 %v1479_v26, 16  ;;  %v7452_v49 = vor.u32 %v9299_v10, %v9301_v18  ;;  %v3246_v56 = vshll.u32 %v3117_v20, 16  ;;  %5528 = vmatpush.bf16.msrb.mxu3 %v7986_v63  ;;  %v2294_v38 = vld [vmem:[#allocation2 + $0x60] sm:$0xf]  ;;  %v7985_v52 = vld [vmem:[#allocation9 + $0x90] sm:$0xff] }
 0x206   : > { %v1825_v35 = vrot.slane %v1823_v39, 4  ;;  %v1828_v47 = vrot.slane %v1826_v11, 5  ;;  %v1834_v6 = vrot.slane %v1832_v29, 5  ;;  %v1838_v48 = vrot.slane %v1836_v34, 4  ;;  %v2295_v12 = vld [vmem:[#allocation2 + $0x64] sm:$0xf] }
 0x207   : > { %v1844_v62 = vrot.slane %v1842_v8, 5  ;;  %v3243_v45 = vor.u32 %v9308_v4, %v9306_v40  ;;  %v9316_v33 = vpop.f32.mrf.mxu1  ;;  %5976 = vmatpush.bf16.msra.mxu0 %v8023_v16  ;;  %v2296_v13 = vld [vmem:[#allocation2 + $0x68] sm:$0x1]  ;;  %v2490_v17 = vshrl.u32 %v2294_v38, 16  ;;  %v2493_v15 = vshll.u32 %v2294_v38, 16 }
 0x208   : > { %v1829_v27 = vor.u32 %v1828_v47, %v1825_v35  ;;  %v3239_v10 = vsel %vm8698_vm2, %v3234_v53, %v9306_v40  ;;  %v7061_v18 = vld [vmem:[#allocation3 + $0x154] sm:$0xf0]  ;;  %v1839_v20 = vor.u32 %v1838_v48, %v1834_v6  ;;  %v2499_v44 = vshll.u32 %v2295_v12, 16  ;;  %v2790_v39 = vld [vmem:[#allocation2 + $0x60] sm:$0xe] }
 0x209   : > { %v2503_v2 = vshrl.u32 %v2295_v12, 16  ;;  %v2509_v26 = vshll.u32 %v2296_v13, 16  ;;  %v7940_v4 = vld [vmem:[#allocation3 + $0x3ac] sm:$0xf]  ;;  %v2492_v34 = vrot.slane %v2490_v17, 4  ;;  %v2495_v16 = vrot.slane %v2493_v15, 5  ;;  %5529 = vmatpush.bf16.msrb.mxu3 %v7985_v52 }
 0x20a   : > { %v5481_v11 = vpop.f32.mrf.mxu2  ;;  %v1830_v29 = vrot.slane %v1829_v27, 4  ;;  %v2791_v8 = vld [vmem:[#allocation2 + $0x64] sm:$0xf]  ;;  %v6872_v63 = vrot.slane %v2790_v39, 9  ;;  %v7861_v47 = vld [vmem:[#allocation3 + $0x134] sm:$0xf] }
 0x20b   : > { %v9322_v35 = vadd.f32 %v5481_v11, %v9282_v42  ;;  %v1840_v38 = vrot.slane %v1839_v20, 4  ;;  %v2501_v40 = vrot.slane %v2499_v44, 5  ;;  %v2505_v53 = vrot.slane %v2503_v2, 4  ;;  %v2792_v48 = vld [vmem:[#allocation2 + $0x68] sm:$0x1] }
 0x20c   : > { %v7369_v5 = vld [vmem:[#allocation3 + $0x3cc] sm:$0xf0]  ;;  %v7095_v12 = vld [vmem:[#allocation3 + $0x178] sm:$0xf]  ;;  %v7874_v13 = vld [vmem:[#allocation3 + $0x198] sm:$0xf0]  ;;  %v1835_v37 = vsel %vm8698_vm2, %v1830_v29, %v1834_v6  ;;  %v2496_v27 = vor.u32 %v2495_v16, %v2492_v34  ;;  %v7064_v11 = vor.u32 %v7861_v47, %v7061_v18  ;;  %v9330_v34 = vpop.f32.mrf.mxu0 }
 0x20d   : > { %v2916_v17 = vrot.slane %v2791_v8, 5  ;;  %v3248_v15 = vrot.slane %v3246_v56, 5  ;;  %3576 = vst [vmem:[#allocation3 + $0xf4] sm:$0xf] %v3239_v10  ;;  %v1845_v42 = vsel %vm8698_vm2, %v1840_v38, %v1844_v62  ;;  %v2506_v20 = vor.u32 %v2505_v53, %v2501_v40  ;;  %v3118_v2 = vld [vmem:[#allocation2 + $0x48] sm:$0xf] }
 0x20e   : > { %1930 = vst [vmem:[#allocation3 + $0x3f4] sm:$0xf] %v1835_v37  ;;  %v2919_v39 = vrot.slane %v2792_v48, 5  ;;  %v3244_v44 = vrot.slane %v3243_v45, 4  ;;  %v2497_v22 = vrot.slane %v2496_v27, 4  ;;  %v7372_v56 = vor.u32 %v7940_v4, %v7369_v5 }
 0x20f   : > { %1931 = vst [vmem:[#allocation3 + $0x418] sm:$0xf] %v1845_v42  ;;  %v2917_v46 = vsel %vm8776_vm8, %v6872_v63, %v2916_v17  ;;  %v2918_v6 = vrot.slane %v2916_v17, 4  ;;  %v3119_v29 = vld [vmem:[#allocation2 + $0x4c] sm:$0xf]  ;;  %v2507_v10 = vrot.slane %v2506_v20, 4  ;;  %v9334_v52 = vpop.f32.mrf.mxu1  ;;  %v7096_v5 = vor.u32 %v7874_v13, %v7095_v12 }
 0x210   : > { %10461 = vst [vmem:[#allocation32_spill] sm:$0xff] %v9330_v34  ;;  %5696 = vmatmul.bf16.gmra.mxu0 %v7452_v49  ;;  %v2511_v62 = vrot.slane %v2509_v26, 5  ;;  %v3249_v37 = vsel %vm8698_vm2, %v3244_v44, %v3248_v15  ;;  %v2502_v45 = vsel %vm8698_vm2, %v2497_v22, %v2501_v40  ;;  %v3251_v16 = vshrl.u32 %v3118_v2, 16  ;;  %v9342_v4 = vld [vmem:[#allocation2 + $0x40] sm:$0xf] }
 0x211   : > { %3023 = vst [vmem:[#allocation3 + $0x20c] sm:$0xf] %v2917_v46  ;;  %v2920_v18 = vsel %vm8776_vm8, %v2918_v6, %v2919_v39  ;;  %v3254_v8 = vshll.u32 %v3118_v2, 16  ;;  %v3260_v49 = vshll.u32 %v3119_v29, 16  ;;  %v3264_v26 = vshrl.u32 %v3119_v29, 16 }
 0x212   : > { %3577 = vst [vmem:[#allocation3 + $0x118] sm:$0xf] %v3249_v37  ;;  %5819 = vmatmul.bf16.gmra.mxu2 %v7064_v11  ;;  %v2512_v46 = vsel %vm8698_vm2, %v2507_v10, %v2511_v62  ;;  %v5484_v63 = vpop.f32.mrf.mxu2  ;;  %v9344_v47 = vld [vmem:[#allocation3 + $0x17c] sm:$0xf]  ;;  %v9346_v22 = vld [vmem:[#allocation3 + $0x19c] sm:$0xf0] }
 0x213   : > { %5508 = vmatmul.bf16.gmra.mxu3 %v7372_v56  ;;  %2751 = vst [vmem:[#allocation3 + $0x208] sm:$0xf] %v2502_v45  ;;  %v9348_v38 = vld [vmem:[#allocation3 + $0x1c0] sm:$0xf]  ;;  %v9351_v40 = vadd.f32 %v5484_v63, %v9297_v23  ;;  %v9353_v53 = vld [vmem:[#allocation3 + $0x1e0] sm:$0xf0] }
 0x214   : > { %2752 = vst [vmem:[#allocation3 + $0x22c] sm:$0xf] %v2512_v46  ;;  %5735 = vmatmul.bf16.gmra.mxu1 %v7096_v5  ;;  %v9355_v48 = vld [vmem:[#allocation2 + $0x3c] sm:$0xe]  ;;  %v9357_v12 = vld [vmem:[#allocation3 + $0x1c] sm:$0xf]  ;;  %v9378_v11 = vpop.f32.mrf.mxu0 }
 0x215   : > { %3024 = vst [vmem:[#allocation3 + $0x230] sm:$0xf] %v2920_v18  ;;  %v6925_v13 = vld [vmem:[#allocation3 + $0x3c] sm:$0xf0]  ;;  %v9359_v27 = vld [vmem:[#allocation2 + $0x50] sm:$0x1] }
 0x216   : > { %v9361_v17 = vrot.slane %v3251_v16, 4  ;;  %v9363_v15 = vrot.slane %v3254_v8, 5  ;;  %v1480_v20 = vld [vmem:[#allocation2 + $0xb4] sm:$0xf]  ;;  %v1481_v39 = vld [vmem:[#allocation2 + $0xb8] sm:$0xf] }
 0x217   : > { %v9368_v44 = vrot.slane %v3260_v49, 5  ;;  %v9370_v2 = vrot.slane %v3264_v26, 4  ;;  %v1482_v6 = vld [vmem:[#allocation2 + $0xbc] sm:$0x1]  ;;  %v1847_v29 = vshrl.u32 %v1480_v20, 16  ;;  %v1850_v56 = vshll.u32 %v1480_v20, 16  ;;  %v9376_v5 = vpop.f32.mrf.mxu1 }
 0x218   : > { %v1856_v10 = vshll.u32 %v1481_v39, 16  ;;  %v7984_v62 = vld [vmem:[#allocation9 + $0x88] sm:$0xff]  ;;  %v1860_v37 = vshrl.u32 %v1481_v39, 16  ;;  %v1866_v45 = vshll.u32 %v1482_v6, 16  ;;  %v2297_v18 = vld [vmem:[#allocation2 + $0x6c] sm:$0xf]  ;;  %v6928_v20 = vor.u32 %v9357_v12, %v6925_v13 }
 0x219   : > { %v1849_v46 = vrot.slane %v1847_v29, 4  ;;  %v1852_v49 = vrot.slane %v1850_v56, 5  ;;  %5530 = vmatpush.bf16.msrb.mxu3 %v7984_v62  ;;  %v2514_v63 = vshrl.u32 %v2297_v18, 16  ;;  %10462 = vst [vmem:[#allocation33_spill] sm:$0xff] %v9378_v11  ;;  %v2298_v42 = vld [vmem:[#allocation2 + $0x70] sm:$0xf]  ;;  %v3257_v6 = vor.u32 %v9363_v15, %v9361_v17 }
 0x21a   : > { %v1858_v26 = vrot.slane %v1856_v10, 5  ;;  %v1862_v23 = vrot.slane %v1860_v37, 4  ;;  %v2299_v39 = vld [vmem:[#allocation2 + $0x74] sm:$0x1]  ;;  %v10463_v16 = vrot.slane %v9342_v4, 5  ;;  %v5486_v34 = vpop.f32.mrf.mxu2  ;;  %v2517_v62 = vshll.u32 %v2297_v18, 16 }
 0x21b   : > { %v7949_v29 = vld [vmem:[#allocation3 + $0x3f4] sm:$0xf]  ;;  %v1853_v56 = vor.u32 %v1852_v49, %v1849_v46  ;;  %v2516_v10 = vrot.slane %v2514_v63, 4  ;;  %v3267_v11 = vor.u32 %v9370_v2, %v9368_v44  ;;  %v9390_v12 = vadd.f32 %v5486_v34, %v9316_v33  ;;  %v7405_v13 = vld [vmem:[#allocation3 + $0x414] sm:$0xf0]  ;;  %v7983_v49 = vld [vmem:[#allocation9 + $0x80] sm:$0xff] }
 0x21c   : > { %v9385_v8 = vrot.slane %v10463_v16, 4  ;;  %v2793_v59 = vld [vmem:[#allocation2 + $0x6c] sm:$0xe]  ;;  %v1863_v37 = vor.u32 %v1862_v23, %v1858_v26  ;;  %v1868_v30 = vrot.slane %v1866_v45, 5  ;;  %v2523_v17 = vshll.u32 %v2298_v42, 16 }
 0x21d   : > { %v2794_v15 = vld [vmem:[#allocation2 + $0x70] sm:$0xf]  ;;  %v1854_v9 = vrot.slane %v1853_v56, 4  ;;  %v2519_v16 = vrot.slane %v2517_v62, 5  ;;  %v2527_v50 = vshrl.u32 %v2298_v42, 16  ;;  %v2533_v41 = vshll.u32 %v2299_v39, 16  ;;  %5531 = vmatpush.bf16.msrb.mxu3 %v7983_v49 }
 0x21e   : > { %v2795_v32 = vld [vmem:[#allocation2 + $0x74] sm:$0x1]  ;;  %v1864_v46 = vrot.slane %v1863_v37, 4  ;;  %v2525_v18 = vrot.slane %v2523_v17, 5  ;;  %v6873_v63 = vrot.slane %v2793_v59, 9  ;;  %v2923_v19 = vrot.slane %v2794_v15, 5 }
 0x21f   : > { %v7408_v24 = vor.u32 %v7949_v29, %v7405_v13  ;;  %v1859_v33 = vsel %vm8698_vm2, %v1854_v9, %v1858_v26  ;;  %v2520_v34 = vor.u32 %v2519_v16, %v2516_v10  ;;  %v2529_v2 = vrot.slane %v2527_v50, 4  ;;  %v3121_v23 = vld [vmem:[#allocation2 + $0x54] sm:$0xf]  ;;  %v3122_v59 = vld [vmem:[#allocation2 + $0x58] sm:$0xf]  ;;  %v9398_v62 = vpop.f32.mrf.mxu1 }
 0x220   : > { %5977 = vmatmul.bf16.vlgmr.msra.gmra.mxu0 %v6928_v20  ;;  %v1869_v45 = vsel %vm8698_vm2, %v1864_v46, %v1868_v30  ;;  %1932 = vst [vmem:[#allocation3 + $0x43c] sm:$0xf] %v1859_v33  ;;  %v2924_v42 = vsel %vm8776_vm8, %v6873_v63, %v2923_v19  ;;  %v2925_v39 = vrot.slane %v2923_v19, 4  ;;  %v2926_v56 = vrot.slane %v2795_v32, 5  ;;  %v1951_v49 = vld [vmem:[#allocation2 + $0x44] sm:$0x1] }
 0x221   : > { %1933 = vst [vmem:[#allocation3 + $0x460] sm:$0xf] %v1869_v45  ;;  %v2521_v29 = vrot.slane %v2520_v34, 4  ;;  %v2530_v9 = vor.u32 %v2529_v2, %v2525_v18  ;;  %v2535_v26 = vrot.slane %v2533_v41, 5  ;;  %v3258_v50 = vrot.slane %v3257_v6, 4 }
 0x222   : > { %v10464_v20 = vor.u32 %v9344_v47, %v9346_v22  ;;  %v2927_v30 = vsel %vm8776_vm8, %v2925_v39, %v2926_v56  ;;  %3025 = vst [vmem:[#allocation3 + $0x254] sm:$0xf] %v2924_v42  ;;  %v3268_v10 = vrot.slane %v3267_v11, 4  ;;  %v3275_v19 = vshrl.u32 %v3121_v23, 16  ;;  %v5489_v13 = vpop.f32.mrf.mxu2  ;;  %v9410_v22 = vpop.f32.mrf.mxu0  ;;  %v1935_v34 = vld [vmem:[#allocation2 + $0x4] sm:$0xf] }
 0x223   : > { %5513 = vmatmul.bf16.gmra.mxu3 %v7408_v24  ;;  %v3278_v32 = vshll.u32 %v3121_v23, 16  ;;  %v2526_v37 = vsel %vm8698_vm2, %v2521_v29, %v2525_v18  ;;  %v2531_v17 = vrot.slane %v2530_v9, 4  ;;  %3026 = vst [vmem:[#allocation3 + $0x278] sm:$0xf] %v2927_v30  ;;  %v3263_v41 = vsel %vm8698_vm2, %v3258_v50, %v9368_v44  ;;  %v3123_v18 = vld [vmem:[#allocation2 + $0x5c] sm:$0x1] }
 0x224   : > { %5824 = vmatmul.bf16.gmra.mxu2 %v10464_v20  ;;  %v3284_v47 = vshll.u32 %v3122_v59, 16  ;;  %10465 = vst [vmem:[#allocation34_spill] sm:$0xff] %v9410_v22  ;;  %v9413_v24 = vadd.f32 %v5489_v13, %v9334_v52  ;;  %v10466_v11 = vor.u32 %v9353_v53, %v9348_v38  ;;  %v10467_v6 = vshll.u32 %v9359_v27, 16  ;;  %v1934_v52 = vld [vmem:[#allocation2] sm:$0xe]  ;;  %v8022_v39 = vld [vmem:[#allocation9 + $0x1b8] sm:$0xff] }
 0x225   : > { %2753 = vst [vmem:[#allocation3 + $0x250] sm:$0xf] %v2526_v37  ;;  %v3277_v16 = vrot.slane %v3275_v19, 4  ;;  %v3280_v46 = vrot.slane %v3278_v32, 5  ;;  %v2536_v44 = vsel %vm8698_vm2, %v2531_v17, %v2535_v26  ;;  %v3288_v33 = vshrl.u32 %v3122_v59, 16  ;;  %5880 = vmatpush.bf16.msra.mxu3 %v8022_v39 }
 0x226   : > { %5740 = vmatmul.bf16.gmra.mxu1 %v10466_v11  ;;  %v3272_v15 = vrot.slane %v10467_v6, 5  ;;  %3578 = vst [vmem:[#allocation3 + $0x13c] sm:$0xf] %v3263_v41  ;;  %v3286_v63 = vrot.slane %v3284_v47, 5  ;;  %v1936_v2 = vld [vmem:[#allocation2 + $0x8] sm:$0x1] }
 0x227   : > { %v3281_v53 = vor.u32 %v3280_v46, %v3277_v16  ;;  %v1952_v23 = vld [vmem:[#allocation2 + $0x48] sm:$0xe]  ;;  %v6849_v27 = vrot.slane %v1934_v52, 9  ;;  %v2035_v45 = vrot.slane %v1935_v34, 5  ;;  %v2038_v42 = vrot.slane %v1936_v2, 5  ;;  %v9424_v20 = vpop.f32.mrf.mxu1 }
 0x228   : > { %v3273_v38 = vsel %vm8698_vm2, %v3268_v10, %v3272_v15  ;;  %v1953_v56 = vld [vmem:[#allocation2 + $0x4c] sm:$0xf]  ;;  %v7835_v29 = vld [vmem:[#allocation3 + $0x64] sm:$0xf]  ;;  %2754 = vst [vmem:[#allocation3 + $0x274] sm:$0xf] %v2536_v44 }
 0x229   : > { %v3282_v9 = vrot.slane %v3281_v53, 4  ;;  %v3290_v26 = vrot.slane %v3288_v33, 4  ;;  %v3294_v50 = vshll.u32 %v3123_v18, 16  ;;  %v6961_v59 = vld [vmem:[#allocation3 + $0x84] sm:$0xf0]  ;;  %v2036_v30 = vsel %vm8776_vm8, %v6849_v27, %v2035_v45 }
 0x22a   : > { %v2037_v19 = vrot.slane %v2035_v45, 4  ;;  %3579 = vst [vmem:[#allocation3 + $0x160] sm:$0xf] %v3273_v38  ;;  %v2073_v10 = vrot.slane %v1951_v49, 5  ;;  %v7133_v32 = vld [vmem:[#allocation3 + $0x1e4] sm:$0xf0]  ;;  %v5491_v6 = vpop.f32.mrf.mxu2  ;;  %v6964_v38 = vor.u32 %v7835_v29, %v6961_v59  ;;  %v9448_v45 = vpop.f32.mrf.mxu0 }
 0x22b   : > { %2177 = vst [vmem:[#allocation3 + $0x8] sm:$0xf] %v2036_v30  ;;  %v3287_v13 = vsel %vm8698_vm2, %v3282_v9, %v3286_v63  ;;  %v3291_v37 = vor.u32 %v3290_v26, %v3286_v63  ;;  %v10468_v17 = vrot.slane %v9342_v4, 5  ;;  %v10469_v41 = vrot.slane %v9355_v48, 9  ;;  %v9436_v11 = vld [vmem:[#allocation2 + $0x24] sm:$0xe] }
 0x22c   : > { %v7958_v15 = vld [vmem:[#allocation3 + $0x43c] sm:$0xf]  ;;  %v2039_v16 = vsel %vm8776_vm8, %v2037_v19, %v2038_v42  ;;  %3580 = vst [vmem:[#allocation3 + $0x184] sm:$0xf] %v3287_v13  ;;  %v2074_v46 = vsel %vm8776_vm8, %v9385_v8, %v2073_v10  ;;  %v6855_v49 = vrot.slane %v1952_v23, 9  ;;  %v2077_v44 = vrot.slane %v1953_v56, 5 }
 0x22d   : > { %v2071_v47 = vsel %vm8776_vm8, %v10469_v41, %v10468_v17  ;;  %v9444_v4 = vadd.f32 %v5491_v6, %v9376_v5  ;;  %v7879_v48 = vld [vmem:[#allocation3 + $0x1c4] sm:$0xf]  ;;  %v7441_v18 = vld [vmem:[#allocation3 + $0x45c] sm:$0xf0]  ;;  %2178 = vst [vmem:[#allocation3 + $0x2c] sm:$0xf] %v2039_v16 }
 0x22e   : > { %v3292_v63 = vrot.slane %v3291_v37, 4  ;;  %v3296_v33 = vrot.slane %v3294_v50, 5  ;;  %v1954_v52 = vld [vmem:[#allocation2 + $0x50] sm:$0x1]  ;;  %v9446_v34 = vld [vmem:[#allocation2 + $0x28] sm:$0xf]  ;;  %v7136_v39 = vor.u32 %v7879_v48, %v7133_v32  ;;  %v2078_v26 = vsel %vm8776_vm8, %v6855_v49, %v2077_v44 }
 0x22f   : > { %v7167_v2 = vld [vmem:[#allocation3 + $0x208] sm:$0xf]  ;;  %v3125_v27 = vld [vmem:[#allocation2 + $0x64] sm:$0xf]  ;;  %2187 = vst [vmem:[#allocation3 + $0x170] sm:$0xf] %v2071_v47  ;;  %v7444_v50 = vor.u32 %v7958_v15, %v7441_v18  ;;  %v9455_v13 = vpop.f32.mrf.mxu1 }
 0x230   : > { %v3124_v53 = vld [vmem:[#allocation2 + $0x60] sm:$0xf]  ;;  %10470 = vst [vmem:[#allocation35_spill] sm:$0xff] %v9448_v45  ;;  %v3297_v8 = vsel %vm8698_vm2, %v3292_v63, %v3296_v33  ;;  %v3308_v42 = vshll.u32 %v3125_v27, 16  ;;  %v7892_v56 = vld [vmem:[#allocation3 + $0x228] sm:$0xf0]  ;;  %5982 = vmatmul.bf16.gmra.mxu0 %v6964_v38 }
 0x231   : > { %v3299_v5 = vshrl.u32 %v3124_v53, 16  ;;  %v3302_v23 = vshll.u32 %v3124_v53, 16  ;;  %2188 = vst [vmem:[#allocation3 + $0x194] sm:$0xf] %v2074_v46  ;;  %v3312_v9 = vshrl.u32 %v3125_v27, 16  ;;  %v6882_v29 = vrot.slane %v9436_v11, 9 }
 0x232   : > { %3581 = vst [vmem:[#allocation3 + $0x1a8] sm:$0xf] %v3297_v8  ;;  %v3126_v59 = vld [vmem:[#allocation2 + $0x68] sm:$0x1]  ;;  %v3310_v10 = vrot.slane %v3308_v42, 5  ;;  %v2079_v17 = vrot.slane %v2077_v44, 4  ;;  %v7168_v47 = vor.u32 %v7892_v56, %v7167_v2 }
 0x233   : > { %v3301_v30 = vrot.slane %v3299_v5, 4  ;;  %v3304_v19 = vrot.slane %v3302_v23, 5  ;;  %v3314_v37 = vrot.slane %v3312_v9, 4  ;;  %v2080_v41 = vrot.slane %v1954_v52, 5  ;;  %5518 = vmatmul.bf16.gmra.mxu3 %v7444_v50  ;;  %v8038_v6 = vld [vmem:[#allocation9 + $0x238] sm:$0xff] }
 0x234   : > { %v3707_v32 = vrot.slane %v9446_v34, 5  ;;  %5829 = vmatmul.bf16.gmra.mxu2 %v7136_v39  ;;  %2189 = vst [vmem:[#allocation3 + $0x1b8] sm:$0xf] %v2078_v26  ;;  %v3318_v11 = vshll.u32 %v3126_v59, 16  ;;  %v1955_v48 = vld [vmem:[#allocation2 + $0x54] sm:$0xe]  ;;  %6058 = vmatpush.bf16.msra.mxu1 %v8038_v6  ;;  %v9467_v26 = vpop.f32.mrf.mxu0 }
 0x235   : > { %v3305_v16 = vor.u32 %v3304_v19, %v3301_v30  ;;  %v2081_v15 = vsel %vm8776_vm8, %v2079_v17, %v2080_v41  ;;  %v3315_v49 = vor.u32 %v3314_v37, %v3310_v10  ;;  %v5494_v18 = vpop.f32.mrf.mxu2  ;;  %v2300_v44 = vld [vmem:[#allocation2 + $0x78] sm:$0xf]  ;;  %v2301_v63 = vld [vmem:[#allocation2 + $0x7c] sm:$0xf]  ;;  %v2302_v2 = vld [vmem:[#allocation2 + $0x80] sm:$0x1] }
 0x236   : > { %5745 = vmatmul.bf16.gmra.mxu1 %v7168_v47  ;;  %2190 = vst [vmem:[#allocation3 + $0x1dc] sm:$0xf] %v2081_v15  ;;  %v1956_v33 = vld [vmem:[#allocation2 + $0x58] sm:$0xf]  ;;  %v3708_v52 = vsel %vm8776_vm8, %v6882_v29, %v3707_v32  ;;  %v9463_v34 = vadd.f32 %v5494_v18, %v9398_v62  ;;  %v2538_v38 = vshrl.u32 %v2300_v44, 16  ;;  %v2541_v53 = vshll.u32 %v2300_v44, 16 }
 0x237   : > { %v3306_v46 = vrot.slane %v3305_v16, 4  ;;  %v2547_v27 = vshll.u32 %v2301_v63, 16  ;;  %v7844_v8 = vld [vmem:[#allocation3 + $0xac] sm:$0xf]  ;;  %v6997_v5 = vld [vmem:[#allocation3 + $0xcc] sm:$0xf0]  ;;  %v9469_v30 = vpop.f32.mrf.mxu1 }
 0x238   : > { %v2551_v23 = vshrl.u32 %v2301_v63, 16  ;;  %v3320_v39 = vrot.slane %v3318_v11, 5  ;;  %v1957_v56 = vld [vmem:[#allocation2 + $0x5c] sm:$0x1]  ;;  %v6856_v9 = vrot.slane %v1955_v48, 9  ;;  %10471 = vst [vmem:[#allocation36_spill] sm:$0xff] %v9467_v26  ;;  %v7000_v44 = vor.u32 %v7844_v8, %v6997_v5 }
 0x239   : > { %v3311_v42 = vsel %vm8698_vm2, %v3306_v46, %v3310_v10  ;;  %v2540_v50 = vrot.slane %v2538_v38, 4  ;;  %v2543_v29 = vrot.slane %v2541_v53, 5  ;;  %v2549_v59 = vrot.slane %v2547_v27, 5  ;;  %v3607_v41 = vld [vmem:[#allocation2 + $0x2c] sm:$0x1] }
 0x23a   : > { %v3316_v62 = vrot.slane %v3315_v49, 4  ;;  %3582 = vst [vmem:[#allocation3 + $0x1cc] sm:$0xf] %v3311_v42  ;;  %v2553_v19 = vrot.slane %v2551_v23, 4  ;;  %v2557_v37 = vshll.u32 %v2302_v2, 16  ;;  %v2084_v17 = vrot.slane %v1956_v33, 5 }
 0x23b   : > { %v3709_v47 = vrot.slane %v3707_v32, 4  ;;  %v6907_v6 = vld [vmem:[#allocation3 + $0x8] sm:$0xf]  ;;  %v7828_v16 = vld [vmem:[#allocation3 + $0x28] sm:$0xf0]  ;;  %v2544_v10 = vor.u32 %v2543_v29, %v2540_v50  ;;  %v2087_v18 = vrot.slane %v1957_v56, 5 }
 0x23c   : > { %v3321_v11 = vsel %vm8698_vm2, %v3316_v62, %v3320_v39  ;;  %3844 = vst [vmem:[#allocation3 + $0x68] sm:$0xf] %v3708_v52  ;;  %v7169_v15 = vld [vmem:[#allocation3 + $0x22c] sm:$0xf0]  ;;  %v2554_v46 = vor.u32 %v2553_v19, %v2549_v59  ;;  %v2085_v49 = vsel %vm8776_vm8, %v6856_v9, %v2084_v17  ;;  %v2086_v48 = vrot.slane %v2084_v17, 4 }
 0x23d   : > { %3583 = vst [vmem:[#allocation3 + $0x1f0] sm:$0xf] %v3321_v11  ;;  %v2545_v63 = vrot.slane %v2544_v10, 4  ;;  %v1958_v33 = vld [vmem:[#allocation2 + $0x60] sm:$0xe]  ;;  %v3710_v32 = vrot.slane %v3607_v41, 5  ;;  %v5496_v2 = vpop.f32.mrf.mxu2  ;;  %v6908_v53 = vor.u32 %v7828_v16, %v6907_v6 }
 0x23e   : > { %2191 = vst [vmem:[#allocation3 + $0x200] sm:$0xf] %v2085_v49  ;;  %v7888_v38 = vld [vmem:[#allocation3 + $0x20c] sm:$0xf]  ;;  %v7203_v27 = vld [vmem:[#allocation3 + $0x250] sm:$0xf]  ;;  %v2088_v29 = vsel %vm8776_vm8, %v2086_v48, %v2087_v18  ;;  %v9478_v9 = vadd.f32 %v5496_v2, %v9424_v20  ;;  %v9490_v49 = vpop.f32.mrf.mxu0 }
 0x23f   : > { %v7901_v23 = vld [vmem:[#allocation3 + $0x270] sm:$0xf0]  ;;  %v2555_v42 = vrot.slane %v2554_v46, 4  ;;  %v2559_v52 = vrot.slane %v2557_v37, 5  ;;  %v2796_v39 = vld [vmem:[#allocation2 + $0x78] sm:$0xe]  ;;  %v2550_v8 = vsel %vm8698_vm2, %v2545_v63, %v2549_v59  ;;  %v3711_v41 = vsel %vm8776_vm8, %v3709_v47, %v3710_v32 }
 0x240   : > { %v2797_v50 = vld [vmem:[#allocation2 + $0x7c] sm:$0xf]  ;;  %v2798_v5 = vld [vmem:[#allocation2 + $0x80] sm:$0x1]  ;;  %v6874_v56 = vrot.slane %v2796_v39, 9  ;;  %v6857_v17 = vrot.slane %v1958_v33, 9  ;;  %v7172_v6 = vor.u32 %v7888_v38, %v7169_v15  ;;  %5987 = vmatmul.bf16.gmra.mxu0 %v7000_v44  ;;  %v9488_v11 = vpop.f32.mrf.mxu1  ;;  %v7204_v48 = vor.u32 %v7901_v23, %v7203_v27 }
 0x241   : > { %v2930_v62 = vrot.slane %v2797_v50, 5  ;;  %2192 = vst [vmem:[#allocation3 + $0x224] sm:$0xf] %v2088_v29  ;;  %v2560_v19 = vsel %vm8698_vm2, %v2555_v42, %v2559_v52  ;;  %v1960_v37 = vld [vmem:[#allocation2 + $0x68] sm:$0x1]  ;;  %v2933_v16 = vrot.slane %v2798_v5, 5 }
 0x242   : > { %2755 = vst [vmem:[#allocation3 + $0x298] sm:$0xf] %v2550_v8  ;;  %v1959_v10 = vld [vmem:[#allocation2 + $0x64] sm:$0xf]  ;;  %v2094_v44 = vrot.slane %v1960_v37, 5  ;;  %v8021_v39 = vld [vmem:[#allocation9 + $0x1b0] sm:$0xff] }
 0x243   : > { %2756 = vst [vmem:[#allocation3 + $0x2bc] sm:$0xf] %v2560_v19  ;;  %v2931_v20 = vsel %vm8776_vm8, %v6874_v56, %v2930_v62  ;;  %v2932_v59 = vrot.slane %v2930_v62, 4  ;;  %v2091_v46 = vrot.slane %v1959_v10, 5  ;;  %5532 = vmatmul.bf16.vlgmr.msrb.gmra.mxu3 %v6908_v53  ;;  %v2303_v32 = vld [vmem:[#allocation2 + $0x84] sm:$0xf] }
 0x244   : > { %10472 = vst [vmem:[#allocation37_spill] sm:$0xff] %v9488_v11  ;;  %5834 = vmatmul.bf16.gmra.mxu2 %v7172_v6  ;;  %v2304_v2 = vld [vmem:[#allocation2 + $0x88] sm:$0xf]  ;;  %v2305_v38 = vld [vmem:[#allocation2 + $0x8c] sm:$0x1]  ;;  %v2562_v23 = vshrl.u32 %v2303_v32, 16  ;;  %5881 = vmatpush.bf16.msra.mxu3 %v8021_v39 }
 0x245   : > { %3027 = vst [vmem:[#allocation3 + $0x29c] sm:$0xf] %v2931_v20  ;;  %v2934_v47 = vsel %vm8776_vm8, %v2932_v59, %v2933_v16  ;;  %v2092_v15 = vsel %vm8776_vm8, %v6857_v17, %v2091_v46  ;;  %v2093_v18 = vrot.slane %v2091_v46, 4  ;;  %v5499_v63 = vpop.f32.mrf.mxu2  ;;  %v2565_v42 = vshll.u32 %v2303_v32, 16  ;;  %v9503_v50 = vld [vmem:[#allocation3 + $0x70] sm:$0xf0] }
 0x246   : > { %10473 = vst [vmem:[#allocation38_spill] sm:$0xff] %v9490_v49  ;;  %5750 = vmatmul.bf16.gmra.mxu1 %v7204_v48  ;;  %v9496_v33 = vpop.f32.mrf.mxu3  ;;  %v9501_v27 = vadd.f32 %v5499_v63, %v9455_v13  ;;  %v2571_v52 = vshll.u32 %v2304_v2, 16  ;;  %v2575_v29 = vshrl.u32 %v2304_v2, 16  ;;  %v2581_v8 = vshll.u32 %v2305_v38, 16  ;;  %v9505_v5 = vld [vmem:[#allocation2 + $0x30] sm:$0xe]  ;;  %v9514_v2 = vpop.f32.mrf.mxu0 }
 0x247   : > { %3845 = vst [vmem:[#allocation3 + $0x8c] sm:$0xf] %v3711_v41  ;;  %v2095_v53 = vsel %vm8776_vm8, %v2093_v18, %v2094_v44  ;;  %v6943_v56 = vld [vmem:[#allocation3 + $0x50] sm:$0xf]  ;;  %v7853_v62 = vld [vmem:[#allocation3 + $0xf4] sm:$0xf] }
 0x248   : > { %3028 = vst [vmem:[#allocation3 + $0x2c0] sm:$0xf] %v2934_v47  ;;  %v2564_v19 = vrot.slane %v2562_v23, 4  ;;  %v2567_v37 = vrot.slane %v2565_v42, 5  ;;  %v2573_v17 = vrot.slane %v2571_v52, 5  ;;  %v9509_v13 = vpop.f32.mrf.mxu1  ;;  %v2577_v6 = vrot.slane %v2575_v29, 4 }
 0x249   : > { %2193 = vst [vmem:[#allocation3 + $0x248] sm:$0xf] %v2092_v15  ;;  %v9507_v41 = vld [vmem:[#allocation2 + $0x34] sm:$0xf]  ;;  %v7205_v59 = vld [vmem:[#allocation3 + $0x274] sm:$0xf0]  ;;  %v6944_v47 = vor.u32 %v9503_v50, %v6943_v56 }
 0x24a   : > { %10474 = vst [vmem:[#allocation39_spill] sm:$0xff] %v9509_v13  ;;  %v3129_v20 = vld [vmem:[#allocation2 + $0x74] sm:$0x1]  ;;  %v7033_v16 = vld [vmem:[#allocation3 + $0x114] sm:$0xf0]  ;;  %v2568_v10 = vor.u32 %v2567_v37, %v2564_v19  ;;  %v2583_v46 = vrot.slane %v2581_v8, 5  ;;  %v2578_v15 = vor.u32 %v2577_v6, %v2573_v17 }
 0x24b   : > { %2194 = vst [vmem:[#allocation3 + $0x26c] sm:$0xf] %v2095_v53  ;;  %v6883_v48 = vrot.slane %v9505_v5, 9  ;;  %v3127_v18 = vld [vmem:[#allocation2 + $0x6c] sm:$0xf]  ;;  %v3342_v63 = vshll.u32 %v3129_v20, 16  ;;  %v7036_v50 = vor.u32 %v7853_v62, %v7033_v16 }
 0x24c   : > { %v3128_v44 = vld [vmem:[#allocation2 + $0x70] sm:$0xf]  ;;  %v3714_v32 = vrot.slane %v9507_v41, 5  ;;  %10475 = vst [vmem:[#allocation40_spill] sm:$0xff] %v9514_v2  ;;  %v7897_v38 = vld [vmem:[#allocation3 + $0x254] sm:$0xf] }
 0x24d   : > { %v2569_v23 = vrot.slane %v2568_v10, 4  ;;  %v3323_v42 = vshrl.u32 %v3127_v18, 16  ;;  %v3326_v53 = vshll.u32 %v3127_v18, 16  ;;  %v3332_v52 = vshll.u32 %v3128_v44, 16  ;;  %v5501_v39 = vpop.f32.mrf.mxu2  ;;  %v7239_v5 = vld [vmem:[#allocation3 + $0x298] sm:$0xf] }
 0x24e   : > { %v7208_v29 = vor.u32 %v7897_v38, %v7205_v59  ;;  %v9516_v8 = vpop.f32.mrf.mxu3  ;;  %v7910_v19 = vld [vmem:[#allocation3 + $0x2b8] sm:$0xf0]  ;;  %v2579_v56 = vrot.slane %v2578_v15, 4  ;;  %v2799_v37 = vld [vmem:[#allocation2 + $0x84] sm:$0xe]  ;;  %v3336_v20 = vshrl.u32 %v3128_v44, 16  ;;  %v9519_v41 = vadd.f32 %v5501_v39, %v9469_v30 }
 0x24f   : > { %v2800_v6 = vld [vmem:[#allocation2 + $0x88] sm:$0xf]  ;;  %v2574_v10 = vsel %vm8698_vm2, %v2569_v23, %v2573_v17  ;;  %v2801_v2 = vld [vmem:[#allocation2 + $0x8c] sm:$0x1]  ;;  %v6875_v18 = vrot.slane %v2799_v37, 9  ;;  %v3325_v16 = vrot.slane %v3323_v42, 4 }
 0x250   : > { %v2937_v49 = vrot.slane %v2800_v6, 5  ;;  %v1961_v26 = vld [vmem:[#allocation2 + $0x6c] sm:$0xe]  ;;  %v1962_v59 = vld [vmem:[#allocation2 + $0x70] sm:$0xf]  ;;  %v2584_v38 = vsel %vm8698_vm2, %v2579_v56, %v2583_v46  ;;  %v2940_v62 = vrot.slane %v2801_v2, 5  ;;  %5992 = vmatmul.bf16.gmra.mxu0 %v7036_v50  ;;  %v9527_v23 = vpop.f32.mrf.mxu1  ;;  %v3715_v46 = vsel %vm8776_vm8, %v6883_v48, %v3714_v32 }
 0x251   : > { %2757 = vst [vmem:[#allocation3 + $0x2e0] sm:$0xf] %v2574_v10  ;;  %v3328_v15 = vrot.slane %v3326_v53, 5  ;;  %v3334_v39 = vrot.slane %v3332_v52, 5  ;;  %v3338_v17 = vrot.slane %v3336_v20, 4  ;;  %v7240_v2 = vor.u32 %v7910_v19, %v7239_v5  ;;  %v8037_v53 = vld [vmem:[#allocation9 + $0x230] sm:$0xff] }
 0x252   : > { %2758 = vst [vmem:[#allocation3 + $0x304] sm:$0xf] %v2584_v38  ;;  %v2938_v30 = vsel %vm8776_vm8, %v6875_v18, %v2937_v49  ;;  %v2939_v44 = vrot.slane %v2937_v49, 4  ;;  %v1963_v6 = vld [vmem:[#allocation2 + $0x74] sm:$0x1]  ;;  %v2098_v56 = vrot.slane %v1962_v59, 5  ;;  %6059 = vmatpush.bf16.msra.mxu1 %v8037_v53  ;;  %v9537_v59 = vpop.f32.mrf.mxu0 }
 0x253   : > { %10476 = vst [vmem:[#allocation41_spill] sm:$0xff] %v9527_v23  ;;  %v3329_v37 = vor.u32 %v3328_v15, %v3325_v16  ;;  %5537 = vmatmul.bf16.gmra.mxu3 %v6944_v47  ;;  %v3339_v50 = vor.u32 %v3338_v17, %v3334_v39  ;;  %v3610_v49 = vld [vmem:[#allocation2 + $0x38] sm:$0x1]  ;;  %v3344_v20 = vrot.slane %v3342_v63, 5  ;;  %v6858_v10 = vrot.slane %v1961_v26, 9 }
 0x254   : > { %3029 = vst [vmem:[#allocation3 + $0x2e4] sm:$0xf] %v2938_v30  ;;  %5839 = vmatmul.bf16.gmra.mxu2 %v7208_v29  ;;  %v2941_v42 = vsel %vm8776_vm8, %v2939_v44, %v2940_v62  ;;  %v2100_v38 = vrot.slane %v2098_v56, 4  ;;  %v2101_v16 = vrot.slane %v1963_v6, 5  ;;  %v3716_v15 = vrot.slane %v3714_v32, 4 }
 0x255   : > { %3030 = vst [vmem:[#allocation3 + $0x308] sm:$0xf] %v2941_v42  ;;  %v3330_v52 = vrot.slane %v3329_v37, 4  ;;  %v3340_v18 = vrot.slane %v3339_v50, 4  ;;  %v2306_v47 = vld [vmem:[#allocation2 + $0x90] sm:$0xf]  ;;  %v2099_v17 = vsel %vm8776_vm8, %v6858_v10, %v2098_v56 }
 0x256   : > { %5755 = vmatmul.bf16.gmra.mxu1 %v7240_v2  ;;  %3846 = vst [vmem:[#allocation3 + $0xb0] sm:$0xf] %v3715_v46  ;;  %v9533_v48 = vpop.f32.mrf.mxu3  ;;  %v2307_v29 = vld [vmem:[#allocation2 + $0x94] sm:$0xf]  ;;  %v2308_v5 = vld [vmem:[#allocation2 + $0x98] sm:$0x1] }
 0x257   : > { %v3335_v19 = vsel %vm8698_vm2, %v3330_v52, %v3334_v39  ;;  %10477 = vst [vmem:[#allocation42_spill] sm:$0xff] %v9537_v59  ;;  %v2586_v62 = vshrl.u32 %v2306_v47, 16  ;;  %v2589_v63 = vshll.u32 %v2306_v47, 16  ;;  %v2595_v26 = vshll.u32 %v2307_v29, 16  ;;  %v7846_v6 = vld [vmem:[#allocation3 + $0xb8] sm:$0xf0] }
 0x258   : > { %v2599_v30 = vshrl.u32 %v2307_v29, 16  ;;  %v2605_v44 = vshll.u32 %v2308_v5, 16  ;;  %v3345_v32 = vsel %vm8698_vm2, %v3340_v18, %v3344_v20  ;;  %3584 = vst [vmem:[#allocation3 + $0x214] sm:$0xf] %v3335_v19  ;;  %v3717_v37 = vrot.slane %v3610_v49, 5  ;;  %v9545_v53 = vpop.f32.mrf.mxu1 }
 0x259   : > { %v2588_v46 = vrot.slane %v2586_v62, 4  ;;  %v2591_v2 = vrot.slane %v2589_v63, 5  ;;  %v2597_v42 = vrot.slane %v2595_v26, 5  ;;  %v2102_v39 = vsel %vm8776_vm8, %v2100_v38, %v2101_v16  ;;  %10478 = vst [vmem:[#allocation43_spill] sm:$0xff] %v9545_v53  ;;  %v7862_v50 = vld [vmem:[#allocation3 + $0x13c] sm:$0xf] }
 0x25a   : > { %v7069_v52 = vld [vmem:[#allocation3 + $0x15c] sm:$0xf0]  ;;  %v2601_v47 = vrot.slane %v2599_v30, 4  ;;  %3585 = vst [vmem:[#allocation3 + $0x238] sm:$0xf] %v3345_v32  ;;  %v3718_v20 = vsel %vm8776_vm8, %v3716_v15, %v3717_v37  ;;  %v2607_v49 = vrot.slane %v2605_v44, 5 }
 0x25b   : > { %v7241_v18 = vld [vmem:[#allocation3 + $0x2bc] sm:$0xf0]  ;;  %v6979_v29 = vld [vmem:[#allocation3 + $0x98] sm:$0xf]  ;;  %v2592_v56 = vor.u32 %v2591_v2, %v2588_v46  ;;  %2195 = vst [vmem:[#allocation3 + $0x290] sm:$0xf] %v2099_v17  ;;  %v7072_v17 = vor.u32 %v7862_v50, %v7069_v52 }
 0x25c   : > { %v2602_v10 = vor.u32 %v2601_v47, %v2597_v42  ;;  %v3130_v5 = vld [vmem:[#allocation2 + $0x78] sm:$0xf]  ;;  %v3131_v19 = vld [vmem:[#allocation2 + $0x7c] sm:$0xf]  ;;  %2196 = vst [vmem:[#allocation3 + $0x2b4] sm:$0xf] %v2102_v39  ;;  %v6980_v32 = vor.u32 %v7846_v6, %v6979_v29 }
 0x25d   : > { %v7906_v62 = vld [vmem:[#allocation3 + $0x29c] sm:$0xf]  ;;  %v2593_v38 = vrot.slane %v2592_v56, 4  ;;  %v3347_v16 = vshrl.u32 %v3130_v5, 16  ;;  %v3350_v63 = vshll.u32 %v3130_v5, 16  ;;  %v3356_v26 = vshll.u32 %v3131_v19, 16 }
 0x25e   : > { %3847 = vst [vmem:[#allocation3 + $0xd4] sm:$0xf] %v3718_v20  ;;  %v9549_v30 = vpop.f32.mrf.mxu3  ;;  %v7275_v59 = vld [vmem:[#allocation3 + $0x2e0] sm:$0xf]  ;;  %v2603_v15 = vrot.slane %v2602_v10, 4  ;;  %v3360_v46 = vshrl.u32 %v3131_v19, 16  ;;  %v7244_v22 = vor.u32 %v7906_v62, %v7241_v18  ;;  %v9555_v10 = vpop.f32.mrf.mxu0 }
 0x25f   : > { %v2802_v37 = vld [vmem:[#allocation2 + $0x90] sm:$0xe]  ;;  %v2803_v45 = vld [vmem:[#allocation2 + $0x94] sm:$0xf]  ;;  %v7919_v44 = vld [vmem:[#allocation3 + $0x300] sm:$0xf0]  ;;  %v2598_v2 = vsel %vm8698_vm2, %v2593_v38, %v2597_v42 }
 0x260   : > { %v2804_v39 = vld [vmem:[#allocation2 + $0x98] sm:$0x1]  ;;  %v6876_v47 = vrot.slane %v2802_v37, 9  ;;  %v2944_v56 = vrot.slane %v2803_v45, 5  ;;  %v2608_v20 = vsel %vm8698_vm2, %v2603_v15, %v2607_v49  ;;  %2759 = vst [vmem:[#allocation3 + $0x328] sm:$0xf] %v2598_v2  ;;  %5997 = vmatmul.bf16.gmra.mxu0 %v7072_v17  ;;  %v9559_v38 = vpop.f32.mrf.mxu1  ;;  %v7276_v62 = vor.u32 %v7919_v44, %v7275_v59 }
 0x261   : > { %v3132_v5 = vld [vmem:[#allocation2 + $0x80] sm:$0x1]  ;;  %v3349_v6 = vrot.slane %v3347_v16, 4  ;;  %v3352_v29 = vrot.slane %v3350_v63, 5  ;;  %10479 = vst [vmem:[#allocation44_spill] sm:$0xff] %v9555_v10  ;;  %v2947_v42 = vrot.slane %v2804_v39, 5 }
 0x262   : > { %2760 = vst [vmem:[#allocation3 + $0x34c] sm:$0xf] %v2608_v20  ;;  %v2945_v50 = vsel %vm8776_vm8, %v6876_v47, %v2944_v56  ;;  %v2946_v52 = vrot.slane %v2944_v56, 4  ;;  %v3358_v19 = vrot.slane %v3356_v26, 5  ;;  %v3362_v18 = vrot.slane %v3360_v46, 4 }
 0x263   : > { %10480 = vst [vmem:[#allocation45_spill] sm:$0xff] %v9559_v38  ;;  %v3353_v45 = vor.u32 %v3352_v29, %v3349_v6  ;;  %v3611_v49 = vld [vmem:[#allocation2 + $0x3c] sm:$0xe]  ;;  %5542 = vmatmul.bf16.gmra.mxu3 %v6980_v32  ;;  %v3612_v63 = vld [vmem:[#allocation2 + $0x40] sm:$0xf]  ;;  %v3366_v17 = vshll.u32 %v3132_v5, 16 }
 0x264   : > { %3031 = vst [vmem:[#allocation3 + $0x32c] sm:$0xf] %v2945_v50  ;;  %5844 = vmatmul.bf16.gmra.mxu2 %v7244_v22  ;;  %v2948_v16 = vsel %vm8776_vm8, %v2946_v52, %v2947_v42  ;;  %v3363_v37 = vor.u32 %v3362_v18, %v3358_v19  ;;  %v6884_v2 = vrot.slane %v3611_v49, 9  ;;  %v3721_v26 = vrot.slane %v3612_v63, 5  ;;  %v2309_v47 = vld [vmem:[#allocation2 + $0x9c] sm:$0xf] }
 0x265   : > { %3032 = vst [vmem:[#allocation3 + $0x350] sm:$0xf] %v2948_v16  ;;  %v3354_v15 = vrot.slane %v3353_v45, 4  ;;  %v2310_v56 = vld [vmem:[#allocation2 + $0xa0] sm:$0xf]  ;;  %v2610_v44 = vshrl.u32 %v2309_v47, 16 }
 0x266   : > { %5760 = vmatmul.bf16.gmra.mxu1 %v7276_v62  ;;  %v9563_v39 = vpop.f32.mrf.mxu3  ;;  %v2311_v46 = vld [vmem:[#allocation2 + $0xa4] sm:$0x1]  ;;  %v9567_v59 = vld [vmem:[#allocation3 + $0x100] sm:$0xf0]  ;;  %v2613_v20 = vshll.u32 %v2309_v47, 16  ;;  %v2619_v6 = vshll.u32 %v2310_v56, 16  ;;  %v3722_v63 = vsel %vm8776_vm8, %v6884_v2, %v3721_v26 }
 0x267   : > { %v3359_v22 = vsel %vm8698_vm2, %v3354_v15, %v3358_v19  ;;  %v7871_v32 = vld [vmem:[#allocation3 + $0x184] sm:$0xf]  ;;  %v2623_v29 = vshrl.u32 %v2310_v56, 16  ;;  %v2629_v50 = vshll.u32 %v2311_v46, 16  ;;  %v8020_v5 = vld [vmem:[#allocation9 + $0x1a8] sm:$0xff]  ;;  %v3364_v52 = vrot.slane %v3363_v37, 4  ;;  %v9575_v37 = vpop.f32.mrf.mxu0 }
 0x268   : > { %v3368_v42 = vrot.slane %v3366_v17, 5  ;;  %v3613_v45 = vld [vmem:[#allocation2 + $0x44] sm:$0x1]  ;;  %v7105_v18 = vld [vmem:[#allocation3 + $0x1a4] sm:$0xf0]  ;;  %v2612_v49 = vrot.slane %v2610_v44, 4  ;;  %v9571_v19 = vpop.f32.mrf.mxu1  ;;  %5882 = vmatpush.bf16.msra.mxu3 %v8020_v5 }
 0x269   : > { %v2615_v62 = vrot.slane %v2613_v20, 5  ;;  %v2621_v16 = vrot.slane %v2619_v6, 5  ;;  %10481 = vst [vmem:[#allocation46_spill] sm:$0xff] %v9571_v19  ;;  %v7015_v15 = vld [vmem:[#allocation3 + $0xe0] sm:$0xf]  ;;  %v2625_v10 = vrot.slane %v2623_v29, 4  ;;  %v7108_v38 = vor.u32 %v7871_v32, %v7105_v18 }
 0x26a   : > { %v3369_v47 = vsel %vm8698_vm2, %v3364_v52, %v3368_v42  ;;  %3586 = vst [vmem:[#allocation3 + $0x25c] sm:$0xf] %v3359_v22  ;;  %v3723_v56 = vrot.slane %v3721_v26, 4  ;;  %v7915_v17 = vld [vmem:[#allocation3 + $0x2e4] sm:$0xf]  ;;  %v2631_v20 = vrot.slane %v2629_v50, 5  ;;  %v7016_v2 = vor.u32 %v9567_v59, %v7015_v15 }
 0x26b   : > { %10482 = vst [vmem:[#allocation47_spill] sm:$0xff] %v9575_v37  ;;  %v7277_v46 = vld [vmem:[#allocation3 + $0x304] sm:$0xf0]  ;;  %v2616_v44 = vor.u32 %v2615_v62, %v2612_v49  ;;  %v3724_v6 = vrot.slane %v3613_v45, 5  ;;  %v2626_v19 = vor.u32 %v2625_v10, %v2621_v16  ;;  %v3133_v53 = vld [vmem:[#allocation2 + $0x84] sm:$0xf] }
 0x26c   : > { %3587 = vst [vmem:[#allocation3 + $0x280] sm:$0xf] %v3369_v47  ;;  %v3134_v29 = vld [vmem:[#allocation2 + $0x88] sm:$0xf]  ;;  %v3135_v23 = vld [vmem:[#allocation2 + $0x8c] sm:$0x1]  ;;  %v7280_v42 = vor.u32 %v7915_v17, %v7277_v46 }
 0x26d   : > { %3848 = vst [vmem:[#allocation3 + $0xf8] sm:$0xf] %v3722_v63  ;;  %v2617_v5 = vrot.slane %v2616_v44, 4  ;;  %v3371_v52 = vshrl.u32 %v3133_v53, 16  ;;  %v3374_v22 = vshll.u32 %v3133_v53, 16  ;;  %v3380_v26 = vshll.u32 %v3134_v29, 16 }
 0x26e   : > { %v9578_v37 = vpop.f32.mrf.mxu3  ;;  %v7311_v13 = vld [vmem:[#allocation3 + $0x328] sm:$0xf]  ;;  %v7928_v49 = vld [vmem:[#allocation3 + $0x348] sm:$0xf0]  ;;  %v2627_v50 = vrot.slane %v2626_v19, 4  ;;  %v3384_v47 = vshrl.u32 %v3134_v29, 16  ;;  %v3725_v10 = vsel %vm8776_vm8, %v3723_v56, %v3724_v6 }
 0x26f   : > { %v2805_v62 = vld [vmem:[#allocation2 + $0x9c] sm:$0xe]  ;;  %v2806_v45 = vld [vmem:[#allocation2 + $0xa0] sm:$0xf]  ;;  %v2622_v59 = vsel %vm8698_vm2, %v2617_v5, %v2621_v16  ;;  %v2807_v32 = vld [vmem:[#allocation2 + $0xa4] sm:$0x1] }
 0x270   : > { %v6877_v18 = vrot.slane %v2805_v62, 9  ;;  %v2951_v63 = vrot.slane %v2806_v45, 5  ;;  %v3373_v53 = vrot.slane %v3371_v52, 4  ;;  %v3615_v15 = vld [vmem:[#allocation2 + $0x4c] sm:$0xf]  ;;  %v2632_v17 = vsel %vm8698_vm2, %v2627_v50, %v2631_v20  ;;  %6002 = vmatmul.bf16.gmra.mxu0 %v7108_v38 }
 0x271   : > { %2761 = vst [vmem:[#allocation3 + $0x370] sm:$0xf] %v2622_v59  ;;  %v2954_v46 = vrot.slane %v2807_v32, 5  ;;  %v3376_v19 = vrot.slane %v3374_v22, 5  ;;  %v3382_v44 = vrot.slane %v3380_v26, 5  ;;  %v3386_v29 = vrot.slane %v3384_v47, 4  ;;  %v9588_v5 = vpop.f32.mrf.mxu1  ;;  %v9592_v59 = vpop.f32.mrf.mxu0 }
 0x272   : > { %2762 = vst [vmem:[#allocation3 + $0x394] sm:$0xf] %v2632_v17  ;;  %v2952_v56 = vsel %vm8776_vm8, %v6877_v18, %v2951_v63  ;;  %v2953_v6 = vrot.slane %v2951_v63, 4  ;;  %v3390_v16 = vshll.u32 %v3135_v23, 16  ;;  %v3614_v62 = vld [vmem:[#allocation2 + $0x48] sm:$0xe]  ;;  %v7312_v20 = vor.u32 %v7928_v49, %v7311_v13 }
 0x273   : > { %10483 = vst [vmem:[#allocation48_spill] sm:$0xff] %v9588_v5  ;;  %v3377_v52 = vor.u32 %v3376_v19, %v3373_v53  ;;  %5547 = vmatmul.bf16.gmra.mxu3 %v7016_v2  ;;  %v8036_v26 = vld [vmem:[#allocation9 + $0x228] sm:$0xff]  ;;  %v3387_v38 = vor.u32 %v3386_v29, %v3382_v44  ;;  %v3728_v45 = vrot.slane %v3615_v15, 5  ;;  %v3616_v32 = vld [vmem:[#allocation2 + $0x50] sm:$0x1]  ;;  %v6885_v18 = vrot.slane %v3614_v62, 9 }
 0x274   : > { %3033 = vst [vmem:[#allocation3 + $0x374] sm:$0xf] %v2952_v56  ;;  %5849 = vmatmul.bf16.gmra.mxu2 %v7280_v42  ;;  %v2955_v22 = vsel %vm8776_vm8, %v2953_v6, %v2954_v46  ;;  %v3392_v47 = vrot.slane %v3390_v16, 5  ;;  %6060 = vmatpush.bf16.msra.mxu1 %v8036_v26  ;;  %v2312_v13 = vld [vmem:[#allocation2 + $0xa8] sm:$0xf]  ;;  %v3731_v6 = vrot.slane %v3616_v32, 5 }
 0x275   : > { %3849 = vst [vmem:[#allocation3 + $0x11c] sm:$0xf] %v3725_v10  ;;  %v3378_v50 = vrot.slane %v3377_v52, 4  ;;  %v3388_v23 = vrot.slane %v3387_v38, 4  ;;  %v2313_v2 = vld [vmem:[#allocation2 + $0xac] sm:$0xf] }
 0x276   : > { %3034 = vst [vmem:[#allocation3 + $0x398] sm:$0xf] %v2955_v22  ;;  %5765 = vmatmul.bf16.gmra.mxu1 %v7312_v20  ;;  %v9594_v63 = vpop.f32.mrf.mxu3  ;;  %v2314_v42 = vld [vmem:[#allocation2 + $0xb0] sm:$0x1]  ;;  %v2634_v10 = vshrl.u32 %v2312_v13, 16  ;;  %v2637_v53 = vshll.u32 %v2312_v13, 16  ;;  %v3729_v20 = vsel %vm8776_vm8, %v6885_v18, %v3728_v45 }
 0x277   : > { %10484 = vst [vmem:[#allocation49_spill] sm:$0xff] %v9592_v59  ;;  %v3383_v49 = vsel %vm8698_vm2, %v3378_v50, %v3382_v44  ;;  %v2643_v17 = vshll.u32 %v2313_v2, 16  ;;  %v2647_v15 = vshrl.u32 %v2313_v2, 16  ;;  %v2653_v46 = vshll.u32 %v2314_v42, 16  ;;  %v7864_v29 = vld [vmem:[#allocation3 + $0x148] sm:$0xf0] }
 0x278   : > { %v3393_v19 = vsel %vm8698_vm2, %v3388_v23, %v3392_v47  ;;  %3588 = vst [vmem:[#allocation3 + $0x2a4] sm:$0xf] %v3383_v49  ;;  %v3730_v56 = vrot.slane %v3728_v45, 4  ;;  %v2636_v16 = vrot.slane %v2634_v10, 4  ;;  %v2639_v52 = vrot.slane %v2637_v53, 5  ;;  %v9606_v45 = vpop.f32.mrf.mxu2 }
 0x279   : > { %v2645_v62 = vrot.slane %v2643_v17, 5  ;;  %v9602_v22 = vpop.f32.mrf.mxu1  ;;  %v7880_v44 = vld [vmem:[#allocation3 + $0x1cc] sm:$0xf]  ;;  %v2649_v26 = vrot.slane %v2647_v15, 4  ;;  %3589 = vst [vmem:[#allocation3 + $0x2c8] sm:$0xf] %v3393_v19  ;;  %v9610_v11 = vpop.f32.mrf.mxu0 }
 0x27a   : > { %10485 = vst [vmem:[#allocation50_spill] sm:$0xff] %v9602_v22  ;;  %v3732_v38 = vsel %vm8776_vm8, %v3730_v56, %v3731_v6  ;;  %v7313_v50 = vld [vmem:[#allocation3 + $0x34c] sm:$0xf0]  ;;  %v7051_v23 = vld [vmem:[#allocation3 + $0x128] sm:$0xf]  ;;  %v2640_v13 = vor.u32 %v2639_v52, %v2636_v16  ;;  %v2655_v32 = vrot.slane %v2653_v46, 5 }
 0x27b   : > { %v7141_v47 = vld [vmem:[#allocation3 + $0x1ec] sm:$0xf0]  ;;  %v7924_v2 = vld [vmem:[#allocation3 + $0x32c] sm:$0xf]  ;;  %v2650_v42 = vor.u32 %v2649_v26, %v2645_v62  ;;  %v3136_v49 = vld [vmem:[#allocation2 + $0x90] sm:$0xf]  ;;  %v7052_v56 = vor.u32 %v7864_v29, %v7051_v23 }
 0x27c   : > { %v3137_v10 = vld [vmem:[#allocation2 + $0x94] sm:$0xf]  ;;  %v3138_v53 = vld [vmem:[#allocation2 + $0x98] sm:$0x1]  ;;  %3850 = vst [vmem:[#allocation3 + $0x140] sm:$0xf] %v3729_v20  ;;  %v7144_v22 = vor.u32 %v7880_v44, %v7141_v47  ;;  %v7316_v20 = vor.u32 %v7924_v2, %v7313_v50 }
 0x27d   : > { %10486 = vst [vmem:[#allocation51_spill] sm:$0xff] %v9606_v45  ;;  %v2641_v18 = vrot.slane %v2640_v13, 4  ;;  %v3395_v17 = vshrl.u32 %v3136_v49, 16  ;;  %v3398_v15 = vshll.u32 %v3136_v49, 16  ;;  %v3404_v19 = vshll.u32 %v3137_v10, 16 }
 0x27e   : > { %3851 = vst [vmem:[#allocation3 + $0x164] sm:$0xf] %v3732_v38  ;;  %v9608_v59 = vpop.f32.mrf.mxu3  ;;  %v7347_v6 = vld [vmem:[#allocation3 + $0x370] sm:$0xf]  ;;  %v2651_v16 = vrot.slane %v2650_v42, 4  ;;  %v3408_v26 = vshrl.u32 %v3137_v10, 16 }
 0x27f   : > { %v2808_v46 = vld [vmem:[#allocation2 + $0xa8] sm:$0xe]  ;;  %v2809_v52 = vld [vmem:[#allocation2 + $0xac] sm:$0xf]  ;;  %v3618_v5 = vld [vmem:[#allocation2 + $0x58] sm:$0xf]  ;;  %v2646_v13 = vsel %vm8698_vm2, %v2641_v18, %v2645_v62 }
 0x280   : > { %10487 = vst [vmem:[#allocation52_spill] sm:$0xff] %v9610_v11  ;;  %v7937_v51 = vld [vmem:[#allocation3 + $0x390] sm:$0xf0]  ;;  %v2810_v49 = vld [vmem:[#allocation2 + $0xb0] sm:$0x1]  ;;  %v6878_v45 = vrot.slane %v2808_v46, 9  ;;  %v2656_v29 = vsel %vm8698_vm2, %v2651_v16, %v2655_v32  ;;  %6007 = vmatmul.bf16.gmra.mxu0 %v7144_v22 }
 0x281   : > { %v2958_v38 = vrot.slane %v2809_v52, 5  ;;  %2763 = vst [vmem:[#allocation3 + $0x3b8] sm:$0xf] %v2646_v13  ;;  %v2961_v44 = vrot.slane %v2810_v49, 5  ;;  %v3397_v23 = vrot.slane %v3395_v17, 4  ;;  %v3400_v47 = vrot.slane %v3398_v15, 5  ;;  %v9618_v52 = vpop.f32.mrf.mxu1 }
 0x282   : > { %v3617_v42 = vld [vmem:[#allocation2 + $0x54] sm:$0xe]  ;;  %2764 = vst [vmem:[#allocation3 + $0x3dc] sm:$0xf] %v2656_v29  ;;  %v3406_v10 = vrot.slane %v3404_v19, 5  ;;  %v3414_v11 = vshll.u32 %v3138_v53, 16  ;;  %v7348_v32 = vor.u32 %v7937_v51, %v7347_v6 }
 0x283   : > { %v2959_v50 = vsel %vm8776_vm8, %v6878_v45, %v2958_v38  ;;  %v2960_v2 = vrot.slane %v2958_v38, 4  ;;  %v3401_v62 = vor.u32 %v3400_v47, %v3397_v23  ;;  %v3410_v18 = vrot.slane %v3408_v26, 4  ;;  %v3619_v46 = vld [vmem:[#allocation2 + $0x5c] sm:$0x1]  ;;  %10488 = vst [vmem:[#allocation53_spill] sm:$0xff] %v9618_v52  ;;  %5552 = vmatmul.bf16.gmra.mxu3 %v7052_v56  ;;  %v9624_v56 = vpop.f32.mrf.mxu2 }
 0x284   : > { %3035 = vst [vmem:[#allocation3 + $0x3bc] sm:$0xf] %v2959_v50  ;;  %5854 = vmatmul.bf16.gmra.mxu2 %v7316_v20  ;;  %v3735_v22 = vrot.slane %v3618_v5, 5  ;;  %v3416_v45 = vrot.slane %v3414_v11, 5  ;;  %v6886_v19 = vrot.slane %v3617_v42, 9  ;;  %v3738_v13 = vrot.slane %v3619_v46, 5 }
 0x285   : > { %v2962_v17 = vsel %vm8776_vm8, %v2960_v2, %v2961_v44  ;;  %v3402_v15 = vrot.slane %v3401_v62, 4  ;;  %v3411_v16 = vor.u32 %v3410_v18, %v3406_v10  ;;  %v3620_v49 = vld [vmem:[#allocation2 + $0x60] sm:$0xe]  ;;  %v2315_v38 = vld [vmem:[#allocation2 + $0xb4] sm:$0xf]  ;;  %v8019_v11 = vld [vmem:[#allocation9 + $0x1a0] sm:$0xff]  ;;  %v9629_v18 = vpop.f32.mrf.mxu0 }
 0x286   : > { %3036 = vst [vmem:[#allocation3 + $0x3e0] sm:$0xf] %v2962_v17  ;;  %5770 = vmatmul.bf16.gmra.mxu1 %v7348_v32  ;;  %v3737_v53 = vrot.slane %v3735_v22, 4  ;;  %v5504_v26 = vpop.f32.mrf.mxu3  ;;  %v2316_v20 = vld [vmem:[#allocation2 + $0xb8] sm:$0xf]  ;;  %v2658_v6 = vshrl.u32 %v2315_v38, 16  ;;  %5883 = vmatpush.bf16.msra.mxu3 %v8019_v11 }
 0x287   : > { %v2317_v29 = vld [vmem:[#allocation2 + $0xbc] sm:$0x1]  ;;  %v3407_v51 = vsel %vm8698_vm2, %v3402_v15, %v3406_v10  ;;  %v9627_v5 = vadd.f32 %v5504_v26, %v9496_v33  ;;  %v2661_v44 = vshll.u32 %v2315_v38, 16  ;;  %v2667_v23 = vshll.u32 %v2316_v20, 16  ;;  %v3621_v47 = vld [vmem:[#allocation2 + $0x64] sm:$0xf] }
 0x288   : > { %v2671_v42 = vshrl.u32 %v2316_v20, 16  ;;  %v2677_v50 = vshll.u32 %v2317_v29, 16  ;;  %v3412_v2 = vrot.slane %v3411_v16, 4  ;;  %v6887_v62 = vrot.slane %v3620_v49, 9  ;;  %10489 = vst [vmem:[#allocation54_spill] sm:$0xff] %v9629_v18 }
 0x289   : > { %v2660_v46 = vrot.slane %v2658_v6, 4  ;;  %v2663_v32 = vrot.slane %v2661_v44, 5  ;;  %v2669_v17 = vrot.slane %v2667_v23, 5  ;;  %v3736_v10 = vsel %vm8776_vm8, %v6886_v19, %v3735_v22  ;;  %v7889_v33 = vld [vmem:[#allocation3 + $0x214] sm:$0xf] }
 0x28a   : > { %v2673_v15 = vrot.slane %v2671_v42, 4  ;;  %v3417_v26 = vsel %vm8698_vm2, %v3412_v2, %v3416_v45  ;;  %3590 = vst [vmem:[#allocation3 + $0x2ec] sm:$0xf] %v3407_v51  ;;  %v3739_v38 = vsel %vm8776_vm8, %v3737_v53, %v3738_v13  ;;  %v3742_v16 = vrot.slane %v3621_v47, 5  ;;  %v7177_v49 = vld [vmem:[#allocation3 + $0x234] sm:$0xf0]  ;;  %v9639_v42 = vpop.f32.mrf.mxu1 }
 0x28b   : > { %v2664_v20 = vor.u32 %v2663_v32, %v2660_v46  ;;  %3591 = vst [vmem:[#allocation3 + $0x310] sm:$0xf] %v3417_v26  ;;  %v3622_v29 = vld [vmem:[#allocation2 + $0x68] sm:$0x1]  ;;  %v7933_v6 = vld [vmem:[#allocation3 + $0x374] sm:$0xf]  ;;  %v7180_v2 = vor.u32 %v7889_v33, %v7177_v49 }
 0x28c   : > { %v7873_v44 = vld [vmem:[#allocation3 + $0x190] sm:$0xf0]  ;;  %v2674_v23 = vor.u32 %v2673_v15, %v2669_v17  ;;  %v2679_v11 = vrot.slane %v2677_v50, 5  ;;  %3852 = vst [vmem:[#allocation3 + $0x188] sm:$0xf] %v3736_v10  ;;  %v3743_v22 = vsel %vm8776_vm8, %v6887_v62, %v3742_v16  ;;  %v3744_v19 = vrot.slane %v3742_v16, 4 }
 0x28d   : > { %10490 = vst [vmem:[#allocation55_spill] sm:$0xff] %v9639_v42  ;;  %v7349_v45 = vld [vmem:[#allocation3 + $0x394] sm:$0xf0]  ;;  %v2665_v51 = vrot.slane %v2664_v20, 4  ;;  %v7087_v13 = vld [vmem:[#allocation3 + $0x170] sm:$0xf] }
 0x28e   : > { %3853 = vst [vmem:[#allocation3 + $0x1ac] sm:$0xf] %v3739_v38  ;;  %v5506_v53 = vpop.f32.mrf.mxu3  ;;  %v7383_v47 = vld [vmem:[#allocation3 + $0x3b8] sm:$0xf]  ;;  %v2675_v46 = vrot.slane %v2674_v23, 4  ;;  %v3745_v18 = vrot.slane %v3622_v29, 5  ;;  %v9650_v29 = vpop.f32.mrf.mxu2  ;;  %v7088_v23 = vor.u32 %v7873_v44, %v7087_v13 }
 0x28f   : > { %v2811_v32 = vld [vmem:[#allocation2 + $0xb4] sm:$0xe]  ;;  %v2812_v26 = vld [vmem:[#allocation2 + $0xb8] sm:$0xf]  ;;  %v9642_v50 = vadd.f32 %v5506_v53, %v9516_v8  ;;  %v2670_v62 = vsel %vm8698_vm2, %v2665_v51, %v2669_v17  ;;  %v2813_v10 = vld [vmem:[#allocation2 + $0xbc] sm:$0x1]  ;;  %v7352_v8 = vor.u32 %v7933_v6, %v7349_v45 }
 0x290   : > { %v6879_v15 = vrot.slane %v2811_v32, 9  ;;  %v2965_v16 = vrot.slane %v2812_v26, 5  ;;  %3854 = vst [vmem:[#allocation3 + $0x1d0] sm:$0xf] %v3743_v22  ;;  %v7946_v20 = vld [vmem:[#allocation3 + $0x3d8] sm:$0xf0]  ;;  %v2680_v38 = vsel %vm8698_vm2, %v2675_v46, %v2679_v11  ;;  %v3746_v49 = vsel %vm8776_vm8, %v3744_v19, %v3745_v18  ;;  %6012 = vmatmul.bf16.gmra.mxu0 %v7180_v2  ;;  %v9654_v11 = vpop.f32.mrf.mxu0 }
 0x291   : > { %2765 = vst [vmem:[#allocation3 + $0x400] sm:$0xf] %v2670_v62  ;;  %v2968_v33 = vrot.slane %v2813_v10, 5  ;;  %v3042_v22 = vld [vmem:[#allocation2 + $0x18] sm:$0xf]  ;;  %v7384_v46 = vor.u32 %v7946_v20, %v7383_v47 }
 0x292   : > { %10491 = vst [vmem:[#allocation56_spill] sm:$0xff] %v9650_v29  ;;  %v2966_v17 = vsel %vm8776_vm8, %v6879_v15, %v2965_v16  ;;  %v2967_v51 = vrot.slane %v2965_v16, 4  ;;  %v3623_v53 = vld [vmem:[#allocation2 + $0x6c] sm:$0xe]  ;;  %v3624_v32 = vld [vmem:[#allocation2 + $0x70] sm:$0xf]  ;;  %v9658_v15 = vpop.f32.mrf.mxu1 }
 0x293   : > { %2766 = vst [vmem:[#allocation3 + $0x424] sm:$0xf] %v2680_v38  ;;  %5557 = vmatmul.bf16.gmra.mxu3 %v7088_v23  ;;  %v8035_v6 = vld [vmem:[#allocation9 + $0x220] sm:$0xff]  ;;  %v3749_v44 = vrot.slane %v3624_v32, 5  ;;  %v3625_v19 = vld [vmem:[#allocation2 + $0x74] sm:$0x1] }
 0x294   : > { %3037 = vst [vmem:[#allocation3 + $0x404] sm:$0xf] %v2966_v17  ;;  %5859 = vmatmul.bf16.gmra.mxu2 %v7352_v8  ;;  %v2969_v18 = vsel %vm8776_vm8, %v2967_v51, %v2968_v33  ;;  %v6888_v45 = vrot.slane %v3623_v53, 9  ;;  %6061 = vmatpush.bf16.msra.mxu1 %v8035_v6  ;;  %v2318_v26 = vld [vmem:[#allocation2 + $0xc0] sm:$0xf]  ;;  %v8034_v33 = vld [vmem:[#allocation9 + $0x218] sm:$0xff] }
 0x295   : > { %10492 = vst [vmem:[#allocation57_spill] sm:$0xff] %v9654_v11  ;;  %v3751_v13 = vrot.slane %v3749_v44, 4  ;;  %v2319_v62 = vld [vmem:[#allocation2 + $0xc4] sm:$0xf]  ;;  %v2320_v10 = vld [vmem:[#allocation2 + $0xc8] sm:$0x1] }
 0x296   : > { %3855 = vst [vmem:[#allocation3 + $0x1f4] sm:$0xf] %v3746_v49  ;;  %5775 = vmatmul.bf16.gmra.mxu1 %v7384_v46  ;;  %v5509_v2 = vpop.f32.mrf.mxu3  ;;  %v2682_v16 = vshrl.u32 %v2318_v26, 16  ;;  %v2685_v20 = vshll.u32 %v2318_v26, 16  ;;  %v2691_v38 = vshll.u32 %v2319_v62, 16  ;;  %v2695_v49 = vshrl.u32 %v2319_v62, 16  ;;  %v9667_v26 = vpop.f32.mrf.mxu2 }
 0x297   : > { %3038 = vst [vmem:[#allocation3 + $0x428] sm:$0xf] %v2969_v18  ;;  %v9661_v47 = vadd.f32 %v5509_v2, %v9533_v48  ;;  %v2701_v8 = vshll.u32 %v2320_v10, 16  ;;  %v1964_v23 = vld [vmem:[#allocation2 + $0x78] sm:$0xe]  ;;  %v3752_v17 = vrot.slane %v3625_v19, 5  ;;  %v3750_v32 = vsel %vm8776_vm8, %v6888_v45, %v3749_v44 }
 0x298   : > { %3074 = vst [vmem:[#allocation3 + $0x18] sm:$0xf] %v3042_v22  ;;  %v2684_v51 = vrot.slane %v2682_v16, 4  ;;  %v2687_v22 = vrot.slane %v2685_v20, 5  ;;  %v2693_v53 = vrot.slane %v2691_v38, 5  ;;  %v2697_v46 = vrot.slane %v2695_v49, 4  ;;  %6062 = vmatpush.bf16.msra.mxu1 %v8034_v33  ;;  %v9669_v44 = vpop.f32.mrf.mxu0 }
 0x299   : > { %10493 = vst [vmem:[#allocation58_spill] sm:$0xff] %v9658_v15  ;;  %v1965_v18 = vld [vmem:[#allocation2 + $0x7c] sm:$0xf]  ;;  %v1966_v6 = vld [vmem:[#allocation2 + $0x80] sm:$0x1]  ;;  %v6859_v48 = vrot.slane %v1964_v23, 9  ;;  %v3753_v2 = vsel %vm8776_vm8, %v3751_v13, %v3752_v17 }
 0x29a   : > { %10494 = vst [vmem:[#allocation59_spill] sm:$0xff] %v9667_v26  ;;  %v7898_v62 = vld [vmem:[#allocation3 + $0x25c] sm:$0xf]  ;;  %v7213_v10 = vld [vmem:[#allocation3 + $0x27c] sm:$0xf0]  ;;  %v2688_v11 = vor.u32 %v2687_v22, %v2684_v51  ;;  %v2105_v19 = vrot.slane %v1965_v18, 5  ;;  %v2698_v15 = vor.u32 %v2697_v46, %v2693_v53 }
 0x29b   : > { %v7942_v16 = vld [vmem:[#allocation3 + $0x3bc] sm:$0xf]  ;;  %v7385_v20 = vld [vmem:[#allocation3 + $0x3dc] sm:$0xf0]  ;;  %v2703_v42 = vrot.slane %v2701_v8, 5  ;;  %10495 = vst [vmem:[#allocation60_spill] sm:$0xff] %v9669_v44  ;;  %v7216_v51 = vor.u32 %v7898_v62, %v7213_v10  ;;  %v9682_v10 = vpop.f32.mrf.mxu1 }
 0x29c   : > { %v7882_v38 = vld [vmem:[#allocation3 + $0x1d8] sm:$0xf0]  ;;  %3856 = vst [vmem:[#allocation3 + $0x218] sm:$0xf] %v3750_v32  ;;  %v2689_v45 = vrot.slane %v2688_v11, 4  ;;  %v2106_v33 = vsel %vm8776_vm8, %v6859_v48, %v2105_v19  ;;  %v2107_v49 = vrot.slane %v2105_v19, 4 }
 0x29d   : > { %v2108_v13 = vrot.slane %v1966_v6, 5  ;;  %3857 = vst [vmem:[#allocation3 + $0x23c] sm:$0xf] %v3753_v2  ;;  %v7123_v17 = vld [vmem:[#allocation3 + $0x1b8] sm:$0xf]  ;;  %v2699_v22 = vrot.slane %v2698_v15, 4 }
 0x29e   : > { %v5511_v23 = vpop.f32.mrf.mxu3  ;;  %v7419_v52 = vld [vmem:[#allocation3 + $0x400] sm:$0xf]  ;;  %v8033_v18 = vld [vmem:[#allocation9 + $0x210] sm:$0xff]  ;;  %v2814_v26 = vld [vmem:[#allocation2 + $0xc0] sm:$0xe]  ;;  %v2694_v11 = vsel %vm8698_vm2, %v2689_v45, %v2693_v53  ;;  %10496 = vst [vmem:[#allocation61_spill] sm:$0xff] %v9682_v10  ;;  %v7124_v19 = vor.u32 %v7882_v38, %v7123_v17 }
 0x29f   : > { %v2815_v29 = vld [vmem:[#allocation2 + $0xc4] sm:$0xf]  ;;  %v9674_v8 = vadd.f32 %v5511_v23, %v9549_v30  ;;  %v2816_v32 = vld [vmem:[#allocation2 + $0xc8] sm:$0x1]  ;;  %v6880_v46 = vrot.slane %v2814_v26, 9  ;;  %v2704_v2 = vsel %vm8698_vm2, %v2699_v22, %v2703_v42  ;;  %6063 = vmatpush.bf16.msra.mxu1 %v8033_v18  ;;  %v2109_v62 = vsel %vm8776_vm8, %v2107_v49, %v2108_v13  ;;  %v8031_v13 = vld [vmem:[#allocation9 + $0x200] sm:$0xff] }
 0x2a0   : > { %v2972_v48 = vrot.slane %v2815_v29, 5  ;;  %2197 = vst [vmem:[#allocation3 + $0x2d8] sm:$0xf] %v2106_v33  ;;  %v7955_v6 = vld [vmem:[#allocation3 + $0x420] sm:$0xf0]  ;;  %v2975_v15 = vrot.slane %v2816_v32, 5  ;;  %v7388_v30 = vor.u32 %v7942_v16, %v7385_v20  ;;  %6017 = vmatmul.bf16.gmra.mxu0 %v7216_v51  ;;  %v9688_v20 = vpop.f32.mrf.mxu2  ;;  %v9690_v17 = vpop.f32.mrf.mxu0 }
 0x2a1   : > { %2767 = vst [vmem:[#allocation3 + $0x448] sm:$0xf] %v2694_v11  ;;  %v3043_v26 = vld [vmem:[#allocation2 + $0x1c] sm:$0xf]  ;;  %v7420_v42 = vor.u32 %v7955_v6, %v7419_v52  ;;  %v8032_v33 = vld [vmem:[#allocation9 + $0x208] sm:$0xff]  ;;  %v8018_v23 = vld [vmem:[#allocation9 + $0x198] sm:$0xff] }
 0x2a2   : > { %2768 = vst [vmem:[#allocation3 + $0x46c] sm:$0xf] %v2704_v2  ;;  %v2973_v29 = vsel %vm8776_vm8, %v6880_v46, %v2972_v48  ;;  %v2974_v53 = vrot.slane %v2972_v48, 4  ;;  %v3044_v49 = vld [vmem:[#allocation2 + $0x24] sm:$0xf]  ;;  %5884 = vmatpush.bf16.msra.mxu3 %v8018_v23 }
 0x2a3   : > { %3039 = vst [vmem:[#allocation3 + $0x44c] sm:$0xf] %v2973_v29  ;;  %5562 = vmatmul.bf16.gmra.mxu3 %v7124_v19  ;;  %v3045_v16 = vld [vmem:[#allocation2 + $0x28] sm:$0xf]  ;;  %6064 = vmatpush.bf16.msra.mxu1 %v8032_v33  ;;  %v3046_v51 = vld [vmem:[#allocation2 + $0x30] sm:$0xf]  ;;  %v9695_v6 = vpop.f32.mrf.mxu1 }
 0x2a4   : > { %5864 = vmatmul.bf16.gmra.mxu2 %v7388_v30  ;;  %v2976_v45 = vsel %vm8776_vm8, %v2974_v53, %v2975_v15  ;;  %2198 = vst [vmem:[#allocation3 + $0x2fc] sm:$0xf] %v2109_v62  ;;  %v3047_v22 = vld [vmem:[#allocation2 + $0x34] sm:$0xf]  ;;  %v1967_v18 = vld [vmem:[#allocation2 + $0x84] sm:$0xe] }
 0x2a5   : > { %3040 = vst [vmem:[#allocation3 + $0x470] sm:$0xf] %v2976_v45  ;;  %v1968_v11 = vld [vmem:[#allocation2 + $0x88] sm:$0xf]  ;;  %v1969_v32 = vld [vmem:[#allocation2 + $0x8c] sm:$0x1] }
 0x2a6   : > { %5780 = vmatmul.bf16.gmra.mxu1 %v7420_v42  ;;  %3075 = vst [vmem:[#allocation3 + $0x3c] sm:$0xf] %v3043_v26  ;;  %v5514_v38 = vpop.f32.mrf.mxu3  ;;  %v6860_v46 = vrot.slane %v1967_v18, 9  ;;  %v2112_v48 = vrot.slane %v1968_v11, 5  ;;  %v2115_v62 = vrot.slane %v1969_v32, 5 }
 0x2a7   : > { %3076 = vst [vmem:[#allocation3 + $0x60] sm:$0xf] %v3044_v49  ;;  %v9693_v52 = vadd.f32 %v5514_v38, %v9563_v39  ;;  %6065 = vmatpush.bf16.msra.mxu1 %v8031_v13  ;;  %v7907_v39 = vld [vmem:[#allocation3 + $0x2a4] sm:$0xf]  ;;  %v7249_v30 = vld [vmem:[#allocation3 + $0x2c4] sm:$0xf0] }
 0x2a8   : > { %10497 = vst [vmem:[#allocation62_spill] sm:$0xff] %v9690_v17  ;;  %v2113_v2 = vsel %vm8776_vm8, %v6860_v46, %v2112_v48  ;;  %v2114_v15 = vrot.slane %v2112_v48, 4  ;;  %v7891_v19 = vld [vmem:[#allocation3 + $0x220] sm:$0xf0]  ;;  %v7421_v26 = vld [vmem:[#allocation3 + $0x424] sm:$0xf0]  ;;  %v9701_v45 = vpop.f32.mrf.mxu2  ;;  %v7252_v49 = vor.u32 %v7907_v39, %v7249_v30  ;;  %v9706_v23 = vpop.f32.mrf.mxu0 }
 0x2a9   : > { %3077 = vst [vmem:[#allocation3 + $0x84] sm:$0xf] %v3045_v16  ;;  %v7951_v53 = vld [vmem:[#allocation3 + $0x404] sm:$0xf]  ;;  %v7159_v16 = vld [vmem:[#allocation3 + $0x200] sm:$0xf] }
 0x2aa   : > { %3078 = vst [vmem:[#allocation3 + $0xa8] sm:$0xf] %v3046_v51  ;;  %v2116_v29 = vsel %vm8776_vm8, %v2114_v15, %v2115_v62  ;;  %v7455_v38 = vld [vmem:[#allocation3 + $0x448] sm:$0xf]  ;;  %v7964_v13 = vld [vmem:[#allocation3 + $0x468] sm:$0xf0]  ;;  %v7424_v51 = vor.u32 %v7951_v53, %v7421_v26 }
 0x2ab   : > { %10498 = vst [vmem:[#allocation63_spill] sm:$0xff] %v9695_v6  ;;  %v7456_v18 = vor.u32 %v7964_v13, %v7455_v38  ;;  %v3048_v11 = vld [vmem:[#allocation2 + $0x3c] sm:$0xf]  ;;  %v3049_v32 = vld [vmem:[#allocation2 + $0x40] sm:$0xf]  ;;  %v9708_v46 = vpop.f32.mrf.mxu1 }
 0x2ac   : > { %3079 = vst [vmem:[#allocation3 + $0xcc] sm:$0xf] %v3047_v22  ;;  %v7160_v22 = vor.u32 %v7891_v19, %v7159_v16  ;;  %v3139_v48 = vld [vmem:[#allocation2 + $0x9c] sm:$0xf]  ;;  %v3141_v15 = vld [vmem:[#allocation2 + $0xa4] sm:$0x1] }
 0x2ad   : > { %2199 = vst [vmem:[#allocation3 + $0x320] sm:$0xf] %v2113_v2  ;;  %v3140_v2 = vld [vmem:[#allocation2 + $0xa0] sm:$0xf]  ;;  %v3419_v39 = vshrl.u32 %v3139_v48, 16  ;;  %v3422_v30 = vshll.u32 %v3139_v48, 16 }
 0x2ae   : > { %v5516_v42 = vpop.f32.mrf.mxu3  ;;  %2200 = vst [vmem:[#allocation3 + $0x344] sm:$0xf] %v2116_v29  ;;  %v3428_v19 = vshll.u32 %v3140_v2, 16  ;;  %v3432_v29 = vshrl.u32 %v3140_v2, 16  ;;  %v3438_v53 = vshll.u32 %v3141_v15, 16 }
 0x2af   : > { %v9704_v33 = vadd.f32 %v5516_v42, %v9578_v37  ;;  %10499 = vst [vmem:[#allocation64_spill] sm:$0xff] %v9706_v23  ;;  %v3421_v42 = vrot.slane %v3419_v39, 4  ;;  %v7457_v48 = vld [vmem:[#allocation3 + $0x46c] sm:$0xf0]  ;;  %v1970_v39 = vld [vmem:[#allocation2 + $0x90] sm:$0xe] }
 0x2b0   : > { %6022 = vmatmul.bf16.gmra.mxu0 %v7252_v49  ;;  %10500 = vst [vmem:[#allocation65_spill] sm:$0xff] %v9708_v46  ;;  %v9713_v26 = vpop.f32.mrf.mxu2  ;;  %v3424_v49 = vrot.slane %v3422_v30, 5  ;;  %v3430_v16 = vrot.slane %v3428_v19, 5  ;;  %v3434_v38 = vrot.slane %v3432_v29, 4  ;;  %v9715_v13 = vpop.f32.mrf.mxu0  ;;  %v3440_v23 = vrot.slane %v3438_v53, 5  ;;  %v8046_v46 = vld [vmem:[#allocation10 + $0x38] sm:$0xff] }
 0x2b1   : > { %3080 = vst [vmem:[#allocation3 + $0xf0] sm:$0xf] %v3048_v11  ;;  %v7960_v11 = vld [vmem:[#allocation3 + $0x44c] sm:$0xf]  ;;  %v1971_v30 = vld [vmem:[#allocation2 + $0x94] sm:$0xf]  ;;  %6331 = vmatpush.bf16.msra.mxu2 %v8046_v46 }
 0x2b2   : > { %3081 = vst [vmem:[#allocation3 + $0x114] sm:$0xf] %v3049_v32  ;;  %v1972_v32 = vld [vmem:[#allocation2 + $0x98] sm:$0x1]  ;;  %v2119_v53 = vrot.slane %v1971_v30, 5  ;;  %v8017_v30 = vld [vmem:[#allocation9 + $0x190] sm:$0xff] }
 0x2b3   : > { %5567 = vmatmul.bf16.gmra.mxu3 %v7160_v22  ;;  %10501 = vst [vmem:[#allocation66_spill] sm:$0xff] %v9713_v26  ;;  %v7285_v22 = vld [vmem:[#allocation3 + $0x30c] sm:$0xf0]  ;;  %v9717_v19 = vpop.f32.mrf.mxu1  ;;  %v1973_v46 = vld [vmem:[#allocation2 + $0x9c] sm:$0xe] }
 0x2b4   : > { %5869 = vmatmul.bf16.gmra.mxu2 %v7424_v51  ;;  %10502 = vst [vmem:[#allocation67_spill] sm:$0xff] %v9715_v13  ;;  %v7916_v51 = vld [vmem:[#allocation3 + $0x2ec] sm:$0xf]  ;;  %v7195_v13 = vld [vmem:[#allocation3 + $0x248] sm:$0xf]  ;;  %5885 = vmatpush.bf16.msra.mxu3 %v8017_v30 }
 0x2b5   : > { %v7288_v15 = vor.u32 %v7916_v51, %v7285_v22  ;;  %10503 = vst [vmem:[#allocation68_spill] sm:$0xff] %v9717_v19  ;;  %v7460_v22 = vor.u32 %v7960_v11, %v7457_v48  ;;  %v6931_v19 = vld [vmem:[#allocation3 + $0x20] sm:$0xf]  ;;  %v1975_v11 = vld [vmem:[#allocation2 + $0xa4] sm:$0x1]  ;;  %v6862_v48 = vrot.slane %v1973_v46, 9 }
 0x2b6   : > { %5785 = vmatmul.bf16.gmra.mxu1 %v7456_v18  ;;  %v5519_v37 = vpop.f32.mrf.mxu3  ;;  %v3425_v18 = vor.u32 %v3424_v49, %v3421_v42  ;;  %v6861_v49 = vrot.slane %v1970_v39, 9 }
 0x2b7   : > { %v9711_v62 = vadd.f32 %v5519_v37, %v9594_v63  ;;  %v7900_v63 = vld [vmem:[#allocation3 + $0x268] sm:$0xf0]  ;;  %v3435_v37 = vor.u32 %v3434_v38, %v3430_v16 }
 0x2b8   : > { %v3426_v17 = vrot.slane %v3425_v18, 4  ;;  %v7196_v38 = vor.u32 %v7900_v63, %v7195_v13  ;;  %v7831_v18 = vld [vmem:[#allocation3 + $0x40] sm:$0xf0]  ;;  %v9732_v63 = vpop.f32.mrf.mxu0 }
 0x2b9   : > { %v3436_v44 = vrot.slane %v3435_v37, 4  ;;  %v2121_v37 = vrot.slane %v2119_v53, 4  ;;  %v6932_v13 = vor.u32 %v7831_v18, %v6931_v19  ;;  %10505 = vst [vmem:[#allocation70_spill] sm:$0xff] %v9732_v63  ;;  %v3144_v19 = vld [vmem:[#allocation2 + $0xb0] sm:$0x1] }
 0x2ba   : > { %v3431_v42 = vsel %vm8698_vm2, %v3426_v17, %v3430_v16  ;;  %v1974_v17 = vld [vmem:[#allocation2 + $0xa0] sm:$0xf]  ;;  %v9728_v16 = vpop.f32.mrf.mxu2  ;;  %v3051_v63 = vld [vmem:[#allocation2 + $0x4c] sm:$0xf] }
 0x2bb   : > { %v3441_v51 = vsel %vm8698_vm2, %v3436_v44, %v3440_v23  ;;  %3592 = vst [vmem:[#allocation3 + $0x334] sm:$0xf] %v3431_v42  ;;  %v2126_v23 = vrot.slane %v1974_v17, 5  ;;  %v3142_v42 = vld [vmem:[#allocation2 + $0xa8] sm:$0xf] }
 0x2bc   : > { %3593 = vst [vmem:[#allocation3 + $0x358] sm:$0xf] %v3441_v51  ;;  %v3446_v18 = vshll.u32 %v3142_v42, 16  ;;  %v3050_v17 = vld [vmem:[#allocation2 + $0x48] sm:$0xf] }
 0x2bd   : > { %10504 = vst [vmem:[#allocation69_spill] sm:$0xff] %v9728_v16  ;;  %v2127_v51 = vsel %vm8776_vm8, %v6862_v48, %v2126_v23  ;;  %v8045_v16 = vld [vmem:[#allocation10 + $0x30] sm:$0xff] }
 0x2be   : > { %v5521_v2 = vpop.f32.mrf.mxu3  ;;  %v3448_v46 = vrot.slane %v3446_v18, 5  ;;  %2203 = vst [vmem:[#allocation3 + $0x3b0] sm:$0xf] %v2127_v51  ;;  %v7231_v51 = vld [vmem:[#allocation3 + $0x290] sm:$0xf]  ;;  %6332 = vmatpush.bf16.msra.mxu2 %v8045_v16 }
 0x2bf   : > { %v9720_v29 = vadd.f32 %v5521_v2, %v9608_v59  ;;  %v2120_v59 = vsel %vm8776_vm8, %v6861_v49, %v2119_v53  ;;  %v2122_v2 = vrot.slane %v1972_v32, 5  ;;  %v2128_v32 = vrot.slane %v2126_v23, 4  ;;  %v3143_v49 = vld [vmem:[#allocation2 + $0xac] sm:$0xf]  ;;  %3082 = vst [vmem:[#allocation3 + $0x138] sm:$0xf] %v3050_v17 }
 0x2c0   : > { %6027 = vmatmul.bf16.gmra.mxu0 %v7288_v15  ;;  %2201 = vst [vmem:[#allocation3 + $0x368] sm:$0xf] %v2120_v59  ;;  %v2129_v15 = vrot.slane %v1975_v11, 5  ;;  %v3456_v59 = vshrl.u32 %v3143_v49, 16  ;;  %v3149_v16 = vld [vmem:[#allocation2 + $0xc4] sm:$0xf] }
 0x2c1   : > { %v2123_v44 = vsel %vm8776_vm8, %v2121_v37, %v2122_v2  ;;  %v3462_v37 = vshll.u32 %v3144_v19, 16  ;;  %3083 = vst [vmem:[#allocation3 + $0x15c] sm:$0xf] %v3051_v63  ;;  %v6967_v63 = vld [vmem:[#allocation3 + $0x68] sm:$0xf] }
 0x2c2   : > { %2202 = vst [vmem:[#allocation3 + $0x38c] sm:$0xf] %v2123_v44  ;;  %v2130_v2 = vsel %vm8776_vm8, %v2128_v32, %v2129_v15  ;;  %v3458_v11 = vrot.slane %v3456_v59, 4  ;;  %v7909_v32 = vld [vmem:[#allocation3 + $0x2b0] sm:$0xf0] }
 0x2c3   : > { %5572 = vmatmul.bf16.gmra.mxu3 %v7196_v38  ;;  %v3443_v38 = vshrl.u32 %v3142_v42, 16  ;;  %2204 = vst [vmem:[#allocation3 + $0x3d4] sm:$0xf] %v2130_v2  ;;  %v7321_v23 = vld [vmem:[#allocation3 + $0x354] sm:$0xf0]  ;;  %v3464_v30 = vrot.slane %v3462_v37, 5  ;;  %v7232_v2 = vor.u32 %v7909_v32, %v7231_v51 }
 0x2c4   : > { %5874 = vmatmul.bf16.gmra.mxu2 %v7460_v22  ;;  %v3452_v22 = vshll.u32 %v3143_v49, 16  ;;  %v1977_v37 = vld [vmem:[#allocation2 + $0xac] sm:$0xf]  ;;  %v3147_v32 = vld [vmem:[#allocation2 + $0xbc] sm:$0x1] }
 0x2c5   : > { %v3445_v44 = vrot.slane %v3443_v38, 4 }
 0x2c6   : > { %6066 = vmatmul.bf16.vlgmr.msra.gmra.mxu1 %v6932_v13  ;;  %v5533_v39 = vpop.f32.mrf.mxu3  ;;  %v9741_v13 = vpop.f32.mrf.mxu1 }
 0x2c7   : > { %v9735_v53 = vadd.f32 %v5533_v39, %v8963_v28  ;;  %10506 = vst [vmem:[#allocation71_spill] sm:$0xff] %v9741_v13  ;;  %v3454_v28 = vrot.slane %v3452_v22, 5  ;;  %v7925_v39 = vld [vmem:[#allocation3 + $0x334] sm:$0xf]  ;;  %v3449_v42 = vor.u32 %v3448_v46, %v3445_v44  ;;  %v9745_v13 = vpop.f32.mrf.mxu0  ;;  %v7840_v22 = vld [vmem:[#allocation3 + $0x88] sm:$0xf0] }
 0x2c8   : > { %v7324_v38 = vor.u32 %v7925_v39, %v7321_v23  ;;  %v6968_v44 = vor.u32 %v7840_v22, %v6967_v63  ;;  %v2133_v46 = vrot.slane %v1977_v37, 5  ;;  %v1978_v39 = vld [vmem:[#allocation2 + $0xb0] sm:$0x1]  ;;  %v3486_v22 = vshll.u32 %v3147_v32, 16 }
 0x2c9   : > { %v3459_v48 = vor.u32 %v3458_v11, %v3454_v28  ;;  %v3450_v49 = vrot.slane %v3449_v42, 4  ;;  %v1976_v11 = vld [vmem:[#allocation2 + $0xa8] sm:$0xe]  ;;  %v2136_v23 = vrot.slane %v1978_v39, 5 }
 0x2ca   : > { %v2135_v42 = vrot.slane %v2133_v46, 4  ;;  %v3488_v10 = vrot.slane %v3486_v22, 5 }
 0x2cb   : > { %v3460_v15 = vrot.slane %v3459_v48, 4  ;;  %v3455_v18 = vsel %vm8698_vm2, %v3450_v49, %v3454_v28  ;;  %v6863_v28 = vrot.slane %v1976_v11, 9  ;;  %v3052_v48 = vld [vmem:[#allocation2 + $0x54] sm:$0xf] }
 0x2cc   : > { %3594 = vst [vmem:[#allocation3 + $0x37c] sm:$0xf] %v3455_v18  ;;  %v2137_v37 = vsel %vm8776_vm8, %v2135_v42, %v2136_v23  ;;  %v7918_v23 = vld [vmem:[#allocation3 + $0x2f8] sm:$0xf0] }
 0x2cd   : > { %v3465_v59 = vsel %vm8698_vm2, %v3460_v15, %v3464_v30  ;;  %v3145_v30 = vld [vmem:[#allocation2 + $0xb4] sm:$0xf]  ;;  %v3146_v15 = vld [vmem:[#allocation2 + $0xb8] sm:$0xf]  ;;  %v2134_v63 = vsel %vm8776_vm8, %v6863_v28, %v2133_v46  ;;  %3084 = vst [vmem:[#allocation3 + $0x180] sm:$0xf] %v3052_v48 }
 0x2ce   : > { %v9743_v19 = vpop.f32.mrf.mxu3  ;;  %3595 = vst [vmem:[#allocation3 + $0x3a0] sm:$0xf] %v3465_v59  ;;  %v9751_v17 = vpop.f32.mrf.mxu1  ;;  %v3467_v18 = vshrl.u32 %v3145_v30, 16  ;;  %v3470_v51 = vshll.u32 %v3145_v30, 16  ;;  %v3476_v59 = vshll.u32 %v3146_v15, 16 }
 0x2cf   : > { %10507 = vst [vmem:[#allocation72_spill] sm:$0xff] %v9751_v17  ;;  %v9760_v11 = vpop.f32.mrf.mxu0 }
 0x2d0   : > { %6032 = vmatmul.bf16.gmra.mxu0 %v7324_v38  ;;  %v3469_v39 = vrot.slane %v3467_v18, 4  ;;  %v3472_v17 = vrot.slane %v3470_v51, 5  ;;  %2205 = vst [vmem:[#allocation3 + $0x3f8] sm:$0xf] %v2134_v63 }
 0x2d1   : > { %2206 = vst [vmem:[#allocation3 + $0x41c] sm:$0xf] %v2137_v37  ;;  %v7003_v37 = vld [vmem:[#allocation3 + $0xb0] sm:$0xf] }
 0x2d2   : > { %v3473_v30 = vor.u32 %v3472_v17, %v3469_v39  ;;  %v7267_v17 = vld [vmem:[#allocation3 + $0x2d8] sm:$0xf] }
 0x2d3   : > { %5577 = vmatmul.bf16.gmra.mxu3 %v7232_v2  ;;  %v3480_v2 = vshrl.u32 %v3146_v15, 16  ;;  %v7934_v15 = vld [vmem:[#allocation3 + $0x37c] sm:$0xf]  ;;  %v7268_v22 = vor.u32 %v7918_v23, %v7267_v17 }
 0x2d4   : > { %v3474_v28 = vrot.slane %v3473_v30, 4  ;;  %v1981_v30 = vld [vmem:[#allocation2 + $0xbc] sm:$0x1] }
 0x2d5   : > { %v7357_v32 = vld [vmem:[#allocation3 + $0x39c] sm:$0xf0] }
 0x2d6   : > { %6071 = vmatmul.bf16.gmra.mxu1 %v6968_v44  ;;  %v5538_v49 = vpop.f32.mrf.mxu3  ;;  %v3053_v44 = vld [vmem:[#allocation2 + $0x58] sm:$0xf]  ;;  %v9762_v46 = vpop.f32.mrf.mxu1  ;;  %v7360_v51 = vor.u32 %v7934_v15, %v7357_v32  ;;  %v2143_v32 = vrot.slane %v1981_v30, 5 }
 0x2d7   : > { %v9754_v38 = vadd.f32 %v5538_v49, %v9055_v60  ;;  %v3478_v60 = vrot.slane %v3476_v59, 5  ;;  %v3482_v49 = vrot.slane %v3480_v2, 4  ;;  %3085 = vst [vmem:[#allocation3 + $0x1a4] sm:$0xf] %v3053_v44  ;;  %v7849_v2 = vld [vmem:[#allocation3 + $0xd0] sm:$0xf0]  ;;  %v9771_v44 = vpop.f32.mrf.mxu0 }
 0x2d8   : > { %10508 = vst [vmem:[#allocation73_spill] sm:$0xff] %v9762_v46 }
 0x2d9   : > { %v3483_v6 = vor.u32 %v3482_v49, %v3478_v60  ;;  %v3479_v59 = vsel %vm8698_vm2, %v3474_v28, %v3478_v60  ;;  %v1979_v49 = vld [vmem:[#allocation2 + $0xb4] sm:$0xe] }
 0x2da   : > { %3596 = vst [vmem:[#allocation3 + $0x3c4] sm:$0xf] %v3479_v59  ;;  %v6864_v60 = vrot.slane %v1979_v49, 9 }
 0x2db   : > { %v3484_v48 = vrot.slane %v3483_v6, 4  ;;  %v1980_v6 = vld [vmem:[#allocation2 + $0xb8] sm:$0xf] }
 0x2dc   : > { %v2140_v39 = vrot.slane %v1980_v6, 5 }
 0x2dd   : > { %v3489_v63 = vsel %vm8698_vm2, %v3484_v48, %v3488_v10  ;;  %v8016_v10 = vld [vmem:[#allocation9 + $0x188] sm:$0xff] }
 0x2de   : > { %v5540_v42 = vpop.f32.mrf.mxu3  ;;  %3597 = vst [vmem:[#allocation3 + $0x3e8] sm:$0xf] %v3489_v63  ;;  %v2142_v15 = vrot.slane %v2140_v39, 4  ;;  %v9773_v23 = vpop.f32.mrf.mxu1  ;;  %5886 = vmatpush.bf16.msra.mxu3 %v8016_v10  ;;  %v3500_v63 = vshll.u32 %v3149_v16, 16 }
 0x2df   : > { %v9765_v18 = vadd.f32 %v5540_v42, %v9091_v3  ;;  %v7004_v3 = vor.u32 %v7849_v2, %v7003_v37  ;;  %v3148_v42 = vld [vmem:[#allocation2 + $0xc0] sm:$0xf]  ;;  %10509 = vst [vmem:[#allocation74_spill] sm:$0xff] %v9773_v23  ;;  %v2141_v2 = vsel %vm8776_vm8, %v6864_v60, %v2140_v39  ;;  %v3055_v23 = vld [vmem:[#allocation2 + $0x64] sm:$0xf]  ;;  %v9782_v10 = vpop.f32.mrf.mxu0 }
 0x2e0   : > { %6037 = vmatmul.bf16.gmra.mxu0 %v7360_v51  ;;  %v3150_v51 = vld [vmem:[#allocation2 + $0xc8] sm:$0x1]  ;;  %v3491_v59 = vshrl.u32 %v3148_v42, 16  ;;  %v3494_v17 = vshll.u32 %v3148_v42, 16  ;;  %v2144_v6 = vsel %vm8776_vm8, %v2142_v15, %v2143_v32  ;;  %2207 = vst [vmem:[#allocation3 + $0x440] sm:$0xf] %v2141_v2 }
 0x2e1   : > { %v3510_v37 = vshll.u32 %v3150_v51, 16  ;;  %2208 = vst [vmem:[#allocation3 + $0x464] sm:$0xf] %v2144_v6  ;;  %v7943_v46 = vld [vmem:[#allocation3 + $0x3c4] sm:$0xf] }
 0x2e2   : > { %v3493_v49 = vrot.slane %v3491_v59, 4  ;;  %v3496_v30 = vrot.slane %v3494_v17, 5  ;;  %3087 = vst [vmem:[#allocation3 + $0x1ec] sm:$0xf] %v3055_v23  ;;  %v7927_v15 = vld [vmem:[#allocation3 + $0x340] sm:$0xf0] }
 0x2e3   : > { %5582 = vmatmul.bf16.gmra.mxu3 %v7268_v22  ;;  %v3504_v22 = vshrl.u32 %v3149_v16, 16  ;;  %v3512_v60 = vrot.slane %v3510_v37, 5 }
 0x2e4   : > { %v3497_v42 = vor.u32 %v3496_v30, %v3493_v49  ;;  %v3057_v30 = vld [vmem:[#allocation2 + $0x70] sm:$0xf] }
 0x2e5   : > { %v7393_v26 = vld [vmem:[#allocation3 + $0x3e4] sm:$0xf0]  ;;  %3089 = vst [vmem:[#allocation3 + $0x234] sm:$0xf] %v3057_v30 }
 0x2e6   : > { %6076 = vmatmul.bf16.gmra.mxu1 %v7004_v3  ;;  %v5543_v28 = vpop.f32.mrf.mxu3  ;;  %v3054_v3 = vld [vmem:[#allocation2 + $0x60] sm:$0xf]  ;;  %v3498_v16 = vrot.slane %v3497_v42, 4  ;;  %v7396_v17 = vor.u32 %v7943_v46, %v7393_v26  ;;  %v9791_v23 = vpop.f32.mrf.mxu1 }
 0x2e7   : > { %v9776_v48 = vadd.f32 %v5543_v28, %v9122_v43  ;;  %v3502_v43 = vrot.slane %v3500_v63, 5  ;;  %v3506_v28 = vrot.slane %v3504_v22, 4  ;;  %3086 = vst [vmem:[#allocation3 + $0x1c8] sm:$0xf] %v3054_v3  ;;  %v7303_v63 = vld [vmem:[#allocation3 + $0x320] sm:$0xf]  ;;  %v9793_v46 = vpop.f32.mrf.mxu0 }
 0x2e8   : > { %v7858_v22 = vld [vmem:[#allocation3 + $0x118] sm:$0xf0]  ;;  %10510 = vst [vmem:[#allocation75_spill] sm:$0xff] %v9791_v23  ;;  %v7304_v37 = vor.u32 %v7927_v15, %v7303_v63  ;;  %v7039_v3 = vld [vmem:[#allocation3 + $0xf8] sm:$0xf] }
 0x2e9   : > { %v3507_v39 = vor.u32 %v3506_v28, %v3502_v43  ;;  %v3503_v2 = vsel %vm8698_vm2, %v3498_v16, %v3502_v43  ;;  %v7040_v49 = vor.u32 %v7858_v22, %v7039_v3  ;;  %v7936_v16 = vld [vmem:[#allocation3 + $0x388] sm:$0xf0]  ;;  %v3626_v3 = vld [vmem:[#allocation2 + $0x78] sm:$0xe] }
 0x2ea   : > { %3598 = vst [vmem:[#allocation3 + $0x40c] sm:$0xf] %v3503_v2  ;;  %v7867_v2 = vld [vmem:[#allocation3 + $0x160] sm:$0xf0] }
 0x2eb   : > { %v3508_v32 = vrot.slane %v3507_v39, 4 }
 0x2ed   : > { %v3513_v6 = vsel %vm8698_vm2, %v3508_v32, %v3512_v60 }
 0x2ee   : > { %v5545_v51 = vpop.f32.mrf.mxu3  ;;  %3599 = vst [vmem:[#allocation3 + $0x430] sm:$0xf] %v3513_v6  ;;  %v9798_v28 = vpop.f32.mrf.mxu1 }
 0x2ef   : > { %v9785_v59 = vadd.f32 %v5545_v51, %v9140_v14  ;;  %v3056_v14 = vld [vmem:[#allocation2 + $0x6c] sm:$0xf]  ;;  %10511 = vst [vmem:[#allocation76_spill] sm:$0xff] %v9798_v28  ;;  %v8044_v51 = vld [vmem:[#allocation10 + $0x28] sm:$0xff]  ;;  %v9803_v63 = vpop.f32.mrf.mxu0 }
 0x2f0   : > { %6042 = vmatmul.bf16.gmra.mxu0 %v7396_v17  ;;  %3088 = vst [vmem:[#allocation3 + $0x210] sm:$0xf] %v3056_v14  ;;  %v7339_v17 = vld [vmem:[#allocation3 + $0x368] sm:$0xf]  ;;  %6333 = vmatpush.bf16.msra.mxu2 %v8044_v51  ;;  %v3058_v14 = vld [vmem:[#allocation2 + $0x78] sm:$0xf] }
 0x2f1   : > { %v7952_v42 = vld [vmem:[#allocation3 + $0x40c] sm:$0xf]  ;;  %v7340_v22 = vor.u32 %v7936_v16, %v7339_v17  ;;  %3090 = vst [vmem:[#allocation3 + $0x258] sm:$0xf] %v3058_v14 }
 0x2f3   : > { %5587 = vmatmul.bf16.gmra.mxu3 %v7304_v37  ;;  %v3628_v37 = vld [vmem:[#allocation2 + $0x80] sm:$0x1] }
 0x2f4   : > { %v3759_v17 = vrot.slane %v3628_v37, 5  ;;  %v3631_v37 = vld [vmem:[#allocation2 + $0x8c] sm:$0x1] }
 0x2f5   : > { %v7429_v39 = vld [vmem:[#allocation3 + $0x42c] sm:$0xf0] }
 0x2f6   : > { %6081 = vmatmul.bf16.gmra.mxu1 %v7040_v49  ;;  %v5548_v26 = vpop.f32.mrf.mxu3  ;;  %v7432_v32 = vor.u32 %v7952_v42, %v7429_v39  ;;  %v3627_v49 = vld [vmem:[#allocation2 + $0x7c] sm:$0xf]  ;;  %v9805_v30 = vpop.f32.mrf.mxu1 }
 0x2f7   : > { %v9796_v43 = vadd.f32 %v5548_v26, %v9164_v7  ;;  %v7075_v7 = vld [vmem:[#allocation3 + $0x140] sm:$0xf]  ;;  %10512 = vst [vmem:[#allocation77_spill] sm:$0xff] %v9805_v30  ;;  %v3756_v26 = vrot.slane %v3627_v49, 5  ;;  %v3059_v42 = vld [vmem:[#allocation2 + $0x7c] sm:$0xf] }
 0x2f8   : > { %v7076_v6 = vor.u32 %v7867_v2, %v7075_v7  ;;  %3091 = vst [vmem:[#allocation3 + $0x27c] sm:$0xf] %v3059_v42  ;;  %v7375_v7 = vld [vmem:[#allocation3 + $0x3b0] sm:$0xf]  ;;  %v7111_v42 = vld [vmem:[#allocation3 + $0x188] sm:$0xf] }
 0x2fe   : > { %v5550_v60 = vpop.f32.mrf.mxu3 }
 0x2ff   : > { %v9801_v15 = vadd.f32 %v5550_v60, %v9181_v61  ;;  %v6889_v61 = vrot.slane %v3626_v3, 9  ;;  %v8015_v60 = vld [vmem:[#allocation9 + $0x180] sm:$0xff]  ;;  %v9814_v3 = vpop.f32.mrf.mxu1 }
 0x300   : > { %6047 = vmatmul.bf16.gmra.mxu0 %v7432_v32  ;;  %v3758_v32 = vrot.slane %v3756_v26, 4  ;;  %5887 = vmatpush.bf16.msra.mxu3 %v8015_v60  ;;  %10513 = vst [vmem:[#allocation78_spill] sm:$0xff] %v9814_v3  ;;  %v3060_v60 = vld [vmem:[#allocation2 + $0x84] sm:$0xf] }
 0x301   : > { %v3757_v51 = vsel %vm8776_vm8, %v6889_v61, %v3756_v26  ;;  %v3629_v26 = vld [vmem:[#allocation2 + $0x84] sm:$0xe]  ;;  %3092 = vst [vmem:[#allocation3 + $0x2a0] sm:$0xf] %v3060_v60 }
 0x302   : > { %3858 = vst [vmem:[#allocation3 + $0x260] sm:$0xf] %v3757_v51  ;;  %v3760_v2 = vsel %vm8776_vm8, %v3758_v32, %v3759_v17  ;;  %v6890_v51 = vrot.slane %v3629_v26, 9  ;;  %v3061_v17 = vld [vmem:[#allocation2 + $0x88] sm:$0xf]  ;;  %v8043_v26 = vld [vmem:[#allocation10 + $0x20] sm:$0xff] }
 0x303   : > { %5592 = vmatmul.bf16.gmra.mxu3 %v7340_v22  ;;  %3859 = vst [vmem:[#allocation3 + $0x284] sm:$0xf] %v3760_v2  ;;  %6334 = vmatpush.bf16.msra.mxu2 %v8043_v26  ;;  %v3636_v26 = vld [vmem:[#allocation2 + $0xa0] sm:$0xf] }
 0x304   : > { %3093 = vst [vmem:[#allocation3 + $0x2c4] sm:$0xf] %v3061_v17  ;;  %v3634_v17 = vld [vmem:[#allocation2 + $0x98] sm:$0x1] }
 0x306   : > { %6086 = vmatmul.bf16.gmra.mxu1 %v7076_v6  ;;  %v5553_v39 = vpop.f32.mrf.mxu3  ;;  %v7945_v6 = vld [vmem:[#allocation3 + $0x3d0] sm:$0xf0] }
 0x307   : > { %v9808_v16 = vadd.f32 %v5553_v39, %v9199_v31  ;;  %v7876_v31 = vld [vmem:[#allocation3 + $0x1a8] sm:$0xf0]  ;;  %v7376_v14 = vor.u32 %v7945_v6, %v7375_v7  ;;  %v3630_v39 = vld [vmem:[#allocation2 + $0x88] sm:$0xf]  ;;  %v3766_v7 = vrot.slane %v3631_v37, 5  ;;  %v9824_v6 = vpop.f32.mrf.mxu1 }
 0x308   : > { %v7112_v61 = vor.u32 %v7876_v31, %v7111_v42  ;;  %v3763_v32 = vrot.slane %v3630_v39, 5  ;;  %10514 = vst [vmem:[#allocation79_spill] sm:$0xff] %v9824_v6  ;;  %v7411_v42 = vld [vmem:[#allocation3 + $0x3f8] sm:$0xf]  ;;  %v3063_v6 = vld [vmem:[#allocation2 + $0x94] sm:$0xf] }
 0x309   : > { %3095 = vst [vmem:[#allocation3 + $0x30c] sm:$0xf] %v3063_v6 }
 0x30e   : > { %v5555_v22 = vpop.f32.mrf.mxu3 }
 0x30f   : > { %v9817_v49 = vadd.f32 %v5555_v22, %v9211_v57  ;;  %v3764_v57 = vsel %vm8776_vm8, %v6890_v51, %v3763_v32  ;;  %v3765_v22 = vrot.slane %v3763_v32, 4  ;;  %v7147_v51 = vld [vmem:[#allocation3 + $0x1d0] sm:$0xf]  ;;  %v9831_v32 = vpop.f32.mrf.mxu1 }
 0x310   : > { %3860 = vst [vmem:[#allocation3 + $0x2a8] sm:$0xf] %v3764_v57  ;;  %v3633_v57 = vld [vmem:[#allocation2 + $0x94] sm:$0xf] }
 0x311   : > { %v3767_v31 = vsel %vm8776_vm8, %v3765_v22, %v3766_v7  ;;  %10515 = vst [vmem:[#allocation80_spill] sm:$0xff] %v9831_v32  ;;  %v3062_v22 = vld [vmem:[#allocation2 + $0x90] sm:$0xf]  ;;  %v3066_v32 = vld [vmem:[#allocation2 + $0xa8] sm:$0xf] }
 0x312   : > { %3861 = vst [vmem:[#allocation3 + $0x2cc] sm:$0xf] %v3767_v31  ;;  %v3770_v31 = vrot.slane %v3633_v57, 5 }
 0x313   : > { %5597 = vmatmul.bf16.gmra.mxu3 %v7376_v14  ;;  %3094 = vst [vmem:[#allocation3 + $0x2e8] sm:$0xf] %v3062_v22  ;;  %v3064_v22 = vld [vmem:[#allocation2 + $0x9c] sm:$0xf] }
 0x314   : > { %3096 = vst [vmem:[#allocation3 + $0x330] sm:$0xf] %v3064_v22 }
 0x315   : > { %3098 = vst [vmem:[#allocation3 + $0x378] sm:$0xf] %v3066_v32  ;;  %v7219_v32 = vld [vmem:[#allocation3 + $0x260] sm:$0xf] }
 0x316   : > { %6091 = vmatmul.bf16.gmra.mxu1 %v7112_v61  ;;  %v5558_v2 = vpop.f32.mrf.mxu3  ;;  %v7954_v61 = vld [vmem:[#allocation3 + $0x418] sm:$0xf0] }
 0x317   : > { %v9820_v3 = vadd.f32 %v5558_v2, %v9240_v1  ;;  %v7885_v1 = vld [vmem:[#allocation3 + $0x1f0] sm:$0xf0]  ;;  %v7412_v60 = vor.u32 %v7954_v61, %v7411_v42  ;;  %v3632_v2 = vld [vmem:[#allocation2 + $0x90] sm:$0xe]  ;;  %v3772_v42 = vrot.slane %v3770_v31, 4  ;;  %v3773_v61 = vrot.slane %v3634_v17, 5 }
 0x318   : > { %v7148_v37 = vor.u32 %v7885_v1, %v7147_v51  ;;  %v6891_v7 = vrot.slane %v3632_v2, 9  ;;  %v3635_v51 = vld [vmem:[#allocation2 + $0x9c] sm:$0xe] }
 0x319   : > { %v3774_v1 = vsel %vm8776_vm8, %v3772_v42, %v3773_v61  ;;  %v6892_v2 = vrot.slane %v3635_v51, 9  ;;  %v7963_v42 = vld [vmem:[#allocation3 + $0x460] sm:$0xf0]  ;;  %v7183_v51 = vld [vmem:[#allocation3 + $0x218] sm:$0xf] }
 0x31a   : > { %3863 = vst [vmem:[#allocation3 + $0x314] sm:$0xf] %v3774_v1 }
 0x31e   : > { %v5560_v14 = vpop.f32.mrf.mxu3 }
 0x31f   : > { %v9829_v39 = vadd.f32 %v5560_v14, %v9257_v36  ;;  %v3771_v14 = vsel %vm8776_vm8, %v6891_v7, %v3770_v31 }
 0x320   : > { %3862 = vst [vmem:[#allocation3 + $0x2f0] sm:$0xf] %v3771_v14  ;;  %v7447_v14 = vld [vmem:[#allocation3 + $0x440] sm:$0xf] }
 0x321   : > { %v7448_v1 = vor.u32 %v7963_v42, %v7447_v14  ;;  %v3067_v14 = vld [vmem:[#allocation2 + $0xac] sm:$0xf] }
 0x322   : > { %3099 = vst [vmem:[#allocation3 + $0x39c] sm:$0xf] %v3067_v14  ;;  %v3643_v14 = vld [vmem:[#allocation2 + $0xbc] sm:$0x1] }
 0x323   : > { %5602 = vmatmul.bf16.gmra.mxu3 %v7412_v60  ;;  %v3777_v60 = vrot.slane %v3636_v26, 5  ;;  %v7894_v26 = vld [vmem:[#allocation3 + $0x238] sm:$0xf0] }
 0x325   : > { %v3779_v57 = vrot.slane %v3777_v60, 4  ;;  %v3778_v17 = vsel %vm8776_vm8, %v6892_v2, %v3777_v60 }
 0x326   : > { %6096 = vmatmul.bf16.gmra.mxu1 %v7148_v37  ;;  %v5563_v30 = vpop.f32.mrf.mxu3  ;;  %v3637_v37 = vld [vmem:[#allocation2 + $0xa4] sm:$0x1]  ;;  %3864 = vst [vmem:[#allocation3 + $0x338] sm:$0xf] %v3778_v17  ;;  %v3638_v17 = vld [vmem:[#allocation2 + $0xa8] sm:$0xe] }
 0x327   : > { %v9834_v36 = vadd.f32 %v5563_v30, %v9278_v25  ;;  %v3780_v6 = vrot.slane %v3637_v37, 5  ;;  %v3065_v25 = vld [vmem:[#allocation2 + $0xa0] sm:$0xf]  ;;  %v9840_v30 = vpop.f32.mrf.mxu1  ;;  %v7184_v37 = vor.u32 %v7894_v26, %v7183_v51  ;;  %v7830_v51 = vld [vmem:[#allocation3 + $0x38] sm:$0xf0] }
 0x328   : > { %10516 = vst [vmem:[#allocation81_spill] sm:$0xff] %v9840_v30  ;;  %v3640_v30 = vld [vmem:[#allocation2 + $0xb0] sm:$0x1] }
 0x329   : > { %v3781_v7 = vsel %vm8776_vm8, %v3779_v57, %v3780_v6  ;;  %3097 = vst [vmem:[#allocation3 + $0x354] sm:$0xf] %v3065_v25  ;;  %v3639_v57 = vld [vmem:[#allocation2 + $0xac] sm:$0xf]  ;;  %v8042_v25 = vld [vmem:[#allocation10 + $0x18] sm:$0xff] }
 0x32a   : > { %3865 = vst [vmem:[#allocation3 + $0x35c] sm:$0xf] %v3781_v7  ;;  %v3784_v6 = vrot.slane %v3639_v57, 5  ;;  %v3787_v7 = vrot.slane %v3640_v30, 5  ;;  %6335 = vmatpush.bf16.msra.mxu2 %v8042_v25  ;;  %v7903_v30 = vld [vmem:[#allocation3 + $0x280] sm:$0xf0] }
 0x32b   : > { %v7220_v25 = vor.u32 %v7903_v30, %v7219_v32  ;;  %v6959_v30 = vld [vmem:[#allocation3 + $0x60] sm:$0xf] }
 0x32e   : > { %v5565_v31 = vpop.f32.mrf.mxu3 }
 0x32f   : > { %v9847_v61 = vadd.f32 %v5565_v31, %v9285_v0  ;;  %v9849_v60 = vpop.f32.mrf.mxu1  ;;  %v6893_v0 = vrot.slane %v3638_v17, 9  ;;  %v3786_v31 = vrot.slane %v3784_v6, 4 }
 0x330   : > { %10517 = vst [vmem:[#allocation82_spill] sm:$0xff] %v9849_v60  ;;  %v3794_v60 = vrot.slane %v3643_v14, 5 }
 0x331   : > { %v3785_v42 = vsel %vm8776_vm8, %v6893_v0, %v3784_v6  ;;  %v3788_v26 = vsel %vm8776_vm8, %v3786_v31, %v3787_v7  ;;  %v3642_v0 = vld [vmem:[#allocation2 + $0xb8] sm:$0xf]  ;;  %v3641_v7 = vld [vmem:[#allocation2 + $0xb4] sm:$0xe] }
 0x332   : > { %3866 = vst [vmem:[#allocation3 + $0x380] sm:$0xf] %v3785_v42  ;;  %v3791_v31 = vrot.slane %v3642_v0, 5  ;;  %v3068_v42 = vld [vmem:[#allocation2 + $0xb4] sm:$0xf] }
 0x333   : > { %5607 = vmatmul.bf16.gmra.mxu3 %v7448_v1  ;;  %v6923_v1 = vld [vmem:[#allocation3 + $0x18] sm:$0xf]  ;;  %3867 = vst [vmem:[#allocation3 + $0x3a4] sm:$0xf] %v3788_v26  ;;  %v6894_v26 = vrot.slane %v3641_v7, 9 }
 0x334   : > { %v6924_v57 = vor.u32 %v7830_v51, %v6923_v1  ;;  %3100 = vst [vmem:[#allocation3 + $0x3c0] sm:$0xf] %v3068_v42  ;;  %v7255_v0 = vld [vmem:[#allocation3 + $0x2a8] sm:$0xf] }
 0x335   : > { %v3792_v1 = vsel %vm8776_vm8, %v6894_v26, %v3791_v31  ;;  %v6995_v26 = vld [vmem:[#allocation3 + $0xa8] sm:$0xf] }
 0x336   : > { %6101 = vmatmul.bf16.gmra.mxu1 %v7184_v37  ;;  %v5568_v22 = vpop.f32.mrf.mxu3  ;;  %3868 = vst [vmem:[#allocation3 + $0x3c8] sm:$0xf] %v3792_v1 }
 0x337   : > { %v9852_v2 = vadd.f32 %v5568_v22, %v9304_v55  ;;  %v9861_v22 = vpop.f32.mrf.mxu1 }
 0x338   : > { %10518 = vst [vmem:[#allocation83_spill] sm:$0xff] %v9861_v22  ;;  %v3069_v22 = vld [vmem:[#allocation2 + $0xb8] sm:$0xf] }
 0x339   : > { %3101 = vst [vmem:[#allocation3 + $0x3e4] sm:$0xf] %v3069_v22  ;;  %v8041_v22 = vld [vmem:[#allocation10 + $0x10] sm:$0xff] }
 0x33a   : > { %6336 = vmatpush.bf16.msra.mxu2 %v8041_v22 }
 0x33e   : > { %v5570_v55 = vpop.f32.mrf.mxu3 }
 0x33f   : > { %v9859_v37 = vadd.f32 %v5570_v55, %v9322_v35  ;;  %v9866_v35 = vpop.f32.mrf.mxu1  ;;  %v3793_v55 = vrot.slane %v3791_v31, 4 }
 0x340   : > { %10519 = vst [vmem:[#allocation84_spill] sm:$0xff] %v9866_v35 }
 0x341   : > { %v3795_v51 = vsel %vm8776_vm8, %v3793_v55, %v3794_v60  ;;  %v7848_v55 = vld [vmem:[#allocation3 + $0xc8] sm:$0xf0] }
 0x342   : > { %3869 = vst [vmem:[#allocation3 + $0x3ec] sm:$0xf] %v3795_v51  ;;  %v7921_v51 = vld [vmem:[#allocation3 + $0x310] sm:$0xf0] }
 0x343   : > { %5888 = vmatmul.bf16.vlgmr.msra.gmra.mxu3 %v6924_v57  ;;  %v7839_v57 = vld [vmem:[#allocation3 + $0x80] sm:$0xf0] }
 0x346   : > { %6106 = vmatmul.bf16.gmra.mxu1 %v7220_v25  ;;  %v5573_v6 = vpop.f32.mrf.mxu3  ;;  %v7912_v25 = vld [vmem:[#allocation3 + $0x2c8] sm:$0xf0] }
 0x347   : > { %v9864_v17 = vadd.f32 %v5573_v6, %v9351_v40  ;;  %v6960_v6 = vor.u32 %v7839_v57, %v6959_v30  ;;  %v7256_v7 = vor.u32 %v7912_v25, %v7255_v0  ;;  %v9875_v14 = vpop.f32.mrf.mxu1  ;;  %v7291_v30 = vld [vmem:[#allocation3 + $0x2f0] sm:$0xf] }
 0x348   : > { %10520 = vst [vmem:[#allocation85_spill] sm:$0xff] %v9875_v14  ;;  %v7292_v57 = vor.u32 %v7921_v51, %v7291_v30  ;;  %v8040_v30 = vld [vmem:[#allocation10 + $0x8] sm:$0xff] }
 0x349   : > { %6337 = vmatpush.bf16.msra.mxu2 %v8040_v30 }
 0x34e   : > { %v5575_v40 = vpop.f32.mrf.mxu3 }
 0x34f   : > { %v9873_v32 = vadd.f32 %v5575_v40, %v9390_v12  ;;  %v9880_v12 = vpop.f32.mrf.mxu1  ;;  %v6996_v40 = vor.u32 %v7848_v55, %v6995_v26  ;;  %v9893_v26 = vpop.f32.mrf.mxu2 }
 0x350   : > { %10521 = vst [vmem:[#allocation86_spill] sm:$0xff] %v9880_v12 }
 0x353   : > { %5893 = vmatmul.bf16.gmra.mxu3 %v6960_v6 }
 0x356   : > { %6111 = vmatmul.bf16.gmra.mxu1 %v7256_v7  ;;  %v5578_v31 = vpop.f32.mrf.mxu3  ;;  %v7031_v7 = vld [vmem:[#allocation3 + $0xf0] sm:$0xf] }
 0x357   : > { %v9878_v60 = vadd.f32 %v5578_v31, %v9413_v24  ;;  %v9888_v6 = vpop.f32.mrf.mxu1  ;;  %v7857_v31 = vld [vmem:[#allocation3 + $0x110] sm:$0xf0] }
 0x358   : > { %10523 = vst [vmem:[#allocation88_spill] sm:$0xff] %v9888_v6  ;;  %v7032_v12 = vor.u32 %v7857_v31, %v7031_v7  ;;  %v7866_v7 = vld [vmem:[#allocation3 + $0x158] sm:$0xf0]  ;;  %v7363_v6 = vld [vmem:[#allocation3 + $0x380] sm:$0xf] }
 0x35e   : > { %v5580_v42 = vpop.f32.mrf.mxu3 }
 0x35f   : > { %v9883_v1 = vadd.f32 %v5580_v42, %v9444_v4  ;;  %v7327_v4 = vld [vmem:[#allocation3 + $0x338] sm:$0xf]  ;;  %v7930_v42 = vld [vmem:[#allocation3 + $0x358] sm:$0xf0]  ;;  %v9895_v55 = vpop.f32.mrf.mxu1 }
 0x360   : > { %v7328_v51 = vor.u32 %v7930_v42, %v7327_v4 }
 0x363   : > { %5898 = vmatmul.bf16.gmra.mxu3 %v6996_v40 }
 0x366   : > { %6116 = vmatmul.bf16.gmra.mxu1 %v7292_v57  ;;  %v5583_v25 = vpop.f32.mrf.mxu3  ;;  %v9900_v57 = vpop.f32.mrf.mxu2 }
 0x367   : > { %v9886_v24 = vadd.f32 %v5583_v25, %v9463_v34 }
 0x369   : > { %10522 = vst [vmem:[#allocation87_spill] sm:$0xff] %v9886_v24 }
 0x36e   : > { %v5585_v0 = vpop.f32.mrf.mxu3  ;;  %v9907_v30 = vpop.f32.mrf.mxu2 }
 0x36f   : > { %v9891_v22 = vadd.f32 %v5585_v0, %v9478_v9  ;;  %v9902_v9 = vpop.f32.mrf.mxu1  ;;  %v7067_v0 = vld [vmem:[#allocation3 + $0x138] sm:$0xf] }
 0x370   : > { %v7068_v4 = vor.u32 %v7866_v7, %v7067_v0 }
 0x371   : > { %10524 = vst [vmem:[#allocation89_spill] sm:$0xff] %v9891_v22 }
 0x373   : > { %5903 = vmatmul.bf16.gmra.mxu3 %v7032_v12  ;;  %v7939_v12 = vld [vmem:[#allocation3 + $0x3a0] sm:$0xf0] }
 0x374   : > { %v7364_v42 = vor.u32 %v7939_v12, %v7363_v6  ;;  %v7103_v12 = vld [vmem:[#allocation3 + $0x180] sm:$0xf] }
 0x376   : > { %6121 = vmatmul.bf16.gmra.mxu1 %v7328_v51  ;;  %v5588_v34 = vpop.f32.mrf.mxu3  ;;  %v3644_v51 = vld [vmem:[#allocation2 + $0xc0] sm:$0xe] }
 0x377   : > { %v9898_v40 = vadd.f32 %v5588_v34, %v9501_v27  ;;  %v3645_v27 = vld [vmem:[#allocation2 + $0xc4] sm:$0xf]  ;;  %v3646_v34 = vld [vmem:[#allocation2 + $0xc8] sm:$0x1]  ;;  %v6895_v14 = vrot.slane %v3644_v51, 9  ;;  %v9921_v51 = vpop.f32.mrf.mxu2 }
 0x378   : > { %v3798_v35 = vrot.slane %v3645_v27, 5 }
 0x379   : > { %10525 = vst [vmem:[#allocation90_spill] sm:$0xff] %v9898_v40  ;;  %v3801_v40 = vrot.slane %v3646_v34, 5 }
 0x37a   : > { %v3799_v28 = vsel %vm8776_vm8, %v6895_v14, %v3798_v35  ;;  %v7399_v14 = vld [vmem:[#allocation3 + $0x3c8] sm:$0xf] }
 0x37b   : > { %3870 = vst [vmem:[#allocation3 + $0x410] sm:$0xf] %v3799_v28 }
 0x37e   : > { %v5590_v25 = vpop.f32.mrf.mxu3 }
 0x37f   : > { %v9905_v31 = vadd.f32 %v5590_v25, %v9519_v41  ;;  %v3800_v41 = vrot.slane %v3798_v35, 4  ;;  %v9911_v25 = vpop.f32.mrf.mxu1  ;;  %v7948_v35 = vld [vmem:[#allocation3 + $0x3e8] sm:$0xf0] }
 0x381   : > { %10526 = vst [vmem:[#allocation91_spill] sm:$0xff] %v9905_v31  ;;  %v3802_v6 = vsel %vm8776_vm8, %v3800_v41, %v3801_v40  ;;  %v9928_v40 = vpop.f32.mrf.mxu2  ;;  %v8039_v41 = vld [vmem:[#allocation10] sm:$0xff]  ;;  %v7175_v31 = vld [vmem:[#allocation3 + $0x210] sm:$0xf] }
 0x382   : > { %3871 = vst [vmem:[#allocation3 + $0x434] sm:$0xf] %v3802_v6  ;;  %6338 = vmatpush.bf16.msra.mxu2 %v8039_v41 }
 0x383   : > { %5908 = vmatmul.bf16.gmra.mxu3 %v7068_v4  ;;  %v7875_v4 = vld [vmem:[#allocation3 + $0x1a0] sm:$0xf0] }
 0x384   : > { %v7104_v34 = vor.u32 %v7875_v4, %v7103_v12  ;;  %v7435_v12 = vld [vmem:[#allocation3 + $0x410] sm:$0xf] }
 0x386   : > { %6126 = vmatmul.bf16.gmra.mxu1 %v7364_v42  ;;  %v5593_v22 = vpop.f32.mrf.mxu3 }
 0x387   : > { %v9914_v0 = vadd.f32 %v5593_v22, %v9627_v5  ;;  %v9923_v27 = vpop.f32.mrf.mxu1  ;;  %v7400_v5 = vor.u32 %v7948_v35, %v7399_v14 }
 0x389   : > { %10527 = vst [vmem:[#allocation92_spill] sm:$0xff] %v9914_v0  ;;  %v7957_v4 = vld [vmem:[#allocation3 + $0x430] sm:$0xf0] }
 0x38a   : > { %v7436_v35 = vor.u32 %v7957_v4, %v7435_v12 }
 0x38e   : > { %v5595_v7 = vpop.f32.mrf.mxu3 }
 0x38f   : > { %v9919_v42 = vadd.f32 %v5595_v7, %v9642_v50  ;;  %v9930_v6 = vpop.f32.mrf.mxu1  ;;  %v7139_v7 = vld [vmem:[#allocation3 + $0x1c8] sm:$0xf] }
 0x391   : > { %10528 = vst [vmem:[#allocation93_spill] sm:$0xff] %v9919_v42  ;;  %v7884_v42 = vld [vmem:[#allocation3 + $0x1e8] sm:$0xf0] }
 0x392   : > { %v7140_v14 = vor.u32 %v7884_v42, %v7139_v7 }
 0x393   : > { %5913 = vmatmul.bf16.gmra.mxu3 %v7104_v34  ;;  %v9935_v34 = vpop.f32.mrf.mxu2 }
 0x396   : > { %6131 = vmatmul.bf16.gmra.mxu1 %v7400_v5  ;;  %v5598_v28 = vpop.f32.mrf.mxu3 }
 0x397   : > { %v9926_v22 = vadd.f32 %v5598_v28, %v9661_v47  ;;  %v9937_v47 = vpop.f32.mrf.mxu1 }
 0x399   : > { %10529 = vst [vmem:[#allocation94_spill] sm:$0xff] %v9926_v22 }
 0x39b   : > { %v9942_v41 = vpop.f32.mrf.mxu2 }
 0x39e   : > { %v5600_v50 = vpop.f32.mrf.mxu3 }
 0x39f   : > { %v9933_v0 = vadd.f32 %v5600_v50, %v9674_v8  ;;  %v7893_v8 = vld [vmem:[#allocation3 + $0x230] sm:$0xf0] }
 0x3a0   : > { %v7176_v42 = vor.u32 %v7893_v8, %v7175_v31  ;;  %v3070_v31 = vld [vmem:[#allocation2 + $0xc0] sm:$0xf] }
 0x3a1   : > { %10530 = vst [vmem:[#allocation95_spill] sm:$0xff] %v9933_v0  ;;  %v10535_v0 = vld [vmem:[#allocation19_spill] sm:$0xff] }
 0x3a2   : > { %3102 = vst [vmem:[#allocation3 + $0x408] sm:$0xf] %v3070_v31  ;;  %v10540_v31 = vld [vmem:[#allocation39_spill] sm:$0xff] }
 0x3a3   : > { %5918 = vmatmul.bf16.gmra.mxu3 %v7140_v14  ;;  %v9950_v4 = vpop.f32.mrf.mxu2 }
 0x3a6   : > { %6136 = vmatmul.bf16.gmra.mxu1 %v7436_v35  ;;  %v5603_v5 = vpop.f32.mrf.mxu3  ;;  %v7211_v35 = vld [vmem:[#allocation3 + $0x258] sm:$0xf] }
 0x3a7   : > { %v9940_v28 = vadd.f32 %v5603_v5, %v9693_v52  ;;  %v5623_v52 = vadd.f32 %v9043_v21, %v9735_v53  ;;  %v7902_v5 = vld [vmem:[#allocation3 + $0x278] sm:$0xf0]  ;;  %v10538_v21 = vld [vmem:[#allocation20_spill] sm:$0xff] }
 0x3a8   : > { %v7212_v8 = vor.u32 %v7902_v5, %v7211_v35 }
 0x3a9   : > { %10531 = vst [vmem:[#allocation96_spill] sm:$0xff] %v9940_v28  ;;  %v10534_v28 = vld [vmem:[#allocation18_spill] sm:$0xff] }
 0x3aa   : > { %v5447_v24 = vadd.f32 %v10535_v0, %v10534_v28 }
 0x3ae   : > { %v5605_v22 = vpop.f32.mrf.mxu3 }
 0x3af   : > { %v9945_v50 = vadd.f32 %v5605_v22, %v9704_v33  ;;  %v3071_v22 = vld [vmem:[#allocation2 + $0xc4] sm:$0xf] }
 0x3b0   : > { %3103 = vst [vmem:[#allocation3 + $0x42c] sm:$0xf] %v3071_v22 }
 0x3b1   : > { %10532 = vst [vmem:[#allocation97_spill] sm:$0xff] %v9945_v50  ;;  %v10539_v50 = vld [vmem:[#allocation51_spill] sm:$0xff] }
 0x3b3   : > { %5923 = vmatmul.bf16.gmra.mxu3 %v7176_v42  ;;  %v10537_v42 = vld [vmem:[#allocation37_spill] sm:$0xff] }
 0x3b6   : > { %v5608_v7 = vpop.f32.mrf.mxu3 }
 0x3b7   : > { %v9948_v12 = vadd.f32 %v5608_v7, %v9711_v62  ;;  %v5536_v62 = vadd.f32 %v9743_v19, %v5447_v24  ;;  %v5712_v7 = vadd.f32 %v10537_v42, %v5623_v52  ;;  %v9969_v19 = vpop.f32.mrf.mxu1  ;;  %v10541_v52 = vld [vmem:[#allocation21_spill] sm:$0xff] }
 0x3b8   : > { %v5628_v35 = vadd.f32 %v10541_v52, %v9754_v38 }
 0x3b9   : > { %10533 = vst [vmem:[#allocation98_spill] sm:$0xff] %v9948_v12  ;;  %v9961_v12 = vpop.f32.mrf.mxu2  ;;  %v5625_v53 = vadd.f32 %v10538_v21, %v5536_v62  ;;  %v5801_v23 = vadd.f32 %v10539_v50, %v5712_v7  ;;  %v9979_v50 = vld [vmem:[%s10418_s5] ss:$0 sm:$0xff]  ;;  %v7911_v62 = vld [vmem:[#allocation3 + $0x2c0] sm:$0xf0]  ;;  %v10542_v21 = vld [vmem:[#allocation41_spill] sm:$0xff] }
 0x3ba   : > { %v9986_v7 = vld [vmem:[%s10419_s6] ss:$0 sm:$0xff] }
 0x3be   : > { %v5610_v14 = vpop.f32.mrf.mxu3 }
 0x3bf   : > { %v9957_v33 = vadd.f32 %v5610_v14, %v9720_v29  ;;  %v9965_v29 = vpop.f32.mrf.mxu0 }
 0x3c1   : > { %10536 = vst [vmem:[#allocation18_spill] sm:$0xff] %v9957_v33  ;;  %v5714_v33 = vadd.f32 %v10540_v31, %v5625_v53  ;;  %v9971_v24 = vpop.f32.mrf.mxu2  ;;  %v5717_v53 = vadd.f32 %v10542_v21, %v5628_v35 }
 0x3c3   : > { %5928 = vmatmul.bf16.gmra.mxu3 %v7212_v8 }
 0x3c6   : > { %v5889_v0 = vpop.f32.mrf.mxu3 }
 0x3c7   : > { %v5890_v28 = vadd.f32 %v5889_v0, %v5801_v23  ;;  %v5803_v23 = vadd.f32 %v9624_v56, %v5714_v33  ;;  %v9990_v0 = vpop.f32.mrf.mxu0  ;;  %v9993_v33 = vpop.f32.mrf.mxu1 }
 0x3c9   : > { %v5979_v14 = vadd.f32 %v9745_v13, %v5890_v28  ;;  %v7247_v13 = vld [vmem:[#allocation3 + $0x2a0] sm:$0xf] }
 0x3ca   : > { %v10543_v28 = vld [vmem:[#allocation22_spill] sm:$0xff] }
 0x3cb   : > { %v6068_v5 = vadd.f32 %v9895_v55, %v5979_v14  ;;  %v7248_v55 = vor.u32 %v7911_v62, %v7247_v13  ;;  %v5630_v14 = vadd.f32 %v10543_v28, %v9765_v18  ;;  %v10548_v28 = vld [vmem:[#allocation59_spill] sm:$0xff] }
 0x3cd   : > { %v6151_v42 = vmul.f32 %v9979_v50, %v6068_v5  ;;  %v10544_v5 = vld [vmem:[#allocation56_spill] sm:$0xff] }
 0x3ce   : > { %v5891_v22 = vpop.f32.mrf.mxu3 }
 0x3cf   : > { %v5892_v8 = vadd.f32 %v5891_v22, %v5803_v23  ;;  %v6187_v31 = vadd.f32 %v9986_v7, %v6151_v42  ;;  %v5806_v23 = vadd.f32 %v10544_v5, %v5717_v53  ;;  %v10005_v18 = vpop.f32.mrf.mxu0  ;;  %v10547_v42 = vld [vmem:[#allocation23_spill] sm:$0xff] }
 0x3d1   : > { %v5981_v38 = vadd.f32 %v9760_v11, %v5892_v8  ;;  %v10000_v11 = vpop.f32.mrf.mxu2  ;;  %v6219_v62 = vmax.f32 %v6187_v31, 0.0  ;;  %v7283_v31 = vld [vmem:[#allocation3 + $0x2e8] sm:$0xf] }
 0x3d2   : > { %10545 = vst [vmem:[#allocation19_spill] sm:$0xff] %v10000_v11  ;;  %v10011_v11 = vpop.f32.mrf.mxu1 }
 0x3d3   : > { %v6070_v56 = vadd.f32 %v9902_v9, %v5981_v38  ;;  %5933 = vmatmul.bf16.gmra.mxu3 %v7248_v55  ;;  %v10546_v38 = vld [vmem:[#allocation43_spill] sm:$0xff] }
 0x3d4   : > { %v5719_v55 = vadd.f32 %v10546_v38, %v5630_v14 }
 0x3d5   : > { %v6152_v52 = vmul.f32 %v9979_v50, %v6070_v56  ;;  %v5633_v56 = vadd.f32 %v10547_v42, %v9776_v48 }
 0x3d6   : > { %v5894_v22 = vpop.f32.mrf.mxu3  ;;  %v5808_v5 = vadd.f32 %v10548_v28, %v5719_v55 }
 0x3d7   : > { %v6188_v35 = vadd.f32 %v9986_v7, %v6152_v52  ;;  %v5895_v13 = vadd.f32 %v5894_v22, %v5806_v23  ;;  %v7920_v23 = vld [vmem:[#allocation3 + $0x308] sm:$0xf0]  ;;  %v10024_v42 = vpop.f32.mrf.mxu0 }
 0x3d9   : > { %v6220_v9 = vmax.f32 %v6188_v35, 0.0  ;;  %v5984_v8 = vadd.f32 %v9771_v44, %v5895_v13  ;;  %v10013_v44 = vpop.f32.mrf.mxu2  ;;  %v7284_v13 = vor.u32 %v7920_v23, %v7283_v31  ;;  %v10551_v31 = vld [vmem:[#allocation46_spill] sm:$0xff] }
 0x3db   : > { %v6251_v21 = vpack.c.bf16 %v6220_v9, %v6219_v62  ;;  %v6073_v53 = vadd.f32 %v9911_v25, %v5984_v8  ;;  %v10549_v62 = vld [vmem:[#allocation45_spill] sm:$0xff]  ;;  %v10550_v9 = vld [vmem:[#allocation24_spill] sm:$0xff] }
 0x3dc   : > { %v5722_v48 = vadd.f32 %v10549_v62, %v5633_v56  ;;  %v5635_v8 = vadd.f32 %v10550_v9, %v9785_v59 }
 0x3dd   : > { %6339 = vmatmul.bf16.vlgmr.msra.gmra.mxu2 %v6251_v21  ;;  %v6153_v14 = vmul.f32 %v9979_v50, %v6073_v53 }
 0x3de   : > { %v5896_v52 = vpop.f32.mrf.mxu3  ;;  %v5811_v55 = vadd.f32 %v9688_v20, %v5722_v48  ;;  %v5724_v59 = vadd.f32 %v10551_v31, %v5635_v8  ;;  %v10552_v20 = vld [vmem:[#allocation25_spill] sm:$0xff]  ;;  %v7319_v48 = vld [vmem:[#allocation3 + $0x330] sm:$0xf] }
 0x3df   : > { %v5897_v22 = vadd.f32 %v5896_v52, %v5808_v5  ;;  %v6189_v21 = vadd.f32 %v9986_v7, %v6153_v14  ;;  %v10027_v5 = vpop.f32.mrf.mxu1  ;;  %v5638_v14 = vadd.f32 %v10552_v20, %v9796_v43 }
 0x3e1   : > { %v5986_v35 = vadd.f32 %v9782_v10, %v5897_v22  ;;  %v6221_v56 = vmax.f32 %v6189_v21, 0.0  ;;  %v10031_v23 = vpop.f32.mrf.mxu2  ;;  %v10553_v21 = vld [vmem:[#allocation48_spill] sm:$0xff] }
 0x3e3   : > { %v6075_v25 = vadd.f32 %v9923_v27, %v5986_v35  ;;  %5938 = vmatmul.bf16.gmra.mxu3 %v7284_v13  ;;  %v5813_v13 = vadd.f32 %v9701_v45, %v5724_v59  ;;  %v10554_v45 = vld [vmem:[#allocation26_spill] sm:$0xff] }
 0x3e5   : > { %v6154_v38 = vmul.f32 %v9979_v50, %v6075_v25  ;;  %v7929_v25 = vld [vmem:[#allocation3 + $0x350] sm:$0xf0] }
 0x3e6   : > { %v5899_v53 = vpop.f32.mrf.mxu3 }
 0x3e7   : > { %v5900_v28 = vadd.f32 %v5899_v53, %v5811_v55  ;;  %v6190_v10 = vadd.f32 %v9986_v7, %v6154_v38  ;;  %v7320_v55 = vor.u32 %v7929_v25, %v7319_v48  ;;  %v5727_v53 = vadd.f32 %v10553_v21, %v5638_v14  ;;  %v10557_v25 = vld [vmem:[#allocation27_spill] sm:$0xff] }
 0x3e9   : > { %v5989_v27 = vadd.f32 %v9793_v46, %v5900_v28  ;;  %v6222_v52 = vmax.f32 %v6190_v10, 0.0  ;;  %v10037_v46 = vpop.f32.mrf.mxu0  ;;  %v10042_v28 = vpop.f32.mrf.mxu1  ;;  %v5640_v10 = vadd.f32 %v10554_v45, %v9801_v15 }
 0x3eb   : > { %v6252_v22 = vpack.c.bf16 %v6222_v52, %v6221_v56  ;;  %v6078_v35 = vadd.f32 %v9930_v6, %v5989_v27  ;;  %v10045_v6 = vpop.f32.mrf.mxu2  ;;  %v10555_v56 = vld [vmem:[#allocation66_spill] sm:$0xff] }
 0x3ec   : > { %v5816_v52 = vadd.f32 %v10555_v56, %v5727_v53  ;;  %v7355_v53 = vld [vmem:[#allocation3 + $0x378] sm:$0xf] }
 0x3ed   : > { %6344 = vmatmul.bf16.gmra.mxu2 %v6252_v22  ;;  %v6155_v38 = vmul.f32 %v9979_v50, %v6078_v35  ;;  %v10556_v35 = vld [vmem:[#allocation50_spill] sm:$0xff] }
 0x3ee   : > { %v5901_v62 = vpop.f32.mrf.mxu3 }
 0x3ef   : > { %v5902_v9 = vadd.f32 %v5901_v62, %v5813_v13  ;;  %v6191_v31 = vadd.f32 %v9986_v7, %v6155_v38  ;;  %v5729_v13 = vadd.f32 %v10556_v35, %v5640_v10 }
 0x3f1   : > { %v5991_v8 = vadd.f32 %v9803_v63, %v5902_v9  ;;  %v6223_v14 = vmax.f32 %v6191_v31, 0.0  ;;  %v10055_v62 = vpop.f32.mrf.mxu0  ;;  %v10057_v15 = vpop.f32.mrf.mxu1  ;;  %v5643_v9 = vadd.f32 %v10557_v25, %v9808_v16 }
 0x3f3   : > { %v6080_v43 = vadd.f32 %v9937_v47, %v5991_v8  ;;  %5943 = vmatmul.bf16.gmra.mxu3 %v7320_v55  ;;  %v10558_v8 = vld [vmem:[#allocation69_spill] sm:$0xff]  ;;  %v10063_v21 = vpop.f32.mrf.mxu2 }
 0x3f4   : > { %v5818_v55 = vadd.f32 %v10558_v8, %v5729_v13 }
 0x3f5   : > { %v6156_v27 = vmul.f32 %v9979_v50, %v6080_v43  ;;  %v7938_v43 = vld [vmem:[#allocation3 + $0x398] sm:$0xf0] }
 0x3f6   : > { %v5904_v63 = vpop.f32.mrf.mxu3  ;;  %v7356_v56 = vor.u32 %v7938_v43, %v7355_v53 }
 0x3f7   : > { %v5905_v59 = vadd.f32 %v5904_v63, %v5816_v52  ;;  %v6192_v22 = vadd.f32 %v9986_v7, %v6156_v27  ;;  %v10559_v52 = vld [vmem:[#allocation53_spill] sm:$0xff]  ;;  %v10560_v63 = vld [vmem:[#allocation28_spill] sm:$0xff] }
 0x3f8   : > { %v5732_v31 = vadd.f32 %v10559_v52, %v5643_v9 }
 0x3f9   : > { %v5994_v20 = vadd.f32 %v9965_v29, %v5905_v59  ;;  %v6224_v47 = vmax.f32 %v6192_v22, 0.0  ;;  %v5645_v59 = vadd.f32 %v10560_v63, %v9817_v49  ;;  %v10563_v63 = vld [vmem:[#allocation58_spill] sm:$0xff] }
 0x3fb   : > { %v6253_v48 = vpack.c.bf16 %v6224_v47, %v6223_v14  ;;  %v6083_v38 = vadd.f32 %v9969_v19, %v5994_v20  ;;  %v10069_v19 = vpop.f32.mrf.mxu0  ;;  %v5821_v20 = vadd.f32 %v9893_v26, %v5732_v31  ;;  %v10076_v47 = vpop.f32.mrf.mxu1  ;;  %v10562_v26 = vld [vmem:[#allocation29_spill] sm:$0xff] }
 0x3fd   : > { %6349 = vmatmul.bf16.gmra.mxu2 %v6253_v48  ;;  %v6157_v10 = vmul.f32 %v9979_v50, %v6083_v38  ;;  %v10079_v48 = vpop.f32.mrf.mxu2  ;;  %v10561_v38 = vld [vmem:[#allocation55_spill] sm:$0xff] }
 0x3fe   : > { %v5906_v29 = vpop.f32.mrf.mxu3  ;;  %v5734_v49 = vadd.f32 %v10561_v38, %v5645_v59 }
 0x3ff   : > { %v5907_v45 = vadd.f32 %v5906_v29, %v5818_v55  ;;  %v6193_v14 = vadd.f32 %v9986_v7, %v6157_v10  ;;  %v5648_v29 = vadd.f32 %v10562_v26, %v9820_v3 }
 0x400   : > { %v5823_v43 = vadd.f32 %v9900_v57, %v5734_v49  ;;  %v3152_v49 = vld [vmem:[#allocation2 + $0xd0] sm:$0xf] }
 0x401   : > { %v5996_v27 = vadd.f32 %v9990_v0, %v5907_v45  ;;  %v6225_v25 = vmax.f32 %v6193_v14, 0.0  ;;  %v5737_v3 = vadd.f32 %v10563_v63, %v5648_v29  ;;  %v3647_v29 = vld [vmem:[#allocation2 + $0xcc] sm:$0xe]  ;;  %v3649_v63 = vld [vmem:[#allocation2 + $0xd4] sm:$0x1] }
 0x403   : > { %v6085_v16 = vadd.f32 %v9993_v33, %v5996_v27  ;;  %5948 = vmatmul.bf16.gmra.mxu3 %v7356_v56  ;;  %v10088_v45 = vpop.f32.mrf.mxu0  ;;  %v7391_v27 = vld [vmem:[#allocation3 + $0x3c0] sm:$0xf]  ;;  %v10090_v52 = vpop.f32.mrf.mxu1 }
 0x405   : > { %v6158_v22 = vmul.f32 %v9979_v50, %v6085_v16  ;;  %v10095_v59 = vpop.f32.mrf.mxu2 }
 0x406   : > { %v5909_v0 = vpop.f32.mrf.mxu3 }
 0x407   : > { %v5910_v35 = vadd.f32 %v5909_v0, %v5821_v20  ;;  %v6194_v13 = vadd.f32 %v9986_v7, %v6158_v22  ;;  %v10564_v22 = vld [vmem:[#allocation30_spill] sm:$0xff] }
 0x408   : > { %v5650_v57 = vadd.f32 %v10564_v22, %v9829_v39 }
 0x409   : > { %v5999_v33 = vadd.f32 %v10005_v18, %v5910_v35  ;;  %v6226_v9 = vmax.f32 %v6194_v13, 0.0  ;;  %v7947_v18 = vld [vmem:[#allocation3 + $0x3e0] sm:$0xf0]  ;;  %v5826_v35 = vadd.f32 %v9907_v30, %v5737_v3  ;;  %v3072_v13 = vld [vmem:[#allocation2 + $0xcc] sm:$0xf]  ;;  %v3528_v30 = vshrl.u32 %v3152_v49, 16 }
 0x40a   : > { %v7392_v16 = vor.u32 %v7947_v18, %v7391_v27  ;;  %3104 = vst [vmem:[#allocation3 + $0x450] sm:$0xf] %v3072_v13  ;;  %v3648_v27 = vld [vmem:[#allocation2 + $0xd0] sm:$0xf]  ;;  %v6896_v18 = vrot.slane %v3647_v29, 9  ;;  %v3808_v13 = vrot.slane %v3649_v63, 5 }
 0x40b   : > { %v6088_v8 = vadd.f32 %v10011_v11, %v5999_v33  ;;  %v6254_v55 = vpack.c.bf16 %v6226_v9, %v6225_v25  ;;  %v3073_v33 = vld [vmem:[#allocation2 + $0xd0] sm:$0xf]  ;;  %v3151_v25 = vld [vmem:[#allocation2 + $0xcc] sm:$0xf]  ;;  %v10107_v3 = vpop.f32.mrf.mxu1  ;;  %v7956_v29 = vld [vmem:[#allocation3 + $0x428] sm:$0xf0] }
 0x40c   : > { %v10565_v9 = vld [vmem:[#allocation61_spill] sm:$0xff]  ;;  %3105 = vst [vmem:[#allocation3 + $0x474] sm:$0xf] %v3073_v33  ;;  %v3518_v26 = vshll.u32 %v3151_v25, 16 }
 0x40d   : > { %v6159_v53 = vmul.f32 %v9979_v50, %v6088_v8  ;;  %6354 = vmatmul.bf16.gmra.mxu2 %v6254_v55  ;;  %v5739_v38 = vadd.f32 %v10565_v9, %v5650_v57  ;;  %v3153_v8 = vld [vmem:[#allocation2 + $0xd4] sm:$0x1]  ;;  %v3530_v57 = vrot.slane %v3528_v30, 4  ;;  %v10109_v33 = vpop.f32.mrf.mxu2 }
 0x40e   : > { %v5911_v10 = vpop.f32.mrf.mxu3 }
 0x40f   : > { %v5912_v56 = vadd.f32 %v5911_v10, %v5823_v43  ;;  %v6195_v31 = vadd.f32 %v9986_v7, %v6159_v53  ;;  %v10104_v53 = vpop.f32.mrf.mxu0  ;;  %v3524_v43 = vshll.u32 %v3152_v49, 16  ;;  %v3534_v10 = vshll.u32 %v3153_v8, 16  ;;  %v10566_v49 = vld [vmem:[#allocation31_spill] sm:$0xff] }
 0x410   : > { %v5653_v8 = vadd.f32 %v10566_v49, %v9834_v36 }
 0x411   : > { %v6001_v11 = vadd.f32 %v10024_v42, %v5912_v56  ;;  %v6227_v14 = vmax.f32 %v6195_v31, 0.0  ;;  %v3526_v22 = vrot.slane %v3524_v43, 5 }
 0x413   : > { %v6090_v20 = vadd.f32 %v10027_v5, %v6001_v11  ;;  %5953 = vmatmul.bf16.gmra.mxu3 %v7392_v16  ;;  %v3515_v5 = vshrl.u32 %v3151_v25, 16  ;;  %v3520_v16 = vrot.slane %v3518_v26, 5  ;;  %v3531_v25 = vor.u32 %v3530_v57, %v3526_v22  ;;  %v7427_v26 = vld [vmem:[#allocation3 + $0x408] sm:$0xf]  ;;  %v10131_v63 = vpop.f32.mrf.mxu1 }
 0x415   : > { %v6160_v0 = vmul.f32 %v9979_v50, %v6090_v20  ;;  %v3517_v11 = vrot.slane %v3515_v5, 4  ;;  %v3805_v20 = vrot.slane %v3648_v27, 5  ;;  %v3532_v43 = vrot.slane %v3531_v25, 4 }
 0x416   : > { %v5914_v42 = vpop.f32.mrf.mxu3 }
 0x417   : > { %v5915_v55 = vadd.f32 %v5914_v42, %v5826_v35  ;;  %v6196_v39 = vadd.f32 %v9986_v7, %v6160_v0  ;;  %v3521_v35 = vor.u32 %v3520_v16, %v3517_v11  ;;  %v3536_v42 = vrot.slane %v3534_v10, 5  ;;  %v10568_v11 = vld [vmem:[#allocation32_spill] sm:$0xff] }
 0x418   : > { %v3806_v9 = vsel %vm8776_vm8, %v6896_v18, %v3805_v20  ;;  %v10567_v18 = vld [vmem:[#allocation63_spill] sm:$0xff]  ;;  %v5655_v16 = vadd.f32 %v10568_v11, %v9847_v61 }
 0x419   : > { %v6004_v56 = vadd.f32 %v10037_v46, %v5915_v55  ;;  %v6228_v31 = vmax.f32 %v6196_v39, 0.0  ;;  %v3807_v46 = vrot.slane %v3805_v20, 4  ;;  %v5828_v39 = vadd.f32 %v9921_v51, %v5739_v38  ;;  %3872 = vst [vmem:[#allocation3 + $0x458] sm:$0xf] %v3806_v9  ;;  %v10136_v20 = vpop.f32.mrf.mxu2  ;;  %v10569_v9 = vld [vmem:[#allocation65_spill] sm:$0xff] }
 0x41a   : > { %v3522_v5 = vrot.slane %v3521_v35, 4  ;;  %v3537_v36 = vsel %vm8698_vm2, %v3532_v43, %v3536_v42  ;;  %v7428_v38 = vor.u32 %v7956_v29, %v7427_v26  ;;  %v5744_v61 = vadd.f32 %v10569_v9, %v5655_v16  ;;  %v7965_v26 = vld [vmem:[#allocation3 + $0x470] sm:$0xf0]  ;;  %v10570_v29 = vld [vmem:[#allocation33_spill] sm:$0xff]  ;;  %v10574_v9 = vld [vmem:[#allocation35_spill] sm:$0xff] }
 0x41b   : > { %v6255_v0 = vpack.c.bf16 %v6228_v31, %v6227_v14  ;;  %v6093_v55 = vadd.f32 %v10042_v28, %v6004_v56  ;;  %v3809_v30 = vsel %vm8776_vm8, %v3807_v46, %v3808_v13  ;;  %v5742_v56 = vadd.f32 %v10567_v18, %v5653_v8  ;;  %3601 = vst [vmem:[#allocation3 + $0x478] sm:$0xf] %v3537_v36  ;;  %v10126_v31 = vpop.f32.mrf.mxu0 }
 0x41c   : > { %v3527_v27 = vsel %vm8698_vm2, %v3522_v5, %v3526_v22  ;;  %3873 = vst [vmem:[#allocation3 + $0x47c] sm:$0xf] %v3809_v30  ;;  %v5658_v43 = vadd.f32 %v10570_v29, %v9852_v2  ;;  %v10572_v2 = vld [vmem:[#allocation34_spill] sm:$0xff] }
 0x41d   : > { %6359 = vmatmul.bf16.gmra.mxu2 %v6255_v0  ;;  %3600 = vst [vmem:[#allocation3 + $0x454] sm:$0xf] %v3527_v27  ;;  %v6161_v51 = vmul.f32 %v9979_v50, %v6093_v55  ;;  %v5831_v57 = vadd.f32 %v9928_v40, %v5742_v56  ;;  %v6107_v27 = vpop.f32.mrf.mxu1  ;;  %v10571_v56 = vld [vmem:[#allocation68_spill] sm:$0xff] }
 0x41e   : > { %v5916_v14 = vpop.f32.mrf.mxu3 }
 0x41f   : > { %v5917_v10 = vadd.f32 %v5916_v14, %v5828_v39  ;;  %v7463_v14 = vld [vmem:[#allocation3 + $0x450] sm:$0xf] }
 0x420   : > { %v7471_v54 = vld [vmem:[#allocation3 + $0x458] sm:$0xf] }
 0x421   : > { %v6006_v28 = vadd.f32 %v10055_v62, %v5917_v10  ;;  %v6197_v62 = vadd.f32 %v9986_v7, %v6161_v51  ;;  %v5833_v10 = vadd.f32 %v9935_v34, %v5744_v61  ;;  %v7464_v51 = vor.u32 %v7965_v26, %v7463_v14 }
 0x422   : > { %v7465_v46 = vld [vmem:[#allocation3 + $0x474] sm:$0xf0] }
 0x423   : > { %v6095_v58 = vadd.f32 %v10057_v15, %v6006_v28  ;;  %5958 = vmatmul.bf16.gmra.mxu3 %v7428_v38  ;;  %v7966_v35 = vld [vmem:[#allocation3 + $0x478] sm:$0xf0]  ;;  %v6229_v8 = vmax.f32 %v6197_v62, 0.0  ;;  %v6018_v5 = vpop.f32.mrf.mxu0  ;;  %v10145_v28 = vpop.f32.mrf.mxu2 }
 0x424   : > { %v7961_v25 = vld [vmem:[#allocation3 + $0x454] sm:$0xf]  ;;  %v7472_v42 = vor.u32 %v7966_v35, %v7471_v54 }
 0x425   : > { %v6162_v22 = vmul.f32 %v9979_v50, %v6095_v58  ;;  %v7468_v39 = vor.u32 %v7961_v25, %v7465_v46  ;;  %v5747_v58 = vadd.f32 %v10571_v56, %v5658_v43  ;;  %v10577_v56 = vld [vmem:[#allocation73_spill] sm:$0xff] }
 0x426   : > { %v5919_v0 = vpop.f32.mrf.mxu3  ;;  %6141 = vmatmul.bf16.gmra.mxu1 %v7472_v42 }
 0x427   : > { %v5920_v13 = vadd.f32 %v5919_v0, %v5831_v57  ;;  %v6198_v15 = vadd.f32 %v9986_v7, %v6162_v22  ;;  %6052 = vmatmul.bf16.gmra.mxu0 %v7468_v39  ;;  %v5836_v16 = vadd.f32 %v9942_v41, %v5747_v58  ;;  %v5663_v41 = vadd.f32 %v10574_v9, %v9864_v17  ;;  %v10576_v17 = vld [vmem:[#allocation36_spill] sm:$0xff] }
 0x429   : > { %v6009_v49 = vadd.f32 %v10069_v19, %v5920_v13  ;;  %v6230_v55 = vmax.f32 %v6198_v15, 0.0  ;;  %v10573_v15 = vld [vmem:[#allocation71_spill] sm:$0xff] }
 0x42b   : > { %v6256_v40 = vpack.c.bf16 %v6230_v55, %v6229_v8  ;;  %v6098_v30 = vadd.f32 %v10076_v47, %v6009_v49  ;;  %v5660_v47 = vadd.f32 %v10572_v2, %v9859_v37  ;;  %v6020_v22 = vpop.f32.mrf.mxu0  ;;  %v10159_v42 = vpop.f32.mrf.mxu2 }
 0x42d   : > { %6364 = vmatmul.bf16.gmra.mxu2 %v6256_v40  ;;  %v6163_v38 = vmul.f32 %v9979_v50, %v6098_v30  ;;  %v5749_v25 = vadd.f32 %v10573_v15, %v5660_v47  ;;  %v10575_v40 = vld [vmem:[#allocation72_spill] sm:$0xff] }
 0x42e   : > { %v5921_v36 = vpop.f32.mrf.mxu3  ;;  %v5752_v14 = vadd.f32 %v10575_v40, %v5663_v41  ;;  %v10580_v15 = vld [vmem:[#allocation40_spill] sm:$0xff] }
 0x42f   : > { %v5922_v19 = vadd.f32 %v5921_v36, %v5833_v10  ;;  %v6199_v54 = vadd.f32 %v9986_v7, %v6163_v38  ;;  %v5838_v46 = vadd.f32 %v9950_v4, %v5749_v25  ;;  %v5670_v25 = vadd.f32 %v10580_v15, %v9883_v1  ;;  %v10583_v1 = vld [vmem:[#allocation87_spill] sm:$0xff]  ;;  %v10588_v15 = vld [vmem:[#allocation77_spill] sm:$0xff] }
 0x430   : > { %v5841_v4 = vadd.f32 %v9961_v12, %v5752_v14  ;;  %v10584_v14 = vld [vmem:[#allocation42_spill] sm:$0xff] }
 0x431   : > { %v6011_v18 = vadd.f32 %v10088_v45, %v5922_v19  ;;  %v6109_v45 = vpop.f32.mrf.mxu1  ;;  %v6231_v13 = vmax.f32 %v6199_v54, 0.0 }
 0x433   : > { %v6100_v11 = vadd.f32 %v10090_v52, %v6011_v18  ;;  %5963 = vmatmul.bf16.gmra.mxu3 %v7464_v51  ;;  %v6023_v55 = vpop.f32.mrf.mxu0  ;;  %v10169_v43 = vpop.f32.mrf.mxu2 }
 0x435   : > { %v6164_v34 = vmul.f32 %v9979_v50, %v6100_v11 }
 0x436   : > { %v5924_v57 = vpop.f32.mrf.mxu3 }
 0x437   : > { %v5925_v62 = vadd.f32 %v5924_v57, %v5836_v16  ;;  %v6200_v0 = vadd.f32 %v9986_v7, %v6164_v34 }
 0x439   : > { %v6014_v35 = vadd.f32 %v10104_v53, %v5925_v62  ;;  %v6232_v52 = vmax.f32 %v6200_v0, 0.0  ;;  %v6112_v26 = vpop.f32.mrf.mxu1  ;;  %v10579_v0 = vld [vmem:[#allocation74_spill] sm:$0xff] }
 0x43b   : > { %v6257_v37 = vpack.c.bf16 %v6232_v52, %v6231_v13  ;;  %v6103_v61 = vadd.f32 %v10107_v3, %v6014_v35  ;;  %v5665_v3 = vadd.f32 %v10576_v17, %v9873_v32  ;;  %v6025_v58 = vpop.f32.mrf.mxu0  ;;  %v10578_v32 = vld [vmem:[#allocation38_spill] sm:$0xff]  ;;  %v10181_v16 = vpop.f32.mrf.mxu2 }
 0x43c   : > { %v5668_v47 = vadd.f32 %v10578_v32, %v9878_v60 }
 0x43d   : > { %6369 = vmatmul.bf16.gmra.mxu2 %v6257_v37  ;;  %v6165_v53 = vmul.f32 %v9979_v50, %v6103_v61 }
 0x43e   : > { %v5926_v49 = vpop.f32.mrf.mxu3  ;;  %v5757_v35 = vadd.f32 %v10579_v0, %v5668_v47  ;;  %v431_v47 = vld [vmem:[%s8647_s4] sm:$0xff]  }
 0x43f   : > { %v5927_v8 = vadd.f32 %v5926_v49, %v5838_v46  ;;  %v6201_v10 = vadd.f32 %v9986_v7, %v6165_v53  ;;  %v10582_v53 = vld [vmem:[#allocation75_spill] sm:$0xff] }
 0x441   : > { %v6016_v39 = vadd.f32 %v10126_v31, %v5927_v8  ;;  %v6233_v38 = vmax.f32 %v6201_v10, 0.0  ;;  %v6114_v2 = vpop.f32.mrf.mxu1 }
 0x443   : > { %v6105_v29 = vadd.f32 %v10131_v63, %v6016_v39  ;;  %v5754_v63 = vadd.f32 %v10577_v56, %v5665_v3  ;;  %v6028_v52 = vpop.f32.mrf.mxu0  ;;  %v10191_v49 = vpop.f32.mrf.mxu2  ;;  %v5759_v39 = vadd.f32 %v10582_v53, %v5670_v25 }
 0x445   : > { %v6166_v30 = vmul.f32 %v9979_v50, %v6105_v29  ;;  %v5843_v12 = vadd.f32 %v9971_v24, %v5754_v63  ;;  %v5673_v29 = vadd.f32 %v10584_v14, %v10583_v1  ;;  %v5848_v3 = vadd.f32 %v10013_v44, %v5759_v39  ;;  %v10208_v44 = vld [vmem:[%s10422_s9] ss:$0 sm:$0xff]  ;;  %v10586_v63 = vld [vmem:[#allocation89_spill] sm:$0xff] }
 0x446   : > { %v5929_v36 = vpop.f32.mrf.mxu3 }
 0x447   : > { %v5930_v19 = vadd.f32 %v5929_v36, %v5841_v4  ;;  %v6202_v31 = vadd.f32 %v9986_v7, %v6166_v30 }
 0x449   : > { %v6019_v51 = vadd.f32 %v6018_v5, %v5930_v19  ;;  %v6234_v18 = vmax.f32 %v6202_v31, 0.0  ;;  %v6117_v9 = vpop.f32.mrf.mxu1 }
 0x44b   : > { %v6258_v11 = vpack.c.bf16 %v6234_v18, %v6233_v38  ;;  %v6108_v34 = vadd.f32 %v6107_v27, %v6019_v51  ;;  %v10581_v27 = vld [vmem:[#allocation19_spill] sm:$0xff]  ;;  %v6030_v30 = vpop.f32.mrf.mxu0  ;;  %v10585_v38 = vld [vmem:[#allocation76_spill] sm:$0xff] }
 0x44c   : > { %v5846_v37 = vadd.f32 %v10581_v27, %v5757_v35  ;;  %v5762_v18 = vadd.f32 %v10585_v38, %v5673_v29  ;;  %v464_v35 = vunpack.c.h.bf16 %v431_v47  ;;  %v10592_v38 = vld [vmem:[#allocation91_spill] sm:$0xff] }
 0x44d   : > { %6374 = vmatmul.bf16.gmra.mxu2 %v6258_v11  ;;  %v6167_v5 = vmul.f32 %v9979_v50, %v6108_v34  ;;  %v10587_v11 = vld [vmem:[#allocation44_spill] sm:$0xff] }
 0x44e   : > { %v5931_v54 = vpop.f32.mrf.mxu3  ;;  %v5675_v32 = vadd.f32 %v10587_v11, %v10586_v63  ;;  %v433_v63 = vld [vmem:[%s8647_s4 + $0x8] sm:$0xff]  }
 0x44f   : > { %v5932_v57 = vadd.f32 %v5931_v54, %v5843_v12  ;;  %v6203_v24 = vadd.f32 %v9986_v7, %v6167_v5  ;;  %v5851_v12 = vadd.f32 %v10031_v23, %v5762_v18  ;;  %v10593_v18 = vld [vmem:[#allocation49_spill] sm:$0xff] }
 0x450   : > { %v5764_v25 = vadd.f32 %v10588_v15, %v5675_v32 }
 0x451   : > { %v6021_v62 = vadd.f32 %v6020_v22, %v5932_v57  ;;  %v6235_v8 = vmax.f32 %v6203_v24, 0.0  ;;  %v6119_v36 = vpop.f32.mrf.mxu1  ;;  %v463_v57 = vunpack.c.l.bf16 %v431_v47 }
 0x453   : > { %v6110_v13 = vadd.f32 %v6109_v45, %v6021_v62  ;;  %v6033_v0 = vpop.f32.mrf.mxu0 }
 0x455   : > { %v6168_v60 = vmul.f32 %v9979_v50, %v6110_v13 }
 0x456   : > { %v5934_v41 = vpop.f32.mrf.mxu3 }
 0x457   : > { %v5935_v61 = vadd.f32 %v5934_v41, %v5846_v37  ;;  %v6204_v46 = vadd.f32 %v9986_v7, %v6168_v60 }
 0x459   : > { %v6024_v22 = vadd.f32 %v6023_v55, %v5935_v61  ;;  %v6236_v45 = vmax.f32 %v6204_v46, 0.0  ;;  %v10200_v55 = vld [vmem:[%s10421_s8] ss:$0 sm:$0xff]  ;;  %v6122_v23 = vpop.f32.mrf.mxu1 }
 0x45b   : > { %v6259_v40 = vpack.c.bf16 %v6236_v45, %v6235_v8  ;;  %v6113_v17 = vadd.f32 %v6112_v26, %v6024_v22  ;;  %v10589_v22 = vld [vmem:[#allocation90_spill] sm:$0xff]  ;;  %v10590_v8 = vld [vmem:[#allocation47_spill] sm:$0xff] }
 0x45c   : > { %v5678_v45 = vadd.f32 %v10590_v8, %v10589_v22 }
 0x45d   : > { %6379 = vmatmul.bf16.gmra.mxu2 %v6259_v40  ;;  %v6169_v31 = vmul.f32 %v9979_v50, %v6113_v17  ;;  %v5853_v40 = vadd.f32 %v10045_v6, %v5764_v25 }
 0x45e   : > { %v5936_v4 = vpop.f32.mrf.mxu3 }
 0x45f   : > { %v5937_v10 = vadd.f32 %v5936_v4, %v5848_v3 }
 0x460   : > { %v6340_v19 = vpop.f32.mrf.mxu2 }
 0x461   : > { %v6026_v51 = vadd.f32 %v6025_v58, %v5937_v10  ;;  %v6424_v56 = vmul.f32 %v10200_v55, %v6340_v19  ;;  %v6205_v58 = vadd.f32 %v9986_v7, %v6169_v31  ;;  %v10591_v19 = vld [vmem:[#allocation78_spill] sm:$0xff] }
 0x462   : > { %v5767_v31 = vadd.f32 %v10591_v19, %v5678_v45 }
 0x463   : > { %v6115_v26 = vadd.f32 %v6114_v2, %v6026_v51  ;;  %v6460_v2 = vadd.f32 %v10208_v44, %v6424_v56  ;;  %v6237_v37 = vmax.f32 %v6205_v58, 0.0  ;;  %v6035_v51 = vpop.f32.mrf.mxu0  ;;  %v6124_v56 = vpop.f32.mrf.mxu1 }
 0x465   : > { %v6170_v34 = vmul.f32 %v9979_v50, %v6115_v26  ;;  %v6492_v41 = vadd.f32 %v6460_v2, %v463_v57  ;;  %v5680_v26 = vadd.f32 %v10593_v18, %v10592_v38  ;;  %v10594_v2 = vld [vmem:[#allocation79_spill] sm:$0xff] }
 0x466   : > { %v5939_v54 = vpop.f32.mrf.mxu3 }
 0x467   : > { %v5940_v5 = vadd.f32 %v5939_v54, %v5851_v12  ;;  %v6206_v62 = vadd.f32 %v9986_v7, %v6170_v34  ;;  %v465_v34 = vunpack.c.l.bf16 %v433_v63  ;;  %v466_v54 = vunpack.c.h.bf16 %v433_v63 }
 0x468   : > { %v6342_v13 = vpop.f32.mrf.mxu2 }
 0x469   : > { %v6029_v60 = vadd.f32 %v6028_v52, %v5940_v5  ;;  %v6425_v27 = vmul.f32 %v10200_v55, %v6342_v13  ;;  %v6238_v24 = vmax.f32 %v6206_v62, 0.0  ;;  %v6524_v52 = vmax.f32 %v6492_v41, 0.0 }
 0x46a   : > { %v5769_v5 = vadd.f32 %v10594_v2, %v5680_v26 }
 0x46b   : > { %v6461_v61 = vadd.f32 %v10208_v44, %v6425_v27  ;;  %v6260_v46 = vpack.c.bf16 %v6238_v24, %v6237_v37  ;;  %v6118_v53 = vadd.f32 %v6117_v9, %v6029_v60  ;;  %v6038_v27 = vpop.f32.mrf.mxu0  ;;  %v10595_v37 = vld [vmem:[#allocation92_spill] sm:$0xff] }
 0x46c   : > { %v10596_v24 = vld [vmem:[#allocation52_spill] sm:$0xff]  ;;  %v5858_v22 = vadd.f32 %v10079_v48, %v5769_v5  ;;  %v10601_v5 = vld [vmem:[#allocation94_spill] sm:$0xff] }
 0x46d   : > { %v6493_v39 = vadd.f32 %v6461_v61, %v464_v35  ;;  %6384 = vmatmul.bf16.gmra.mxu2 %v6260_v46  ;;  %v6171_v3 = vmul.f32 %v9979_v50, %v6118_v53  ;;  %v5683_v41 = vadd.f32 %v10596_v24, %v10595_v37  ;;  %v435_v48 = vld [vmem:[%s8647_s4 + $0x10] sm:$0xff]  }
 0x46e   : > { %v5941_v1 = vpop.f32.mrf.mxu3  ;;  %v467_v26 = vunpack.c.l.bf16 %v435_v48 }
 0x46f   : > { %v6525_v14 = vmax.f32 %v6493_v39, 0.0  ;;  %v5942_v29 = vadd.f32 %v5941_v1, %v5853_v40  ;;  %v6207_v32 = vadd.f32 %v9986_v7, %v6171_v3 }
 0x470   : > { %v6345_v17 = vpop.f32.mrf.mxu2 }
 0x471   : > { %v8051_v4 = vpack.c.bf16 %v6525_v14, %v6524_v52  ;;  %v6031_v10 = vadd.f32 %v6030_v30, %v5942_v29  ;;  %v6426_v6 = vmul.f32 %v10200_v55, %v6345_v17  ;;  %v5856_v30 = vadd.f32 %v10063_v21, %v5767_v31  ;;  %v10597_v29 = vld [vmem:[#allocation80_spill] sm:$0xff] }
 0x472   : > { %v6239_v13 = vmax.f32 %v6207_v32, 0.0  ;;  %v5772_v17 = vadd.f32 %v10597_v29, %v5683_v41 }
 0x473   : > { %8052 = vst [vmem:[%s10228_s28] sm:$0xff] %v8051_v4   ;;  %v6120_v9 = vadd.f32 %v6119_v36, %v6031_v10  ;;  %v6462_v12 = vadd.f32 %v10208_v44, %v6426_v6  ;;  %v10598_v4 = vld [vmem:[#allocation93_spill] sm:$0xff]  ;;  %v10599_v10 = vld [vmem:[#allocation54_spill] sm:$0xff]  ;;  %v6040_v38 = vpop.f32.mrf.mxu0 }
 0x474   : > { %v5685_v19 = vadd.f32 %v10599_v10, %v10598_v4 }
 0x475   : > { %v6172_v11 = vmul.f32 %v9979_v50, %v6120_v9  ;;  %v6494_v25 = vadd.f32 %v6462_v12, %v465_v34  ;;  %v5861_v9 = vadd.f32 %v10095_v59, %v5772_v17 }
 0x476   : > { %v5944_v47 = vpop.f32.mrf.mxu3 }
 0x477   : > { %v5945_v58 = vadd.f32 %v5944_v47, %v5856_v30  ;;  %v6208_v36 = vadd.f32 %v9986_v7, %v6172_v11  ;;  %v6526_v45 = vmax.f32 %v6494_v25, 0.0  ;;  %v468_v30 = vunpack.c.h.bf16 %v435_v48  ;;  %v10600_v47 = vld [vmem:[#allocation81_spill] sm:$0xff] }
 0x478   : > { %v6347_v57 = vpop.f32.mrf.mxu2  ;;  %v5774_v34 = vadd.f32 %v10600_v47, %v5685_v19  ;;  %v10608_v47 = vld [vmem:[#allocation62_spill] sm:$0xff] }
 0x479   : > { %v6034_v62 = vadd.f32 %v6033_v0, %v5945_v58  ;;  %v6427_v35 = vmul.f32 %v10200_v55, %v6347_v57  ;;  %v6240_v15 = vmax.f32 %v6208_v36, 0.0  ;;  %v6127_v0 = vpop.f32.mrf.mxu1 }
 0x47a   : > { %v5863_v25 = vadd.f32 %v10109_v33, %v5774_v34  ;;  %v10605_v33 = vld [vmem:[#allocation60_spill] sm:$0xff] }
 0x47b   : > { %v6463_v21 = vadd.f32 %v10208_v44, %v6427_v35  ;;  %v6261_v60 = vpack.c.bf16 %v6240_v15, %v6239_v13  ;;  %v6123_v61 = vadd.f32 %v6122_v23, %v6034_v62  ;;  %v10602_v62 = vld [vmem:[#allocation57_spill] sm:$0xff]  ;;  %v6043_v24 = vpop.f32.mrf.mxu0 }
 0x47c   : > { %v5688_v35 = vadd.f32 %v10602_v62, %v10601_v5 }
 0x47d   : > { %v6495_v46 = vadd.f32 %v6463_v21, %v466_v54  ;;  %6389 = vmatmul.bf16.gmra.mxu2 %v6261_v60  ;;  %v6173_v1 = vmul.f32 %v9979_v50, %v6123_v61 }
 0x47e   : > { %v5946_v8 = vpop.f32.mrf.mxu3 }
 0x47f   : > { %v6527_v53 = vmax.f32 %v6495_v46, 0.0  ;;  %v5947_v39 = vadd.f32 %v5946_v8, %v5858_v22  ;;  %v6209_v6 = vadd.f32 %v9986_v7, %v6173_v1  ;;  %v10603_v8 = vld [vmem:[#allocation82_spill] sm:$0xff] }
 0x480   : > { %v6350_v40 = vpop.f32.mrf.mxu2 }
 0x481   : > { %v8056_v52 = vpack.c.bf16 %v6527_v53, %v6526_v45  ;;  %v6036_v14 = vadd.f32 %v6035_v51, %v5947_v39  ;;  %v6428_v23 = vmul.f32 %v10200_v55, %v6350_v40  ;;  %v6129_v11 = vpop.f32.mrf.mxu1  ;;  %v6241_v36 = vmax.f32 %v6209_v6, 0.0  ;;  %v10604_v40 = vld [vmem:[#allocation95_spill] sm:$0xff] }
 0x482   : > { %v5777_v45 = vadd.f32 %v10603_v8, %v5688_v35  ;;  %v5690_v1 = vadd.f32 %v10605_v33, %v10604_v40 }
 0x483   : > { %8128 = vst [vmem:[%s10228_s28 + $0x8] sm:$0xff] %v8056_v52   ;;  %v6125_v3 = vadd.f32 %v6124_v56, %v6036_v14  ;;  %v6464_v51 = vadd.f32 %v10208_v44, %v6428_v23  ;;  %v437_v52 = vld [vmem:[%s8647_s4 + $0x18] sm:$0xff]  }
 0x484   : > { %v5866_v29 = vadd.f32 %v10136_v20, %v5777_v45  ;;  %v469_v23 = vunpack.c.l.bf16 %v437_v52  ;;  %v470_v48 = vunpack.c.h.bf16 %v437_v52  ;;  %v10612_v52 = vld [vmem:[#allocation85_spill] sm:$0xff] }
 0x485   : > { %v6174_v31 = vmul.f32 %v9979_v50, %v6125_v3  ;;  %v6496_v54 = vadd.f32 %v6464_v51, %v467_v26 }
 0x486   : > { %v5949_v18 = vpop.f32.mrf.mxu3 }
 0x487   : > { %v5950_v63 = vadd.f32 %v5949_v18, %v5861_v9  ;;  %v6210_v56 = vadd.f32 %v9986_v7, %v6174_v31  ;;  %v6528_v60 = vmax.f32 %v6496_v54, 0.0  ;;  %v10606_v9 = vld [vmem:[#allocation83_spill] sm:$0xff] }
 0x488   : > { %v6352_v32 = vpop.f32.mrf.mxu2  ;;  %v5779_v6 = vadd.f32 %v10606_v9, %v5690_v1 }
 0x489   : > { %v6039_v12 = vadd.f32 %v6038_v27, %v5950_v63  ;;  %v6429_v58 = vmul.f32 %v10200_v55, %v6352_v32  ;;  %v6242_v59 = vmax.f32 %v6210_v56, 0.0  ;;  %v6132_v53 = vpop.f32.mrf.mxu1  ;;  %v6045_v63 = vpop.f32.mrf.mxu0  ;;  %v10607_v32 = vld [vmem:[#allocation96_spill] sm:$0xff] }
 0x48a   : > { %v5693_v34 = vadd.f32 %v10608_v47, %v10607_v32  ;;  %v10615_v47 = vld [vmem:[#allocation86_spill] sm:$0xff] }
 0x48b   : > { %v6465_v57 = vadd.f32 %v10208_v44, %v6429_v58  ;;  %v6262_v2 = vpack.c.bf16 %v6242_v59, %v6241_v36  ;;  %v6128_v13 = vadd.f32 %v6127_v0, %v6039_v12  ;;  %v5868_v36 = vadd.f32 %v10145_v28, %v5779_v6  ;;  %v439_v28 = vld [vmem:[%s8647_s4 + $0x20] sm:$0xff]  }
 0x48c   : > { %v472_v33 = vunpack.c.h.bf16 %v439_v28 }
 0x48d   : > { %v6497_v15 = vadd.f32 %v6465_v57, %v468_v30  ;;  %6394 = vmatmul.bf16.gmra.mxu2 %v6262_v2  ;;  %v6175_v61 = vmul.f32 %v9979_v50, %v6128_v13 }
 0x48e   : > { %v5951_v21 = vpop.f32.mrf.mxu3 }
 0x48f   : > { %v6529_v27 = vmax.f32 %v6497_v15, 0.0  ;;  %v5952_v37 = vadd.f32 %v5951_v21, %v5863_v25  ;;  %v6211_v17 = vadd.f32 %v9986_v7, %v6175_v61  ;;  %v10609_v15 = vld [vmem:[#allocation84_spill] sm:$0xff] }
 0x490   : > { %v6355_v41 = vpop.f32.mrf.mxu2  ;;  %v5782_v25 = vadd.f32 %v10609_v15, %v5693_v34 }
 0x491   : > { %v8061_v46 = vpack.c.bf16 %v6529_v27, %v6528_v60  ;;  %v6041_v22 = vadd.f32 %v6040_v38, %v5952_v37  ;;  %v6430_v39 = vmul.f32 %v10200_v55, %v6355_v41  ;;  %v6243_v26 = vmax.f32 %v6211_v17, 0.0  ;;  %v6134_v30 = vpop.f32.mrf.mxu1  ;;  %v6048_v27 = vpop.f32.mrf.mxu0  ;;  %v10610_v37 = vld [vmem:[#allocation97_spill] sm:$0xff] }
 0x493   : > { %8129 = vst [vmem:[%s10228_s28 + $0x10] sm:$0xff] %v8061_v46   ;;  %v6130_v0 = vadd.f32 %v6129_v11, %v6041_v22  ;;  %v6466_v4 = vadd.f32 %v10208_v44, %v6430_v39  ;;  %v5871_v46 = vadd.f32 %v10159_v42, %v5782_v25 }
 0x495   : > { %v6176_v14 = vmul.f32 %v9979_v50, %v6130_v0  ;;  %v6498_v20 = vadd.f32 %v6466_v4, %v469_v23 }
 0x496   : > { %v5954_v3 = vpop.f32.mrf.mxu3 }
 0x497   : > { %v5955_v10 = vadd.f32 %v5954_v3, %v5866_v29  ;;  %v6212_v19 = vadd.f32 %v9986_v7, %v6176_v14  ;;  %v6530_v54 = vmax.f32 %v6498_v20, 0.0 }
 0x498   : > { %v6357_v31 = vpop.f32.mrf.mxu2 }
 0x499   : > { %v6044_v38 = vadd.f32 %v6043_v24, %v5955_v10  ;;  %v6431_v18 = vmul.f32 %v10200_v55, %v6357_v31  ;;  %v6244_v51 = vmax.f32 %v6212_v19, 0.0  ;;  %v10611_v24 = vld [vmem:[#allocation64_spill] sm:$0xff]  ;;  %v6137_v8 = vpop.f32.mrf.mxu1  ;;  %v10613_v10 = vld [vmem:[#allocation98_spill] sm:$0xff]  ;;  %v10614_v19 = vld [vmem:[#allocation67_spill] sm:$0xff]  ;;  %v6050_v6 = vpop.f32.mrf.mxu0 }
 0x49a   : > { %v5695_v41 = vadd.f32 %v10611_v24, %v10610_v37 }
 0x49b   : > { %v6467_v56 = vadd.f32 %v10208_v44, %v6431_v18  ;;  %v6263_v11 = vpack.c.bf16 %v6244_v51, %v6243_v26  ;;  %v6133_v12 = vadd.f32 %v6132_v53, %v6044_v38  ;;  %v471_v53 = vunpack.c.l.bf16 %v439_v28 }
 0x49c   : > { %v5784_v14 = vadd.f32 %v10612_v52, %v5695_v41  ;;  %v10618_v41 = vld [vmem:[#allocation88_spill] sm:$0xff] }
 0x49d   : > { %v6499_v58 = vadd.f32 %v6467_v56, %v470_v48  ;;  %6399 = vmatmul.bf16.gmra.mxu2 %v6263_v11  ;;  %v6177_v62 = vmul.f32 %v9979_v50, %v6133_v12  ;;  %v5698_v48 = vadd.f32 %v10614_v19, %v10613_v10  ;;  %v8259_v56 = vld [vmem:[%s10418_s5] ss:$0 sm:$0xff]  ;;  %v443_v19 = vld [vmem:[%s8647_s4 + $0x30] sm:$0xff]  }
 0x49e   : > { %v5956_v59 = vpop.f32.mrf.mxu3 }
 0x49f   : > { %v6531_v57 = vmax.f32 %v6499_v58, 0.0  ;;  %v5957_v2 = vadd.f32 %v5956_v59, %v5868_v36  ;;  %v6213_v22 = vadd.f32 %v9986_v7, %v6177_v62  ;;  %v5787_v34 = vadd.f32 %v10615_v47, %v5698_v48  ;;  %v10616_v58 = vld [vmem:[#allocation18_spill] sm:$0xff] }
 0x4a0   : > { %v6360_v5 = vpop.f32.mrf.mxu2  ;;  %v10617_v36 = vld [vmem:[#allocation70_spill] sm:$0xff] }
 0x4a1   : > { %v8066_v35 = vpack.c.bf16 %v6531_v57, %v6530_v54  ;;  %v6046_v13 = vadd.f32 %v6045_v63, %v5957_v2  ;;  %v6432_v60 = vmul.f32 %v10200_v55, %v6360_v5  ;;  %v6139_v63 = vpop.f32.mrf.mxu1  ;;  %v5700_v59 = vadd.f32 %v10617_v36, %v10616_v58  ;;  %v441_v54 = vld [vmem:[%s8647_s4 + $0x28] sm:$0xff]  }
 0x4a2   : > { %v5876_v2 = vadd.f32 %v10181_v16, %v5787_v34  ;;  %v8260_v5 = vld [vmem:[%s10419_s6] ss:$0 sm:$0xff]  ;;  %v473_v15 = vunpack.c.l.bf16 %v441_v54  ;;  %v474_v37 = vunpack.c.h.bf16 %v441_v54 }
 0x4a3   : > { %8130 = vst [vmem:[%s10228_s28 + $0x18] sm:$0xff] %v8066_v35   ;;  %v6135_v21 = vadd.f32 %v6134_v30, %v6046_v13  ;;  %v6468_v0 = vadd.f32 %v10208_v44, %v6432_v60  ;;  %v5789_v28 = vadd.f32 %v10618_v41, %v5700_v59 }
 0x4a4   : > { %v6053_v35 = vpop.f32.mrf.mxu0 }
 0x4a5   : > { %v6178_v61 = vmul.f32 %v9979_v50, %v6135_v21  ;;  %v6245_v50 = vmax.f32 %v6213_v22, 0.0  ;;  %v6500_v42 = vadd.f32 %v6468_v0, %v471_v53 }
 0x4a6   : > { %v5959_v45 = vpop.f32.mrf.mxu3 }
 0x4a7   : > { %v5960_v39 = vadd.f32 %v5959_v45, %v5871_v46  ;;  %v6214_v40 = vadd.f32 %v9986_v7, %v6178_v61  ;;  %v5873_v7 = vadd.f32 %v10169_v43, %v5784_v14  ;;  %v6532_v18 = vmax.f32 %v6500_v42, 0.0 }
 0x4a8   : > { %v6362_v1 = vpop.f32.mrf.mxu2 }
 0x4a9   : > { %v6049_v29 = vadd.f32 %v6048_v27, %v5960_v39  ;;  %v6433_v17 = vmul.f32 %v10200_v55, %v6362_v1  ;;  %v6246_v3 = vmax.f32 %v6214_v40, 0.0  ;;  %v6142_v27 = vpop.f32.mrf.mxu1  ;;  %v5878_v40 = vadd.f32 %v10191_v49, %v5789_v28 }
 0x4ab   : > { %v6469_v23 = vadd.f32 %v10208_v44, %v6433_v17  ;;  %v6264_v4 = vpack.c.bf16 %v6246_v3, %v6245_v50  ;;  %v6138_v31 = vadd.f32 %v6137_v8, %v6049_v29 }
 0x4ac   : > { %v6055_v29 = vpop.f32.mrf.mxu0 }
 0x4ad   : > { %v6501_v9 = vadd.f32 %v6469_v23, %v472_v33  ;;  %6404 = vmatmul.bf16.gmra.mxu2 %v6264_v4  ;;  %v6179_v11 = vmul.f32 %v8259_v56, %v6138_v31 }
 0x4ae   : > { %v5961_v38 = vpop.f32.mrf.mxu3 }
 0x4af   : > { %v6533_v26 = vmax.f32 %v6501_v9, 0.0  ;;  %v5962_v51 = vadd.f32 %v5961_v38, %v5873_v7  ;;  %v6215_v62 = vadd.f32 %v8260_v5, %v6179_v11  ;;  %v475_v9 = vunpack.c.l.bf16 %v443_v19 }
 0x4b0   : > { %v6365_v20 = vpop.f32.mrf.mxu2  ;;  %v476_v38 = vunpack.c.h.bf16 %v443_v19  ;;  %v451_v19 = vld [vmem:[%s8647_s4 + $0x50] sm:$0xff]  }
 0x4b1   : > { %v8071_v30 = vpack.c.bf16 %v6533_v26, %v6532_v18  ;;  %v6051_v32 = vadd.f32 %v6050_v6, %v5962_v51  ;;  %v6434_v43 = vmul.f32 %v10200_v55, %v6365_v20  ;;  %v6247_v46 = vmax.f32 %v6215_v62, 0.0  ;;  %v6144_v23 = vpop.f32.mrf.mxu1 }
 0x4b3   : > { %8131 = vst [vmem:[%s10228_s28 + $0x20] sm:$0xff] %v8071_v30   ;;  %v6140_v12 = vadd.f32 %v6139_v63, %v6051_v32  ;;  %v6470_v25 = vadd.f32 %v10208_v44, %v6434_v43  ;;  %v445_v43 = vld [vmem:[%s8647_s4 + $0x38] sm:$0xff]  }
 0x4b4   : > { %v477_v58 = vunpack.c.l.bf16 %v445_v43  ;;  %v478_v54 = vunpack.c.h.bf16 %v445_v43 }
 0x4b5   : > { %v6180_v57 = vmul.f32 %v8259_v56, %v6140_v12  ;;  %v6502_v8 = vadd.f32 %v6470_v25, %v473_v15 }
 0x4b6   : > { %v5964_v13 = vpop.f32.mrf.mxu3 }
 0x4b7   : > { %v5965_v21 = vadd.f32 %v5964_v13, %v5876_v2  ;;  %v6216_v60 = vadd.f32 %v8260_v5, %v6180_v57  ;;  %v6534_v1 = vmax.f32 %v6502_v8, 0.0 }
 0x4b8   : > { %v6367_v24 = vpop.f32.mrf.mxu2 }
 0x4b9   : > { %v6054_v61 = vadd.f32 %v6053_v35, %v5965_v21  ;;  %v6435_v16 = vmul.f32 %v10200_v55, %v6367_v24  ;;  %v6248_v22 = vmax.f32 %v6216_v60, 0.0  ;;  %v447_v60 = vld [vmem:[%s8647_s4 + $0x40] sm:$0xff]  }
 0x4ba   : > { %v480_v41 = vunpack.c.h.bf16 %v447_v60 }
 0x4bb   : > { %v6471_v45 = vadd.f32 %v10208_v44, %v6435_v16  ;;  %v6265_v53 = vpack.c.bf16 %v6248_v22, %v6247_v46  ;;  %v6143_v0 = vadd.f32 %v6142_v27, %v6054_v61  ;;  %v479_v27 = vunpack.c.l.bf16 %v447_v60 }
 0x4bd   : > { %v6503_v39 = vadd.f32 %v6471_v45, %v474_v37  ;;  %6409 = vmatmul.bf16.gmra.mxu2 %v6265_v53  ;;  %v6181_v50 = vmul.f32 %v8259_v56, %v6143_v0 }
 0x4be   : > { %v5966_v33 = vpop.f32.mrf.mxu3 }
 0x4bf   : > { %v6535_v52 = vmax.f32 %v6503_v39, 0.0  ;;  %v5967_v14 = vadd.f32 %v5966_v33, %v5878_v40  ;;  %v6217_v31 = vadd.f32 %v8260_v5, %v6181_v50  ;;  %v449_v39 = vld [vmem:[%s8647_s4 + $0x48] sm:$0xff]  }
 0x4c0   : > { %v6370_v17 = vpop.f32.mrf.mxu2  ;;  %v481_v40 = vunpack.c.l.bf16 %v449_v39 }
 0x4c1   : > { %v8076_v3 = vpack.c.bf16 %v6535_v52, %v6534_v1  ;;  %v6056_v42 = vadd.f32 %v6055_v29, %v5967_v14  ;;  %v6436_v10 = vmul.f32 %v10200_v55, %v6370_v17  ;;  %v6249_v26 = vmax.f32 %v6217_v31, 0.0 }
 0x4c2   : > { %v482_v52 = vunpack.c.h.bf16 %v449_v39 }
 0x4c3   : > { %8132 = vst [vmem:[%s10228_s28 + $0x28] sm:$0xff] %v8076_v3   ;;  %v6145_v4 = vadd.f32 %v6144_v23, %v6056_v42  ;;  %v6472_v49 = vadd.f32 %v10208_v44, %v6436_v10 }
 0x4c5   : > { %v6182_v48 = vmul.f32 %v8259_v56, %v6145_v4  ;;  %v6504_v63 = vadd.f32 %v6472_v49, %v475_v9  ;;  %v484_v49 = vunpack.c.h.bf16 %v451_v19 }
 0x4c7   : > { %v6218_v7 = vadd.f32 %v8260_v5, %v6182_v48  ;;  %v6536_v56 = vmax.f32 %v6504_v63, 0.0  ;;  %v483_v48 = vunpack.c.l.bf16 %v451_v19 }
 0x4c8   : > { %v6372_v6 = vpop.f32.mrf.mxu2 }
 0x4c9   : > { %v6437_v18 = vmul.f32 %v10200_v55, %v6372_v6  ;;  %v6250_v51 = vmax.f32 %v6218_v7, 0.0 }
 0x4cb   : > { %v6473_v20 = vadd.f32 %v10208_v44, %v6437_v18  ;;  %v6266_v11 = vpack.c.bf16 %v6250_v51, %v6249_v26 }
 0x4cd   : > { %v6505_v30 = vadd.f32 %v6473_v20, %v476_v38  ;;  %6414 = vmatmul.bf16.gmra.mxu2 %v6266_v11 }
 0x4cf   : > { %v6537_v32 = vmax.f32 %v6505_v30, 0.0  ;;  %v453_v30 = vld [vmem:[%s8647_s4 + $0x58] sm:$0xff]  }
 0x4d0   : > { %v6375_v47 = vpop.f32.mrf.mxu2 }
 0x4d1   : > { %v8081_v34 = vpack.c.bf16 %v6537_v32, %v6536_v56  ;;  %v6438_v12 = vmul.f32 %v10200_v55, %v6375_v47  ;;  %v485_v56 = vunpack.c.l.bf16 %v453_v30 }
 0x4d3   : > { %8133 = vst [vmem:[%s10228_s28 + $0x30] sm:$0xff] %v8081_v34   ;;  %v6474_v36 = vadd.f32 %v10208_v44, %v6438_v12  ;;  %v486_v34 = vunpack.c.h.bf16 %v453_v30 }
 0x4d5   : > { %v6506_v2 = vadd.f32 %v6474_v36, %v477_v58 }
 0x4d7   : > { %v6538_v35 = vmax.f32 %v6506_v2, 0.0 }
 0x4d8   : > { %v6377_v59 = vpop.f32.mrf.mxu2 }
 0x4d9   : > { %v6439_v57 = vmul.f32 %v10200_v55, %v6377_v59 }
 0x4db   : > { %v6475_v5 = vadd.f32 %v10208_v44, %v6439_v57 }
 0x4dd   : > { %v6507_v62 = vadd.f32 %v6475_v5, %v478_v54 }
 0x4df   : > { %v6539_v13 = vmax.f32 %v6507_v62, 0.0  ;;  %v455_v62 = vld [vmem:[%s8647_s4 + $0x60] sm:$0xff]  }
 0x4e0   : > { %v6380_v15 = vpop.f32.mrf.mxu2 }
 0x4e1   : > { %v8086_v25 = vpack.c.bf16 %v6539_v13, %v6538_v35  ;;  %v6440_v21 = vmul.f32 %v10200_v55, %v6380_v15  ;;  %v487_v35 = vunpack.c.l.bf16 %v455_v62 }
 0x4e3   : > { %8134 = vst [vmem:[%s10228_s28 + $0x38] sm:$0xff] %v8086_v25   ;;  %v6476_v37 = vadd.f32 %v10208_v44, %v6440_v21  ;;  %v488_v25 = vunpack.c.h.bf16 %v455_v62 }
 0x4e5   : > { %v6508_v61 = vadd.f32 %v6476_v37, %v479_v27 }
 0x4e7   : > { %v6540_v22 = vmax.f32 %v6508_v61, 0.0 }
 0x4e8   : > { %v6382_v24 = vpop.f32.mrf.mxu2 }
 0x4e9   : > { %v6441_v28 = vmul.f32 %v10200_v55, %v6382_v24 }
 0x4eb   : > { %v6477_v16 = vadd.f32 %v10208_v44, %v6441_v28 }
 0x4ed   : > { %v6509_v46 = vadd.f32 %v6477_v16, %v480_v41 }
 0x4ef   : > { %v6541_v8 = vmax.f32 %v6509_v46, 0.0  ;;  %v457_v46 = vld [vmem:[%s8647_s4 + $0x68] sm:$0xff]  }
 0x4f0   : > { %v6385_v45 = vpop.f32.mrf.mxu2 }
 0x4f1   : > { %v8091_v53 = vpack.c.bf16 %v6541_v8, %v6540_v22  ;;  %v6442_v0 = vmul.f32 %v10200_v55, %v6385_v45  ;;  %v489_v22 = vunpack.c.l.bf16 %v457_v46 }
 0x4f3   : > { %8135 = vst [vmem:[%s10228_s28 + $0x40] sm:$0xff] %v8091_v53   ;;  %v6478_v33 = vadd.f32 %v10208_v44, %v6442_v0  ;;  %v490_v53 = vunpack.c.h.bf16 %v457_v46 }
 0x4f5   : > { %v6510_v29 = vadd.f32 %v6478_v33, %v481_v40 }
 0x4f7   : > { %v6542_v3 = vmax.f32 %v6510_v29, 0.0 }
 0x4f8   : > { %v6387_v1 = vpop.f32.mrf.mxu2 }
 0x4f9   : > { %v6443_v14 = vmul.f32 %v10200_v55, %v6387_v1 }
 0x4fb   : > { %v6479_v17 = vadd.f32 %v10208_v44, %v6443_v14 }
 0x4fd   : > { %v6511_v50 = vadd.f32 %v6479_v17, %v482_v52 }
 0x4ff   : > { %v6543_v42 = vmax.f32 %v6511_v50, 0.0  ;;  %v459_v50 = vld [vmem:[%s8647_s4 + $0x70] sm:$0xff]  }
 0x500   : > { %v6390_v23 = vpop.f32.mrf.mxu2 }
 0x501   : > { %v8096_v4 = vpack.c.bf16 %v6543_v42, %v6542_v3  ;;  %v6444_v10 = vmul.f32 %v10200_v55, %v6390_v23  ;;  %v491_v3 = vunpack.c.l.bf16 %v459_v50 }
 0x503   : > { %8136 = vst [vmem:[%s10228_s28 + $0x48] sm:$0xff] %v8096_v4   ;;  %v6480_v31 = vadd.f32 %v10208_v44, %v6444_v10  ;;  %v492_v4 = vunpack.c.h.bf16 %v459_v50 }
 0x505   : > { %v6512_v6 = vadd.f32 %v6480_v31, %v483_v48 }
 0x507   : > { %v6544_v26 = vmax.f32 %v6512_v6, 0.0 }
 0x508   : > { %v6392_v9 = vpop.f32.mrf.mxu2 }
 0x509   : > { %v6445_v7 = vmul.f32 %v10200_v55, %v6392_v9 }
 0x50b   : > { %v6481_v38 = vadd.f32 %v10208_v44, %v6445_v7 }
 0x50d   : > { %v6513_v18 = vadd.f32 %v6481_v38, %v484_v49 }
 0x50f   : > { %v6545_v51 = vmax.f32 %v6513_v18, 0.0  ;;  %v461_v18 = vld [vmem:[%s8647_s4 + $0x78] sm:$0xff]   ;;  %s6633_s4 = sshll.u32 %s10228_s28, 4  ;;  %s6634_s4 = int_to_ptr.vmem [resolvable:$true] %s6633_s4 }
 0x510   : > { %v6395_v63 = vpop.f32.mrf.mxu2 }
 0x511   : > { %v8101_v20 = vpack.c.bf16 %v6545_v51, %v6544_v26  ;;  %v6446_v11 = vmul.f32 %v10200_v55, %v6395_v63  ;;  %v493_v26 = vunpack.c.l.bf16 %v461_v18 }
 0x513   : > { %8137 = vst [vmem:[%s10228_s28 + $0x50] sm:$0xff] %v8101_v20   ;;  %v6482_v32 = vadd.f32 %v10208_v44, %v6446_v11  ;;  %v494_v20 = vunpack.c.h.bf16 %v461_v18 }
 0x515   : > { %v6514_v43 = vadd.f32 %v6482_v32, %v485_v56 }
 0x517   : > { %v6546_v59 = vmax.f32 %v6514_v43, 0.0 }
 0x518   : > { %v6397_v47 = vpop.f32.mrf.mxu2 }
 0x519   : > { %v6447_v12 = vmul.f32 %v10200_v55, %v6397_v47 }
 0x51b   : > { %v6483_v58 = vadd.f32 %v10208_v44, %v6447_v12 }
 0x51d   : > { %v6515_v36 = vadd.f32 %v6483_v58, %v486_v34 }
 0x51f   : > { %v6547_v54 = vmax.f32 %v6515_v36, 0.0 }
 0x520   : > { %v6400_v57 = vpop.f32.mrf.mxu2 }
 0x521   : > { %v8106_v2 = vpack.c.bf16 %v6547_v54, %v6546_v59  ;;  %v6448_v5 = vmul.f32 %v10200_v55, %v6400_v57 }
 0x523   : > { %8138 = vst [vmem:[%s10228_s28 + $0x58] sm:$0xff] %v8106_v2   ;;  %v6484_v13 = vadd.f32 %v10208_v44, %v6448_v5 }
 0x525   : > { %v6516_v60 = vadd.f32 %v6484_v13, %v487_v35 }
 0x527   : > { %v6548_v24 = vmax.f32 %v6516_v60, 0.0 }
 0x528   : > { %v6402_v15 = vpop.f32.mrf.mxu2 }
 0x529   : > { %v6449_v21 = vmul.f32 %v10200_v55, %v6402_v15 }
 0x52b   : > { %v6485_v27 = vadd.f32 %v10208_v44, %v6449_v21 }
 0x52d   : > { %v6517_v37 = vadd.f32 %v6485_v27, %v488_v25 }
 0x52f   : > { %v6549_v41 = vmax.f32 %v6517_v37, 0.0 }
 0x530   : > { %v6405_v28 = vpop.f32.mrf.mxu2 }
 0x531   : > { %v8111_v61 = vpack.c.bf16 %v6549_v41, %v6548_v24  ;;  %v6450_v16 = vmul.f32 %v10200_v55, %v6405_v28 }
 0x533   : > { %8139 = vst [vmem:[%s10228_s28 + $0x60] sm:$0xff] %v8111_v61   ;;  %v6486_v8 = vadd.f32 %v10208_v44, %v6450_v16 }
 0x535   : > { %v6518_v39 = vadd.f32 %v6486_v8, %v489_v22 }
 0x537   : > { %v6550_v1 = vmax.f32 %v6518_v39, 0.0 }
 0x538   : > { %v6407_v45 = vpop.f32.mrf.mxu2 }
 0x539   : > { %v6451_v0 = vmul.f32 %v10200_v55, %v6407_v45 }
 0x53b   : > { %v6487_v40 = vadd.f32 %v10208_v44, %v6451_v0 }
 0x53d   : > { %v6519_v33 = vadd.f32 %v6487_v40, %v490_v53 }
 0x53f   : > { %v6551_v52 = vmax.f32 %v6519_v33, 0.0 }
 0x540   : > { %v6410_v14 = vpop.f32.mrf.mxu2 }
 0x541   : > { %v8116_v29 = vpack.c.bf16 %v6551_v52, %v6550_v1  ;;  %v6452_v17 = vmul.f32 %v10200_v55, %v6410_v14 }
 0x543   : > { %8140 = vst [vmem:[%s10228_s28 + $0x68] sm:$0xff] %v8116_v29   ;;  %v6488_v42 = vadd.f32 %v10208_v44, %v6452_v17 }
 0x545   : > { %v6520_v19 = vadd.f32 %v6488_v42, %v491_v3 }
 0x547   : > { %v6552_v9 = vmax.f32 %v6520_v19, 0.0 }
 0x548   : > { %v6412_v23 = vpop.f32.mrf.mxu2 }
 0x549   : > { %v6453_v10 = vmul.f32 %v10200_v55, %v6412_v23 }
 0x54b   : > { %v6489_v48 = vadd.f32 %v10208_v44, %v6453_v10 }
 0x54d   : > { %v6521_v31 = vadd.f32 %v6489_v48, %v492_v4 }
 0x54f   : > { %v6553_v49 = vmax.f32 %v6521_v31, 0.0 }
 0x550   : > { %v6415_v7 = vpop.f32.mrf.mxu2 }
 0x551   : > { %v8121_v6 = vpack.c.bf16 %v6553_v49, %v6552_v9  ;;  %v6454_v38 = vmul.f32 %v10200_v55, %v6415_v7 }
 0x553   : > { %8141 = vst [vmem:[%s10228_s28 + $0x70] sm:$0xff] %v8121_v6   ;;  %v6490_v51 = vadd.f32 %v10208_v44, %v6454_v38 }
 0x555   : > { %v6522_v30 = vadd.f32 %v6490_v51, %v493_v26 }
 0x557   : > { %v6554_v47 = vmax.f32 %v6522_v30, 0.0 }
 0x558   : > { %v6417_v63 = vpop.f32.mrf.mxu2 }
 0x559   : > { %v6455_v11 = vmul.f32 %v10200_v55, %v6417_v63 }
 0x55b   : > { %v6491_v56 = vadd.f32 %v10208_v44, %v6455_v11 }
 0x55d   : > { %v6523_v32 = vadd.f32 %v6491_v56, %v494_v20 }
 0x55f   : > { %v6555_v34 = vmax.f32 %v6523_v32, 0.0 }
 0x561   : > { %v8126_v12 = vpack.c.bf16 %v6555_v34, %v6554_v47 }
 0x563   : > { %8142 = vst [vmem:[%s10228_s28 + $0x78] sm:$0xff] %v8126_v12  }
 0x564   : > { %8408 = shalt.err (!%p8405_p10)
}
 0x565   : > { %s8463_s1 = smov 64   ;;  %s8464_s28 = smov 4  }
 0x566   : > { %8181 = dma.vmem_to_hbm [thread:$0]  (%p8611_p3), %s6634_s4, 2048, %s6636_s26, %s6621_s17, %s8463_s1, %s8463_s1, %s8464_s28  }
 0x567 PF: > { %s6650_s19 = sand.u32 1, %s8443_s13   ;;  %p10619_p12 = scmp.ge.s32.totalorder %s8455_s16, 2 }
 0x568   : > { %s6651_s24 = scalar_lea.sflag [#allocation6], %s6650_s19 }
 0x569   : > { %p8198_p13 = pnand %p10619_p12, %p8555_p6 }
 0x56b   : > { %p8199_p0 = pneg %p8198_p13 }
 0x56d   : > { %8438 = dma.done.wait (%p8199_p0), %s6651_s24, 2048  }
 0x56e   : > { %8440 = vsyncadd (%p8199_p0), %s6651_s24, 4294965248  ;;  %s10620_s11 = sld [smem:[#allocation17_spill]]  ;;  %p25_p5 = scmp.ge.s32.totalorder %s8593_s29, 4  }
 0x56f   : > { %s10621_s13 = smov %s8447_s14  ;;  %s10622_s14 = smov %s8451_s15 }
 0x570   : > { %s10624_s16 = smov %s8593_s29  ;;  %27 = sbr.rel (!%p25_p5) target bundleno = 11 (0xb), region = 120 }
 0x574   : > { %s10623_s15 = smov %s10620_s11 }
 0x575   :  { %6657 = vsyncpa [#allocation5], 1 }
 0x576   :  { %6659 = vsyncpa [#allocation5 + $0x1], 1 }
 0x577   :  { %6660 = vsyncpa [#allocation8], 1 }
 0x578   :  { %6661 = vsyncpa [#allocation11], 1 }
 0x579   :  { %6662 = vsyncpa [#allocation6], 1 }
 0x57a   :  { %6664 = vsyncpa [#allocation6 + $0x1], 1 }

</bundles_post_ra>
